<compile_context>
chip_gen: v7x
topology: tpu7x:2x2x1
jax: 0.10.0
libtpu: 0.0.40
codegen_flags: <defaults>
</compile_context>

<pallas_src>
import math

import jax
import jax.numpy as jnp
from jax import lax
from jax.experimental import pallas as pl
from jax.experimental.pallas import tpu as pltpu


# ----------------------------------------------------------------------------
# Fused kernel: 3 LSTM layers + BatchNorm + MLP head, one batch tile per step
# ----------------------------------------------------------------------------
def _fused_lstm_net_kernel(
    x_ref,                                           # (T, Bb, D)   bf16
    wih0_ref, whh0_ref, b0_ref,                      # (D,4H) (H,4H) (1,4H)
    wih1_ref, whh1_ref, b1_ref,                      # (H,4H) (H,4H) (1,4H)
    wih2_ref, whh2_ref, b2_ref,                      # (H,4H) (H,4H) (1,4H)
    bng_ref, bnb_ref, bnm_ref, bnv_ref,              # (1,H) each, f32
    w1_ref, bb1_ref, w2_ref, bb2_ref, wfc_ref, bfc_ref,
    out_ref,                                         # (Bb, O_pad)  f32
    seq_scr,                                         # (T, Bb, H)   bf16 scratch
    gates_scr,                                       # (T, Bb, 4H)  f32  scratch
):
    T, Bb, D = x_ref.shape
    H = whh0_ref.shape[0]
    f32, bf16 = jnp.float32, jnp.bfloat16

    def run_layer(inp_flat, w_ih_ref, w_hh_ref, b_ref, write_seq):
        # (1) hoisted input->gates matmul over all T timesteps at once.
        g = jnp.dot(inp_flat, w_ih_ref[...], preferred_element_type=f32)
        gates_scr[...] = (g + b_ref[...]).reshape(T, Bb, 4 * H)

        # (2) serial recurrence: only h @ W_hh per step.  W_hh loaded once.
        w_hh = w_hh_ref[...]

        def step(t, carry):
            h, c = carry
            gates = gates_scr[t] + jnp.dot(
                h.astype(bf16), w_hh, preferred_element_type=f32)     # (Bb, 4H)
            # PyTorch gate order: i, f, g, o (128-lane-aligned slices).
            i_g = jax.nn.sigmoid(gates[:, 0 * H:1 * H])
            f_g = jax.nn.sigmoid(gates[:, 1 * H:2 * H])
            g_g = jnp.tanh(gates[:, 2 * H:3 * H])
            o_g = jax.nn.sigmoid(gates[:, 3 * H:4 * H])
            c_new = f_g * c + i_g * g_g
            h_new = o_g * jnp.tanh(c_new)
            if write_seq:
                seq_scr[t] = h_new.astype(bf16)
            return h_new, c_new

        init = (jnp.zeros((Bb, H), f32), jnp.zeros((Bb, H), f32))
        h_last, _ = lax.fori_loop(0, T, step, init, unroll=True)
        return h_last

    # Layer 0: input is x.
    run_layer(x_ref[...].reshape(T * Bb, D), wih0_ref, whh0_ref, b0_ref, True)
    # Layer 1: input is layer-0 hidden sequence, kept in VMEM scratch.
    run_layer(seq_scr[...].reshape(T * Bb, H), wih1_ref, whh1_ref, b1_ref, True)
    # Layer 2: only h_T is consumed downstream -> skip sequence writeback.
    h_T = run_layer(seq_scr[...].reshape(T * Bb, H), wih2_ref, whh2_ref, b2_ref, False)

    # Head: BatchNorm1d (eval, running stats) -> 2x (Linear+ReLU) -> fc.
    eps = 1e-5
    y = (h_T - bnm_ref[...]) * lax.rsqrt(bnv_ref[...] + eps)
    y = y * bng_ref[...] + bnb_ref[...]
    y = jnp.maximum(
        jnp.dot(y.astype(bf16), w1_ref[...], preferred_element_type=f32)
        + bb1_ref[...], 0.0)
    y = jnp.maximum(
        jnp.dot(y.astype(bf16), w2_ref[...], preferred_element_type=f32)
        + bb2_ref[...], 0.0)
    out = jnp.dot(y.astype(bf16), wfc_ref[...], preferred_element_type=f32) + bfc_ref[...]
    out_ref[...] = out.astype(out_ref.dtype)        # lane-dense (Bb, 128) store


# ----------------------------------------------------------------------------
# Wrapper: single pallas_call, batch-parallel grid
# ----------------------------------------------------------------------------
def lstm_net_forward(x, params, block_b=16):
    """x: (B, T, D) batch-first, like the PyTorch module. Returns (B, output_dim)."""
    B, T, D = x.shape
    (wih0, whh0, b0), (wih1, whh1, b1), (wih2, whh2, b2) = params["lstm"]
    bn_g, bn_b, bn_m, bn_v = params["bn"]
    w1, bb1, w2, bb2, wfc, bfc = params["mlp"]
    H = whh0.shape[0]
    O_pad = wfc.shape[1]

    if B % block_b != 0:          # fall back to a single batch tile
        block_b = B
    grid = (B // block_b,)

    # Time-major bf16 input for the kernel (contiguous (Bb, D) slab per step).
    x_tm = jnp.transpose(x.astype(jnp.bfloat16), (1, 0, 2))         # (T, B, D)

    weight_args = (wih0, whh0, b0, wih1, whh1, b1, wih2, whh2, b2,
                   bn_g, bn_b, bn_m, bn_v, w1, bb1, w2, bb2, wfc, bfc)
    weight_specs = [pl.BlockSpec(w.shape, lambda i: (0, 0)) for w in weight_args]

    out_padded = pl.pallas_call(
        _fused_lstm_net_kernel,
        out_shape=jax.ShapeDtypeStruct((B, O_pad), jnp.float32),
        grid_spec=pltpu.PrefetchScalarGridSpec(
            num_scalar_prefetch=0,
            grid=grid,
            in_specs=[pl.BlockSpec((T, block_b, D), lambda i: (0, i, 0))]
                     + weight_specs,
            out_specs=pl.BlockSpec((block_b, O_pad), lambda i: (i, 0)),
            scratch_shapes=[
                pltpu.VMEM((T, block_b, H), jnp.bfloat16),       # hidden sequence
                pltpu.VMEM((T, block_b, 4 * H), jnp.float32),    # hoisted gates
            ],
        ),
        compiler_params=pltpu.CompilerParams(
            dimension_semantics=("parallel",),      # batch tiles -> v7x 2nd TC
        ),
    )(x_tm, *weight_args)
    return out_padded[:, :params["out_dim"]]


# ----------------------------------------------------------------------------
# Parameter construction (PyTorch-default-style uniform init)
# ----------------------------------------------------------------------------
def init_params(key, input_dim, hidden_dim, output_dim, num_layers=3):
    H = hidden_dim
    k = 1.0 / math.sqrt(H)
    keys = jax.random.split(key, 4 * num_layers + 6)
    ki = iter(keys)

    lstm = []
    for layer in range(num_layers):
        D = input_dim if layer == 0 else H
        w_ih = jax.random.uniform(next(ki), (4 * H, D), jnp.float32, -k, k)
        w_hh = jax.random.uniform(next(ki), (4 * H, H), jnp.float32, -k, k)
        b_ih = jax.random.uniform(next(ki), (4 * H,), jnp.float32, -k, k)
        b_hh = jax.random.uniform(next(ki), (4 * H,), jnp.float32, -k, k)
        # Pre-transpose for (x @ W), bf16 weights, folded f32 bias.
        lstm.append((w_ih.T.astype(jnp.bfloat16),
                     w_hh.T.astype(jnp.bfloat16),
                     (b_ih + b_hh).reshape(1, 4 * H)))

    # BatchNorm1d(H): gamma=1, beta=0, running_mean=0, running_var=1
    bn = (jnp.ones((1, H), jnp.float32), jnp.zeros((1, H), jnp.float32),
          jnp.zeros((1, H), jnp.float32), jnp.ones((1, H), jnp.float32))

    kl = 1.0 / math.sqrt(H)
    w1 = jax.random.uniform(next(ki), (H, H), jnp.float32, -kl, kl)
    b1 = jax.random.uniform(next(ki), (1, H), jnp.float32, -kl, kl)
    w2 = jax.random.uniform(next(ki), (H, H), jnp.float32, -kl, kl)
    b2 = jax.random.uniform(next(ki), (1, H), jnp.float32, -kl, kl)
    wfc = jax.random.uniform(next(ki), (output_dim, H), jnp.float32, -kl, kl)
    bfc = jax.random.uniform(next(ki), (1, output_dim), jnp.float32, -kl, kl)

    # Pad final projection to a 128-wide lane-dense slab (sliced in wrapper).
    O_pad = ((output_dim + 127) // 128) * 128
    wfc_p = jnp.zeros((H, O_pad), jnp.bfloat16).at[:, :output_dim].set(
        wfc.T.astype(jnp.bfloat16))
    bfc_p = jnp.zeros((1, O_pad), jnp.float32).at[:, :output_dim].set(bfc)

    return {
        "lstm": lstm,
        "bn": bn,
        "mlp": (w1.T.astype(jnp.bfloat16), b1,
                w2.T.astype(jnp.bfloat16), b2, wfc_p, bfc_p),
        "out_dim": output_dim,
    }


# ----------------------------------------------------------------------------
# Pure-JAX reference with identical precision choices (for validation)
# ----------------------------------------------------------------------------
def lstm_net_reference(x, params):
    bf16, f32 = jnp.bfloat16, jnp.float32
    seq = jnp.transpose(x.astype(bf16), (1, 0, 2))                 # (T, B, D)
    T, B, _ = seq.shape
    h = None
    for (w_ih, w_hh, b) in params["lstm"]:
        H = w_hh.shape[0]
        gx = (jnp.dot(seq.reshape(T * B, -1), w_ih, preferred_element_type=f32)
              + b).reshape(T, B, 4 * H)
        h = jnp.zeros((B, H), f32)
        c = jnp.zeros((B, H), f32)
        outs = []
        for t in range(T):
            gates = gx[t] + jnp.dot(h.astype(bf16), w_hh, preferred_element_type=f32)
            i_g = jax.nn.sigmoid(gates[:, :H])
            f_g = jax.nn.sigmoid(gates[:, H:2 * H])
            g_g = jnp.tanh(gates[:, 2 * H:3 * H])
            o_g = jax.nn.sigmoid(gates[:, 3 * H:])
            c = f_g * c + i_g * g_g
            h = o_g * jnp.tanh(c)
            outs.append(h)
        seq = jnp.stack(outs, 0).astype(bf16)
    bn_g, bn_b, bn_m, bn_v = params["bn"]
    y = (h - bn_m) * lax.rsqrt(bn_v + 1e-5) * bn_g + bn_b
    w1, bb1, w2, bb2, wfc, bfc = params["mlp"]
    y = jnp.maximum(jnp.dot(y.astype(bf16), w1, preferred_element_type=f32) + bb1, 0.0)
    y = jnp.maximum(jnp.dot(y.astype(bf16), w2, preferred_element_type=f32) + bb2, 0.0)
    out = jnp.dot(y.astype(bf16), wfc, preferred_element_type=f32) + bfc
    return out[:, :params["out_dim"]]


if __name__ == "__main__":
    # batch, seq, input_dim, hidden_dim, output_dim
    # H multiple of 128 (lane-aligned gates), B multiple of 16 (bf16 sublanes).
    B, T, D, H, O = 32, 8, 16, 128, 2

    key = jax.random.PRNGKey(0)
    kx, kp = jax.random.split(key)
    x = jax.random.normal(kx, (B, T, D), jnp.float32)
    params = init_params(kp, input_dim=D, hidden_dim=H, output_dim=O, num_layers=3)

    out = jax.block_until_ready(lstm_net_forward(x, params, block_b=16))
    ref = jax.block_until_ready(lstm_net_reference(x, params))

    assert out.shape == (B, O)
    assert bool(jnp.all(jnp.isfinite(out)))
    assert bool(jnp.allclose(out, ref, atol=5e-2, rtol=5e-2)), \
        float(jnp.max(jnp.abs(out - ref)))
    print("KERNEL_OK")
</pallas_src>

<mosaic_0001>
module attributes {stable_mosaic.version = 11 : i64} {
  func.func @_fused_lstm_net_kernel(%arg0: i32, %arg1: memref<8x16x16xbf16, #tpu.memory_space<vmem>>, %arg2: memref<16x512xbf16, #tpu.memory_space<vmem>>, %arg3: memref<128x512xbf16, #tpu.memory_space<vmem>>, %arg4: memref<1x512xf32, #tpu.memory_space<vmem>>, %arg5: memref<128x512xbf16, #tpu.memory_space<vmem>>, %arg6: memref<128x512xbf16, #tpu.memory_space<vmem>>, %arg7: memref<1x512xf32, #tpu.memory_space<vmem>>, %arg8: memref<128x512xbf16, #tpu.memory_space<vmem>>, %arg9: memref<128x512xbf16, #tpu.memory_space<vmem>>, %arg10: memref<1x512xf32, #tpu.memory_space<vmem>>, %arg11: memref<1x128xf32, #tpu.memory_space<vmem>>, %arg12: memref<1x128xf32, #tpu.memory_space<vmem>>, %arg13: memref<1x128xf32, #tpu.memory_space<vmem>>, %arg14: memref<1x128xf32, #tpu.memory_space<vmem>>, %arg15: memref<128x128xbf16, #tpu.memory_space<vmem>>, %arg16: memref<1x128xf32, #tpu.memory_space<vmem>>, %arg17: memref<128x128xbf16, #tpu.memory_space<vmem>>, %arg18: memref<1x128xf32, #tpu.memory_space<vmem>>, %arg19: memref<128x128xbf16, #tpu.memory_space<vmem>>, %arg20: memref<1x128xf32, #tpu.memory_space<vmem>>, %arg21: memref<16x128xf32, #tpu.memory_space<vmem>>, %arg22: memref<8x16x128xbf16, #tpu.memory_space<vmem>>, %arg23: memref<8x16x512xf32, #tpu.memory_space<vmem>>) attributes {dimension_semantics = [#tpu.dimension_semantics<parallel>], iteration_bounds = array<i64: 2>, scalar_prefetch = 0 : i64, scratch_operands = 2 : i64, tpu.core_type = #tpu.core_type<tc>, window_params = [{transform_indices = @transform_0, window_bounds = array<i64: 8, 16, 16>}, {pipeline_mode = #tpu.pipeline_mode<synchronous>, transform_indices = @transform_1, window_bounds = array<i64: 16, 512>}, {pipeline_mode = #tpu.pipeline_mode<synchronous>, transform_indices = @transform_2, window_bounds = array<i64: 128, 512>}, {pipeline_mode = #tpu.pipeline_mode<synchronous>, transform_indices = @transform_3, window_bounds = array<i64: 1, 512>}, {pipeline_mode = #tpu.pipeline_mode<synchronous>, transform_indices = @transform_4, window_bounds = array<i64: 128, 512>}, {pipeline_mode = #tpu.pipeline_mode<synchronous>, transform_indices = @transform_5, window_bounds = array<i64: 128, 512>}, {pipeline_mode = #tpu.pipeline_mode<synchronous>, transform_indices = @transform_6, window_bounds = array<i64: 1, 512>}, {pipeline_mode = #tpu.pipeline_mode<synchronous>, transform_indices = @transform_7, window_bounds = array<i64: 128, 512>}, {pipeline_mode = #tpu.pipeline_mode<synchronous>, transform_indices = @transform_8, window_bounds = array<i64: 128, 512>}, {pipeline_mode = #tpu.pipeline_mode<synchronous>, transform_indices = @transform_9, window_bounds = array<i64: 1, 512>}, {pipeline_mode = #tpu.pipeline_mode<synchronous>, transform_indices = @transform_10, window_bounds = array<i64: 1, 128>}, {pipeline_mode = #tpu.pipeline_mode<synchronous>, transform_indices = @transform_11, window_bounds = array<i64: 1, 128>}, {pipeline_mode = #tpu.pipeline_mode<synchronous>, transform_indices = @transform_12, window_bounds = array<i64: 1, 128>}, {pipeline_mode = #tpu.pipeline_mode<synchronous>, transform_indices = @transform_13, window_bounds = array<i64: 1, 128>}, {pipeline_mode = #tpu.pipeline_mode<synchronous>, transform_indices = @transform_14, window_bounds = array<i64: 128, 128>}, {pipeline_mode = #tpu.pipeline_mode<synchronous>, transform_indices = @transform_15, window_bounds = array<i64: 1, 128>}, {pipeline_mode = #tpu.pipeline_mode<synchronous>, transform_indices = @transform_16, window_bounds = array<i64: 128, 128>}, {pipeline_mode = #tpu.pipeline_mode<synchronous>, transform_indices = @transform_17, window_bounds = array<i64: 1, 128>}, {pipeline_mode = #tpu.pipeline_mode<synchronous>, transform_indices = @transform_18, window_bounds = array<i64: 128, 128>}, {pipeline_mode = #tpu.pipeline_mode<synchronous>, transform_indices = @transform_19, window_bounds = array<i64: 1, 128>}, {transform_indices = @transform_20, window_bounds = array<i64: 16, 128>}]} {
    %c0 = arith.constant 0 : index
    %c0_0 = arith.constant 0 : index
    %c0_1 = arith.constant 0 : index
    %0 = vector.load %arg1[%c0, %c0_0, %c0_1] : memref<8x16x16xbf16, #tpu.memory_space<vmem>>, vector<8x16x16xbf16>
    %1 = vector.shape_cast %0 : vector<8x16x16xbf16> to vector<128x16xbf16>
    %c0_2 = arith.constant 0 : index
    %c0_3 = arith.constant 0 : index
    %2 = vector.load %arg2[%c0_2, %c0_3] : memref<16x512xbf16, #tpu.memory_space<vmem>>, vector<16x512xbf16>
    %cst = arith.constant dense<0.000000e+00> : vector<128x512xf32>
    %3 = tpu.matmul %1, %2, %cst {dimension_numbers = #tpu.dot_dimension_numbers<[1], [0], [0], [1], [0, 0, 1, 1], [], []>} : vector<128x16xbf16>, vector<16x512xbf16>, vector<128x512xf32> -> vector<128x512xf32>
    %c0_4 = arith.constant 0 : index
    %c0_5 = arith.constant 0 : index
    %4 = vector.load %arg4[%c0_4, %c0_5] : memref<1x512xf32, #tpu.memory_space<vmem>>, vector<1x512xf32>
    %5 = vector.broadcast %4 : vector<1x512xf32> to vector<128x512xf32>
    %6 = arith.addf %3, %5 : vector<128x512xf32>
    %7 = vector.shape_cast %6 : vector<128x512xf32> to vector<8x16x512xf32>
    %c0_6 = arith.constant 0 : index
    %c0_7 = arith.constant 0 : index
    %c0_8 = arith.constant 0 : index
    %8 = vector.load %arg23[%c0_6, %c0_7, %c0_8] : memref<8x16x512xf32, #tpu.memory_space<vmem>>, vector<8x16x512xf32>
    tpu.vector_store %arg23[%c0_6, %c0_7, %c0_8], %7 {strides = array<i32>} : memref<8x16x512xf32, #tpu.memory_space<vmem>>, vector<8x16x512xf32>,
    %c0_9 = arith.constant 0 : index
    %c0_10 = arith.constant 0 : index
    %9 = vector.load %arg3[%c0_9, %c0_10] : memref<128x512xbf16, #tpu.memory_space<vmem>>, vector<128x512xbf16>
    %cst_11 = arith.constant 0.000000e+00 : f32
    %10 = vector.broadcast %cst_11 : f32 to vector<16x128xf32>
    %cst_12 = arith.constant 0.000000e+00 : f32
    %11 = vector.broadcast %cst_12 : f32 to vector<16x128xf32>
    %c0_i32 = arith.constant 0 : i32
    %12 = arith.index_cast %c0_i32 : i32 to index
    %c0_13 = arith.constant 0 : index
    %c0_14 = arith.constant 0 : index
    %13 = vector.load %arg23[%12, %c0_13, %c0_14] : memref<8x16x512xf32, #tpu.memory_space<vmem>>, vector<1x16x512xf32>
    %14 = vector.shape_cast %13 : vector<1x16x512xf32> to vector<16x512xf32>
    %15 = arith.truncf %10 : vector<16x128xf32> to vector<16x128xbf16>
    %cst_15 = arith.constant dense<0.000000e+00> : vector<16x512xf32>
    %16 = tpu.matmul %15, %9, %cst_15 {dimension_numbers = #tpu.dot_dimension_numbers<[1], [0], [0], [1], [0, 0, 1, 1], [], []>} : vector<16x128xbf16>, vector<128x512xbf16>, vector<16x512xf32> -> vector<16x512xf32>
    %17 = arith.addf %14, %16 : vector<16x512xf32>
    %18 = vector.extract_strided_slice %17 {offsets = [0, 0], sizes = [16, 128], strides = [1, 1]} : vector<16x512xf32> to vector<16x128xf32>
    %19 = arith.negf %18 : vector<16x128xf32>
    %20 = math.exp %19 : vector<16x128xf32>
    %cst_16 = arith.constant 1.000000e+00 : f32
    %21 = vector.broadcast %cst_16 : f32 to vector<16x128xf32>
    %22 = arith.addf %21, %20 : vector<16x128xf32>
    %23 = arith.divf %21, %22 : vector<16x128xf32>
    %24 = vector.extract_strided_slice %17 {offsets = [0, 128], sizes = [16, 128], strides = [1, 1]} : vector<16x512xf32> to vector<16x128xf32>
    %25 = arith.negf %24 : vector<16x128xf32>
    %26 = math.exp %25 : vector<16x128xf32>
    %cst_17 = arith.constant 1.000000e+00 : f32
    %27 = vector.broadcast %cst_17 : f32 to vector<16x128xf32>
    %28 = arith.addf %27, %26 : vector<16x128xf32>
    %29 = arith.divf %27, %28 : vector<16x128xf32>
    %30 = vector.extract_strided_slice %17 {offsets = [0, 256], sizes = [16, 128], strides = [1, 1]} : vector<16x512xf32> to vector<16x128xf32>
    %31 = math.tanh %30 : vector<16x128xf32>
    %32 = vector.extract_strided_slice %17 {offsets = [0, 384], sizes = [16, 128], strides = [1, 1]} : vector<16x512xf32> to vector<16x128xf32>
    %33 = arith.negf %32 : vector<16x128xf32>
    %34 = math.exp %33 : vector<16x128xf32>
    %cst_18 = arith.constant 1.000000e+00 : f32
    %35 = vector.broadcast %cst_18 : f32 to vector<16x128xf32>
    %36 = arith.addf %35, %34 : vector<16x128xf32>
    %37 = arith.divf %35, %36 : vector<16x128xf32>
    %38 = arith.mulf %29, %11 : vector<16x128xf32>
    %39 = arith.mulf %23, %31 : vector<16x128xf32>
    %40 = arith.addf %38, %39 : vector<16x128xf32>
    %41 = math.tanh %40 : vector<16x128xf32>
    %42 = arith.mulf %37, %41 : vector<16x128xf32>
    %43 = arith.truncf %42 : vector<16x128xf32> to vector<16x128xbf16>
    %44 = arith.index_cast %c0_i32 : i32 to index
    %c0_19 = arith.constant 0 : index
    %c0_20 = arith.constant 0 : index
    %45 = vector.load %arg22[%44, %c0_19, %c0_20] : memref<8x16x128xbf16, #tpu.memory_space<vmem>>, vector<1x16x128xbf16>
    %46 = vector.shape_cast %45 : vector<1x16x128xbf16> to vector<16x128xbf16>
    %47 = vector.shape_cast %43 : vector<16x128xbf16> to vector<1x16x128xbf16>
    tpu.vector_store %arg22[%44, %c0_19, %c0_20], %47 {strides = array<i32>} : memref<8x16x128xbf16, #tpu.memory_space<vmem>>, vector<1x16x128xbf16>,
    %c1_i32 = arith.constant 1 : i32
    %48 = arith.index_cast %c1_i32 : i32 to index
    %c0_21 = arith.constant 0 : index
    %c0_22 = arith.constant 0 : index
    %49 = vector.load %arg23[%48, %c0_21, %c0_22] : memref<8x16x512xf32, #tpu.memory_space<vmem>>, vector<1x16x512xf32>
    %50 = vector.shape_cast %49 : vector<1x16x512xf32> to vector<16x512xf32>
    %51 = arith.truncf %42 : vector<16x128xf32> to vector<16x128xbf16>
    %cst_23 = arith.constant dense<0.000000e+00> : vector<16x512xf32>
    %52 = tpu.matmul %51, %9, %cst_23 {dimension_numbers = #tpu.dot_dimension_numbers<[1], [0], [0], [1], [0, 0, 1, 1], [], []>} : vector<16x128xbf16>, vector<128x512xbf16>, vector<16x512xf32> -> vector<16x512xf32>
    %53 = arith.addf %50, %52 : vector<16x512xf32>
    %54 = vector.extract_strided_slice %53 {offsets = [0, 0], sizes = [16, 128], strides = [1, 1]} : vector<16x512xf32> to vector<16x128xf32>
    %55 = arith.negf %54 : vector<16x128xf32>
    %56 = math.exp %55 : vector<16x128xf32>
    %cst_24 = arith.constant 1.000000e+00 : f32
    %57 = vector.broadcast %cst_24 : f32 to vector<16x128xf32>
    %58 = arith.addf %57, %56 : vector<16x128xf32>
    %59 = arith.divf %57, %58 : vector<16x128xf32>
    %60 = vector.extract_strided_slice %53 {offsets = [0, 128], sizes = [16, 128], strides = [1, 1]} : vector<16x512xf32> to vector<16x128xf32>
    %61 = arith.negf %60 : vector<16x128xf32>
    %62 = math.exp %61 : vector<16x128xf32>
    %cst_25 = arith.constant 1.000000e+00 : f32
    %63 = vector.broadcast %cst_25 : f32 to vector<16x128xf32>
    %64 = arith.addf %63, %62 : vector<16x128xf32>
    %65 = arith.divf %63, %64 : vector<16x128xf32>
    %66 = vector.extract_strided_slice %53 {offsets = [0, 256], sizes = [16, 128], strides = [1, 1]} : vector<16x512xf32> to vector<16x128xf32>
    %67 = math.tanh %66 : vector<16x128xf32>
    %68 = vector.extract_strided_slice %53 {offsets = [0, 384], sizes = [16, 128], strides = [1, 1]} : vector<16x512xf32> to vector<16x128xf32>
    %69 = arith.negf %68 : vector<16x128xf32>
    %70 = math.exp %69 : vector<16x128xf32>
    %cst_26 = arith.constant 1.000000e+00 : f32
    %71 = vector.broadcast %cst_26 : f32 to vector<16x128xf32>
    %72 = arith.addf %71, %70 : vector<16x128xf32>
    %73 = arith.divf %71, %72 : vector<16x128xf32>
    %74 = arith.mulf %65, %40 : vector<16x128xf32>
    %75 = arith.mulf %59, %67 : vector<16x128xf32>
    %76 = arith.addf %74, %75 : vector<16x128xf32>
    %77 = math.tanh %76 : vector<16x128xf32>
    %78 = arith.mulf %73, %77 : vector<16x128xf32>
    %79 = arith.truncf %78 : vector<16x128xf32> to vector<16x128xbf16>
    %80 = arith.index_cast %c1_i32 : i32 to index
    %c0_27 = arith.constant 0 : index
    %c0_28 = arith.constant 0 : index
    %81 = vector.load %arg22[%80, %c0_27, %c0_28] : memref<8x16x128xbf16, #tpu.memory_space<vmem>>, vector<1x16x128xbf16>
    %82 = vector.shape_cast %81 : vector<1x16x128xbf16> to vector<16x128xbf16>
    %83 = vector.shape_cast %79 : vector<16x128xbf16> to vector<1x16x128xbf16>
    tpu.vector_store %arg22[%80, %c0_27, %c0_28], %83 {strides = array<i32>} : memref<8x16x128xbf16, #tpu.memory_space<vmem>>, vector<1x16x128xbf16>,
    %c2_i32 = arith.constant 2 : i32
    %84 = arith.index_cast %c2_i32 : i32 to index
    %c0_29 = arith.constant 0 : index
    %c0_30 = arith.constant 0 : index
    %85 = vector.load %arg23[%84, %c0_29, %c0_30] : memref<8x16x512xf32, #tpu.memory_space<vmem>>, vector<1x16x512xf32>
    %86 = vector.shape_cast %85 : vector<1x16x512xf32> to vector<16x512xf32>
    %87 = arith.truncf %78 : vector<16x128xf32> to vector<16x128xbf16>
    %cst_31 = arith.constant dense<0.000000e+00> : vector<16x512xf32>
    %88 = tpu.matmul %87, %9, %cst_31 {dimension_numbers = #tpu.dot_dimension_numbers<[1], [0], [0], [1], [0, 0, 1, 1], [], []>} : vector<16x128xbf16>, vector<128x512xbf16>, vector<16x512xf32> -> vector<16x512xf32>
    %89 = arith.addf %86, %88 : vector<16x512xf32>
    %90 = vector.extract_strided_slice %89 {offsets = [0, 0], sizes = [16, 128], strides = [1, 1]} : vector<16x512xf32> to vector<16x128xf32>
    %91 = arith.negf %90 : vector<16x128xf32>
    %92 = math.exp %91 : vector<16x128xf32>
    %cst_32 = arith.constant 1.000000e+00 : f32
    %93 = vector.broadcast %cst_32 : f32 to vector<16x128xf32>
    %94 = arith.addf %93, %92 : vector<16x128xf32>
    %95 = arith.divf %93, %94 : vector<16x128xf32>
    %96 = vector.extract_strided_slice %89 {offsets = [0, 128], sizes = [16, 128], strides = [1, 1]} : vector<16x512xf32> to vector<16x128xf32>
    %97 = arith.negf %96 : vector<16x128xf32>
    %98 = math.exp %97 : vector<16x128xf32>
    %cst_33 = arith.constant 1.000000e+00 : f32
    %99 = vector.broadcast %cst_33 : f32 to vector<16x128xf32>
    %100 = arith.addf %99, %98 : vector<16x128xf32>
    %101 = arith.divf %99, %100 : vector<16x128xf32>
    %102 = vector.extract_strided_slice %89 {offsets = [0, 256], sizes = [16, 128], strides = [1, 1]} : vector<16x512xf32> to vector<16x128xf32>
    %103 = math.tanh %102 : vector<16x128xf32>
    %104 = vector.extract_strided_slice %89 {offsets = [0, 384], sizes = [16, 128], strides = [1, 1]} : vector<16x512xf32> to vector<16x128xf32>
    %105 = arith.negf %104 : vector<16x128xf32>
    %106 = math.exp %105 : vector<16x128xf32>
    %cst_34 = arith.constant 1.000000e+00 : f32
    %107 = vector.broadcast %cst_34 : f32 to vector<16x128xf32>
    %108 = arith.addf %107, %106 : vector<16x128xf32>
    %109 = arith.divf %107, %108 : vector<16x128xf32>
    %110 = arith.mulf %101, %76 : vector<16x128xf32>
    %111 = arith.mulf %95, %103 : vector<16x128xf32>
    %112 = arith.addf %110, %111 : vector<16x128xf32>
    %113 = math.tanh %112 : vector<16x128xf32>
    %114 = arith.mulf %109, %113 : vector<16x128xf32>
    %115 = arith.truncf %114 : vector<16x128xf32> to vector<16x128xbf16>
    %116 = arith.index_cast %c2_i32 : i32 to index
    %c0_35 = arith.constant 0 : index
    %c0_36 = arith.constant 0 : index
    %117 = vector.load %arg22[%116, %c0_35, %c0_36] : memref<8x16x128xbf16, #tpu.memory_space<vmem>>, vector<1x16x128xbf16>
    %118 = vector.shape_cast %117 : vector<1x16x128xbf16> to vector<16x128xbf16>
    %119 = vector.shape_cast %115 : vector<16x128xbf16> to vector<1x16x128xbf16>
    tpu.vector_store %arg22[%116, %c0_35, %c0_36], %119 {strides = array<i32>} : memref<8x16x128xbf16, #tpu.memory_space<vmem>>, vector<1x16x128xbf16>,
    %c3_i32 = arith.constant 3 : i32
    %120 = arith.index_cast %c3_i32 : i32 to index
    %c0_37 = arith.constant 0 : index
    %c0_38 = arith.constant 0 : index
    %121 = vector.load %arg23[%120, %c0_37, %c0_38] : memref<8x16x512xf32, #tpu.memory_space<vmem>>, vector<1x16x512xf32>
    %122 = vector.shape_cast %121 : vector<1x16x512xf32> to vector<16x512xf32>
    %123 = arith.truncf %114 : vector<16x128xf32> to vector<16x128xbf16>
    %cst_39 = arith.constant dense<0.000000e+00> : vector<16x512xf32>
    %124 = tpu.matmul %123, %9, %cst_39 {dimension_numbers = #tpu.dot_dimension_numbers<[1], [0], [0], [1], [0, 0, 1, 1], [], []>} : vector<16x128xbf16>, vector<128x512xbf16>, vector<16x512xf32> -> vector<16x512xf32>
    %125 = arith.addf %122, %124 : vector<16x512xf32>
    %126 = vector.extract_strided_slice %125 {offsets = [0, 0], sizes = [16, 128], strides = [1, 1]} : vector<16x512xf32> to vector<16x128xf32>
    %127 = arith.negf %126 : vector<16x128xf32>
    %128 = math.exp %127 : vector<16x128xf32>
    %cst_40 = arith.constant 1.000000e+00 : f32
    %129 = vector.broadcast %cst_40 : f32 to vector<16x128xf32>
    %130 = arith.addf %129, %128 : vector<16x128xf32>
    %131 = arith.divf %129, %130 : vector<16x128xf32>
    %132 = vector.extract_strided_slice %125 {offsets = [0, 128], sizes = [16, 128], strides = [1, 1]} : vector<16x512xf32> to vector<16x128xf32>
    %133 = arith.negf %132 : vector<16x128xf32>
    %134 = math.exp %133 : vector<16x128xf32>
    %cst_41 = arith.constant 1.000000e+00 : f32
    %135 = vector.broadcast %cst_41 : f32 to vector<16x128xf32>
    %136 = arith.addf %135, %134 : vector<16x128xf32>
    %137 = arith.divf %135, %136 : vector<16x128xf32>
    %138 = vector.extract_strided_slice %125 {offsets = [0, 256], sizes = [16, 128], strides = [1, 1]} : vector<16x512xf32> to vector<16x128xf32>
    %139 = math.tanh %138 : vector<16x128xf32>
    %140 = vector.extract_strided_slice %125 {offsets = [0, 384], sizes = [16, 128], strides = [1, 1]} : vector<16x512xf32> to vector<16x128xf32>
    %141 = arith.negf %140 : vector<16x128xf32>
    %142 = math.exp %141 : vector<16x128xf32>
    %cst_42 = arith.constant 1.000000e+00 : f32
    %143 = vector.broadcast %cst_42 : f32 to vector<16x128xf32>
    %144 = arith.addf %143, %142 : vector<16x128xf32>
    %145 = arith.divf %143, %144 : vector<16x128xf32>
    %146 = arith.mulf %137, %112 : vector<16x128xf32>
    %147 = arith.mulf %131, %139 : vector<16x128xf32>
    %148 = arith.addf %146, %147 : vector<16x128xf32>
    %149 = math.tanh %148 : vector<16x128xf32>
    %150 = arith.mulf %145, %149 : vector<16x128xf32>
    %151 = arith.truncf %150 : vector<16x128xf32> to vector<16x128xbf16>
    %152 = arith.index_cast %c3_i32 : i32 to index
    %c0_43 = arith.constant 0 : index
    %c0_44 = arith.constant 0 : index
    %153 = vector.load %arg22[%152, %c0_43, %c0_44] : memref<8x16x128xbf16, #tpu.memory_space<vmem>>, vector<1x16x128xbf16>
    %154 = vector.shape_cast %153 : vector<1x16x128xbf16> to vector<16x128xbf16>
    %155 = vector.shape_cast %151 : vector<16x128xbf16> to vector<1x16x128xbf16>
    tpu.vector_store %arg22[%152, %c0_43, %c0_44], %155 {strides = array<i32>} : memref<8x16x128xbf16, #tpu.memory_space<vmem>>, vector<1x16x128xbf16>,
    %c4_i32 = arith.constant 4 : i32
    %156 = arith.index_cast %c4_i32 : i32 to index
    %c0_45 = arith.constant 0 : index
    %c0_46 = arith.constant 0 : index
    %157 = vector.load %arg23[%156, %c0_45, %c0_46] : memref<8x16x512xf32, #tpu.memory_space<vmem>>, vector<1x16x512xf32>
    %158 = vector.shape_cast %157 : vector<1x16x512xf32> to vector<16x512xf32>
    %159 = arith.truncf %150 : vector<16x128xf32> to vector<16x128xbf16>
    %cst_47 = arith.constant dense<0.000000e+00> : vector<16x512xf32>
    %160 = tpu.matmul %159, %9, %cst_47 {dimension_numbers = #tpu.dot_dimension_numbers<[1], [0], [0], [1], [0, 0, 1, 1], [], []>} : vector<16x128xbf16>, vector<128x512xbf16>, vector<16x512xf32> -> vector<16x512xf32>
    %161 = arith.addf %158, %160 : vector<16x512xf32>
    %162 = vector.extract_strided_slice %161 {offsets = [0, 0], sizes = [16, 128], strides = [1, 1]} : vector<16x512xf32> to vector<16x128xf32>
    %163 = arith.negf %162 : vector<16x128xf32>
    %164 = math.exp %163 : vector<16x128xf32>
    %cst_48 = arith.constant 1.000000e+00 : f32
    %165 = vector.broadcast %cst_48 : f32 to vector<16x128xf32>
    %166 = arith.addf %165, %164 : vector<16x128xf32>
    %167 = arith.divf %165, %166 : vector<16x128xf32>
    %168 = vector.extract_strided_slice %161 {offsets = [0, 128], sizes = [16, 128], strides = [1, 1]} : vector<16x512xf32> to vector<16x128xf32>
    %169 = arith.negf %168 : vector<16x128xf32>
    %170 = math.exp %169 : vector<16x128xf32>
    %cst_49 = arith.constant 1.000000e+00 : f32
    %171 = vector.broadcast %cst_49 : f32 to vector<16x128xf32>
    %172 = arith.addf %171, %170 : vector<16x128xf32>
    %173 = arith.divf %171, %172 : vector<16x128xf32>
    %174 = vector.extract_strided_slice %161 {offsets = [0, 256], sizes = [16, 128], strides = [1, 1]} : vector<16x512xf32> to vector<16x128xf32>
    %175 = math.tanh %174 : vector<16x128xf32>
    %176 = vector.extract_strided_slice %161 {offsets = [0, 384], sizes = [16, 128], strides = [1, 1]} : vector<16x512xf32> to vector<16x128xf32>
    %177 = arith.negf %176 : vector<16x128xf32>
    %178 = math.exp %177 : vector<16x128xf32>
    %cst_50 = arith.constant 1.000000e+00 : f32
    %179 = vector.broadcast %cst_50 : f32 to vector<16x128xf32>
    %180 = arith.addf %179, %178 : vector<16x128xf32>
    %181 = arith.divf %179, %180 : vector<16x128xf32>
    %182 = arith.mulf %173, %148 : vector<16x128xf32>
    %183 = arith.mulf %167, %175 : vector<16x128xf32>
    %184 = arith.addf %182, %183 : vector<16x128xf32>
    %185 = math.tanh %184 : vector<16x128xf32>
    %186 = arith.mulf %181, %185 : vector<16x128xf32>
    %187 = arith.truncf %186 : vector<16x128xf32> to vector<16x128xbf16>
    %188 = arith.index_cast %c4_i32 : i32 to index
    %c0_51 = arith.constant 0 : index
    %c0_52 = arith.constant 0 : index
    %189 = vector.load %arg22[%188, %c0_51, %c0_52] : memref<8x16x128xbf16, #tpu.memory_space<vmem>>, vector<1x16x128xbf16>
    %190 = vector.shape_cast %189 : vector<1x16x128xbf16> to vector<16x128xbf16>
    %191 = vector.shape_cast %187 : vector<16x128xbf16> to vector<1x16x128xbf16>
    tpu.vector_store %arg22[%188, %c0_51, %c0_52], %191 {strides = array<i32>} : memref<8x16x128xbf16, #tpu.memory_space<vmem>>, vector<1x16x128xbf16>,
    %c5_i32 = arith.constant 5 : i32
    %192 = arith.index_cast %c5_i32 : i32 to index
    %c0_53 = arith.constant 0 : index
    %c0_54 = arith.constant 0 : index
    %193 = vector.load %arg23[%192, %c0_53, %c0_54] : memref<8x16x512xf32, #tpu.memory_space<vmem>>, vector<1x16x512xf32>
    %194 = vector.shape_cast %193 : vector<1x16x512xf32> to vector<16x512xf32>
    %195 = arith.truncf %186 : vector<16x128xf32> to vector<16x128xbf16>
    %cst_55 = arith.constant dense<0.000000e+00> : vector<16x512xf32>
    %196 = tpu.matmul %195, %9, %cst_55 {dimension_numbers = #tpu.dot_dimension_numbers<[1], [0], [0], [1], [0, 0, 1, 1], [], []>} : vector<16x128xbf16>, vector<128x512xbf16>, vector<16x512xf32> -> vector<16x512xf32>
    %197 = arith.addf %194, %196 : vector<16x512xf32>
    %198 = vector.extract_strided_slice %197 {offsets = [0, 0], sizes = [16, 128], strides = [1, 1]} : vector<16x512xf32> to vector<16x128xf32>
    %199 = arith.negf %198 : vector<16x128xf32>
    %200 = math.exp %199 : vector<16x128xf32>
    %cst_56 = arith.constant 1.000000e+00 : f32
    %201 = vector.broadcast %cst_56 : f32 to vector<16x128xf32>
    %202 = arith.addf %201, %200 : vector<16x128xf32>
    %203 = arith.divf %201, %202 : vector<16x128xf32>
    %204 = vector.extract_strided_slice %197 {offsets = [0, 128], sizes = [16, 128], strides = [1, 1]} : vector<16x512xf32> to vector<16x128xf32>
    %205 = arith.negf %204 : vector<16x128xf32>
    %206 = math.exp %205 : vector<16x128xf32>
    %cst_57 = arith.constant 1.000000e+00 : f32
    %207 = vector.broadcast %cst_57 : f32 to vector<16x128xf32>
    %208 = arith.addf %207, %206 : vector<16x128xf32>
    %209 = arith.divf %207, %208 : vector<16x128xf32>
    %210 = vector.extract_strided_slice %197 {offsets = [0, 256], sizes = [16, 128], strides = [1, 1]} : vector<16x512xf32> to vector<16x128xf32>
    %211 = math.tanh %210 : vector<16x128xf32>
    %212 = vector.extract_strided_slice %197 {offsets = [0, 384], sizes = [16, 128], strides = [1, 1]} : vector<16x512xf32> to vector<16x128xf32>
    %213 = arith.negf %212 : vector<16x128xf32>
    %214 = math.exp %213 : vector<16x128xf32>
    %cst_58 = arith.constant 1.000000e+00 : f32
    %215 = vector.broadcast %cst_58 : f32 to vector<16x128xf32>
    %216 = arith.addf %215, %214 : vector<16x128xf32>
    %217 = arith.divf %215, %216 : vector<16x128xf32>
    %218 = arith.mulf %209, %184 : vector<16x128xf32>
    %219 = arith.mulf %203, %211 : vector<16x128xf32>
    %220 = arith.addf %218, %219 : vector<16x128xf32>
    %221 = math.tanh %220 : vector<16x128xf32>
    %222 = arith.mulf %217, %221 : vector<16x128xf32>
    %223 = arith.truncf %222 : vector<16x128xf32> to vector<16x128xbf16>
    %224 = arith.index_cast %c5_i32 : i32 to index
    %c0_59 = arith.constant 0 : index
    %c0_60 = arith.constant 0 : index
    %225 = vector.load %arg22[%224, %c0_59, %c0_60] : memref<8x16x128xbf16, #tpu.memory_space<vmem>>, vector<1x16x128xbf16>
    %226 = vector.shape_cast %225 : vector<1x16x128xbf16> to vector<16x128xbf16>
    %227 = vector.shape_cast %223 : vector<16x128xbf16> to vector<1x16x128xbf16>
    tpu.vector_store %arg22[%224, %c0_59, %c0_60], %227 {strides = array<i32>} : memref<8x16x128xbf16, #tpu.memory_space<vmem>>, vector<1x16x128xbf16>,
    %c6_i32 = arith.constant 6 : i32
    %228 = arith.index_cast %c6_i32 : i32 to index
    %c0_61 = arith.constant 0 : index
    %c0_62 = arith.constant 0 : index
    %229 = vector.load %arg23[%228, %c0_61, %c0_62] : memref<8x16x512xf32, #tpu.memory_space<vmem>>, vector<1x16x512xf32>
    %230 = vector.shape_cast %229 : vector<1x16x512xf32> to vector<16x512xf32>
    %231 = arith.truncf %222 : vector<16x128xf32> to vector<16x128xbf16>
    %cst_63 = arith.constant dense<0.000000e+00> : vector<16x512xf32>
    %232 = tpu.matmul %231, %9, %cst_63 {dimension_numbers = #tpu.dot_dimension_numbers<[1], [0], [0], [1], [0, 0, 1, 1], [], []>} : vector<16x128xbf16>, vector<128x512xbf16>, vector<16x512xf32> -> vector<16x512xf32>
    %233 = arith.addf %230, %232 : vector<16x512xf32>
    %234 = vector.extract_strided_slice %233 {offsets = [0, 0], sizes = [16, 128], strides = [1, 1]} : vector<16x512xf32> to vector<16x128xf32>
    %235 = arith.negf %234 : vector<16x128xf32>
    %236 = math.exp %235 : vector<16x128xf32>
    %cst_64 = arith.constant 1.000000e+00 : f32
    %237 = vector.broadcast %cst_64 : f32 to vector<16x128xf32>
    %238 = arith.addf %237, %236 : vector<16x128xf32>
    %239 = arith.divf %237, %238 : vector<16x128xf32>
    %240 = vector.extract_strided_slice %233 {offsets = [0, 128], sizes = [16, 128], strides = [1, 1]} : vector<16x512xf32> to vector<16x128xf32>
    %241 = arith.negf %240 : vector<16x128xf32>
    %242 = math.exp %241 : vector<16x128xf32>
    %cst_65 = arith.constant 1.000000e+00 : f32
    %243 = vector.broadcast %cst_65 : f32 to vector<16x128xf32>
    %244 = arith.addf %243, %242 : vector<16x128xf32>
    %245 = arith.divf %243, %244 : vector<16x128xf32>
    %246 = vector.extract_strided_slice %233 {offsets = [0, 256], sizes = [16, 128], strides = [1, 1]} : vector<16x512xf32> to vector<16x128xf32>
    %247 = math.tanh %246 : vector<16x128xf32>
    %248 = vector.extract_strided_slice %233 {offsets = [0, 384], sizes = [16, 128], strides = [1, 1]} : vector<16x512xf32> to vector<16x128xf32>
    %249 = arith.negf %248 : vector<16x128xf32>
    %250 = math.exp %249 : vector<16x128xf32>
    %cst_66 = arith.constant 1.000000e+00 : f32
    %251 = vector.broadcast %cst_66 : f32 to vector<16x128xf32>
    %252 = arith.addf %251, %250 : vector<16x128xf32>
    %253 = arith.divf %251, %252 : vector<16x128xf32>
    %254 = arith.mulf %245, %220 : vector<16x128xf32>
    %255 = arith.mulf %239, %247 : vector<16x128xf32>
    %256 = arith.addf %254, %255 : vector<16x128xf32>
    %257 = math.tanh %256 : vector<16x128xf32>
    %258 = arith.mulf %253, %257 : vector<16x128xf32>
    %259 = arith.truncf %258 : vector<16x128xf32> to vector<16x128xbf16>
    %260 = arith.index_cast %c6_i32 : i32 to index
    %c0_67 = arith.constant 0 : index
    %c0_68 = arith.constant 0 : index
    %261 = vector.load %arg22[%260, %c0_67, %c0_68] : memref<8x16x128xbf16, #tpu.memory_space<vmem>>, vector<1x16x128xbf16>
    %262 = vector.shape_cast %261 : vector<1x16x128xbf16> to vector<16x128xbf16>
    %263 = vector.shape_cast %259 : vector<16x128xbf16> to vector<1x16x128xbf16>
    tpu.vector_store %arg22[%260, %c0_67, %c0_68], %263 {strides = array<i32>} : memref<8x16x128xbf16, #tpu.memory_space<vmem>>, vector<1x16x128xbf16>,
    %c7_i32 = arith.constant 7 : i32
    %264 = arith.index_cast %c7_i32 : i32 to index
    %c0_69 = arith.constant 0 : index
    %c0_70 = arith.constant 0 : index
    %265 = vector.load %arg23[%264, %c0_69, %c0_70] : memref<8x16x512xf32, #tpu.memory_space<vmem>>, vector<1x16x512xf32>
    %266 = vector.shape_cast %265 : vector<1x16x512xf32> to vector<16x512xf32>
    %267 = arith.truncf %258 : vector<16x128xf32> to vector<16x128xbf16>
    %cst_71 = arith.constant dense<0.000000e+00> : vector<16x512xf32>
    %268 = tpu.matmul %267, %9, %cst_71 {dimension_numbers = #tpu.dot_dimension_numbers<[1], [0], [0], [1], [0, 0, 1, 1], [], []>} : vector<16x128xbf16>, vector<128x512xbf16>, vector<16x512xf32> -> vector<16x512xf32>
    %269 = arith.addf %266, %268 : vector<16x512xf32>
    %270 = vector.extract_strided_slice %269 {offsets = [0, 0], sizes = [16, 128], strides = [1, 1]} : vector<16x512xf32> to vector<16x128xf32>
    %271 = arith.negf %270 : vector<16x128xf32>
    %272 = math.exp %271 : vector<16x128xf32>
    %cst_72 = arith.constant 1.000000e+00 : f32
    %273 = vector.broadcast %cst_72 : f32 to vector<16x128xf32>
    %274 = arith.addf %273, %272 : vector<16x128xf32>
    %275 = arith.divf %273, %274 : vector<16x128xf32>
    %276 = vector.extract_strided_slice %269 {offsets = [0, 128], sizes = [16, 128], strides = [1, 1]} : vector<16x512xf32> to vector<16x128xf32>
    %277 = arith.negf %276 : vector<16x128xf32>
    %278 = math.exp %277 : vector<16x128xf32>
    %cst_73 = arith.constant 1.000000e+00 : f32
    %279 = vector.broadcast %cst_73 : f32 to vector<16x128xf32>
    %280 = arith.addf %279, %278 : vector<16x128xf32>
    %281 = arith.divf %279, %280 : vector<16x128xf32>
    %282 = vector.extract_strided_slice %269 {offsets = [0, 256], sizes = [16, 128], strides = [1, 1]} : vector<16x512xf32> to vector<16x128xf32>
    %283 = math.tanh %282 : vector<16x128xf32>
    %284 = vector.extract_strided_slice %269 {offsets = [0, 384], sizes = [16, 128], strides = [1, 1]} : vector<16x512xf32> to vector<16x128xf32>
    %285 = arith.negf %284 : vector<16x128xf32>
    %286 = math.exp %285 : vector<16x128xf32>
    %cst_74 = arith.constant 1.000000e+00 : f32
    %287 = vector.broadcast %cst_74 : f32 to vector<16x128xf32>
    %288 = arith.addf %287, %286 : vector<16x128xf32>
    %289 = arith.divf %287, %288 : vector<16x128xf32>
    %290 = arith.mulf %281, %256 : vector<16x128xf32>
    %291 = arith.mulf %275, %283 : vector<16x128xf32>
    %292 = arith.addf %290, %291 : vector<16x128xf32>
    %293 = math.tanh %292 : vector<16x128xf32>
    %294 = arith.mulf %289, %293 : vector<16x128xf32>
    %295 = arith.truncf %294 : vector<16x128xf32> to vector<16x128xbf16>
    %296 = arith.index_cast %c7_i32 : i32 to index
    %c0_75 = arith.constant 0 : index
    %c0_76 = arith.constant 0 : index
    %297 = vector.load %arg22[%296, %c0_75, %c0_76] : memref<8x16x128xbf16, #tpu.memory_space<vmem>>, vector<1x16x128xbf16>
    %298 = vector.shape_cast %297 : vector<1x16x128xbf16> to vector<16x128xbf16>
    %299 = vector.shape_cast %295 : vector<16x128xbf16> to vector<1x16x128xbf16>
    tpu.vector_store %arg22[%296, %c0_75, %c0_76], %299 {strides = array<i32>} : memref<8x16x128xbf16, #tpu.memory_space<vmem>>, vector<1x16x128xbf16>,
    %c8_i32 = arith.constant 8 : i32
    %c0_77 = arith.constant 0 : index
    %c0_78 = arith.constant 0 : index
    %c0_79 = arith.constant 0 : index
    %300 = vector.load %arg22[%c0_77, %c0_78, %c0_79] : memref<8x16x128xbf16, #tpu.memory_space<vmem>>, vector<8x16x128xbf16>
    %301 = vector.shape_cast %300 : vector<8x16x128xbf16> to vector<128x128xbf16>
    %c0_80 = arith.constant 0 : index
    %c0_81 = arith.constant 0 : index
    %302 = vector.load %arg5[%c0_80, %c0_81] : memref<128x512xbf16, #tpu.memory_space<vmem>>, vector<128x512xbf16>
    %cst_82 = arith.constant dense<0.000000e+00> : vector<128x512xf32>
    %303 = tpu.matmul %301, %302, %cst_82 {dimension_numbers = #tpu.dot_dimension_numbers<[1], [0], [0], [1], [0, 0, 1, 1], [], []>} : vector<128x128xbf16>, vector<128x512xbf16>, vector<128x512xf32> -> vector<128x512xf32>
    %c0_83 = arith.constant 0 : index
    %c0_84 = arith.constant 0 : index
    %304 = vector.load %arg7[%c0_83, %c0_84] : memref<1x512xf32, #tpu.memory_space<vmem>>, vector<1x512xf32>
    %305 = vector.broadcast %304 : vector<1x512xf32> to vector<128x512xf32>
    %306 = arith.addf %303, %305 : vector<128x512xf32>
    %307 = vector.shape_cast %306 : vector<128x512xf32> to vector<8x16x512xf32>
    %c0_85 = arith.constant 0 : index
    %c0_86 = arith.constant 0 : index
    %c0_87 = arith.constant 0 : index
    %308 = vector.load %arg23[%c0_85, %c0_86, %c0_87] : memref<8x16x512xf32, #tpu.memory_space<vmem>>, vector<8x16x512xf32>
    tpu.vector_store %arg23[%c0_85, %c0_86, %c0_87], %307 {strides = array<i32>} : memref<8x16x512xf32, #tpu.memory_space<vmem>>, vector<8x16x512xf32>,
    %c0_88 = arith.constant 0 : index
    %c0_89 = arith.constant 0 : index
    %309 = vector.load %arg6[%c0_88, %c0_89] : memref<128x512xbf16, #tpu.memory_space<vmem>>, vector<128x512xbf16>
    %cst_90 = arith.constant 0.000000e+00 : f32
    %310 = vector.broadcast %cst_90 : f32 to vector<16x128xf32>
    %cst_91 = arith.constant 0.000000e+00 : f32
    %311 = vector.broadcast %cst_91 : f32 to vector<16x128xf32>
    %c0_i32_92 = arith.constant 0 : i32
    %312 = arith.index_cast %c0_i32_92 : i32 to index
    %c0_93 = arith.constant 0 : index
    %c0_94 = arith.constant 0 : index
    %313 = vector.load %arg23[%312, %c0_93, %c0_94] : memref<8x16x512xf32, #tpu.memory_space<vmem>>, vector<1x16x512xf32>
    %314 = vector.shape_cast %313 : vector<1x16x512xf32> to vector<16x512xf32>
    %315 = arith.truncf %310 : vector<16x128xf32> to vector<16x128xbf16>
    %cst_95 = arith.constant dense<0.000000e+00> : vector<16x512xf32>
    %316 = tpu.matmul %315, %309, %cst_95 {dimension_numbers = #tpu.dot_dimension_numbers<[1], [0], [0], [1], [0, 0, 1, 1], [], []>} : vector<16x128xbf16>, vector<128x512xbf16>, vector<16x512xf32> -> vector<16x512xf32>
    %317 = arith.addf %314, %316 : vector<16x512xf32>
    %318 = vector.extract_strided_slice %317 {offsets = [0, 0], sizes = [16, 128], strides = [1, 1]} : vector<16x512xf32> to vector<16x128xf32>
    %319 = arith.negf %318 : vector<16x128xf32>
    %320 = math.exp %319 : vector<16x128xf32>
    %cst_96 = arith.constant 1.000000e+00 : f32
    %321 = vector.broadcast %cst_96 : f32 to vector<16x128xf32>
    %322 = arith.addf %321, %320 : vector<16x128xf32>
    %323 = arith.divf %321, %322 : vector<16x128xf32>
    %324 = vector.extract_strided_slice %317 {offsets = [0, 128], sizes = [16, 128], strides = [1, 1]} : vector<16x512xf32> to vector<16x128xf32>
    %325 = arith.negf %324 : vector<16x128xf32>
    %326 = math.exp %325 : vector<16x128xf32>
    %cst_97 = arith.constant 1.000000e+00 : f32
    %327 = vector.broadcast %cst_97 : f32 to vector<16x128xf32>
    %328 = arith.addf %327, %326 : vector<16x128xf32>
    %329 = arith.divf %327, %328 : vector<16x128xf32>
    %330 = vector.extract_strided_slice %317 {offsets = [0, 256], sizes = [16, 128], strides = [1, 1]} : vector<16x512xf32> to vector<16x128xf32>
    %331 = math.tanh %330 : vector<16x128xf32>
    %332 = vector.extract_strided_slice %317 {offsets = [0, 384], sizes = [16, 128], strides = [1, 1]} : vector<16x512xf32> to vector<16x128xf32>
    %333 = arith.negf %332 : vector<16x128xf32>
    %334 = math.exp %333 : vector<16x128xf32>
    %cst_98 = arith.constant 1.000000e+00 : f32
    %335 = vector.broadcast %cst_98 : f32 to vector<16x128xf32>
    %336 = arith.addf %335, %334 : vector<16x128xf32>
    %337 = arith.divf %335, %336 : vector<16x128xf32>
    %338 = arith.mulf %329, %311 : vector<16x128xf32>
    %339 = arith.mulf %323, %331 : vector<16x128xf32>
    %340 = arith.addf %338, %339 : vector<16x128xf32>
    %341 = math.tanh %340 : vector<16x128xf32>
    %342 = arith.mulf %337, %341 : vector<16x128xf32>
    %343 = arith.truncf %342 : vector<16x128xf32> to vector<16x128xbf16>
    %344 = arith.index_cast %c0_i32_92 : i32 to index
    %c0_99 = arith.constant 0 : index
    %c0_100 = arith.constant 0 : index
    %345 = vector.load %arg22[%344, %c0_99, %c0_100] : memref<8x16x128xbf16, #tpu.memory_space<vmem>>, vector<1x16x128xbf16>
    %346 = vector.shape_cast %345 : vector<1x16x128xbf16> to vector<16x128xbf16>
    %347 = vector.shape_cast %343 : vector<16x128xbf16> to vector<1x16x128xbf16>
    tpu.vector_store %arg22[%344, %c0_99, %c0_100], %347 {strides = array<i32>} : memref<8x16x128xbf16, #tpu.memory_space<vmem>>, vector<1x16x128xbf16>,
    %c1_i32_101 = arith.constant 1 : i32
    %348 = arith.index_cast %c1_i32_101 : i32 to index
    %c0_102 = arith.constant 0 : index
    %c0_103 = arith.constant 0 : index
    %349 = vector.load %arg23[%348, %c0_102, %c0_103] : memref<8x16x512xf32, #tpu.memory_space<vmem>>, vector<1x16x512xf32>
    %350 = vector.shape_cast %349 : vector<1x16x512xf32> to vector<16x512xf32>
    %351 = arith.truncf %342 : vector<16x128xf32> to vector<16x128xbf16>
    %cst_104 = arith.constant dense<0.000000e+00> : vector<16x512xf32>
    %352 = tpu.matmul %351, %309, %cst_104 {dimension_numbers = #tpu.dot_dimension_numbers<[1], [0], [0], [1], [0, 0, 1, 1], [], []>} : vector<16x128xbf16>, vector<128x512xbf16>, vector<16x512xf32> -> vector<16x512xf32>
    %353 = arith.addf %350, %352 : vector<16x512xf32>
    %354 = vector.extract_strided_slice %353 {offsets = [0, 0], sizes = [16, 128], strides = [1, 1]} : vector<16x512xf32> to vector<16x128xf32>
    %355 = arith.negf %354 : vector<16x128xf32>
    %356 = math.exp %355 : vector<16x128xf32>
    %cst_105 = arith.constant 1.000000e+00 : f32
    %357 = vector.broadcast %cst_105 : f32 to vector<16x128xf32>
    %358 = arith.addf %357, %356 : vector<16x128xf32>
    %359 = arith.divf %357, %358 : vector<16x128xf32>
    %360 = vector.extract_strided_slice %353 {offsets = [0, 128], sizes = [16, 128], strides = [1, 1]} : vector<16x512xf32> to vector<16x128xf32>
    %361 = arith.negf %360 : vector<16x128xf32>
    %362 = math.exp %361 : vector<16x128xf32>
    %cst_106 = arith.constant 1.000000e+00 : f32
    %363 = vector.broadcast %cst_106 : f32 to vector<16x128xf32>
    %364 = arith.addf %363, %362 : vector<16x128xf32>
    %365 = arith.divf %363, %364 : vector<16x128xf32>
    %366 = vector.extract_strided_slice %353 {offsets = [0, 256], sizes = [16, 128], strides = [1, 1]} : vector<16x512xf32> to vector<16x128xf32>
    %367 = math.tanh %366 : vector<16x128xf32>
    %368 = vector.extract_strided_slice %353 {offsets = [0, 384], sizes = [16, 128], strides = [1, 1]} : vector<16x512xf32> to vector<16x128xf32>
    %369 = arith.negf %368 : vector<16x128xf32>
    %370 = math.exp %369 : vector<16x128xf32>
    %cst_107 = arith.constant 1.000000e+00 : f32
    %371 = vector.broadcast %cst_107 : f32 to vector<16x128xf32>
    %372 = arith.addf %371, %370 : vector<16x128xf32>
    %373 = arith.divf %371, %372 : vector<16x128xf32>
    %374 = arith.mulf %365, %340 : vector<16x128xf32>
    %375 = arith.mulf %359, %367 : vector<16x128xf32>
    %376 = arith.addf %374, %375 : vector<16x128xf32>
    %377 = math.tanh %376 : vector<16x128xf32>
    %378 = arith.mulf %373, %377 : vector<16x128xf32>
    %379 = arith.truncf %378 : vector<16x128xf32> to vector<16x128xbf16>
    %380 = arith.index_cast %c1_i32_101 : i32 to index
    %c0_108 = arith.constant 0 : index
    %c0_109 = arith.constant 0 : index
    %381 = vector.load %arg22[%380, %c0_108, %c0_109] : memref<8x16x128xbf16, #tpu.memory_space<vmem>>, vector<1x16x128xbf16>
    %382 = vector.shape_cast %381 : vector<1x16x128xbf16> to vector<16x128xbf16>
    %383 = vector.shape_cast %379 : vector<16x128xbf16> to vector<1x16x128xbf16>
    tpu.vector_store %arg22[%380, %c0_108, %c0_109], %383 {strides = array<i32>} : memref<8x16x128xbf16, #tpu.memory_space<vmem>>, vector<1x16x128xbf16>,
    %c2_i32_110 = arith.constant 2 : i32
    %384 = arith.index_cast %c2_i32_110 : i32 to index
    %c0_111 = arith.constant 0 : index
    %c0_112 = arith.constant 0 : index
    %385 = vector.load %arg23[%384, %c0_111, %c0_112] : memref<8x16x512xf32, #tpu.memory_space<vmem>>, vector<1x16x512xf32>
    %386 = vector.shape_cast %385 : vector<1x16x512xf32> to vector<16x512xf32>
    %387 = arith.truncf %378 : vector<16x128xf32> to vector<16x128xbf16>
    %cst_113 = arith.constant dense<0.000000e+00> : vector<16x512xf32>
    %388 = tpu.matmul %387, %309, %cst_113 {dimension_numbers = #tpu.dot_dimension_numbers<[1], [0], [0], [1], [0, 0, 1, 1], [], []>} : vector<16x128xbf16>, vector<128x512xbf16>, vector<16x512xf32> -> vector<16x512xf32>
    %389 = arith.addf %386, %388 : vector<16x512xf32>
    %390 = vector.extract_strided_slice %389 {offsets = [0, 0], sizes = [16, 128], strides = [1, 1]} : vector<16x512xf32> to vector<16x128xf32>
    %391 = arith.negf %390 : vector<16x128xf32>
    %392 = math.exp %391 : vector<16x128xf32>
    %cst_114 = arith.constant 1.000000e+00 : f32
    %393 = vector.broadcast %cst_114 : f32 to vector<16x128xf32>
    %394 = arith.addf %393, %392 : vector<16x128xf32>
    %395 = arith.divf %393, %394 : vector<16x128xf32>
    %396 = vector.extract_strided_slice %389 {offsets = [0, 128], sizes = [16, 128], strides = [1, 1]} : vector<16x512xf32> to vector<16x128xf32>
    %397 = arith.negf %396 : vector<16x128xf32>
    %398 = math.exp %397 : vector<16x128xf32>
    %cst_115 = arith.constant 1.000000e+00 : f32
    %399 = vector.broadcast %cst_115 : f32 to vector<16x128xf32>
    %400 = arith.addf %399, %398 : vector<16x128xf32>
    %401 = arith.divf %399, %400 : vector<16x128xf32>
    %402 = vector.extract_strided_slice %389 {offsets = [0, 256], sizes = [16, 128], strides = [1, 1]} : vector<16x512xf32> to vector<16x128xf32>
    %403 = math.tanh %402 : vector<16x128xf32>
    %404 = vector.extract_strided_slice %389 {offsets = [0, 384], sizes = [16, 128], strides = [1, 1]} : vector<16x512xf32> to vector<16x128xf32>
    %405 = arith.negf %404 : vector<16x128xf32>
    %406 = math.exp %405 : vector<16x128xf32>
    %cst_116 = arith.constant 1.000000e+00 : f32
    %407 = vector.broadcast %cst_116 : f32 to vector<16x128xf32>
    %408 = arith.addf %407, %406 : vector<16x128xf32>
    %409 = arith.divf %407, %408 : vector<16x128xf32>
    %410 = arith.mulf %401, %376 : vector<16x128xf32>
    %411 = arith.mulf %395, %403 : vector<16x128xf32>
    %412 = arith.addf %410, %411 : vector<16x128xf32>
    %413 = math.tanh %412 : vector<16x128xf32>
    %414 = arith.mulf %409, %413 : vector<16x128xf32>
    %415 = arith.truncf %414 : vector<16x128xf32> to vector<16x128xbf16>
    %416 = arith.index_cast %c2_i32_110 : i32 to index
    %c0_117 = arith.constant 0 : index
    %c0_118 = arith.constant 0 : index
    %417 = vector.load %arg22[%416, %c0_117, %c0_118] : memref<8x16x128xbf16, #tpu.memory_space<vmem>>, vector<1x16x128xbf16>
    %418 = vector.shape_cast %417 : vector<1x16x128xbf16> to vector<16x128xbf16>
    %419 = vector.shape_cast %415 : vector<16x128xbf16> to vector<1x16x128xbf16>
    tpu.vector_store %arg22[%416, %c0_117, %c0_118], %419 {strides = array<i32>} : memref<8x16x128xbf16, #tpu.memory_space<vmem>>, vector<1x16x128xbf16>,
    %c3_i32_119 = arith.constant 3 : i32
    %420 = arith.index_cast %c3_i32_119 : i32 to index
    %c0_120 = arith.constant 0 : index
    %c0_121 = arith.constant 0 : index
    %421 = vector.load %arg23[%420, %c0_120, %c0_121] : memref<8x16x512xf32, #tpu.memory_space<vmem>>, vector<1x16x512xf32>
    %422 = vector.shape_cast %421 : vector<1x16x512xf32> to vector<16x512xf32>
    %423 = arith.truncf %414 : vector<16x128xf32> to vector<16x128xbf16>
    %cst_122 = arith.constant dense<0.000000e+00> : vector<16x512xf32>
    %424 = tpu.matmul %423, %309, %cst_122 {dimension_numbers = #tpu.dot_dimension_numbers<[1], [0], [0], [1], [0, 0, 1, 1], [], []>} : vector<16x128xbf16>, vector<128x512xbf16>, vector<16x512xf32> -> vector<16x512xf32>
    %425 = arith.addf %422, %424 : vector<16x512xf32>
    %426 = vector.extract_strided_slice %425 {offsets = [0, 0], sizes = [16, 128], strides = [1, 1]} : vector<16x512xf32> to vector<16x128xf32>
    %427 = arith.negf %426 : vector<16x128xf32>
    %428 = math.exp %427 : vector<16x128xf32>
    %cst_123 = arith.constant 1.000000e+00 : f32
    %429 = vector.broadcast %cst_123 : f32 to vector<16x128xf32>
    %430 = arith.addf %429, %428 : vector<16x128xf32>
    %431 = arith.divf %429, %430 : vector<16x128xf32>
    %432 = vector.extract_strided_slice %425 {offsets = [0, 128], sizes = [16, 128], strides = [1, 1]} : vector<16x512xf32> to vector<16x128xf32>
    %433 = arith.negf %432 : vector<16x128xf32>
    %434 = math.exp %433 : vector<16x128xf32>
    %cst_124 = arith.constant 1.000000e+00 : f32
    %435 = vector.broadcast %cst_124 : f32 to vector<16x128xf32>
    %436 = arith.addf %435, %434 : vector<16x128xf32>
    %437 = arith.divf %435, %436 : vector<16x128xf32>
    %438 = vector.extract_strided_slice %425 {offsets = [0, 256], sizes = [16, 128], strides = [1, 1]} : vector<16x512xf32> to vector<16x128xf32>
    %439 = math.tanh %438 : vector<16x128xf32>
    %440 = vector.extract_strided_slice %425 {offsets = [0, 384], sizes = [16, 128], strides = [1, 1]} : vector<16x512xf32> to vector<16x128xf32>
    %441 = arith.negf %440 : vector<16x128xf32>
    %442 = math.exp %441 : vector<16x128xf32>
    %cst_125 = arith.constant 1.000000e+00 : f32
    %443 = vector.broadcast %cst_125 : f32 to vector<16x128xf32>
    %444 = arith.addf %443, %442 : vector<16x128xf32>
    %445 = arith.divf %443, %444 : vector<16x128xf32>
    %446 = arith.mulf %437, %412 : vector<16x128xf32>
    %447 = arith.mulf %431, %439 : vector<16x128xf32>
    %448 = arith.addf %446, %447 : vector<16x128xf32>
    %449 = math.tanh %448 : vector<16x128xf32>
    %450 = arith.mulf %445, %449 : vector<16x128xf32>
    %451 = arith.truncf %450 : vector<16x128xf32> to vector<16x128xbf16>
    %452 = arith.index_cast %c3_i32_119 : i32 to index
    %c0_126 = arith.constant 0 : index
    %c0_127 = arith.constant 0 : index
    %453 = vector.load %arg22[%452, %c0_126, %c0_127] : memref<8x16x128xbf16, #tpu.memory_space<vmem>>, vector<1x16x128xbf16>
    %454 = vector.shape_cast %453 : vector<1x16x128xbf16> to vector<16x128xbf16>
    %455 = vector.shape_cast %451 : vector<16x128xbf16> to vector<1x16x128xbf16>
    tpu.vector_store %arg22[%452, %c0_126, %c0_127], %455 {strides = array<i32>} : memref<8x16x128xbf16, #tpu.memory_space<vmem>>, vector<1x16x128xbf16>,
    %c4_i32_128 = arith.constant 4 : i32
    %456 = arith.index_cast %c4_i32_128 : i32 to index
    %c0_129 = arith.constant 0 : index
    %c0_130 = arith.constant 0 : index
    %457 = vector.load %arg23[%456, %c0_129, %c0_130] : memref<8x16x512xf32, #tpu.memory_space<vmem>>, vector<1x16x512xf32>
    %458 = vector.shape_cast %457 : vector<1x16x512xf32> to vector<16x512xf32>
    %459 = arith.truncf %450 : vector<16x128xf32> to vector<16x128xbf16>
    %cst_131 = arith.constant dense<0.000000e+00> : vector<16x512xf32>
    %460 = tpu.matmul %459, %309, %cst_131 {dimension_numbers = #tpu.dot_dimension_numbers<[1], [0], [0], [1], [0, 0, 1, 1], [], []>} : vector<16x128xbf16>, vector<128x512xbf16>, vector<16x512xf32> -> vector<16x512xf32>
    %461 = arith.addf %458, %460 : vector<16x512xf32>
    %462 = vector.extract_strided_slice %461 {offsets = [0, 0], sizes = [16, 128], strides = [1, 1]} : vector<16x512xf32> to vector<16x128xf32>
    %463 = arith.negf %462 : vector<16x128xf32>
    %464 = math.exp %463 : vector<16x128xf32>
    %cst_132 = arith.constant 1.000000e+00 : f32
    %465 = vector.broadcast %cst_132 : f32 to vector<16x128xf32>
    %466 = arith.addf %465, %464 : vector<16x128xf32>
    %467 = arith.divf %465, %466 : vector<16x128xf32>
    %468 = vector.extract_strided_slice %461 {offsets = [0, 128], sizes = [16, 128], strides = [1, 1]} : vector<16x512xf32> to vector<16x128xf32>
    %469 = arith.negf %468 : vector<16x128xf32>
    %470 = math.exp %469 : vector<16x128xf32>
    %cst_133 = arith.constant 1.000000e+00 : f32
    %471 = vector.broadcast %cst_133 : f32 to vector<16x128xf32>
    %472 = arith.addf %471, %470 : vector<16x128xf32>
    %473 = arith.divf %471, %472 : vector<16x128xf32>
    %474 = vector.extract_strided_slice %461 {offsets = [0, 256], sizes = [16, 128], strides = [1, 1]} : vector<16x512xf32> to vector<16x128xf32>
    %475 = math.tanh %474 : vector<16x128xf32>
    %476 = vector.extract_strided_slice %461 {offsets = [0, 384], sizes = [16, 128], strides = [1, 1]} : vector<16x512xf32> to vector<16x128xf32>
    %477 = arith.negf %476 : vector<16x128xf32>
    %478 = math.exp %477 : vector<16x128xf32>
    %cst_134 = arith.constant 1.000000e+00 : f32
    %479 = vector.broadcast %cst_134 : f32 to vector<16x128xf32>
    %480 = arith.addf %479, %478 : vector<16x128xf32>
    %481 = arith.divf %479, %480 : vector<16x128xf32>
    %482 = arith.mulf %473, %448 : vector<16x128xf32>
    %483 = arith.mulf %467, %475 : vector<16x128xf32>
    %484 = arith.addf %482, %483 : vector<16x128xf32>
    %485 = math.tanh %484 : vector<16x128xf32>
    %486 = arith.mulf %481, %485 : vector<16x128xf32>
    %487 = arith.truncf %486 : vector<16x128xf32> to vector<16x128xbf16>
    %488 = arith.index_cast %c4_i32_128 : i32 to index
    %c0_135 = arith.constant 0 : index
    %c0_136 = arith.constant 0 : index
    %489 = vector.load %arg22[%488, %c0_135, %c0_136] : memref<8x16x128xbf16, #tpu.memory_space<vmem>>, vector<1x16x128xbf16>
    %490 = vector.shape_cast %489 : vector<1x16x128xbf16> to vector<16x128xbf16>
    %491 = vector.shape_cast %487 : vector<16x128xbf16> to vector<1x16x128xbf16>
    tpu.vector_store %arg22[%488, %c0_135, %c0_136], %491 {strides = array<i32>} : memref<8x16x128xbf16, #tpu.memory_space<vmem>>, vector<1x16x128xbf16>,
    %c5_i32_137 = arith.constant 5 : i32
    %492 = arith.index_cast %c5_i32_137 : i32 to index
    %c0_138 = arith.constant 0 : index
    %c0_139 = arith.constant 0 : index
    %493 = vector.load %arg23[%492, %c0_138, %c0_139] : memref<8x16x512xf32, #tpu.memory_space<vmem>>, vector<1x16x512xf32>
    %494 = vector.shape_cast %493 : vector<1x16x512xf32> to vector<16x512xf32>
    %495 = arith.truncf %486 : vector<16x128xf32> to vector<16x128xbf16>
    %cst_140 = arith.constant dense<0.000000e+00> : vector<16x512xf32>
    %496 = tpu.matmul %495, %309, %cst_140 {dimension_numbers = #tpu.dot_dimension_numbers<[1], [0], [0], [1], [0, 0, 1, 1], [], []>} : vector<16x128xbf16>, vector<128x512xbf16>, vector<16x512xf32> -> vector<16x512xf32>
    %497 = arith.addf %494, %496 : vector<16x512xf32>
    %498 = vector.extract_strided_slice %497 {offsets = [0, 0], sizes = [16, 128], strides = [1, 1]} : vector<16x512xf32> to vector<16x128xf32>
    %499 = arith.negf %498 : vector<16x128xf32>
    %500 = math.exp %499 : vector<16x128xf32>
    %cst_141 = arith.constant 1.000000e+00 : f32
    %501 = vector.broadcast %cst_141 : f32 to vector<16x128xf32>
    %502 = arith.addf %501, %500 : vector<16x128xf32>
    %503 = arith.divf %501, %502 : vector<16x128xf32>
    %504 = vector.extract_strided_slice %497 {offsets = [0, 128], sizes = [16, 128], strides = [1, 1]} : vector<16x512xf32> to vector<16x128xf32>
    %505 = arith.negf %504 : vector<16x128xf32>
    %506 = math.exp %505 : vector<16x128xf32>
    %cst_142 = arith.constant 1.000000e+00 : f32
    %507 = vector.broadcast %cst_142 : f32 to vector<16x128xf32>
    %508 = arith.addf %507, %506 : vector<16x128xf32>
    %509 = arith.divf %507, %508 : vector<16x128xf32>
    %510 = vector.extract_strided_slice %497 {offsets = [0, 256], sizes = [16, 128], strides = [1, 1]} : vector<16x512xf32> to vector<16x128xf32>
    %511 = math.tanh %510 : vector<16x128xf32>
    %512 = vector.extract_strided_slice %497 {offsets = [0, 384], sizes = [16, 128], strides = [1, 1]} : vector<16x512xf32> to vector<16x128xf32>
    %513 = arith.negf %512 : vector<16x128xf32>
    %514 = math.exp %513 : vector<16x128xf32>
    %cst_143 = arith.constant 1.000000e+00 : f32
    %515 = vector.broadcast %cst_143 : f32 to vector<16x128xf32>
    %516 = arith.addf %515, %514 : vector<16x128xf32>
    %517 = arith.divf %515, %516 : vector<16x128xf32>
    %518 = arith.mulf %509, %484 : vector<16x128xf32>
    %519 = arith.mulf %503, %511 : vector<16x128xf32>
    %520 = arith.addf %518, %519 : vector<16x128xf32>
    %521 = math.tanh %520 : vector<16x128xf32>
    %522 = arith.mulf %517, %521 : vector<16x128xf32>
    %523 = arith.truncf %522 : vector<16x128xf32> to vector<16x128xbf16>
    %524 = arith.index_cast %c5_i32_137 : i32 to index
    %c0_144 = arith.constant 0 : index
    %c0_145 = arith.constant 0 : index
    %525 = vector.load %arg22[%524, %c0_144, %c0_145] : memref<8x16x128xbf16, #tpu.memory_space<vmem>>, vector<1x16x128xbf16>
    %526 = vector.shape_cast %525 : vector<1x16x128xbf16> to vector<16x128xbf16>
    %527 = vector.shape_cast %523 : vector<16x128xbf16> to vector<1x16x128xbf16>
    tpu.vector_store %arg22[%524, %c0_144, %c0_145], %527 {strides = array<i32>} : memref<8x16x128xbf16, #tpu.memory_space<vmem>>, vector<1x16x128xbf16>,
    %c6_i32_146 = arith.constant 6 : i32
    %528 = arith.index_cast %c6_i32_146 : i32 to index
    %c0_147 = arith.constant 0 : index
    %c0_148 = arith.constant 0 : index
    %529 = vector.load %arg23[%528, %c0_147, %c0_148] : memref<8x16x512xf32, #tpu.memory_space<vmem>>, vector<1x16x512xf32>
    %530 = vector.shape_cast %529 : vector<1x16x512xf32> to vector<16x512xf32>
    %531 = arith.truncf %522 : vector<16x128xf32> to vector<16x128xbf16>
    %cst_149 = arith.constant dense<0.000000e+00> : vector<16x512xf32>
    %532 = tpu.matmul %531, %309, %cst_149 {dimension_numbers = #tpu.dot_dimension_numbers<[1], [0], [0], [1], [0, 0, 1, 1], [], []>} : vector<16x128xbf16>, vector<128x512xbf16>, vector<16x512xf32> -> vector<16x512xf32>
    %533 = arith.addf %530, %532 : vector<16x512xf32>
    %534 = vector.extract_strided_slice %533 {offsets = [0, 0], sizes = [16, 128], strides = [1, 1]} : vector<16x512xf32> to vector<16x128xf32>
    %535 = arith.negf %534 : vector<16x128xf32>
    %536 = math.exp %535 : vector<16x128xf32>
    %cst_150 = arith.constant 1.000000e+00 : f32
    %537 = vector.broadcast %cst_150 : f32 to vector<16x128xf32>
    %538 = arith.addf %537, %536 : vector<16x128xf32>
    %539 = arith.divf %537, %538 : vector<16x128xf32>
    %540 = vector.extract_strided_slice %533 {offsets = [0, 128], sizes = [16, 128], strides = [1, 1]} : vector<16x512xf32> to vector<16x128xf32>
    %541 = arith.negf %540 : vector<16x128xf32>
    %542 = math.exp %541 : vector<16x128xf32>
    %cst_151 = arith.constant 1.000000e+00 : f32
    %543 = vector.broadcast %cst_151 : f32 to vector<16x128xf32>
    %544 = arith.addf %543, %542 : vector<16x128xf32>
    %545 = arith.divf %543, %544 : vector<16x128xf32>
    %546 = vector.extract_strided_slice %533 {offsets = [0, 256], sizes = [16, 128], strides = [1, 1]} : vector<16x512xf32> to vector<16x128xf32>
    %547 = math.tanh %546 : vector<16x128xf32>
    %548 = vector.extract_strided_slice %533 {offsets = [0, 384], sizes = [16, 128], strides = [1, 1]} : vector<16x512xf32> to vector<16x128xf32>
    %549 = arith.negf %548 : vector<16x128xf32>
    %550 = math.exp %549 : vector<16x128xf32>
    %cst_152 = arith.constant 1.000000e+00 : f32
    %551 = vector.broadcast %cst_152 : f32 to vector<16x128xf32>
    %552 = arith.addf %551, %550 : vector<16x128xf32>
    %553 = arith.divf %551, %552 : vector<16x128xf32>
    %554 = arith.mulf %545, %520 : vector<16x128xf32>
    %555 = arith.mulf %539, %547 : vector<16x128xf32>
    %556 = arith.addf %554, %555 : vector<16x128xf32>
    %557 = math.tanh %556 : vector<16x128xf32>
    %558 = arith.mulf %553, %557 : vector<16x128xf32>
    %559 = arith.truncf %558 : vector<16x128xf32> to vector<16x128xbf16>
    %560 = arith.index_cast %c6_i32_146 : i32 to index
    %c0_153 = arith.constant 0 : index
    %c0_154 = arith.constant 0 : index
    %561 = vector.load %arg22[%560, %c0_153, %c0_154] : memref<8x16x128xbf16, #tpu.memory_space<vmem>>, vector<1x16x128xbf16>
    %562 = vector.shape_cast %561 : vector<1x16x128xbf16> to vector<16x128xbf16>
    %563 = vector.shape_cast %559 : vector<16x128xbf16> to vector<1x16x128xbf16>
    tpu.vector_store %arg22[%560, %c0_153, %c0_154], %563 {strides = array<i32>} : memref<8x16x128xbf16, #tpu.memory_space<vmem>>, vector<1x16x128xbf16>,
    %c7_i32_155 = arith.constant 7 : i32
    %564 = arith.index_cast %c7_i32_155 : i32 to index
    %c0_156 = arith.constant 0 : index
    %c0_157 = arith.constant 0 : index
    %565 = vector.load %arg23[%564, %c0_156, %c0_157] : memref<8x16x512xf32, #tpu.memory_space<vmem>>, vector<1x16x512xf32>
    %566 = vector.shape_cast %565 : vector<1x16x512xf32> to vector<16x512xf32>
    %567 = arith.truncf %558 : vector<16x128xf32> to vector<16x128xbf16>
    %cst_158 = arith.constant dense<0.000000e+00> : vector<16x512xf32>
    %568 = tpu.matmul %567, %309, %cst_158 {dimension_numbers = #tpu.dot_dimension_numbers<[1], [0], [0], [1], [0, 0, 1, 1], [], []>} : vector<16x128xbf16>, vector<128x512xbf16>, vector<16x512xf32> -> vector<16x512xf32>
    %569 = arith.addf %566, %568 : vector<16x512xf32>
    %570 = vector.extract_strided_slice %569 {offsets = [0, 0], sizes = [16, 128], strides = [1, 1]} : vector<16x512xf32> to vector<16x128xf32>
    %571 = arith.negf %570 : vector<16x128xf32>
    %572 = math.exp %571 : vector<16x128xf32>
    %cst_159 = arith.constant 1.000000e+00 : f32
    %573 = vector.broadcast %cst_159 : f32 to vector<16x128xf32>
    %574 = arith.addf %573, %572 : vector<16x128xf32>
    %575 = arith.divf %573, %574 : vector<16x128xf32>
    %576 = vector.extract_strided_slice %569 {offsets = [0, 128], sizes = [16, 128], strides = [1, 1]} : vector<16x512xf32> to vector<16x128xf32>
    %577 = arith.negf %576 : vector<16x128xf32>
    %578 = math.exp %577 : vector<16x128xf32>
    %cst_160 = arith.constant 1.000000e+00 : f32
    %579 = vector.broadcast %cst_160 : f32 to vector<16x128xf32>
    %580 = arith.addf %579, %578 : vector<16x128xf32>
    %581 = arith.divf %579, %580 : vector<16x128xf32>
    %582 = vector.extract_strided_slice %569 {offsets = [0, 256], sizes = [16, 128], strides = [1, 1]} : vector<16x512xf32> to vector<16x128xf32>
    %583 = math.tanh %582 : vector<16x128xf32>
    %584 = vector.extract_strided_slice %569 {offsets = [0, 384], sizes = [16, 128], strides = [1, 1]} : vector<16x512xf32> to vector<16x128xf32>
    %585 = arith.negf %584 : vector<16x128xf32>
    %586 = math.exp %585 : vector<16x128xf32>
    %cst_161 = arith.constant 1.000000e+00 : f32
    %587 = vector.broadcast %cst_161 : f32 to vector<16x128xf32>
    %588 = arith.addf %587, %586 : vector<16x128xf32>
    %589 = arith.divf %587, %588 : vector<16x128xf32>
    %590 = arith.mulf %581, %556 : vector<16x128xf32>
    %591 = arith.mulf %575, %583 : vector<16x128xf32>
    %592 = arith.addf %590, %591 : vector<16x128xf32>
    %593 = math.tanh %592 : vector<16x128xf32>
    %594 = arith.mulf %589, %593 : vector<16x128xf32>
    %595 = arith.truncf %594 : vector<16x128xf32> to vector<16x128xbf16>
    %596 = arith.index_cast %c7_i32_155 : i32 to index
    %c0_162 = arith.constant 0 : index
    %c0_163 = arith.constant 0 : index
    %597 = vector.load %arg22[%596, %c0_162, %c0_163] : memref<8x16x128xbf16, #tpu.memory_space<vmem>>, vector<1x16x128xbf16>
    %598 = vector.shape_cast %597 : vector<1x16x128xbf16> to vector<16x128xbf16>
    %599 = vector.shape_cast %595 : vector<16x128xbf16> to vector<1x16x128xbf16>
    tpu.vector_store %arg22[%596, %c0_162, %c0_163], %599 {strides = array<i32>} : memref<8x16x128xbf16, #tpu.memory_space<vmem>>, vector<1x16x128xbf16>,
    %c8_i32_164 = arith.constant 8 : i32
    %c0_165 = arith.constant 0 : index
    %c0_166 = arith.constant 0 : index
    %c0_167 = arith.constant 0 : index
    %600 = vector.load %arg22[%c0_165, %c0_166, %c0_167] : memref<8x16x128xbf16, #tpu.memory_space<vmem>>, vector<8x16x128xbf16>
    %601 = vector.shape_cast %600 : vector<8x16x128xbf16> to vector<128x128xbf16>
    %c0_168 = arith.constant 0 : index
    %c0_169 = arith.constant 0 : index
    %602 = vector.load %arg8[%c0_168, %c0_169] : memref<128x512xbf16, #tpu.memory_space<vmem>>, vector<128x512xbf16>
    %cst_170 = arith.constant dense<0.000000e+00> : vector<128x512xf32>
    %603 = tpu.matmul %601, %602, %cst_170 {dimension_numbers = #tpu.dot_dimension_numbers<[1], [0], [0], [1], [0, 0, 1, 1], [], []>} : vector<128x128xbf16>, vector<128x512xbf16>, vector<128x512xf32> -> vector<128x512xf32>
    %c0_171 = arith.constant 0 : index
    %c0_172 = arith.constant 0 : index
    %604 = vector.load %arg10[%c0_171, %c0_172] : memref<1x512xf32, #tpu.memory_space<vmem>>, vector<1x512xf32>
    %605 = vector.broadcast %604 : vector<1x512xf32> to vector<128x512xf32>
    %606 = arith.addf %603, %605 : vector<128x512xf32>
    %607 = vector.shape_cast %606 : vector<128x512xf32> to vector<8x16x512xf32>
    %c0_173 = arith.constant 0 : index
    %c0_174 = arith.constant 0 : index
    %c0_175 = arith.constant 0 : index
    %608 = vector.load %arg23[%c0_173, %c0_174, %c0_175] : memref<8x16x512xf32, #tpu.memory_space<vmem>>, vector<8x16x512xf32>
    tpu.vector_store %arg23[%c0_173, %c0_174, %c0_175], %607 {strides = array<i32>} : memref<8x16x512xf32, #tpu.memory_space<vmem>>, vector<8x16x512xf32>,
    %c0_176 = arith.constant 0 : index
    %c0_177 = arith.constant 0 : index
    %609 = vector.load %arg9[%c0_176, %c0_177] : memref<128x512xbf16, #tpu.memory_space<vmem>>, vector<128x512xbf16>
    %cst_178 = arith.constant 0.000000e+00 : f32
    %610 = vector.broadcast %cst_178 : f32 to vector<16x128xf32>
    %cst_179 = arith.constant 0.000000e+00 : f32
    %611 = vector.broadcast %cst_179 : f32 to vector<16x128xf32>
    %c0_i32_180 = arith.constant 0 : i32
    %612 = arith.index_cast %c0_i32_180 : i32 to index
    %c0_181 = arith.constant 0 : index
    %c0_182 = arith.constant 0 : index
    %613 = vector.load %arg23[%612, %c0_181, %c0_182] : memref<8x16x512xf32, #tpu.memory_space<vmem>>, vector<1x16x512xf32>
    %614 = vector.shape_cast %613 : vector<1x16x512xf32> to vector<16x512xf32>
    %615 = arith.truncf %610 : vector<16x128xf32> to vector<16x128xbf16>
    %cst_183 = arith.constant dense<0.000000e+00> : vector<16x512xf32>
    %616 = tpu.matmul %615, %609, %cst_183 {dimension_numbers = #tpu.dot_dimension_numbers<[1], [0], [0], [1], [0, 0, 1, 1], [], []>} : vector<16x128xbf16>, vector<128x512xbf16>, vector<16x512xf32> -> vector<16x512xf32>
    %617 = arith.addf %614, %616 : vector<16x512xf32>
    %618 = vector.extract_strided_slice %617 {offsets = [0, 0], sizes = [16, 128], strides = [1, 1]} : vector<16x512xf32> to vector<16x128xf32>
    %619 = arith.negf %618 : vector<16x128xf32>
    %620 = math.exp %619 : vector<16x128xf32>
    %cst_184 = arith.constant 1.000000e+00 : f32
    %621 = vector.broadcast %cst_184 : f32 to vector<16x128xf32>
    %622 = arith.addf %621, %620 : vector<16x128xf32>
    %623 = arith.divf %621, %622 : vector<16x128xf32>
    %624 = vector.extract_strided_slice %617 {offsets = [0, 128], sizes = [16, 128], strides = [1, 1]} : vector<16x512xf32> to vector<16x128xf32>
    %625 = arith.negf %624 : vector<16x128xf32>
    %626 = math.exp %625 : vector<16x128xf32>
    %cst_185 = arith.constant 1.000000e+00 : f32
    %627 = vector.broadcast %cst_185 : f32 to vector<16x128xf32>
    %628 = arith.addf %627, %626 : vector<16x128xf32>
    %629 = arith.divf %627, %628 : vector<16x128xf32>
    %630 = vector.extract_strided_slice %617 {offsets = [0, 256], sizes = [16, 128], strides = [1, 1]} : vector<16x512xf32> to vector<16x128xf32>
    %631 = math.tanh %630 : vector<16x128xf32>
    %632 = vector.extract_strided_slice %617 {offsets = [0, 384], sizes = [16, 128], strides = [1, 1]} : vector<16x512xf32> to vector<16x128xf32>
    %633 = arith.negf %632 : vector<16x128xf32>
    %634 = math.exp %633 : vector<16x128xf32>
    %cst_186 = arith.constant 1.000000e+00 : f32
    %635 = vector.broadcast %cst_186 : f32 to vector<16x128xf32>
    %636 = arith.addf %635, %634 : vector<16x128xf32>
    %637 = arith.divf %635, %636 : vector<16x128xf32>
    %638 = arith.mulf %629, %611 : vector<16x128xf32>
    %639 = arith.mulf %623, %631 : vector<16x128xf32>
    %640 = arith.addf %638, %639 : vector<16x128xf32>
    %641 = math.tanh %640 : vector<16x128xf32>
    %642 = arith.mulf %637, %641 : vector<16x128xf32>
    %c1_i32_187 = arith.constant 1 : i32
    %643 = arith.index_cast %c1_i32_187 : i32 to index
    %c0_188 = arith.constant 0 : index
    %c0_189 = arith.constant 0 : index
    %644 = vector.load %arg23[%643, %c0_188, %c0_189] : memref<8x16x512xf32, #tpu.memory_space<vmem>>, vector<1x16x512xf32>
    %645 = vector.shape_cast %644 : vector<1x16x512xf32> to vector<16x512xf32>
    %646 = arith.truncf %642 : vector<16x128xf32> to vector<16x128xbf16>
    %cst_190 = arith.constant dense<0.000000e+00> : vector<16x512xf32>
    %647 = tpu.matmul %646, %609, %cst_190 {dimension_numbers = #tpu.dot_dimension_numbers<[1], [0], [0], [1], [0, 0, 1, 1], [], []>} : vector<16x128xbf16>, vector<128x512xbf16>, vector<16x512xf32> -> vector<16x512xf32>
    %648 = arith.addf %645, %647 : vector<16x512xf32>
    %649 = vector.extract_strided_slice %648 {offsets = [0, 0], sizes = [16, 128], strides = [1, 1]} : vector<16x512xf32> to vector<16x128xf32>
    %650 = arith.negf %649 : vector<16x128xf32>
    %651 = math.exp %650 : vector<16x128xf32>
    %cst_191 = arith.constant 1.000000e+00 : f32
    %652 = vector.broadcast %cst_191 : f32 to vector<16x128xf32>
    %653 = arith.addf %652, %651 : vector<16x128xf32>
    %654 = arith.divf %652, %653 : vector<16x128xf32>
    %655 = vector.extract_strided_slice %648 {offsets = [0, 128], sizes = [16, 128], strides = [1, 1]} : vector<16x512xf32> to vector<16x128xf32>
    %656 = arith.negf %655 : vector<16x128xf32>
    %657 = math.exp %656 : vector<16x128xf32>
    %cst_192 = arith.constant 1.000000e+00 : f32
    %658 = vector.broadcast %cst_192 : f32 to vector<16x128xf32>
    %659 = arith.addf %658, %657 : vector<16x128xf32>
    %660 = arith.divf %658, %659 : vector<16x128xf32>
    %661 = vector.extract_strided_slice %648 {offsets = [0, 256], sizes = [16, 128], strides = [1, 1]} : vector<16x512xf32> to vector<16x128xf32>
    %662 = math.tanh %661 : vector<16x128xf32>
    %663 = vector.extract_strided_slice %648 {offsets = [0, 384], sizes = [16, 128], strides = [1, 1]} : vector<16x512xf32> to vector<16x128xf32>
    %664 = arith.negf %663 : vector<16x128xf32>
    %665 = math.exp %664 : vector<16x128xf32>
    %cst_193 = arith.constant 1.000000e+00 : f32
    %666 = vector.broadcast %cst_193 : f32 to vector<16x128xf32>
    %667 = arith.addf %666, %665 : vector<16x128xf32>
    %668 = arith.divf %666, %667 : vector<16x128xf32>
    %669 = arith.mulf %660, %640 : vector<16x128xf32>
    %670 = arith.mulf %654, %662 : vector<16x128xf32>
    %671 = arith.addf %669, %670 : vector<16x128xf32>
    %672 = math.tanh %671 : vector<16x128xf32>
    %673 = arith.mulf %668, %672 : vector<16x128xf32>
    %c2_i32_194 = arith.constant 2 : i32
    %674 = arith.index_cast %c2_i32_194 : i32 to index
    %c0_195 = arith.constant 0 : index
    %c0_196 = arith.constant 0 : index
    %675 = vector.load %arg23[%674, %c0_195, %c0_196] : memref<8x16x512xf32, #tpu.memory_space<vmem>>, vector<1x16x512xf32>
    %676 = vector.shape_cast %675 : vector<1x16x512xf32> to vector<16x512xf32>
    %677 = arith.truncf %673 : vector<16x128xf32> to vector<16x128xbf16>
    %cst_197 = arith.constant dense<0.000000e+00> : vector<16x512xf32>
    %678 = tpu.matmul %677, %609, %cst_197 {dimension_numbers = #tpu.dot_dimension_numbers<[1], [0], [0], [1], [0, 0, 1, 1], [], []>} : vector<16x128xbf16>, vector<128x512xbf16>, vector<16x512xf32> -> vector<16x512xf32>
    %679 = arith.addf %676, %678 : vector<16x512xf32>
    %680 = vector.extract_strided_slice %679 {offsets = [0, 0], sizes = [16, 128], strides = [1, 1]} : vector<16x512xf32> to vector<16x128xf32>
    %681 = arith.negf %680 : vector<16x128xf32>
    %682 = math.exp %681 : vector<16x128xf32>
    %cst_198 = arith.constant 1.000000e+00 : f32
    %683 = vector.broadcast %cst_198 : f32 to vector<16x128xf32>
    %684 = arith.addf %683, %682 : vector<16x128xf32>
    %685 = arith.divf %683, %684 : vector<16x128xf32>
    %686 = vector.extract_strided_slice %679 {offsets = [0, 128], sizes = [16, 128], strides = [1, 1]} : vector<16x512xf32> to vector<16x128xf32>
    %687 = arith.negf %686 : vector<16x128xf32>
    %688 = math.exp %687 : vector<16x128xf32>
    %cst_199 = arith.constant 1.000000e+00 : f32
    %689 = vector.broadcast %cst_199 : f32 to vector<16x128xf32>
    %690 = arith.addf %689, %688 : vector<16x128xf32>
    %691 = arith.divf %689, %690 : vector<16x128xf32>
    %692 = vector.extract_strided_slice %679 {offsets = [0, 256], sizes = [16, 128], strides = [1, 1]} : vector<16x512xf32> to vector<16x128xf32>
    %693 = math.tanh %692 : vector<16x128xf32>
    %694 = vector.extract_strided_slice %679 {offsets = [0, 384], sizes = [16, 128], strides = [1, 1]} : vector<16x512xf32> to vector<16x128xf32>
    %695 = arith.negf %694 : vector<16x128xf32>
    %696 = math.exp %695 : vector<16x128xf32>
    %cst_200 = arith.constant 1.000000e+00 : f32
    %697 = vector.broadcast %cst_200 : f32 to vector<16x128xf32>
    %698 = arith.addf %697, %696 : vector<16x128xf32>
    %699 = arith.divf %697, %698 : vector<16x128xf32>
    %700 = arith.mulf %691, %671 : vector<16x128xf32>
    %701 = arith.mulf %685, %693 : vector<16x128xf32>
    %702 = arith.addf %700, %701 : vector<16x128xf32>
    %703 = math.tanh %702 : vector<16x128xf32>
    %704 = arith.mulf %699, %703 : vector<16x128xf32>
    %c3_i32_201 = arith.constant 3 : i32
    %705 = arith.index_cast %c3_i32_201 : i32 to index
    %c0_202 = arith.constant 0 : index
    %c0_203 = arith.constant 0 : index
    %706 = vector.load %arg23[%705, %c0_202, %c0_203] : memref<8x16x512xf32, #tpu.memory_space<vmem>>, vector<1x16x512xf32>
    %707 = vector.shape_cast %706 : vector<1x16x512xf32> to vector<16x512xf32>
    %708 = arith.truncf %704 : vector<16x128xf32> to vector<16x128xbf16>
    %cst_204 = arith.constant dense<0.000000e+00> : vector<16x512xf32>
    %709 = tpu.matmul %708, %609, %cst_204 {dimension_numbers = #tpu.dot_dimension_numbers<[1], [0], [0], [1], [0, 0, 1, 1], [], []>} : vector<16x128xbf16>, vector<128x512xbf16>, vector<16x512xf32> -> vector<16x512xf32>
    %710 = arith.addf %707, %709 : vector<16x512xf32>
    %711 = vector.extract_strided_slice %710 {offsets = [0, 0], sizes = [16, 128], strides = [1, 1]} : vector<16x512xf32> to vector<16x128xf32>
    %712 = arith.negf %711 : vector<16x128xf32>
    %713 = math.exp %712 : vector<16x128xf32>
    %cst_205 = arith.constant 1.000000e+00 : f32
    %714 = vector.broadcast %cst_205 : f32 to vector<16x128xf32>
    %715 = arith.addf %714, %713 : vector<16x128xf32>
    %716 = arith.divf %714, %715 : vector<16x128xf32>
    %717 = vector.extract_strided_slice %710 {offsets = [0, 128], sizes = [16, 128], strides = [1, 1]} : vector<16x512xf32> to vector<16x128xf32>
    %718 = arith.negf %717 : vector<16x128xf32>
    %719 = math.exp %718 : vector<16x128xf32>
    %cst_206 = arith.constant 1.000000e+00 : f32
    %720 = vector.broadcast %cst_206 : f32 to vector<16x128xf32>
    %721 = arith.addf %720, %719 : vector<16x128xf32>
    %722 = arith.divf %720, %721 : vector<16x128xf32>
    %723 = vector.extract_strided_slice %710 {offsets = [0, 256], sizes = [16, 128], strides = [1, 1]} : vector<16x512xf32> to vector<16x128xf32>
    %724 = math.tanh %723 : vector<16x128xf32>
    %725 = vector.extract_strided_slice %710 {offsets = [0, 384], sizes = [16, 128], strides = [1, 1]} : vector<16x512xf32> to vector<16x128xf32>
    %726 = arith.negf %725 : vector<16x128xf32>
    %727 = math.exp %726 : vector<16x128xf32>
    %cst_207 = arith.constant 1.000000e+00 : f32
    %728 = vector.broadcast %cst_207 : f32 to vector<16x128xf32>
    %729 = arith.addf %728, %727 : vector<16x128xf32>
    %730 = arith.divf %728, %729 : vector<16x128xf32>
    %731 = arith.mulf %722, %702 : vector<16x128xf32>
    %732 = arith.mulf %716, %724 : vector<16x128xf32>
    %733 = arith.addf %731, %732 : vector<16x128xf32>
    %734 = math.tanh %733 : vector<16x128xf32>
    %735 = arith.mulf %730, %734 : vector<16x128xf32>
    %c4_i32_208 = arith.constant 4 : i32
    %736 = arith.index_cast %c4_i32_208 : i32 to index
    %c0_209 = arith.constant 0 : index
    %c0_210 = arith.constant 0 : index
    %737 = vector.load %arg23[%736, %c0_209, %c0_210] : memref<8x16x512xf32, #tpu.memory_space<vmem>>, vector<1x16x512xf32>
    %738 = vector.shape_cast %737 : vector<1x16x512xf32> to vector<16x512xf32>
    %739 = arith.truncf %735 : vector<16x128xf32> to vector<16x128xbf16>
    %cst_211 = arith.constant dense<0.000000e+00> : vector<16x512xf32>
    %740 = tpu.matmul %739, %609, %cst_211 {dimension_numbers = #tpu.dot_dimension_numbers<[1], [0], [0], [1], [0, 0, 1, 1], [], []>} : vector<16x128xbf16>, vector<128x512xbf16>, vector<16x512xf32> -> vector<16x512xf32>
    %741 = arith.addf %738, %740 : vector<16x512xf32>
    %742 = vector.extract_strided_slice %741 {offsets = [0, 0], sizes = [16, 128], strides = [1, 1]} : vector<16x512xf32> to vector<16x128xf32>
    %743 = arith.negf %742 : vector<16x128xf32>
    %744 = math.exp %743 : vector<16x128xf32>
    %cst_212 = arith.constant 1.000000e+00 : f32
    %745 = vector.broadcast %cst_212 : f32 to vector<16x128xf32>
    %746 = arith.addf %745, %744 : vector<16x128xf32>
    %747 = arith.divf %745, %746 : vector<16x128xf32>
    %748 = vector.extract_strided_slice %741 {offsets = [0, 128], sizes = [16, 128], strides = [1, 1]} : vector<16x512xf32> to vector<16x128xf32>
    %749 = arith.negf %748 : vector<16x128xf32>
    %750 = math.exp %749 : vector<16x128xf32>
    %cst_213 = arith.constant 1.000000e+00 : f32
    %751 = vector.broadcast %cst_213 : f32 to vector<16x128xf32>
    %752 = arith.addf %751, %750 : vector<16x128xf32>
    %753 = arith.divf %751, %752 : vector<16x128xf32>
    %754 = vector.extract_strided_slice %741 {offsets = [0, 256], sizes = [16, 128], strides = [1, 1]} : vector<16x512xf32> to vector<16x128xf32>
    %755 = math.tanh %754 : vector<16x128xf32>
    %756 = vector.extract_strided_slice %741 {offsets = [0, 384], sizes = [16, 128], strides = [1, 1]} : vector<16x512xf32> to vector<16x128xf32>
    %757 = arith.negf %756 : vector<16x128xf32>
    %758 = math.exp %757 : vector<16x128xf32>
    %cst_214 = arith.constant 1.000000e+00 : f32
    %759 = vector.broadcast %cst_214 : f32 to vector<16x128xf32>
    %760 = arith.addf %759, %758 : vector<16x128xf32>
    %761 = arith.divf %759, %760 : vector<16x128xf32>
    %762 = arith.mulf %753, %733 : vector<16x128xf32>
    %763 = arith.mulf %747, %755 : vector<16x128xf32>
    %764 = arith.addf %762, %763 : vector<16x128xf32>
    %765 = math.tanh %764 : vector<16x128xf32>
    %766 = arith.mulf %761, %765 : vector<16x128xf32>
    %c5_i32_215 = arith.constant 5 : i32
    %767 = arith.index_cast %c5_i32_215 : i32 to index
    %c0_216 = arith.constant 0 : index
    %c0_217 = arith.constant 0 : index
    %768 = vector.load %arg23[%767, %c0_216, %c0_217] : memref<8x16x512xf32, #tpu.memory_space<vmem>>, vector<1x16x512xf32>
    %769 = vector.shape_cast %768 : vector<1x16x512xf32> to vector<16x512xf32>
    %770 = arith.truncf %766 : vector<16x128xf32> to vector<16x128xbf16>
    %cst_218 = arith.constant dense<0.000000e+00> : vector<16x512xf32>
    %771 = tpu.matmul %770, %609, %cst_218 {dimension_numbers = #tpu.dot_dimension_numbers<[1], [0], [0], [1], [0, 0, 1, 1], [], []>} : vector<16x128xbf16>, vector<128x512xbf16>, vector<16x512xf32> -> vector<16x512xf32>
    %772 = arith.addf %769, %771 : vector<16x512xf32>
    %773 = vector.extract_strided_slice %772 {offsets = [0, 0], sizes = [16, 128], strides = [1, 1]} : vector<16x512xf32> to vector<16x128xf32>
    %774 = arith.negf %773 : vector<16x128xf32>
    %775 = math.exp %774 : vector<16x128xf32>
    %cst_219 = arith.constant 1.000000e+00 : f32
    %776 = vector.broadcast %cst_219 : f32 to vector<16x128xf32>
    %777 = arith.addf %776, %775 : vector<16x128xf32>
    %778 = arith.divf %776, %777 : vector<16x128xf32>
    %779 = vector.extract_strided_slice %772 {offsets = [0, 128], sizes = [16, 128], strides = [1, 1]} : vector<16x512xf32> to vector<16x128xf32>
    %780 = arith.negf %779 : vector<16x128xf32>
    %781 = math.exp %780 : vector<16x128xf32>
    %cst_220 = arith.constant 1.000000e+00 : f32
    %782 = vector.broadcast %cst_220 : f32 to vector<16x128xf32>
    %783 = arith.addf %782, %781 : vector<16x128xf32>
    %784 = arith.divf %782, %783 : vector<16x128xf32>
    %785 = vector.extract_strided_slice %772 {offsets = [0, 256], sizes = [16, 128], strides = [1, 1]} : vector<16x512xf32> to vector<16x128xf32>
    %786 = math.tanh %785 : vector<16x128xf32>
    %787 = vector.extract_strided_slice %772 {offsets = [0, 384], sizes = [16, 128], strides = [1, 1]} : vector<16x512xf32> to vector<16x128xf32>
    %788 = arith.negf %787 : vector<16x128xf32>
    %789 = math.exp %788 : vector<16x128xf32>
    %cst_221 = arith.constant 1.000000e+00 : f32
    %790 = vector.broadcast %cst_221 : f32 to vector<16x128xf32>
    %791 = arith.addf %790, %789 : vector<16x128xf32>
    %792 = arith.divf %790, %791 : vector<16x128xf32>
    %793 = arith.mulf %784, %764 : vector<16x128xf32>
    %794 = arith.mulf %778, %786 : vector<16x128xf32>
    %795 = arith.addf %793, %794 : vector<16x128xf32>
    %796 = math.tanh %795 : vector<16x128xf32>
    %797 = arith.mulf %792, %796 : vector<16x128xf32>
    %c6_i32_222 = arith.constant 6 : i32
    %798 = arith.index_cast %c6_i32_222 : i32 to index
    %c0_223 = arith.constant 0 : index
    %c0_224 = arith.constant 0 : index
    %799 = vector.load %arg23[%798, %c0_223, %c0_224] : memref<8x16x512xf32, #tpu.memory_space<vmem>>, vector<1x16x512xf32>
    %800 = vector.shape_cast %799 : vector<1x16x512xf32> to vector<16x512xf32>
    %801 = arith.truncf %797 : vector<16x128xf32> to vector<16x128xbf16>
    %cst_225 = arith.constant dense<0.000000e+00> : vector<16x512xf32>
    %802 = tpu.matmul %801, %609, %cst_225 {dimension_numbers = #tpu.dot_dimension_numbers<[1], [0], [0], [1], [0, 0, 1, 1], [], []>} : vector<16x128xbf16>, vector<128x512xbf16>, vector<16x512xf32> -> vector<16x512xf32>
    %803 = arith.addf %800, %802 : vector<16x512xf32>
    %804 = vector.extract_strided_slice %803 {offsets = [0, 0], sizes = [16, 128], strides = [1, 1]} : vector<16x512xf32> to vector<16x128xf32>
    %805 = arith.negf %804 : vector<16x128xf32>
    %806 = math.exp %805 : vector<16x128xf32>
    %cst_226 = arith.constant 1.000000e+00 : f32
    %807 = vector.broadcast %cst_226 : f32 to vector<16x128xf32>
    %808 = arith.addf %807, %806 : vector<16x128xf32>
    %809 = arith.divf %807, %808 : vector<16x128xf32>
    %810 = vector.extract_strided_slice %803 {offsets = [0, 128], sizes = [16, 128], strides = [1, 1]} : vector<16x512xf32> to vector<16x128xf32>
    %811 = arith.negf %810 : vector<16x128xf32>
    %812 = math.exp %811 : vector<16x128xf32>
    %cst_227 = arith.constant 1.000000e+00 : f32
    %813 = vector.broadcast %cst_227 : f32 to vector<16x128xf32>
    %814 = arith.addf %813, %812 : vector<16x128xf32>
    %815 = arith.divf %813, %814 : vector<16x128xf32>
    %816 = vector.extract_strided_slice %803 {offsets = [0, 256], sizes = [16, 128], strides = [1, 1]} : vector<16x512xf32> to vector<16x128xf32>
    %817 = math.tanh %816 : vector<16x128xf32>
    %818 = vector.extract_strided_slice %803 {offsets = [0, 384], sizes = [16, 128], strides = [1, 1]} : vector<16x512xf32> to vector<16x128xf32>
    %819 = arith.negf %818 : vector<16x128xf32>
    %820 = math.exp %819 : vector<16x128xf32>
    %cst_228 = arith.constant 1.000000e+00 : f32
    %821 = vector.broadcast %cst_228 : f32 to vector<16x128xf32>
    %822 = arith.addf %821, %820 : vector<16x128xf32>
    %823 = arith.divf %821, %822 : vector<16x128xf32>
    %824 = arith.mulf %815, %795 : vector<16x128xf32>
    %825 = arith.mulf %809, %817 : vector<16x128xf32>
    %826 = arith.addf %824, %825 : vector<16x128xf32>
    %827 = math.tanh %826 : vector<16x128xf32>
    %828 = arith.mulf %823, %827 : vector<16x128xf32>
    %c7_i32_229 = arith.constant 7 : i32
    %829 = arith.index_cast %c7_i32_229 : i32 to index
    %c0_230 = arith.constant 0 : index
    %c0_231 = arith.constant 0 : index
    %830 = vector.load %arg23[%829, %c0_230, %c0_231] : memref<8x16x512xf32, #tpu.memory_space<vmem>>, vector<1x16x512xf32>
    %831 = vector.shape_cast %830 : vector<1x16x512xf32> to vector<16x512xf32>
    %832 = arith.truncf %828 : vector<16x128xf32> to vector<16x128xbf16>
    %cst_232 = arith.constant dense<0.000000e+00> : vector<16x512xf32>
    %833 = tpu.matmul %832, %609, %cst_232 {dimension_numbers = #tpu.dot_dimension_numbers<[1], [0], [0], [1], [0, 0, 1, 1], [], []>} : vector<16x128xbf16>, vector<128x512xbf16>, vector<16x512xf32> -> vector<16x512xf32>
    %834 = arith.addf %831, %833 : vector<16x512xf32>
    %835 = vector.extract_strided_slice %834 {offsets = [0, 0], sizes = [16, 128], strides = [1, 1]} : vector<16x512xf32> to vector<16x128xf32>
    %836 = arith.negf %835 : vector<16x128xf32>
    %837 = math.exp %836 : vector<16x128xf32>
    %cst_233 = arith.constant 1.000000e+00 : f32
    %838 = vector.broadcast %cst_233 : f32 to vector<16x128xf32>
    %839 = arith.addf %838, %837 : vector<16x128xf32>
    %840 = arith.divf %838, %839 : vector<16x128xf32>
    %841 = vector.extract_strided_slice %834 {offsets = [0, 128], sizes = [16, 128], strides = [1, 1]} : vector<16x512xf32> to vector<16x128xf32>
    %842 = arith.negf %841 : vector<16x128xf32>
    %843 = math.exp %842 : vector<16x128xf32>
    %cst_234 = arith.constant 1.000000e+00 : f32
    %844 = vector.broadcast %cst_234 : f32 to vector<16x128xf32>
    %845 = arith.addf %844, %843 : vector<16x128xf32>
    %846 = arith.divf %844, %845 : vector<16x128xf32>
    %847 = vector.extract_strided_slice %834 {offsets = [0, 256], sizes = [16, 128], strides = [1, 1]} : vector<16x512xf32> to vector<16x128xf32>
    %848 = math.tanh %847 : vector<16x128xf32>
    %849 = vector.extract_strided_slice %834 {offsets = [0, 384], sizes = [16, 128], strides = [1, 1]} : vector<16x512xf32> to vector<16x128xf32>
    %850 = arith.negf %849 : vector<16x128xf32>
    %851 = math.exp %850 : vector<16x128xf32>
    %cst_235 = arith.constant 1.000000e+00 : f32
    %852 = vector.broadcast %cst_235 : f32 to vector<16x128xf32>
    %853 = arith.addf %852, %851 : vector<16x128xf32>
    %854 = arith.divf %852, %853 : vector<16x128xf32>
    %855 = arith.mulf %846, %826 : vector<16x128xf32>
    %856 = arith.mulf %840, %848 : vector<16x128xf32>
    %857 = arith.addf %855, %856 : vector<16x128xf32>
    %858 = math.tanh %857 : vector<16x128xf32>
    %859 = arith.mulf %854, %858 : vector<16x128xf32>
    %c8_i32_236 = arith.constant 8 : i32
    %c0_237 = arith.constant 0 : index
    %c0_238 = arith.constant 0 : index
    %860 = vector.load %arg13[%c0_237, %c0_238] : memref<1x128xf32, #tpu.memory_space<vmem>>, vector<1x128xf32>
    %861 = vector.broadcast %860 : vector<1x128xf32> to vector<16x128xf32>
    %862 = arith.subf %859, %861 : vector<16x128xf32>
    %c0_239 = arith.constant 0 : index
    %c0_240 = arith.constant 0 : index
    %863 = vector.load %arg14[%c0_239, %c0_240] : memref<1x128xf32, #tpu.memory_space<vmem>>, vector<1x128xf32>
    %cst_241 = arith.constant 9.99999974E-6 : f32
    %864 = vector.broadcast %cst_241 : f32 to vector<1x128xf32>
    %865 = arith.addf %863, %864 : vector<1x128xf32>
    %866 = math.rsqrt %865 : vector<1x128xf32>
    %867 = vector.broadcast %866 : vector<1x128xf32> to vector<16x128xf32>
    %868 = arith.mulf %862, %867 : vector<16x128xf32>
    %c0_242 = arith.constant 0 : index
    %c0_243 = arith.constant 0 : index
    %869 = vector.load %arg11[%c0_242, %c0_243] : memref<1x128xf32, #tpu.memory_space<vmem>>, vector<1x128xf32>
    %870 = vector.broadcast %869 : vector<1x128xf32> to vector<16x128xf32>
    %871 = arith.mulf %868, %870 : vector<16x128xf32>
    %c0_244 = arith.constant 0 : index
    %c0_245 = arith.constant 0 : index
    %872 = vector.load %arg12[%c0_244, %c0_245] : memref<1x128xf32, #tpu.memory_space<vmem>>, vector<1x128xf32>
    %873 = vector.broadcast %872 : vector<1x128xf32> to vector<16x128xf32>
    %874 = arith.addf %871, %873 : vector<16x128xf32>
    %875 = arith.truncf %874 : vector<16x128xf32> to vector<16x128xbf16>
    %c0_246 = arith.constant 0 : index
    %c0_247 = arith.constant 0 : index
    %876 = vector.load %arg15[%c0_246, %c0_247] : memref<128x128xbf16, #tpu.memory_space<vmem>>, vector<128x128xbf16>
    %cst_248 = arith.constant dense<0.000000e+00> : vector<16x128xf32>
    %877 = tpu.matmul %875, %876, %cst_248 {dimension_numbers = #tpu.dot_dimension_numbers<[1], [0], [0], [1], [0, 0, 1, 1], [], []>} : vector<16x128xbf16>, vector<128x128xbf16>, vector<16x128xf32> -> vector<16x128xf32>
    %c0_249 = arith.constant 0 : index
    %c0_250 = arith.constant 0 : index
    %878 = vector.load %arg16[%c0_249, %c0_250] : memref<1x128xf32, #tpu.memory_space<vmem>>, vector<1x128xf32>
    %879 = vector.broadcast %878 : vector<1x128xf32> to vector<16x128xf32>
    %880 = arith.addf %877, %879 : vector<16x128xf32>
    %cst_251 = arith.constant 0.000000e+00 : f32
    %881 = vector.broadcast %cst_251 : f32 to vector<16x128xf32>
    %882 = arith.maximumf %880, %881 : vector<16x128xf32>
    %883 = arith.truncf %882 : vector<16x128xf32> to vector<16x128xbf16>
    %c0_252 = arith.constant 0 : index
    %c0_253 = arith.constant 0 : index
    %884 = vector.load %arg17[%c0_252, %c0_253] : memref<128x128xbf16, #tpu.memory_space<vmem>>, vector<128x128xbf16>
    %cst_254 = arith.constant dense<0.000000e+00> : vector<16x128xf32>
    %885 = tpu.matmul %883, %884, %cst_254 {dimension_numbers = #tpu.dot_dimension_numbers<[1], [0], [0], [1], [0, 0, 1, 1], [], []>} : vector<16x128xbf16>, vector<128x128xbf16>, vector<16x128xf32> -> vector<16x128xf32>
    %c0_255 = arith.constant 0 : index
    %c0_256 = arith.constant 0 : index
    %886 = vector.load %arg18[%c0_255, %c0_256] : memref<1x128xf32, #tpu.memory_space<vmem>>, vector<1x128xf32>
    %887 = vector.broadcast %886 : vector<1x128xf32> to vector<16x128xf32>
    %888 = arith.addf %885, %887 : vector<16x128xf32>
    %cst_257 = arith.constant 0.000000e+00 : f32
    %889 = vector.broadcast %cst_257 : f32 to vector<16x128xf32>
    %890 = arith.maximumf %888, %889 : vector<16x128xf32>
    %891 = arith.truncf %890 : vector<16x128xf32> to vector<16x128xbf16>
    %c0_258 = arith.constant 0 : index
    %c0_259 = arith.constant 0 : index
    %892 = vector.load %arg19[%c0_258, %c0_259] : memref<128x128xbf16, #tpu.memory_space<vmem>>, vector<128x128xbf16>
    %cst_260 = arith.constant dense<0.000000e+00> : vector<16x128xf32>
    %893 = tpu.matmul %891, %892, %cst_260 {dimension_numbers = #tpu.dot_dimension_numbers<[1], [0], [0], [1], [0, 0, 1, 1], [], []>} : vector<16x128xbf16>, vector<128x128xbf16>, vector<16x128xf32> -> vector<16x128xf32>
    %c0_261 = arith.constant 0 : index
    %c0_262 = arith.constant 0 : index
    %894 = vector.load %arg20[%c0_261, %c0_262] : memref<1x128xf32, #tpu.memory_space<vmem>>, vector<1x128xf32>
    %895 = vector.broadcast %894 : vector<1x128xf32> to vector<16x128xf32>
    %896 = arith.addf %893, %895 : vector<16x128xf32>
    %c0_263 = arith.constant 0 : index
    %c0_264 = arith.constant 0 : index
    %897 = vector.load %arg21[%c0_263, %c0_264] : memref<16x128xf32, #tpu.memory_space<vmem>>, vector<16x128xf32>
    tpu.vector_store %arg21[%c0_263, %c0_264], %896 {strides = array<i32>} : memref<16x128xf32, #tpu.memory_space<vmem>>, vector<16x128xf32>,
    return
  }
  func.func @transform_0(%arg0: i32) -> (i32, i32, i32) {
    %c0_i32 = arith.constant 0 : i32
    %c0_i32_0 = arith.constant 0 : i32
    %c0_i32_1 = arith.constant 0 : i32
    return %c0_i32, %arg0, %c0_i32_0 : i32, i32, i32
  }
  func.func @transform_1(%arg0: i32) -> (i32, i32) {
    %c0_i32 = arith.constant 0 : i32
    %c0_i32_0 = arith.constant 0 : i32
    %c0_i32_1 = arith.constant 0 : i32
    return %c0_i32, %c0_i32_0 : i32, i32
  }
  func.func @transform_2(%arg0: i32) -> (i32, i32) {
    %c0_i32 = arith.constant 0 : i32
    %c0_i32_0 = arith.constant 0 : i32
    %c0_i32_1 = arith.constant 0 : i32
    return %c0_i32, %c0_i32_0 : i32, i32
  }
  func.func @transform_3(%arg0: i32) -> (i32, i32) {
    %c0_i32 = arith.constant 0 : i32
    %c0_i32_0 = arith.constant 0 : i32
    %c0_i32_1 = arith.constant 0 : i32
    return %c0_i32, %c0_i32_0 : i32, i32
  }
  func.func @transform_4(%arg0: i32) -> (i32, i32) {
    %c0_i32 = arith.constant 0 : i32
    %c0_i32_0 = arith.constant 0 : i32
    %c0_i32_1 = arith.constant 0 : i32
    return %c0_i32, %c0_i32_0 : i32, i32
  }
  func.func @transform_5(%arg0: i32) -> (i32, i32) {
    %c0_i32 = arith.constant 0 : i32
    %c0_i32_0 = arith.constant 0 : i32
    %c0_i32_1 = arith.constant 0 : i32
    return %c0_i32, %c0_i32_0 : i32, i32
  }
  func.func @transform_6(%arg0: i32) -> (i32, i32) {
    %c0_i32 = arith.constant 0 : i32
    %c0_i32_0 = arith.constant 0 : i32
    %c0_i32_1 = arith.constant 0 : i32
    return %c0_i32, %c0_i32_0 : i32, i32
  }
  func.func @transform_7(%arg0: i32) -> (i32, i32) {
    %c0_i32 = arith.constant 0 : i32
    %c0_i32_0 = arith.constant 0 : i32
    %c0_i32_1 = arith.constant 0 : i32
    return %c0_i32, %c0_i32_0 : i32, i32
  }
  func.func @transform_8(%arg0: i32) -> (i32, i32) {
    %c0_i32 = arith.constant 0 : i32
    %c0_i32_0 = arith.constant 0 : i32
    %c0_i32_1 = arith.constant 0 : i32
    return %c0_i32, %c0_i32_0 : i32, i32
  }
  func.func @transform_9(%arg0: i32) -> (i32, i32) {
    %c0_i32 = arith.constant 0 : i32
    %c0_i32_0 = arith.constant 0 : i32
    %c0_i32_1 = arith.constant 0 : i32
    return %c0_i32, %c0_i32_0 : i32, i32
  }
  func.func @transform_10(%arg0: i32) -> (i32, i32) {
    %c0_i32 = arith.constant 0 : i32
    %c0_i32_0 = arith.constant 0 : i32
    %c0_i32_1 = arith.constant 0 : i32
    return %c0_i32, %c0_i32_0 : i32, i32
  }
  func.func @transform_11(%arg0: i32) -> (i32, i32) {
    %c0_i32 = arith.constant 0 : i32
    %c0_i32_0 = arith.constant 0 : i32
    %c0_i32_1 = arith.constant 0 : i32
    return %c0_i32, %c0_i32_0 : i32, i32
  }
  func.func @transform_12(%arg0: i32) -> (i32, i32) {
    %c0_i32 = arith.constant 0 : i32
    %c0_i32_0 = arith.constant 0 : i32
    %c0_i32_1 = arith.constant 0 : i32
    return %c0_i32, %c0_i32_0 : i32, i32
  }
  func.func @transform_13(%arg0: i32) -> (i32, i32) {
    %c0_i32 = arith.constant 0 : i32
    %c0_i32_0 = arith.constant 0 : i32
    %c0_i32_1 = arith.constant 0 : i32
    return %c0_i32, %c0_i32_0 : i32, i32
  }
  func.func @transform_14(%arg0: i32) -> (i32, i32) {
    %c0_i32 = arith.constant 0 : i32
    %c0_i32_0 = arith.constant 0 : i32
    %c0_i32_1 = arith.constant 0 : i32
    return %c0_i32, %c0_i32_0 : i32, i32
  }
  func.func @transform_15(%arg0: i32) -> (i32, i32) {
    %c0_i32 = arith.constant 0 : i32
    %c0_i32_0 = arith.constant 0 : i32
    %c0_i32_1 = arith.constant 0 : i32
    return %c0_i32, %c0_i32_0 : i32, i32
  }
  func.func @transform_16(%arg0: i32) -> (i32, i32) {
    %c0_i32 = arith.constant 0 : i32
    %c0_i32_0 = arith.constant 0 : i32
    %c0_i32_1 = arith.constant 0 : i32
    return %c0_i32, %c0_i32_0 : i32, i32
  }
  func.func @transform_17(%arg0: i32) -> (i32, i32) {
    %c0_i32 = arith.constant 0 : i32
    %c0_i32_0 = arith.constant 0 : i32
    %c0_i32_1 = arith.constant 0 : i32
    return %c0_i32, %c0_i32_0 : i32, i32
  }
  func.func @transform_18(%arg0: i32) -> (i32, i32) {
    %c0_i32 = arith.constant 0 : i32
    %c0_i32_0 = arith.constant 0 : i32
    %c0_i32_1 = arith.constant 0 : i32
    return %c0_i32, %c0_i32_0 : i32, i32
  }
  func.func @transform_19(%arg0: i32) -> (i32, i32) {
    %c0_i32 = arith.constant 0 : i32
    %c0_i32_0 = arith.constant 0 : i32
    %c0_i32_1 = arith.constant 0 : i32
    return %c0_i32, %c0_i32_0 : i32, i32
  }
  func.func @transform_20(%arg0: i32) -> (i32, i32) {
    %c0_i32 = arith.constant 0 : i32
    %c0_i32_0 = arith.constant 0 : i32
    return %arg0, %c0_i32 : i32, i32
  }
}

</mosaic_0001>

<bundles_post_ra>
// kernel: tpu_custom_call.1
= control target key start
LH: loop header
LB: loop body
LE: loop exit
PB: predicated region body
PF: predicated region fallthrough
CT: control target
= control target key end

     0   :  { %s11728_s0 = inlined_call_operand.vmem [shape: bf16[8,32,16], index: 0, kind: input, shape index: {}]   ;;  %s11729_s1 = inlined_call_operand.hbm [shape: bf16[16,512], index: 1, kind: input, shape index: {}]   ;;  %s11730_s2 = inlined_call_operand.hbm [shape: bf16[128,512], index: 2, kind: input, shape index: {}]   ;;  %s11731_s3 = inlined_call_operand.vmem [shape: f32[1,512], index: 3, kind: input, shape index: {}]   ;;  %s11732_s4 = inlined_call_operand.hbm [shape: bf16[128,512], index: 4, kind: input, shape index: {}]   ;;  %s11733_s5 = inlined_call_operand.hbm [shape: bf16[128,512], index: 5, kind: input, shape index: {}]   ;;  %s11734_s6 = inlined_call_operand.vmem [shape: f32[1,512], index: 6, kind: input, shape index: {}]   ;;  %s11735_s7 = inlined_call_operand.hbm [shape: bf16[128,512], index: 7, kind: input, shape index: {}]   ;;  %s11736_s8 = inlined_call_operand.hbm [shape: bf16[128,512], index: 8, kind: input, shape index: {}]   ;;  %s11737_s9 = inlined_call_operand.vmem [shape: f32[1,512], index: 9, kind: input, shape index: {}]   ;;  %s11738_s10 = inlined_call_operand.vmem [shape: f32[1,128], index: 10, kind: input, shape index: {}]   ;;  %s11739_s11 = inlined_call_operand.vmem [shape: f32[1,128], index: 11, kind: input, shape index: {}]   ;;  %s11740_s12 = inlined_call_operand.vmem [shape: f32[1,128], index: 12, kind: input, shape index: {}]   ;;  %s11741_s13 = inlined_call_operand.vmem [shape: f32[1,128], index: 13, kind: input, shape index: {}]   ;;  %s11742_s14 = inlined_call_operand.vmem [shape: bf16[128,128], index: 14, kind: input, shape index: {}]   ;;  %s11743_s15 = inlined_call_operand.vmem [shape: f32[1,128], index: 15, kind: input, shape index: {}]   ;;  %s11744_s16 = inlined_call_operand.vmem [shape: bf16[128,128], index: 16, kind: input, shape index: {}]   ;;  %s11745_s17 = inlined_call_operand.vmem [shape: f32[1,128], index: 17, kind: input, shape index: {}]   ;;  %s11746_s18 = inlined_call_operand.vmem [shape: bf16[128,128], index: 18, kind: input, shape index: {}]   ;;  %s11747_s19 = inlined_call_operand.vmem [shape: f32[1,128], index: 19, kind: input, shape index: {}]   ;;  %s11748_s20 = inlined_call_operand.hbm [shape: f32[32,128], index: 20, kind: output, shape index: {}]  }
   0x1   :  { %11778 = sst [smem:[#allocation37_spill]] %s11728_s0 }
   0x2   :  { %11779 = sst [smem:[#allocation38_spill]] %s11729_s1 }
   0x3   :  { %11780 = sst [smem:[#allocation39_spill]] %s11730_s2 }
   0x4   :  { %11781 = sst [smem:[#allocation40_spill]] %s11731_s3 }
   0x5   :  { %11782 = sst [smem:[#allocation41_spill]] %s11732_s4 }
   0x6   :  { %11783 = sst [smem:[#allocation42_spill]] %s11733_s5 }
   0x7   :  { %11784 = sst [smem:[#allocation43_spill]] %s11738_s10 }
   0x8   :  { %11785 = sst [smem:[#allocation44_spill]] %s11739_s11 }
   0x9   :  { %11786 = sst [smem:[#allocation45_spill]] %s11740_s12 }
   0xa   :  { %11787 = sst [smem:[#allocation46_spill]] %s11741_s13 }
   0xb   :  { %11788 = sst [smem:[#allocation47_spill]] %s11743_s15 }
   0xc   :  { %11789 = sst [smem:[#allocation48_spill]] %s11745_s17 }
   0xd   :  { %11790 = sst [smem:[#allocation49_spill]] %s11746_s18 }
   0xe   :  { %11791 = sst [smem:[#allocation50_spill]] %s11747_s19 }
   0xf   :  { %11792 = sst [smem:[#allocation51_spill]] %s11748_s20 }
  0x10   :  { %25 = vsyncpa [#allocation6], 0 }
  0x11   :  { %26 = vsyncpa [#allocation9], 0 }
  0x12   :  { %27 = vsyncpa [#allocation12], 0 }
  0x13   :  { %28 = vsyncpa [#allocation15], 0 }
  0x14   :  { %29 = vsyncpa [#allocation7], 0 }
  0x15   :  { %31 = vsyncpa [#allocation7 + $0x1], 0  ;;  %s9497_s1 = smov 0   ;;  %s9499_s22 = smov 0  }
  0x16   :  { %s9501_s23 = smov 0   ;;  %s9503_s24 = smov 0  }
  0x17 LB: > { %11793 = sst [smem:[#allocation22_spill]] %s9364_s1  ;;  %s9518_s2 = sadd.s32 4294967295, %s9376_s24   ;;  %s9376_s24 = sphi %s9503_s24, %s11858_s24   ;;  %s9372_s23 = sphi %s9501_s23, %s11862_s23   ;;  %s9368_s22 = sphi %s9499_s22, %s11861_s22   ;;  %s9364_s1 = sphi %s9497_s1, %s11860_s1  }
  0x18   : > { %s7016_s25 = sadd.s32 4294967294, %s9376_s24   ;;  %s9522_s3 = sadd.s32 1, %s9376_s24  }
  0x19   : > { %11794 = sst [smem:[#allocation23_spill]] %s9522_s3  ;;  %s44_s26 = sadd.s32 1, %s9372_s23 }
  0x1a   : > { %s41_s27 = ssub.s32 %s9376_s24, %s9522_s3  ;;  %p51_p0 = scmp.ne.s32.totalorder %s9372_s23, %s9368_s22 }
  0x1b   : > { %p42_p1 = scmp.eq.s32.totalorder %s41_s27, 0  ;;  %p52_p2 = scmp.eq.s32.totalorder %s9376_s24, 0 }
  0x1c   : > { %p480_p3 = scmp.eq.s32.totalorder %s9518_s2, 1  ;;  %p485_p4 = scmp.ne.s32.totalorder %s9368_s22, %s9364_s1 }
  0x1d   : > { %s9534_s28 = scalar_select %p42_p1, %s9372_s23, %s44_s26  }
  0x1e   : > { %p9536_p5 = por %p52_p2, %p51_p0  ;;  %p9540_p6 = por %p480_p3, %p51_p0 }
  0x1f   : > { %11795 = sst [smem:[#allocation24_spill]] %s9534_s28  ;;  %p486_p7 = scmp.eq.s32.totalorder %s7016_s25, 1 }
  0x20   : > { %s11796_s4 = scalar_select %p9536_p5, 1, 0 }
  0x21   : > { %s11797_s29 = scalar_select %p9540_p6, 1, 0 }
  0x22   : > { %p7017_p8 = scmp.ge.s32.totalorder %s9376_s24, 1  ;;  %p493_p9 = scmp.lt.s32.totalorder %s9376_s24, 3 }
  0x23   : > { %11798 = sst [smem:[#allocation25_spill]] %s11797_s29  ;;  %p9546_p10 = por %p486_p7, %p485_p4 }
  0x24   : > { %p11759_p11 = scmp.eq.s32.totalorder %s9518_s2, 0  ;;  %p9551_p12 = pnand %p7017_p8, %p493_p9 }
  0x25   : > { %s11799_s30 = scalar_select %p9546_p10, 1, 0 }
  0x26   : > { %s11801_s0 = scalar_select %p9551_p12, 1, 0 }
  0x27   : > { %11800 = sst [smem:[#allocation26_spill]] %s11799_s30  ;;  %p7905_p13 = pneg %p9551_p12 }
  0x28   : > { %s9378_s21 = smov [#allocation8]   ;;  %s9379_s27 = smov [#allocation11]  }
  0x29   : > { %s518_s26 = sshll.u32 %s9378_s21, 4  ;;  %p9561_p0 = pnand %p11759_p11, %p7905_p13  ;;  %s9557_s26 = int_to_ptr.vmem [resolvable:$true] %s518_s26 }
  0x2a   : > { %s547_s28 = sshll.u32 %s9379_s27, 4  ;;  %s9380_s3 = smov [#allocation5]   ;;  %s9565_s28 = int_to_ptr.vmem [resolvable:$true] %s547_s28 }
  0x2b   : > { %s9567_s30 = sshll.u32 %s9380_s3, 4  ;;  %s11803_s29 = sld [smem:[#allocation39_spill]]  ;;  %s506_s30 = int_to_ptr.vmem [resolvable:$true] %s9567_s30 }
  0x2c   : > { %p9577_p2 = pneg %p9561_p0 }
  0x31   : > { %s9130_s19 = scalar_lea.hbm %s11803_s29, 4096 }
  0x32   : > { %p9131_p1 = scmp.ne.s32.totalorder %s11803_s29, %s9130_s19  ;;  %p9137_p7 = scmp.lt.u32.totalorder %s9130_s19, %s11803_s29 }
  0x34   : > { %p9133_p3 = pnand %p9577_p2, %p9131_p1 }
  0x36   : > { %p9134_p4 = pneg %p9133_p3 }
  0x38   : > { %p9139_p8 = pnand %p9137_p7, %p9134_p4 }
  0x3a   : > { %9142 = shalt.err (!%p9139_p8)
}
  0x3b   : > { %s9143_s17 = scalar_lea.vmem %s9557_s26, 4096  ;;  %p9151_p10 = scmp.lt.s32.totalorder %s9557_s26, %s9557_s26 }
  0x3c   : > { %p9144_p9 = scmp.ne.s32.totalorder %s9557_s26, %s9143_s17  ;;  %p9152_p6 = scmp.lt.s32.totalorder %s9143_s17, %s9143_s17 }
  0x3e   : > { %p9146_p13 = pnand %p9144_p9, %p9577_p2  ;;  %p9153_p1 = por %p9152_p6, %p9151_p10 }
  0x40   : > { %p9147_p11 = pneg %p9146_p13 }
  0x42   : > { %p9154_p3 = pnand %p9153_p1, %p9147_p11 }
  0x44   : > { %9157 = shalt.err (!%p9154_p3)
}
  0x45   : > { %s9381_s20 = smov 256   ;;  %s9382_s19 = smov 16  }
  0x46   : > { %7911 = dma.hbm_to_vmem [thread:$0]  (!%p9561_p0), %s11803_s29, 4096, %s9557_s26, [#allocation9], %s9381_s20, %s9381_s20, %s9382_s19  }
  0x47   : > { %s11805_s5 = sld [smem:[#allocation42_spill]] }
  0x4d   : > { %s9158_s17 = scalar_lea.hbm %s11805_s5, 4096 }
  0x4e   : > { %p9159_p6 = scmp.ne.s32.totalorder %s11805_s5, %s9158_s17  ;;  %p9165_p4 = scmp.lt.u32.totalorder %s9158_s17, %s11805_s5 }
  0x50   : > { %p9161_p10 = pnand %p9159_p6, %p9577_p2 }
  0x52   : > { %p9162_p11 = pneg %p9161_p10 }
  0x54   : > { %p9167_p7 = pnand %p9165_p4, %p9162_p11 }
  0x56   : > { %9170 = shalt.err (!%p9167_p7)
}
  0x57   : > { %s9171_s26 = scalar_lea.vmem %s9565_s28, 4096  ;;  %p9179_p1 = scmp.lt.s32.totalorder %s9565_s28, %s9565_s28 }
  0x58   : > { %p9172_p8 = scmp.ne.s32.totalorder %s9565_s28, %s9171_s26  ;;  %p9180_p3 = scmp.lt.s32.totalorder %s9171_s26, %s9171_s26 }
  0x5a   : > { %p9174_p9 = pnand %p9172_p8, %p9577_p2  ;;  %p9181_p6 = por %p9180_p3, %p9179_p1 }
  0x5c   : > { %p9175_p13 = pneg %p9174_p9 }
  0x5e   : > { %p9182_p10 = pnand %p9181_p6, %p9175_p13 }
  0x60   : > { %9185 = shalt.err (!%p9182_p10)
}
  0x61   : > { %7917 = dma.hbm_to_vmem [thread:$0]  (!%p9561_p0), %s11805_s5, 4096, %s9565_s28, [#allocation12], %s9381_s20, %s9381_s20, %s9382_s19  }
  0x62   : > { %s11806_s1 = sld [smem:[#allocation38_spill]] }
  0x68   : > { %s11807_s21 = smov %s11806_s1  ;;  %s9186_s27 = scalar_lea.hbm %s11806_s1, 512 }
  0x69   : > { %p9187_p11 = scmp.ne.s32.totalorder %s11807_s21, %s9186_s27  ;;  %p9193_p8 = scmp.lt.u32.totalorder %s9186_s27, %s11807_s21 }
  0x6b   : > { %p9189_p4 = pnand %p9187_p11, %p9577_p2 }
  0x6d   : > { %p9190_p7 = pneg %p9189_p4 }
  0x6f   : > { %p9195_p9 = pnand %p9193_p8, %p9190_p7 }
  0x71   : > { %9198 = shalt.err (!%p9195_p9)
}
  0x72   : > { %s9199_s10 = scalar_lea.vmem %s506_s30, 512  ;;  %p9207_p6 = scmp.lt.s32.totalorder %s506_s30, %s506_s30 }
  0x73   : > { %p9200_p13 = scmp.ne.s32.totalorder %s506_s30, %s9199_s10  ;;  %p9208_p10 = scmp.lt.s32.totalorder %s9199_s10, %s9199_s10 }
  0x75   : > { %p9202_p1 = pnand %p9200_p13, %p9577_p2  ;;  %p9209_p12 = por %p9208_p10, %p9207_p6 }
  0x77   : > { %p9203_p3 = pneg %p9202_p1 }
  0x79   : > { %p9210_p5 = pnand %p9209_p12, %p9203_p3 }
  0x7b   : > { %9213 = shalt.err (!%p9210_p5)
}
  0x7c   : > { %7908 = dma.hbm_to_vmem [thread:$0]  (!%p9561_p0), %s11807_s21, 512, %s506_s30, [#allocation6], %s9381_s20, %s9381_s20, %s9382_s19  }
  0x7d   : > { %s9383_s11 = smov [#allocation10]   ;;  %s9384_s18 = smov [#allocation13]  }
  0x7e   : > { %s534_s12 = sshll.u32 %s9383_s11, 4  ;;  %s563_s1 = sshll.u32 %s9384_s18, 4  ;;  %s535_s12 = int_to_ptr.vmem [resolvable:$true] %s534_s12  ;;  %s564_s1 = int_to_ptr.vmem [resolvable:$true] %s563_s1 }
  0x7f   : > { %s11808_s17 = sld [smem:[#allocation41_spill]] }
  0x85   : > { %s9214_s26 = scalar_lea.hbm %s11808_s17, 4096 }
  0x86   : > { %p9215_p5 = scmp.ne.s32.totalorder %s11808_s17, %s9214_s26  ;;  %p9221_p4 = scmp.lt.u32.totalorder %s9214_s26, %s11808_s17 }
  0x88   : > { %p9217_p12 = pnand %p9215_p5, %p9577_p2 }
  0x8a   : > { %p9218_p11 = pneg %p9217_p12 }
  0x8c   : > { %p9223_p7 = pnand %p9221_p4, %p9218_p11 }
  0x8e   : > { %9226 = shalt.err (!%p9223_p7)
}
  0x8f   : > { %s9227_s30 = scalar_lea.vmem %s535_s12, 4096  ;;  %p9235_p1 = scmp.lt.s32.totalorder %s535_s12, %s535_s12 }
  0x90   : > { %p9228_p8 = scmp.ne.s32.totalorder %s535_s12, %s9227_s30  ;;  %p9236_p3 = scmp.lt.s32.totalorder %s9227_s30, %s9227_s30 }
  0x92   : > { %p9230_p9 = pnand %p9228_p8, %p9577_p2  ;;  %p9237_p6 = por %p9236_p3, %p9235_p1 }
  0x94   : > { %p9231_p13 = pneg %p9230_p9 }
  0x96   : > { %p9238_p10 = pnand %p9237_p6, %p9231_p13 }
  0x98   : > { %9241 = shalt.err (!%p9238_p10)
}
  0x99   : > { %7914 = dma.hbm_to_vmem [thread:$0]  (!%p9561_p0), %s11808_s17, 4096, %s535_s12, [#allocation9], %s9381_s20, %s9381_s20, %s9382_s19  }
  0x9a   : > { %s9242_s18 = scalar_lea.hbm %s11735_s7, 4096 }
  0x9b   : > { %p9243_p5 = scmp.ne.s32.totalorder %s11735_s7, %s9242_s18  ;;  %p9249_p4 = scmp.lt.u32.totalorder %s9242_s18, %s11735_s7 }
  0x9d   : > { %p9245_p12 = pnand %p9243_p5, %p9577_p2 }
  0x9f   : > { %p9246_p11 = pneg %p9245_p12 }
  0xa1   : > { %p9251_p7 = pnand %p9249_p4, %p9246_p11 }
  0xa3   : > { %9254 = shalt.err (!%p9251_p7)
}
  0xa4   : > { %s9255_s28 = scalar_lea.vmem %s564_s1, 4096  ;;  %p9263_p1 = scmp.lt.s32.totalorder %s564_s1, %s564_s1 }
  0xa5   : > { %p9256_p8 = scmp.ne.s32.totalorder %s564_s1, %s9255_s28  ;;  %p9264_p3 = scmp.lt.s32.totalorder %s9255_s28, %s9255_s28 }
  0xa7   : > { %p9258_p9 = pnand %p9256_p8, %p9577_p2  ;;  %p9265_p6 = por %p9264_p3, %p9263_p1 }
  0xa9   : > { %p9259_p13 = pneg %p9258_p9 }
  0xab   : > { %p9266_p10 = pnand %p9265_p6, %p9259_p13 }
  0xad   : > { %9269 = shalt.err (!%p9266_p10)
}
  0xae   : > { %7920 = dma.hbm_to_vmem [thread:$0]  (!%p9561_p0), %s11735_s7, 4096, %s564_s1, [#allocation12], %s9381_s20, %s9381_s20, %s9382_s19  }
  0xaf   : > { %s9385_s5 = smov [#allocation14]   ;;  %s9270_s18 = scalar_lea.hbm %s11736_s8, 4096 }
  0xb0   : > { %s576_s13 = sshll.u32 %s9385_s5, 4  ;;  %p9271_p5 = scmp.ne.s32.totalorder %s11736_s8, %s9270_s18  ;;  %s577_s13 = int_to_ptr.vmem [resolvable:$true] %s576_s13 }
  0xb1   : > { %p9277_p4 = scmp.lt.u32.totalorder %s9270_s18, %s11736_s8 }
  0xb2   : > { %p9273_p12 = pnand %p9271_p5, %p9577_p2 }
  0xb4   : > { %p9274_p11 = pneg %p9273_p12 }
  0xb6   : > { %p9279_p7 = pnand %p9277_p4, %p9274_p11 }
  0xb8   : > { %9282 = shalt.err (!%p9279_p7)
}
  0xb9   : > { %s9283_s1 = scalar_lea.vmem %s577_s13, 4096  ;;  %p9291_p1 = scmp.lt.s32.totalorder %s577_s13, %s577_s13 }
  0xba   : > { %p9284_p8 = scmp.ne.s32.totalorder %s577_s13, %s9283_s1  ;;  %p9292_p3 = scmp.lt.s32.totalorder %s9283_s1, %s9283_s1 }
  0xbc   : > { %p9286_p9 = pnand %p9284_p8, %p9577_p2  ;;  %p9293_p6 = por %p9292_p3, %p9291_p1 }
  0xbe   : > { %p9287_p13 = pneg %p9286_p9 }
  0xc0   : > { %p9294_p10 = pnand %p9293_p6, %p9287_p13 }
  0xc2   : > { %9297 = shalt.err (!%p9294_p10)
}
  0xc3   : > { %7923 = dma.hbm_to_vmem [thread:$0]  (!%p9561_p0), %s11736_s8, 4096, %s577_s13, [#allocation15], %s9381_s20, %s9381_s20, %s9382_s19  }
  0xc4   : > { %p7024_p5 = scmp.ge.s32.totalorder %s9376_s24, 2 }
  0xc5   : > { %p11809_p2 = scmp.ne.s32.totalorder (!%p7024_p5), %s11796_s4, 0 }
  0xc6   : > { %619 = sbr.rel (%p7024_p5) target bundleno = 219 (0xdb), region = 92 }
  0xcd   : > { %622 = sbr.rel (!%p11809_p2) target bundleno = 219 (0xdb), region = 96  ;;  %s624_s15 = sand.u32 (%p11809_p2), 1, %s9372_s23  }
  0xce   : > { %s7404_s30 = sshll.u32 (%p11809_p2), %s9376_s24, 3  ;;  %s7025_s25 = sshll.u32 (%p11809_p2), %s624_s15, 6 }
  0xcf   : > { %s11810_s11 = sld [smem:[#allocation37_spill]] (%p11809_p2)  ;;  %s626_s20 = scalar_lea.vmem (%p11809_p2), [#allocation4], %s7025_s25 }
  0xd5   : > { %s629_s18 = scalar_lea.vmem %s11810_s11, %s7404_s30 }
  0xd6   : > { %v645_v0 = vld [vmem:[%s629_s18] sm:$0xff]   ;;  %v649_v1 = vld [vmem:[%s629_s18 + $0x10] sm:$0xff]  }
  0xd7   : > { %v653_v2 = vld [vmem:[%s629_s18 + $0x20] sm:$0xff]   ;;  %646 = vst [vmem:[%s626_s20] sm:$0xff] %v645_v0   ;;  %650 = vst [vmem:[%s626_s20 + $0x8] sm:$0xff] %v649_v1   ;;  %v657_v3 = vld [vmem:[%s629_s18 + $0x30] sm:$0xff]  }
  0xd8   : > { %654 = vst [vmem:[%s626_s20 + $0x10] sm:$0xff] %v653_v2   ;;  %v661_v4 = vld [vmem:[%s629_s18 + $0x40] sm:$0xff]   ;;  %v665_v5 = vld [vmem:[%s629_s18 + $0x50] sm:$0xff]   ;;  %658 = vst [vmem:[%s626_s20 + $0x18] sm:$0xff] %v657_v3  }
  0xd9   : > { %662 = vst [vmem:[%s626_s20 + $0x20] sm:$0xff] %v661_v4   ;;  %666 = vst [vmem:[%s626_s20 + $0x28] sm:$0xff] %v665_v5   ;;  %v669_v6 = vld [vmem:[%s629_s18 + $0x60] sm:$0xff]   ;;  %v673_v7 = vld [vmem:[%s629_s18 + $0x70] sm:$0xff]  }
  0xda   : > { %670 = vst [vmem:[%s626_s20 + $0x30] sm:$0xff] %v669_v6   ;;  %674 = vst [vmem:[%s626_s20 + $0x38] sm:$0xff] %v673_v7  }
  0xdb PF: > { %p11811_p0 = scmp.ne.s32.totalorder %s11801_s0, 0 }
  0xdd   : > { %734 = sbr.rel (%p11811_p0) target bundleno = 7319 (0x1c97), region = 137 }
  0xe4   : > { %s9725_s4 = sand.u32 1, %s9368_s22   ;;  %p11812_p12 = scmp.eq.s32.totalorder %s9518_s2, 0 }
  0xe5   : > { %s7029_s19 = sshll.u32 %s9725_s4, 6 }
  0xe6   : > { %s9728_s13 = scalar_lea.vmem [#allocation4], %s7029_s19 }
  0xe7   : > { %9343 = dma.done.wait (%p11812_p12), [#allocation6], 512   ;;  %p11813_p11 = pmov %p11812_p12 }
  0xe9   : > { %9345 = vsyncadd (%p11813_p11), [#allocation6], 4294966784  ;;  %p11814_p4 = pmov %p11813_p11 }
  0xeb   : > { %9347 = dma.done.wait (%p11814_p4), [#allocation9], 8192   ;;  %p11815_p7 = pmov %p11814_p4 }
  0xec   : > { %p11816_p8 = pmov %p11814_p4 }
  0xed   : > { %9349 = vsyncadd (%p11815_p7), [#allocation9], 4294959104 }
  0xee   : > { %9351 = dma.done.wait (%p11816_p8), [#allocation12], 8192   ;;  %p11817_p9 = pmov %p11814_p4 }
  0xef   : > { %p11818_p13 = pmov %p11814_p4 }
  0xf0   : > { %9353 = vsyncadd (%p11817_p9), [#allocation12], 4294959104 }
  0xf1   : > { %9355 = dma.done.wait (%p11818_p13), [#allocation15], 4096   ;;  %p11819_p1 = pmov %p11814_p4 }
  0xf2   : > { %v11764_v8 = vmov 0   ;;  %v7986_v9 = vld [vmem:[#allocation5 + $0x4] ss:$16 sps:$4 sm:$0xff]   ;;  %v7988_v10 = vld [vmem:[#allocation5] ss:$16 sps:$4 sm:$0xff]   ;;  %vm923_vm0 = vcmask 130048   ;;  %v843_v61 = vlaneseq }
  0xf3   : > { %9357 = vsyncadd (%p11819_p1), [#allocation15], 4294963200  ;;  %980 = vmatprep.mubr.bf16.mxu0 %v11764_v8  ;;  %1040 = vmatprep.mubr.bf16.mxu1 %v11764_v8  ;;  %v7989_v11 = vld [vmem:[%s9728_s13] sm:$0xff]   ;;  %v9750_v12 = vld [vmem:[%s9728_s13 + $0x30] sm:$0xff]   ;;  %s11825_s3 = sld [smem:[#allocation40_spill]]  ;;  %vm9388_vm1 = vmmov 0  }
  0xf4   : > { %948 = vmatprep.subr.bf16.mxu0 %v7986_v9  ;;  %7493 = vmatprep.subr.bf16.mxu1 %v7986_v9  ;;  %v7991_v13 = vld [vmem:[#allocation5 + $0x8] ss:$16 sps:$4 sm:$0xff]   ;;  %v7993_v14 = vld [vmem:[#allocation5 + $0xc] ss:$16 sps:$4 sm:$0xff]   ;;  %v9758_v16 = vld [vmem:[#allocation8 + $0x4] ss:$16 sps:$4 sm:$0xff]  }
  0xf5   : > { %949 = vmatpush1.bf16.msra.mxu0 %v7988_v10  ;;  %7494 = vmatpush1.bf16.msra.mxu1 %v7988_v10  ;;  %v7994_v15 = vld [vmem:[%s9728_s13 + $0x8] sm:$0xff]   ;;  %v9762_v18 = vld [vmem:[#allocation8] ss:$16 sps:$4 sm:$0xff]   ;;  %v9765_v19 = vld [vmem:[%s9728_s13 + $0x38] sm:$0xff]   ;;  %v844_v62 = vshrl.u32 %v843_v61, 7  ;;  %s11844_s27 = sld [smem:[#allocation46_spill]] }
  0xf6   : > { %1061 = vmatprep.subr.bf16.mxu1 %v7993_v14  ;;  %v9760_v17 = vld [vmem:[#allocation8 + $0xc] ss:$16 sps:$4 sm:$0xff]   ;;  %1438 = vmatprep.subr.bf16.mxu0 %v9758_v16  ;;  %v9770_v20 = vld [vmem:[#allocation8 + $0x24] ss:$16 sps:$4 sm:$0xff]   ;;  %v9772_v21 = vld [vmem:[#allocation8 + $0x20] ss:$16 sps:$4 sm:$0xff]  }
  0xf7   : > { %v9775_v22 = vld [vmem:[#allocation8 + $0x44] ss:$16 sps:$4 sm:$0xff]   ;;  %v9783_v23 = vld [vmem:[#allocation8 + $0x40] ss:$16 sps:$4 sm:$0xff]   ;;  %v9789_v26 = vld [vmem:[#allocation8 + $0x8] ss:$16 sps:$4 sm:$0xff]  }
  0xf8   : > { %7049 = vmatmul.mubr.msk.bf16.vlgmr.msra.gmra.mrb[0].mxu0 %vm923_vm0, %v7989_v11  ;;  %7055 = vmatmul.mubr.msk.bf16.vlgmr.msra.gmra.mrb[0].mxu1 %vm923_vm0, %v9750_v12  ;;  %v9786_v24 = vld [vmem:[#allocation8 + $0x64] ss:$16 sps:$4 sm:$0xff]   ;;  %v9791_v27 = vld [vmem:[#allocation8 + $0x2c] ss:$16 sps:$4 sm:$0xff]   ;;  %v9795_v28 = vld [vmem:[#allocation8 + $0x60] ss:$16 sps:$4 sm:$0xff]  }
  0xf9   : > { %990 = vmatprep.mubr.bf16.mxu0 %v11764_v8  ;;  %1062 = vmatpush1.bf16.msra.mxu1 %v7991_v13  ;;  %v7996_v25 = vld [vmem:[%s9728_s13 + $0x10] sm:$0xff]   ;;  %v9803_v30 = vld [vmem:[#allocation8 + $0x28] ss:$16 sps:$4 sm:$0xff]   ;;  %v9807_v31 = vld [vmem:[#allocation8 + $0x4c] ss:$16 sps:$4 sm:$0xff]   ;;  %v9946_v0 = vsub.s32 0, %v844_v62 }
  0xfa   : > { %1050 = vmatprep.mubr.bf16.mxu1 %v11764_v8  ;;  %1481 = vmatprep.subr.bf16.mxu1 %v9760_v17  ;;  %v9799_v29 = vld [vmem:[#allocation8 + $0x84] ss:$16 sps:$4 sm:$0xff]   ;;  %v9810_v32 = vld [vmem:[#allocation8 + $0x80] ss:$16 sps:$4 sm:$0xff]   ;;  %v8006_v33 = vld [vmem:[%s9728_s13 + $0x18] sm:$0xff]   ;;  %v9951_v3 = vsub.s32 1, %v844_v62 }
  0xfb   : > { %1439 = vmatpush1.bf16.msra.mxu0 %v9762_v18  ;;  %v9815_v34 = vld [vmem:[#allocation8 + $0x48] ss:$16 sps:$4 sm:$0xff]   ;;  %v9817_v35 = vld [vmem:[#allocation8 + $0xa4] ss:$16 sps:$4 sm:$0xff]   ;;  %v9820_v36 = vld [vmem:[#allocation8 + $0xa0] ss:$16 sps:$4 sm:$0xff]  }
  0xfc   : > { %1440 = vmatprep.subr.bf16.mxu0 %v9770_v20  ;;  %v9823_v37 = vld [vmem:[#allocation8 + $0x6c] ss:$16 sps:$4 sm:$0xff]   ;;  %v9827_v38 = vld [vmem:[#allocation8 + $0xc4] ss:$16 sps:$4 sm:$0xff]   ;;  %v9831_v39 = vld [vmem:[#allocation8 + $0xc0] ss:$16 sps:$4 sm:$0xff]  }
  0xfd   : > { %v9833_v40 = vld [vmem:[#allocation8 + $0x68] ss:$16 sps:$4 sm:$0xff]   ;;  %v8016_v41 = vld [vmem:[%s9728_s13 + $0x20] sm:$0xff]   ;;  %v9838_v42 = vld [vmem:[#allocation8 + $0x8c] ss:$16 sps:$4 sm:$0xff]   ;;  %11824 = vst [vmem:[#allocation31_spill] sm:$0xff] %v9946_v0 }
  0xfe   : > { %v9843_v43 = vld [vmem:[#allocation8 + $0xe4] ss:$16 sps:$4 sm:$0xff]   ;;  %v9845_v44 = vld [vmem:[#allocation8 + $0x88] ss:$16 sps:$4 sm:$0xff]   ;;  %v9847_v45 = vld [vmem:[#allocation8 + $0xe0] ss:$16 sps:$4 sm:$0xff]  }
  0xff   : > { %1441 = vmatpush1.bf16.msra.mxu0 %v9772_v21  ;;  %v9849_v46 = vld [vmem:[#allocation8 + $0xac] ss:$16 sps:$4 sm:$0xff]   ;;  %v9856_v47 = vld [vmem:[#allocation8 + $0xa8] ss:$16 sps:$4 sm:$0xff]   ;;  %v841_v2 = vld [vmem:[%s11825_s3] sm:$0xf] }
 0x100   : > { %7050 = vmatmul.mubr.msk.bf16.gmra.mrb[4].mxu0 %vm923_vm0, %v7994_v15  ;;  %7056 = vmatmul.mubr.msk.bf16.gmra.mrb[4].mxu1 %vm923_vm0, %v9765_v19  ;;  %v9860_v48 = vld [vmem:[#allocation8 + $0xcc] ss:$16 sps:$4 sm:$0xff]   ;;  %v9867_v50 = vld [vmem:[#allocation8 + $0xc8] ss:$16 sps:$4 sm:$0xff]   ;;  %11826 = vst [vmem:[#allocation32_spill] sm:$0xff] %v9951_v3  ;;  %v9954_v6 = vrot.slane %v841_v2, %v9946_v0  ;;  %v9957_v7 = vrot.slane %v841_v2, %v9951_v3  ;;  %s11845_s10 = sld [smem:[#allocation45_spill]] }
 0x101   : > { %1000 = vmatprep.mubr.bf16.mxu0 %v11764_v8  ;;  %1093 = vmatprep.mubr.bf16.mxu1 %v11764_v8  ;;  %v8026_v49 = vld [vmem:[%s9728_s13 + $0x28] sm:$0xff]   ;;  %s11846_s12 = sld [smem:[#allocation43_spill]]  ;;  %s11847_s25 = sld [smem:[#allocation44_spill]] }
 0x102   : > { %1442 = vmatprep.subr.bf16.mxu0 %v9775_v22  ;;  %v9870_v51 = vld [vmem:[#allocation8 + $0xec] ss:$16 sps:$4 sm:$0xff]   ;;  %v9876_v52 = vld [vmem:[#allocation8 + $0xe8] ss:$16 sps:$4 sm:$0xff]   ;;  %s11848_s13 = sld [smem:[#allocation49_spill]]  ;;  %s11849_s29 = sld [smem:[#allocation47_spill]] }
 0x103   : > { %1443 = vmatpush1.bf16.msra.mxu0 %v9783_v23  ;;  %s11850_s3 = sld [smem:[#allocation48_spill]]  ;;  %s7036_s26 = sshll.u32 %s9725_s4, 4 }
 0x104   : > { %1444 = vmatprep.subr.bf16.mxu0 %v9786_v24  ;;  %s11851_s28 = sld [smem:[#allocation50_spill]]  ;;  %s11852_s15 = sld [smem:[#allocation25_spill]] }
 0x105   : > { %s11853_s11 = sld [smem:[#allocation51_spill]]  ;;  %s6875_s20 = scalar_lea.sflag [#allocation7], %s9725_s4 }
 0x106   : > { %s9389_s19 = smov [#allocation16]  }
 0x107   : > { %1445 = vmatpush1.bf16.msra.mxu0 %v9795_v28  ;;  %s9302_s0 = sshll.u32 %s9389_s19, 4  ;;  %s9303_s0 = int_to_ptr.vmem [resolvable:$false] %s9302_s0 }
 0x108   : > { %7051 = vmatmul.mubr.msk.bf16.gmra.mrb[8].mxu0 %vm923_vm0, %v7996_v25  ;;  %7057 = vmatmul.mubr.msk.bf16.vlgmr.msra.gmra.mrb[8].mxu1 %vm923_vm0, %v7989_v11 }
 0x109   : > { %1482 = vmatpush1.bf16.msra.mxu1 %v9789_v26  ;;  %1010 = vmatprep.mubr.bf16.mxu0 %v11764_v8 }
 0x10a   : > { %1103 = vmatprep.mubr.bf16.mxu1 %v11764_v8  ;;  %1483 = vmatprep.subr.bf16.mxu1 %v9791_v27  ;;  %p11854_p6 = scmp.ne.s32.totalorder %s11852_s15, 0 }
 0x10b   : > { %1446 = vmatprep.subr.bf16.mxu0 %v9799_v29 }
 0x10c   : > { %1447 = vmatpush1.bf16.msra.mxu0 %v9810_v32 }
 0x10d   : > { %1484 = vmatpush1.bf16.msra.mxu1 %v9803_v30  ;;  %1448 = vmatprep.subr.bf16.mxu0 %v9817_v35 }
 0x10e   : > { %1485 = vmatprep.subr.bf16.mxu1 %v9807_v31 }
 0x110   : > { %7052 = vmatmul.mubr.msk.bf16.gmra.mrb[12].mxu0 %vm923_vm0, %v8006_v33  ;;  %7058 = vmatmul.mubr.msk.bf16.gmra.mrb[12].mxu1 %vm923_vm0, %v7994_v15 }
 0x111   : > { %1020 = vmatprep.mubr.bf16.mxu0 %v11764_v8  ;;  %1113 = vmatprep.mubr.bf16.mxu1 %v11764_v8 }
 0x112   : > { %1486 = vmatpush1.bf16.msra.mxu1 %v9815_v34  ;;  %1449 = vmatpush1.bf16.msra.mxu0 %v9820_v36 }
 0x113   : > { %1487 = vmatprep.subr.bf16.mxu1 %v9823_v37  ;;  %1450 = vmatprep.subr.bf16.mxu0 %v9827_v38 }
 0x116   : > { %1488 = vmatpush1.bf16.msra.mxu1 %v9833_v40  ;;  %1451 = vmatpush1.bf16.msra.mxu0 %v9831_v39 }
 0x117   : > { %1489 = vmatprep.subr.bf16.mxu1 %v9838_v42  ;;  %1452 = vmatprep.subr.bf16.mxu0 %v9843_v43 }
 0x118   : > { %7053 = vmatmul.mubr.msk.bf16.gmra.mrb[16].mxu0 %vm923_vm0, %v8016_v41  ;;  %7059 = vmatmul.mubr.msk.bf16.gmra.mrb[16].mxu1 %vm923_vm0, %v7996_v25 }
 0x119   : > { %1030 = vmatprep.mubr.bf16.mxu0 %v11764_v8  ;;  %1123 = vmatprep.mubr.bf16.mxu1 %v11764_v8 }
 0x11a   : > { %1490 = vmatpush1.bf16.msra.mxu1 %v9845_v44  ;;  %1453 = vmatpush1.bf16.msra.mxu0 %v9847_v45 }
 0x11b   : > { %1491 = vmatprep.subr.bf16.mxu1 %v9849_v46  ;;  %1591 = vmatprep.subr.bf16.mxu0 %v9758_v16 }
 0x11e   : > { %1492 = vmatpush1.bf16.msra.mxu1 %v9856_v47 }
 0x11f   : > { %1493 = vmatprep.subr.bf16.mxu1 %v9860_v48 }
 0x120   : > { %7054 = vmatmul.mubr.msk.bf16.gmra.mrb[20].mxu0 %vm923_vm0, %v8026_v49  ;;  %7060 = vmatmul.mubr.msk.bf16.gmra.mrb[20].mxu1 %vm923_vm0, %v8006_v33  ;;  %v9963_v33 = vsub.s32 2, %v844_v62 }
 0x121   : > { %1133 = vmatprep.mubr.bf16.mxu1 %v11764_v8  ;;  %1470 = vmatprep.mubr.bf16.mxu0 %v11764_v8 }
 0x122   : > { %1494 = vmatpush1.bf16.msra.mxu1 %v9867_v50  ;;  %11827 = vst [vmem:[#allocation33_spill] sm:$0xff] %v9963_v33 }
 0x123   : > { %1495 = vmatprep.subr.bf16.mxu1 %v9870_v51 }
 0x126   : > { %1496 = vmatpush1.bf16.msra.mxu1 %v9876_v52 }
 0x127   : > { %1634 = vmatprep.subr.bf16.mxu1 %v9760_v17 }
 0x128   : > { %7061 = vmatmul.mubr.msk.bf16.gmra.mrb[24].mxu1 %vm923_vm0, %v8016_v41  ;;  %1471 = vmatmul.mubr.bf16.vlgmr.msra.gmra.mrb[0].mxu0 %v11764_v8 }
 0x129   : > { %1143 = vmatprep.mubr.bf16.mxu1 %v11764_v8  ;;  %1592 = vmatpush1.bf16.msra.mxu0 %v9762_v18 }
 0x12a   : > { %1593 = vmatprep.subr.bf16.mxu0 %v9770_v20  ;;  %1623 = vmatprep.mubr.bf16.mxu0 %v11764_v8 }
 0x12d   : > { %1594 = vmatpush1.bf16.msra.mxu0 %v9772_v21 }
 0x12e   : > { %1595 = vmatprep.subr.bf16.mxu0 %v9775_v22 }
 0x130   : > { %7062 = vmatmul.mubr.msk.bf16.gmra.mrb[28].mxu1 %vm923_vm0, %v8026_v49  ;;  %v9965_v49 = vsub.s32 3, %v844_v62 }
 0x131   : > { %1153 = vmatprep.mubr.bf16.mxu1 %v11764_v8  ;;  %1596 = vmatpush1.bf16.msra.mxu0 %v9783_v23 }
 0x132   : > { %1597 = vmatprep.subr.bf16.mxu0 %v9786_v24  ;;  %11828 = vst [vmem:[#allocation34_spill] sm:$0xff] %v9965_v49 }
 0x135   : > { %1598 = vmatpush1.bf16.msra.mxu0 %v9795_v28 }
 0x136   : > { %1599 = vmatprep.subr.bf16.mxu0 %v9799_v29 }
 0x138   : > { %7063 = vmatmul.mubr.msk.bf16.gmra.mrb[32].mxu1 %vm923_vm0, %v9750_v12 }
 0x139   : > { %1163 = vmatprep.mubr.bf16.mxu1 %v11764_v8  ;;  %1600 = vmatpush1.bf16.msra.mxu0 %v9810_v32 }
 0x13a   : > { %1601 = vmatprep.subr.bf16.mxu0 %v9817_v35 }
 0x13d   : > { %1602 = vmatpush1.bf16.msra.mxu0 %v9820_v36 }
 0x13e   : > { %1603 = vmatprep.subr.bf16.mxu0 %v9827_v38 }
 0x140   : > { %7064 = vmatmul.mubr.msk.bf16.gmra.mrb[36].mxu1 %vm923_vm0, %v9765_v19 }
 0x141   : > { %1513 = vmatprep.mubr.bf16.mxu1 %v11764_v8  ;;  %1604 = vmatpush1.bf16.msra.mxu0 %v9831_v39 }
 0x142   : > { %1605 = vmatprep.subr.bf16.mxu0 %v9843_v43 }
 0x145   : > { %1606 = vmatpush1.bf16.msra.mxu0 %v9847_v45 }
 0x146   : > { %1745 = vmatprep.subr.bf16.mxu0 %v9758_v16 }
 0x148   : > { %1514 = vmatmul.mubr.bf16.vlgmr.msra.gmra.mrb[8].mxu1 %v11764_v8 }
 0x149   : > { %1635 = vmatpush1.bf16.msra.mxu1 %v9789_v26  ;;  %1666 = vmatprep.mubr.bf16.mxu1 %v11764_v8 }
 0x14a   : > { %1636 = vmatprep.subr.bf16.mxu1 %v9791_v27 }
 0x14d   : > { %1637 = vmatpush1.bf16.msra.mxu1 %v9803_v30 }
 0x14e   : > { %1638 = vmatprep.subr.bf16.mxu1 %v9807_v31 }
 0x151   : > { %1639 = vmatpush1.bf16.msra.mxu1 %v9815_v34 }
 0x152   : > { %1640 = vmatprep.subr.bf16.mxu1 %v9823_v37 }
 0x155   : > { %1641 = vmatpush1.bf16.msra.mxu1 %v9833_v40 }
 0x156   : > { %1642 = vmatprep.subr.bf16.mxu1 %v9838_v42 }
 0x159   : > { %1643 = vmatpush1.bf16.msra.mxu1 %v9845_v44 }
 0x15a   : > { %1644 = vmatprep.subr.bf16.mxu1 %v9849_v46 }
 0x15d   : > { %1645 = vmatpush1.bf16.msra.mxu1 %v9856_v47 }
 0x15e   : > { %1646 = vmatprep.subr.bf16.mxu1 %v9860_v48 }
 0x161   : > { %1647 = vmatpush1.bf16.msra.mxu1 %v9867_v50 }
 0x162   : > { %1648 = vmatprep.subr.bf16.mxu1 %v9870_v51 }
 0x165   : > { %1649 = vmatpush1.bf16.msra.mxu1 %v9876_v52 }
 0x166   : > { %1788 = vmatprep.subr.bf16.mxu1 %v9760_v17 }
 0x1cb   : > { %v9930_v53 = vpop.f32.mrb[0].mxu1 }
 0x1cc   : > { %v9932_v54 = vpop.f32.mrb[1].mxu1 }
 0x1cd   : > { %v9934_v55 = vpop.f32.mrb[2].mxu1 }
 0x1ce   : > { %v9936_v56 = vpop.f32.mrb[3].mxu1 }
 0x1d3   : > { %v9938_v57 = vpop.f32.mrb[4].mxu1 }
 0x1d4   : > { %11820 = vst [vmem:[#allocation27_spill] sm:$0xff] %v9938_v57  ;;  %v9940_v58 = vpop.f32.mrb[5].mxu1 }
 0x1d5   : > { %11821 = vst [vmem:[#allocation28_spill] sm:$0xff] %v9940_v58  ;;  %v9942_v59 = vpop.f32.mrb[6].mxu1 }
 0x1d6   : > { %11822 = vst [vmem:[#allocation29_spill] sm:$0xff] %v9942_v59  ;;  %v9944_v60 = vpop.f32.mrb[7].mxu1 }
 0x1d7   : > { %11823 = vst [vmem:[#allocation30_spill] sm:$0xff] %v9944_v60 }
 0x1fb   : > { %v1472_v63 = vpop.f32.mrb[0].mxu0 }
 0x1fc   : > { %v1474_v1 = vpop.f32.mrb[1].mxu0  ;;  %v7495_v9 = vadd.f32 %v1472_v63, %v9954_v6 }
 0x1fd   : > { %v1476_v4 = vpop.f32.mrb[2].mxu0  ;;  %v7496_v10 = vadd.f32 %v1474_v1, %v9957_v7 }
 0x1fe   : > { %v1478_v5 = vpop.f32.mrb[3].mxu0  ;;  %v7097_v12 = vmul.f32 -1.442695, %v7495_v9  ;;  %v7497_v13 = vadd.f32 %v1476_v4, %v9954_v6  ;;  %v9968_v9 = vrot.slane %v841_v2, %v9963_v33 }
 0x1ff   : > { %v7498_v11 = vadd.f32 %v1478_v5, %v9957_v7  ;;  %v7099_v14 = vmul.f32 -1.442695, %v7496_v10  ;;  %v9971_v10 = vrot.slane %v841_v2, %v9965_v49 }
 0x200   : > { %8264 = vpow2.f32 %v7097_v12  ;;  %v7098_v19 = vmul.f32 -1.442695, %v7497_v13 }
 0x201   : > { %v7100_v15 = vmul.f32 -1.442695, %v7498_v11  ;;  %8266 = vpow2.f32 %v7099_v14 }
 0x203   : > { %8268 = vpow2.f32 %v7100_v15 }
 0x204   : > { %8270 = vpow2.f32 %v7098_v19 }
 0x20a   : > { %v8265_v25 = vpop.eup %8264 }
 0x20b   : > { %v8267_v41 = vpop.eup %8266  ;;  %v1538_v63 = vadd.f32 1.0, %v8265_v25 }
 0x20c   : > { %v1550_v5 = vadd.f32 1.0, %v8267_v41 }
 0x20d   : > { %v8269_v61 = vpop.eup %8268  ;;  %8272 = vrcp.f32 %v1538_v63 }
 0x20e   : > { %v8271_v1 = vpop.eup %8270  ;;  %v1551_v4 = vadd.f32 1.0, %v8269_v61  ;;  %8274 = vrcp.f32 %v1550_v5 }
 0x20f   : > { %v1539_v11 = vadd.f32 1.0, %v8271_v1 }
 0x210   : > { %8276 = vrcp.f32 %v1551_v4 }
 0x217   : > { %v8273_v63 = vpop.eup %8272 }
 0x218   : > { %v8275_v1 = vpop.eup %8274 }
 0x219   : > { %v1570_v8 = vmul.f32 0.0, %v8275_v1 }
 0x21a   : > { %v8277_v5 = vpop.eup %8276 }
 0x21b   : > { %v1515_v12 = vpop.f32.mrb[8].mxu1  ;;  %v1571_v49 = vmul.f32 0.0, %v8277_v5 }
 0x21c   : > { %v7535_v13 = vadd.f32 %v1515_v12, %v9968_v9  ;;  %v1517_v14 = vpop.f32.mrb[9].mxu1 }
 0x21d   : > { %v7536_v62 = vadd.f32 %v1517_v14, %v9971_v10  ;;  %v1519_v15 = vpop.f32.mrb[10].mxu1 }
 0x21e   : > { %8278 = vtanh.f32 %v7535_v13  ;;  %v7537_v19 = vadd.f32 %v1519_v15, %v9968_v9  ;;  %v1521_v25 = vpop.f32.mrb[11].mxu1 }
 0x21f   : > { %8280 = vrcp.f32 %v1539_v11  ;;  %v7101_v41 = vmul.f32 -1.442695, %v7536_v62  ;;  %v7538_v2 = vadd.f32 %v1521_v25, %v9971_v10 }
 0x220   : > { %8282 = vtanh.f32 %v7537_v19 }
 0x221   : > { %8284 = vpow2.f32 %v7101_v41  ;;  %v7102_v61 = vmul.f32 -1.442695, %v7538_v2 }
 0x223   : > { %8286 = vpow2.f32 %v7102_v61 }
 0x228   : > { %v8279_v12 = vpop.eup %8278 }
 0x229   : > { %v8281_v4 = vpop.eup %8280  ;;  %v1572_v14 = vmul.f32 %v8279_v12, %v8273_v63 }
 0x22a   : > { %v8283_v33 = vpop.eup %8282 }
 0x22b   : > { %v8285_v13 = vpop.eup %8284  ;;  %v9977_v15 = vadd.f32 %v1572_v14, %v1570_v8  ;;  %v1573_v11 = vmul.f32 %v8283_v33, %v8281_v4 }
 0x22c   : > { %v1564_v62 = vadd.f32 1.0, %v8285_v13 }
 0x22d   : > { %v8287_v3 = vpop.eup %8286  ;;  %8288 = vtanh.f32 %v9977_v15  ;;  %v9980_v19 = vadd.f32 %v1573_v11, %v1571_v49 }
 0x22e   : > { %8290 = vrcp.f32 %v1564_v62  ;;  %v1565_v25 = vadd.f32 1.0, %v8287_v3  ;;  %v11829_v3 = vmov 0  }
 0x22f   : > { %8292 = vtanh.f32 %v9980_v19 }
 0x230   : > { %8294 = vrcp.f32 %v1565_v25 }
 0x237   : > { %v8289_v41 = vpop.eup %8288 }
 0x238   : > { %v8291_v2 = vpop.eup %8290 }
 0x239   : > { %v8293_v61 = vpop.eup %8292  ;;  %v1578_v1 = vmul.f32 %v8291_v2, %v8289_v41 }
 0x23a   : > { %v8295_v63 = vpop.eup %8294 }
 0x23b   : > { %v1579_v5 = vmul.f32 %v8295_v63, %v8293_v61 }
 0x23d   : > { %v9983_v8 = vpack.c.bf16 %v1579_v5, %v1578_v1 }
 0x23f   : > { %1624 = vmatmul.mubr.bf16.vlgmr.msra.gmra.mrb[4].mxu0 %v9983_v8  ;;  %1667 = vmatmul.mubr.bf16.vlgmr.msra.gmra.mrb[12].mxu1 %v9983_v8 }
 0x240   : > { %1746 = vmatpush1.bf16.msra.mxu0 %v9762_v18  ;;  %1789 = vmatpush1.bf16.msra.mxu1 %v9789_v26 }
 0x241   : > { %1747 = vmatprep.subr.bf16.mxu0 %v9770_v20  ;;  %1790 = vmatprep.subr.bf16.mxu1 %v9791_v27 }
 0x242   : > { %1777 = vmatprep.mubr.bf16.mxu0 %v11829_v3  ;;  %1820 = vmatprep.mubr.bf16.mxu1 %v11829_v3 }
 0x244   : > { %1748 = vmatpush1.bf16.msra.mxu0 %v9772_v21  ;;  %1791 = vmatpush1.bf16.msra.mxu1 %v9803_v30 }
 0x245   : > { %1749 = vmatprep.subr.bf16.mxu0 %v9775_v22  ;;  %1792 = vmatprep.subr.bf16.mxu1 %v9807_v31 }
 0x248   : > { %1750 = vmatpush1.bf16.msra.mxu0 %v9783_v23  ;;  %1793 = vmatpush1.bf16.msra.mxu1 %v9815_v34 }
 0x249   : > { %1751 = vmatprep.subr.bf16.mxu0 %v9786_v24  ;;  %1794 = vmatprep.subr.bf16.mxu1 %v9823_v37 }
 0x24c   : > { %1752 = vmatpush1.bf16.msra.mxu0 %v9795_v28  ;;  %1795 = vmatpush1.bf16.msra.mxu1 %v9833_v40 }
 0x24d   : > { %1753 = vmatprep.subr.bf16.mxu0 %v9799_v29  ;;  %1796 = vmatprep.subr.bf16.mxu1 %v9838_v42 }
 0x250   : > { %1754 = vmatpush1.bf16.msra.mxu0 %v9810_v32  ;;  %1797 = vmatpush1.bf16.msra.mxu1 %v9845_v44 }
 0x251   : > { %1755 = vmatprep.subr.bf16.mxu0 %v9817_v35  ;;  %1798 = vmatprep.subr.bf16.mxu1 %v9849_v46 }
 0x254   : > { %1756 = vmatpush1.bf16.msra.mxu0 %v9820_v36  ;;  %1799 = vmatpush1.bf16.msra.mxu1 %v9856_v47 }
 0x255   : > { %1757 = vmatprep.subr.bf16.mxu0 %v9827_v38  ;;  %1800 = vmatprep.subr.bf16.mxu1 %v9860_v48 }
 0x258   : > { %1758 = vmatpush1.bf16.msra.mxu0 %v9831_v39  ;;  %1801 = vmatpush1.bf16.msra.mxu1 %v9867_v50 }
 0x259   : > { %1759 = vmatprep.subr.bf16.mxu0 %v9843_v43  ;;  %1802 = vmatprep.subr.bf16.mxu1 %v9870_v51 }
 0x25c   : > { %1760 = vmatpush1.bf16.msra.mxu0 %v9847_v45  ;;  %1803 = vmatpush1.bf16.msra.mxu1 %v9876_v52 }
 0x25d   : > { %1899 = vmatprep.subr.bf16.mxu0 %v9758_v16  ;;  %1942 = vmatprep.subr.bf16.mxu1 %v9760_v17 }
 0x312   : > { %v1625_v18 = vpop.f32.mrb[4].mxu0  ;;  %v1668_v20 = vpop.f32.mrb[12].mxu1 }
 0x313   : > { %v7499_v21 = vadd.f32 %v1625_v18, %v9954_v6  ;;  %v1627_v22 = vpop.f32.mrb[5].mxu0  ;;  %v1670_v23 = vpop.f32.mrb[13].mxu1  ;;  %v7539_v25 = vadd.f32 %v1668_v20, %v9968_v9 }
 0x314   : > { %v7500_v24 = vadd.f32 %v1627_v22, %v9957_v7  ;;  %v1629_v28 = vpop.f32.mrb[6].mxu0  ;;  %v1672_v33 = vpop.f32.mrb[14].mxu1  ;;  %v7540_v62 = vadd.f32 %v1670_v23, %v9971_v10 }
 0x315   : > { %v7103_v49 = vmul.f32 -1.442695, %v7499_v21  ;;  %v7501_v12 = vadd.f32 %v1629_v28, %v9954_v6  ;;  %v1631_v4 = vpop.f32.mrb[7].mxu0  ;;  %v1674_v14 = vpop.f32.mrb[15].mxu1  ;;  %v7541_v61 = vadd.f32 %v1672_v33, %v9968_v9 }
 0x316   : > { %v7105_v13 = vmul.f32 -1.442695, %v7500_v24  ;;  %v7502_v16 = vadd.f32 %v1631_v4, %v9957_v7  ;;  %v7107_v41 = vmul.f32 -1.442695, %v7540_v62  ;;  %v7542_v2 = vadd.f32 %v1674_v14, %v9971_v10 }
 0x317   : > { %8296 = vpow2.f32 %v7103_v49  ;;  %v7104_v17 = vmul.f32 -1.442695, %v7501_v12 }
 0x318   : > { %8298 = vpow2.f32 %v7105_v13  ;;  %v7106_v11 = vmul.f32 -1.442695, %v7502_v16  ;;  %v7108_v18 = vmul.f32 -1.442695, %v7542_v2 }
 0x319   : > { %8300 = vpow2.f32 %v7104_v17 }
 0x31a   : > { %8302 = vpow2.f32 %v7106_v11 }
 0x31b   : > { %8304 = vtanh.f32 %v7539_v25 }
 0x31c   : > { %8306 = vpow2.f32 %v7107_v41 }
 0x31d   : > { %8308 = vtanh.f32 %v7541_v61 }
 0x321   : > { %v8297_v63 = vpop.eup %8296 }
 0x322   : > { %v8299_v1 = vpop.eup %8298  ;;  %v1691_v5 = vadd.f32 1.0, %v8297_v63 }
 0x323   : > { %v1703_v21 = vadd.f32 1.0, %v8299_v1  ;;  %v8301_v22 = vpop.eup %8300 }
 0x324   : > { %8310 = vrcp.f32 %v1691_v5  ;;  %v1692_v23 = vadd.f32 1.0, %v8301_v22  ;;  %v8303_v24 = vpop.eup %8302 }
 0x325   : > { %8312 = vrcp.f32 %v1703_v21  ;;  %v1704_v20 = vadd.f32 1.0, %v8303_v24  ;;  %v8305_v28 = vpop.eup %8304  ;;  %v10045_v24 = vld [vmem:[#allocation8 + $0x24] ss:$16 sps:$4 sm:$0xff]  }
 0x326   : > { %8314 = vpow2.f32 %v7108_v18  ;;  %v8307_v49 = vpop.eup %8306 }
 0x327   : > { %8316 = vrcp.f32 %v1692_v23  ;;  %v8309_v33 = vpop.eup %8308  ;;  %v1717_v11 = vadd.f32 1.0, %v8307_v49  ;;  %v10067_v49 = vld [vmem:[#allocation8 + $0x60] ss:$16 sps:$4 sm:$0xff]  }
 0x328   : > { %8318 = vrcp.f32 %v1704_v20  ;;  %v10051_v20 = vld [vmem:[#allocation8 + $0x20] ss:$16 sps:$4 sm:$0xff]  }
 0x329   : > { %8320 = vrcp.f32 %v1717_v11 }
 0x32e   : > { %v8311_v12 = vpop.eup %8310 }
 0x32f   : > { %v8313_v4 = vpop.eup %8312  ;;  %v1725_v14 = vmul.f32 %v8311_v12, %v8305_v28  ;;  %v10055_v28 = vld [vmem:[#allocation8 + $0x44] ss:$16 sps:$4 sm:$0xff]  }
 0x330   : > { %v8315_v13 = vpop.eup %8314  ;;  %v1723_v16 = vmul.f32 %v8313_v4, %v9977_v15 }
 0x331   : > { %v8317_v17 = vpop.eup %8316  ;;  %v1718_v2 = vadd.f32 1.0, %v8315_v13 }
 0x332   : > { %v10030_v62 = vadd.f32 %v1725_v14, %v1723_v16  ;;  %v1726_v25 = vmul.f32 %v8317_v17, %v8309_v33  ;;  %v8319_v41 = vpop.eup %8318 }
 0x333   : > { %v1724_v61 = vmul.f32 %v8319_v41, %v9980_v19  ;;  %v8321_v1 = vpop.eup %8320  ;;  %v10041_v19 = vld [vmem:[#allocation8] ss:$16 sps:$4 sm:$0xff]  }
 0x334   : > { %8322 = vtanh.f32 %v10030_v62 }
 0x335   : > { %v10034_v63 = vadd.f32 %v1726_v25, %v1724_v61  ;;  %8324 = vrcp.f32 %v1718_v2 }
 0x337   : > { %8326 = vtanh.f32 %v10034_v63 }
 0x33e   : > { %v8323_v5 = vpop.eup %8322 }
 0x33f   : > { %v8325_v15 = vpop.eup %8324  ;;  %v1731_v21 = vmul.f32 %v8323_v5, %v8321_v1 }
 0x341   : > { %v8327_v18 = vpop.eup %8326 }
 0x342   : > { %v1732_v22 = vmul.f32 %v8327_v18, %v8325_v15 }
 0x344   : > { %v10037_v23 = vpack.c.bf16 %v1732_v22, %v1731_v21 }
 0x346   : > { %1778 = vmatmul.mubr.bf16.vlgmr.msra.gmra.mrb[8].mxu0 %v10037_v23  ;;  %1821 = vmatmul.mubr.bf16.vlgmr.msra.gmra.mrb[16].mxu1 %v10037_v23 }
 0x347   : > { %1900 = vmatpush1.bf16.msra.mxu0 %v10041_v19  ;;  %1943 = vmatpush1.bf16.msra.mxu1 %v9789_v26  ;;  %v10059_v26 = vld [vmem:[#allocation8 + $0x40] ss:$16 sps:$4 sm:$0xff]  }
 0x348   : > { %1901 = vmatprep.subr.bf16.mxu0 %v10045_v24  ;;  %1944 = vmatprep.subr.bf16.mxu1 %v9791_v27  ;;  %v10063_v27 = vld [vmem:[#allocation8 + $0x64] ss:$16 sps:$4 sm:$0xff]  }
 0x349   : > { %1931 = vmatprep.mubr.bf16.mxu0 %v11829_v3  ;;  %1974 = vmatprep.mubr.bf16.mxu1 %v11829_v3 }
 0x34b   : > { %1902 = vmatpush1.bf16.msra.mxu0 %v10051_v20  ;;  %1945 = vmatpush1.bf16.msra.mxu1 %v9803_v30  ;;  %v10090_v30 = vld [vmem:[#allocation8 + $0xc] ss:$16 sps:$4 sm:$0xff]  }
 0x34c   : > { %1903 = vmatprep.subr.bf16.mxu0 %v10055_v28  ;;  %1946 = vmatprep.subr.bf16.mxu1 %v9807_v31 }
 0x34f   : > { %1904 = vmatpush1.bf16.msra.mxu0 %v10059_v26  ;;  %1947 = vmatpush1.bf16.msra.mxu1 %v9815_v34 }
 0x350   : > { %1905 = vmatprep.subr.bf16.mxu0 %v10063_v27  ;;  %1948 = vmatprep.subr.bf16.mxu1 %v9823_v37 }
 0x353   : > { %1906 = vmatpush1.bf16.msra.mxu0 %v10067_v49  ;;  %1949 = vmatpush1.bf16.msra.mxu1 %v9833_v40 }
 0x354   : > { %1907 = vmatprep.subr.bf16.mxu0 %v9799_v29  ;;  %1950 = vmatprep.subr.bf16.mxu1 %v9838_v42  ;;  %v10087_v29 = vld [vmem:[#allocation8 + $0x4] ss:$16 sps:$4 sm:$0xff]  }
 0x357   : > { %1908 = vmatpush1.bf16.msra.mxu0 %v9810_v32  ;;  %1951 = vmatpush1.bf16.msra.mxu1 %v9845_v44 }
 0x358   : > { %1909 = vmatprep.subr.bf16.mxu0 %v9817_v35  ;;  %1952 = vmatprep.subr.bf16.mxu1 %v9849_v46 }
 0x35b   : > { %1910 = vmatpush1.bf16.msra.mxu0 %v9820_v36  ;;  %1953 = vmatpush1.bf16.msra.mxu1 %v9856_v47 }
 0x35c   : > { %1911 = vmatprep.subr.bf16.mxu0 %v9827_v38  ;;  %1954 = vmatprep.subr.bf16.mxu1 %v9860_v48 }
 0x35f   : > { %1912 = vmatpush1.bf16.msra.mxu0 %v9831_v39  ;;  %1955 = vmatpush1.bf16.msra.mxu1 %v9867_v50 }
 0x360   : > { %1913 = vmatprep.subr.bf16.mxu0 %v9843_v43  ;;  %1956 = vmatprep.subr.bf16.mxu1 %v9870_v51 }
 0x363   : > { %1914 = vmatpush1.bf16.msra.mxu0 %v9847_v45  ;;  %1957 = vmatpush1.bf16.msra.mxu1 %v9876_v52 }
 0x364   : > { %2053 = vmatprep.subr.bf16.mxu0 %v10087_v29  ;;  %2096 = vmatprep.subr.bf16.mxu1 %v10090_v30 }
 0x419   : > { %v1779_v31 = vpop.f32.mrb[8].mxu0  ;;  %v1822_v32 = vpop.f32.mrb[16].mxu1 }
 0x41a   : > { %v7503_v34 = vadd.f32 %v1779_v31, %v9954_v6  ;;  %v1781_v35 = vpop.f32.mrb[9].mxu0  ;;  %v1824_v36 = vpop.f32.mrb[17].mxu1  ;;  %v7543_v51 = vadd.f32 %v1822_v32, %v9968_v9 }
 0x41b   : > { %v7504_v37 = vadd.f32 %v1781_v35, %v9957_v7  ;;  %v1783_v38 = vpop.f32.mrb[10].mxu0  ;;  %v1826_v39 = vpop.f32.mrb[18].mxu1  ;;  %v7544_v50 = vadd.f32 %v1824_v36, %v9971_v10 }
 0x41c   : > { %v7109_v40 = vmul.f32 -1.442695, %v7503_v34  ;;  %v7505_v42 = vadd.f32 %v1783_v38, %v9954_v6  ;;  %v1785_v43 = vpop.f32.mrb[11].mxu0  ;;  %v1828_v44 = vpop.f32.mrb[19].mxu1  ;;  %v7545_v12 = vadd.f32 %v1826_v39, %v9968_v9 }
 0x41d   : > { %v7111_v45 = vmul.f32 -1.442695, %v7504_v37  ;;  %v7506_v46 = vadd.f32 %v1785_v43, %v9957_v7  ;;  %v7113_v52 = vmul.f32 -1.442695, %v7544_v50  ;;  %v7546_v33 = vadd.f32 %v1828_v44, %v9971_v10  ;;  %v10124_v50 = vld [vmem:[#allocation8 + $0x28] ss:$16 sps:$4 sm:$0xff]  }
 0x41e   : > { %8328 = vpow2.f32 %v7109_v40  ;;  %v7110_v47 = vmul.f32 -1.442695, %v7505_v42 }
 0x41f   : > { %8330 = vpow2.f32 %v7111_v45  ;;  %v7112_v48 = vmul.f32 -1.442695, %v7506_v46  ;;  %v7114_v16 = vmul.f32 -1.442695, %v7546_v33  ;;  %v10136_v33 = vld [vmem:[#allocation8 + $0x6c] ss:$16 sps:$4 sm:$0xff]  }
 0x420   : > { %8332 = vpow2.f32 %v7110_v47 }
 0x421   : > { %8334 = vpow2.f32 %v7112_v48  ;;  %v10118_v48 = vld [vmem:[#allocation8 + $0x2c] ss:$16 sps:$4 sm:$0xff]  }
 0x422   : > { %8336 = vtanh.f32 %v7543_v51  ;;  %v10128_v51 = vld [vmem:[#allocation8 + $0x4c] ss:$16 sps:$4 sm:$0xff]  }
 0x423   : > { %8338 = vpow2.f32 %v7113_v52  ;;  %v10132_v52 = vld [vmem:[#allocation8 + $0x48] ss:$16 sps:$4 sm:$0xff]  }
 0x424   : > { %8340 = vtanh.f32 %v7545_v12  ;;  %v10140_v12 = vld [vmem:[#allocation8 + $0x68] ss:$16 sps:$4 sm:$0xff]  }
 0x428   : > { %v8329_v4 = vpop.eup %8328 }
 0x429   : > { %v8331_v14 = vpop.eup %8330  ;;  %v1845_v13 = vadd.f32 1.0, %v8329_v4  ;;  %v10143_v4 = vld [vmem:[#allocation8 + $0x84] ss:$16 sps:$4 sm:$0xff]  }
 0x42a   : > { %v1857_v17 = vadd.f32 1.0, %v8331_v14  ;;  %v8333_v11 = vpop.eup %8332  ;;  %v10146_v14 = vld [vmem:[#allocation8 + $0x8c] ss:$16 sps:$4 sm:$0xff]  }
 0x42b   : > { %8342 = vrcp.f32 %v1845_v13  ;;  %v1846_v25 = vadd.f32 1.0, %v8333_v11  ;;  %v8335_v41 = vpop.eup %8334  ;;  %v10149_v13 = vld [vmem:[#allocation8 + $0x80] ss:$16 sps:$4 sm:$0xff]   ;;  %v10158_v11 = vld [vmem:[#allocation8 + $0xac] ss:$16 sps:$4 sm:$0xff]  }
 0x42c   : > { %8344 = vrcp.f32 %v1857_v17  ;;  %v1858_v2 = vadd.f32 1.0, %v8335_v41  ;;  %v8337_v61 = vpop.eup %8336  ;;  %v10155_v17 = vld [vmem:[#allocation8 + $0xa4] ss:$16 sps:$4 sm:$0xff]   ;;  %v10164_v41 = vld [vmem:[#allocation8 + $0xa8] ss:$16 sps:$4 sm:$0xff]  }
 0x42d   : > { %8346 = vpow2.f32 %v7114_v16  ;;  %v8339_v1 = vpop.eup %8338  ;;  %v10152_v16 = vld [vmem:[#allocation8 + $0x88] ss:$16 sps:$4 sm:$0xff]  }
 0x42e   : > { %8348 = vrcp.f32 %v1846_v25  ;;  %v8341_v5 = vpop.eup %8340  ;;  %v1871_v34 = vadd.f32 1.0, %v8339_v1  ;;  %v10161_v25 = vld [vmem:[#allocation8 + $0xa0] ss:$16 sps:$4 sm:$0xff]  }
 0x42f   : > { %8350 = vrcp.f32 %v1858_v2  ;;  %v10167_v2 = vld [vmem:[#allocation8 + $0xc4] ss:$16 sps:$4 sm:$0xff]   ;;  %v10173_v1 = vld [vmem:[#allocation8 + $0xc0] ss:$16 sps:$4 sm:$0xff]  }
 0x430   : > { %8352 = vrcp.f32 %v1871_v34 }
 0x435   : > { %v8343_v15 = vpop.eup %8342 }
 0x436   : > { %v8345_v18 = vpop.eup %8344  ;;  %v1879_v21 = vmul.f32 %v8343_v15, %v8337_v61  ;;  %v10170_v61 = vld [vmem:[#allocation8 + $0xcc] ss:$16 sps:$4 sm:$0xff]   ;;  %v10179_v15 = vld [vmem:[#allocation8 + $0xe4] ss:$16 sps:$4 sm:$0xff]  }
 0x437   : > { %v8347_v22 = vpop.eup %8346  ;;  %v1877_v31 = vmul.f32 %v8345_v18, %v10030_v62  ;;  %v10182_v18 = vld [vmem:[#allocation8 + $0xec] ss:$16 sps:$4 sm:$0xff]  }
 0x438   : > { %v8349_v32 = vpop.eup %8348  ;;  %v1872_v38 = vadd.f32 1.0, %v8347_v22  ;;  %v10188_v22 = vld [vmem:[#allocation8 + $0xe8] ss:$16 sps:$4 sm:$0xff]  }
 0x439   : > { %v10102_v35 = vadd.f32 %v1879_v21, %v1877_v31  ;;  %v1880_v36 = vmul.f32 %v8349_v32, %v8341_v5  ;;  %v8351_v37 = vpop.eup %8350  ;;  %v10176_v5 = vld [vmem:[#allocation8 + $0xc8] ss:$16 sps:$4 sm:$0xff]   ;;  %v10185_v21 = vld [vmem:[#allocation8 + $0xe0] ss:$16 sps:$4 sm:$0xff]  }
 0x43a   : > { %v1878_v39 = vmul.f32 %v8351_v37, %v10034_v63  ;;  %v8353_v42 = vpop.eup %8352  ;;  %v10114_v63 = vld [vmem:[#allocation8 + $0x8] ss:$16 sps:$4 sm:$0xff]  }
 0x43b   : > { %8354 = vtanh.f32 %v10102_v35 }
 0x43c   : > { %v10106_v40 = vadd.f32 %v1880_v36, %v1878_v39  ;;  %8356 = vrcp.f32 %v1872_v38 }
 0x43e   : > { %8358 = vtanh.f32 %v10106_v40 }
 0x445   : > { %v8355_v43 = vpop.eup %8354 }
 0x446   : > { %v8357_v62 = vpop.eup %8356  ;;  %v1885_v45 = vmul.f32 %v8355_v43, %v8353_v42 }
 0x448   : > { %v8359_v44 = vpop.eup %8358 }
 0x449   : > { %v1886_v46 = vmul.f32 %v8359_v44, %v8357_v62 }
 0x44b   : > { %v10109_v47 = vpack.c.bf16 %v1886_v46, %v1885_v45 }
 0x44d   : > { %11830 = vst [vmem:[#allocation35_spill] sm:$0xff] %v10109_v47  ;;  %1932 = vmatmul.mubr.bf16.vlgmr.msra.gmra.mrb[12].mxu0 %v10109_v47  ;;  %1975 = vmatmul.mubr.bf16.vlgmr.msra.gmra.mrb[20].mxu1 %v10109_v47 }
 0x44e   : > { %2054 = vmatpush1.bf16.msra.mxu0 %v10041_v19  ;;  %2097 = vmatpush1.bf16.msra.mxu1 %v10114_v63 }
 0x44f   : > { %2055 = vmatprep.subr.bf16.mxu0 %v10045_v24  ;;  %2098 = vmatprep.subr.bf16.mxu1 %v10118_v48 }
 0x450   : > { %2085 = vmatprep.mubr.bf16.mxu0 %v11829_v3  ;;  %2128 = vmatprep.mubr.bf16.mxu1 %v11829_v3 }
 0x452   : > { %2056 = vmatpush1.bf16.msra.mxu0 %v10051_v20  ;;  %2099 = vmatpush1.bf16.msra.mxu1 %v10124_v50 }
 0x453   : > { %2057 = vmatprep.subr.bf16.mxu0 %v10055_v28  ;;  %2100 = vmatprep.subr.bf16.mxu1 %v10128_v51 }
 0x456   : > { %2058 = vmatpush1.bf16.msra.mxu0 %v10059_v26  ;;  %2101 = vmatpush1.bf16.msra.mxu1 %v10132_v52 }
 0x457   : > { %2059 = vmatprep.subr.bf16.mxu0 %v10063_v27  ;;  %2102 = vmatprep.subr.bf16.mxu1 %v10136_v33 }
 0x45a   : > { %2060 = vmatpush1.bf16.msra.mxu0 %v10067_v49  ;;  %2103 = vmatpush1.bf16.msra.mxu1 %v10140_v12 }
 0x45b   : > { %2061 = vmatprep.subr.bf16.mxu0 %v10143_v4  ;;  %2104 = vmatprep.subr.bf16.mxu1 %v10146_v14 }
 0x45e   : > { %2062 = vmatpush1.bf16.msra.mxu0 %v10149_v13  ;;  %2105 = vmatpush1.bf16.msra.mxu1 %v10152_v16 }
 0x45f   : > { %2063 = vmatprep.subr.bf16.mxu0 %v10155_v17  ;;  %2106 = vmatprep.subr.bf16.mxu1 %v10158_v11 }
 0x462   : > { %2064 = vmatpush1.bf16.msra.mxu0 %v10161_v25  ;;  %2107 = vmatpush1.bf16.msra.mxu1 %v10164_v41 }
 0x463   : > { %2065 = vmatprep.subr.bf16.mxu0 %v10167_v2  ;;  %2108 = vmatprep.subr.bf16.mxu1 %v10170_v61 }
 0x466   : > { %2066 = vmatpush1.bf16.msra.mxu0 %v10173_v1  ;;  %2109 = vmatpush1.bf16.msra.mxu1 %v10176_v5 }
 0x467   : > { %2067 = vmatprep.subr.bf16.mxu0 %v10179_v15  ;;  %2110 = vmatprep.subr.bf16.mxu1 %v10182_v18 }
 0x46a   : > { %2068 = vmatpush1.bf16.msra.mxu0 %v10185_v21  ;;  %2111 = vmatpush1.bf16.msra.mxu1 %v10188_v22 }
 0x46b   : > { %2207 = vmatprep.subr.bf16.mxu0 %v10087_v29  ;;  %2250 = vmatprep.subr.bf16.mxu1 %v10090_v30 }
 0x520   : > { %v1933_v31 = vpop.f32.mrb[12].mxu0  ;;  %v1976_v32 = vpop.f32.mrb[20].mxu1 }
 0x521   : > { %v7507_v34 = vadd.f32 %v1933_v31, %v9954_v6  ;;  %v1935_v36 = vpop.f32.mrb[13].mxu0  ;;  %v1978_v37 = vpop.f32.mrb[21].mxu1 }
 0x522   : > { %v7508_v38 = vadd.f32 %v1935_v36, %v9957_v7  ;;  %v1937_v39 = vpop.f32.mrb[14].mxu0  ;;  %v1980_v42 = vpop.f32.mrb[22].mxu1  ;;  %v7548_v31 = vadd.f32 %v1978_v37, %v9971_v10  ;;  %v7547_v36 = vadd.f32 %v1976_v32, %v9968_v9 }
 0x523   : > { %v7115_v43 = vmul.f32 -1.442695, %v7507_v34  ;;  %v7509_v62 = vadd.f32 %v1937_v39, %v9954_v6  ;;  %v1939_v44 = vpop.f32.mrb[15].mxu0  ;;  %v1982_v45 = vpop.f32.mrb[23].mxu1  ;;  %v7549_v39 = vadd.f32 %v1980_v42, %v9968_v9 }
 0x524   : > { %v7117_v46 = vmul.f32 -1.442695, %v7508_v38  ;;  %v7510_v0 = vadd.f32 %v1939_v44, %v9957_v7  ;;  %v7119_v58 = vmul.f32 -1.442695, %v7548_v31  ;;  %v7550_v34 = vadd.f32 %v1982_v45, %v9971_v10 }
 0x525   : > { %8360 = vpow2.f32 %v7115_v43  ;;  %v7116_v60 = vmul.f32 -1.442695, %v7509_v62 }
 0x526   : > { %8362 = vpow2.f32 %v7117_v46  ;;  %v7118_v59 = vmul.f32 -1.442695, %v7510_v0  ;;  %v7120_v43 = vmul.f32 -1.442695, %v7550_v34 }
 0x527   : > { %8364 = vpow2.f32 %v7116_v60 }
 0x528   : > { %8366 = vpow2.f32 %v7118_v59 }
 0x529   : > { %8368 = vtanh.f32 %v7547_v36 }
 0x52a   : > { %8370 = vpow2.f32 %v7119_v58 }
 0x52b   : > { %8372 = vtanh.f32 %v7549_v39 }
 0x52f   : > { %v8361_v57 = vpop.eup %8360 }
 0x530   : > { %v8363_v38 = vpop.eup %8362  ;;  %v1999_v47 = vadd.f32 1.0, %v8361_v57 }
 0x531   : > { %v2011_v62 = vadd.f32 1.0, %v8363_v38  ;;  %v8365_v0 = vpop.eup %8364 }
 0x532   : > { %8374 = vrcp.f32 %v1999_v47  ;;  %v2000_v60 = vadd.f32 1.0, %v8365_v0  ;;  %v8367_v59 = vpop.eup %8366 }
 0x533   : > { %8376 = vrcp.f32 %v2011_v62  ;;  %v2012_v32 = vadd.f32 1.0, %v8367_v59  ;;  %v8369_v37 = vpop.eup %8368 }
 0x534   : > { %8378 = vpow2.f32 %v7120_v43  ;;  %v8371_v44 = vpop.eup %8370 }
 0x535   : > { %8380 = vrcp.f32 %v2000_v60  ;;  %v8373_v42 = vpop.eup %8372  ;;  %v2025_v34 = vadd.f32 1.0, %v8371_v44 }
 0x536   : > { %8382 = vrcp.f32 %v2012_v32 }
 0x537   : > { %8384 = vrcp.f32 %v2025_v34 }
 0x53c   : > { %v8375_v45 = vpop.eup %8374 }
 0x53d   : > { %v8377_v46 = vpop.eup %8376  ;;  %v2033_v31 = vmul.f32 %v8375_v45, %v8369_v37 }
 0x53e   : > { %v8379_v57 = vpop.eup %8378  ;;  %v2031_v58 = vmul.f32 %v8377_v46, %v10102_v35 }
 0x53f   : > { %v8381_v36 = vpop.eup %8380  ;;  %v2026_v62 = vadd.f32 1.0, %v8379_v57 }
 0x540   : > { %v10202_v39 = vadd.f32 %v2033_v31, %v2031_v58  ;;  %v2034_v47 = vmul.f32 %v8381_v36, %v8373_v42  ;;  %v8383_v38 = vpop.eup %8382 }
 0x541   : > { %v2032_v43 = vmul.f32 %v8383_v38, %v10106_v40  ;;  %v8385_v60 = vpop.eup %8384 }
 0x542   : > { %8386 = vtanh.f32 %v10202_v39 }
 0x543   : > { %v10206_v0 = vadd.f32 %v2034_v47, %v2032_v43  ;;  %8388 = vrcp.f32 %v2026_v62 }
 0x545   : > { %8390 = vtanh.f32 %v10206_v0 }
 0x54c   : > { %v8387_v59 = vpop.eup %8386 }
 0x54d   : > { %v8389_v35 = vpop.eup %8388  ;;  %v2039_v37 = vmul.f32 %v8387_v59, %v8385_v60 }
 0x54f   : > { %v8391_v32 = vpop.eup %8390 }
 0x550   : > { %v2040_v44 = vmul.f32 %v8391_v32, %v8389_v35 }
 0x552   : > { %v10209_v45 = vpack.c.bf16 %v2040_v44, %v2039_v37 }
 0x554   : > { %11831 = vst [vmem:[#allocation36_spill] sm:$0xff] %v10209_v45  ;;  %2086 = vmatmul.mubr.bf16.vlgmr.msra.gmra.mrb[16].mxu0 %v10209_v45  ;;  %2129 = vmatmul.mubr.bf16.vlgmr.msra.gmra.mrb[24].mxu1 %v10209_v45 }
 0x555   : > { %2208 = vmatpush1.bf16.msra.mxu0 %v10041_v19  ;;  %2251 = vmatpush1.bf16.msra.mxu1 %v10114_v63 }
 0x556   : > { %2209 = vmatprep.subr.bf16.mxu0 %v10045_v24  ;;  %2252 = vmatprep.subr.bf16.mxu1 %v10118_v48 }
 0x557   : > { %2239 = vmatprep.mubr.bf16.mxu0 %v11829_v3  ;;  %2282 = vmatprep.mubr.bf16.mxu1 %v11829_v3 }
 0x559   : > { %2210 = vmatpush1.bf16.msra.mxu0 %v10051_v20  ;;  %2253 = vmatpush1.bf16.msra.mxu1 %v10124_v50 }
 0x55a   : > { %2211 = vmatprep.subr.bf16.mxu0 %v10055_v28  ;;  %2254 = vmatprep.subr.bf16.mxu1 %v10128_v51 }
 0x55d   : > { %2212 = vmatpush1.bf16.msra.mxu0 %v10059_v26  ;;  %2255 = vmatpush1.bf16.msra.mxu1 %v10132_v52 }
 0x55e   : > { %2213 = vmatprep.subr.bf16.mxu0 %v10063_v27  ;;  %2256 = vmatprep.subr.bf16.mxu1 %v10136_v33 }
 0x561   : > { %2214 = vmatpush1.bf16.msra.mxu0 %v10067_v49  ;;  %2257 = vmatpush1.bf16.msra.mxu1 %v10140_v12 }
 0x562   : > { %2215 = vmatprep.subr.bf16.mxu0 %v10143_v4  ;;  %2258 = vmatprep.subr.bf16.mxu1 %v10146_v14 }
 0x565   : > { %2216 = vmatpush1.bf16.msra.mxu0 %v10149_v13  ;;  %2259 = vmatpush1.bf16.msra.mxu1 %v10152_v16 }
 0x566   : > { %2217 = vmatprep.subr.bf16.mxu0 %v10155_v17  ;;  %2260 = vmatprep.subr.bf16.mxu1 %v10158_v11 }
 0x569   : > { %2218 = vmatpush1.bf16.msra.mxu0 %v10161_v25  ;;  %2261 = vmatpush1.bf16.msra.mxu1 %v10164_v41 }
 0x56a   : > { %2219 = vmatprep.subr.bf16.mxu0 %v10167_v2  ;;  %2262 = vmatprep.subr.bf16.mxu1 %v10170_v61 }
 0x56d   : > { %2220 = vmatpush1.bf16.msra.mxu0 %v10173_v1  ;;  %2263 = vmatpush1.bf16.msra.mxu1 %v10176_v5 }
 0x56e   : > { %2221 = vmatprep.subr.bf16.mxu0 %v10179_v15  ;;  %2264 = vmatprep.subr.bf16.mxu1 %v10182_v18 }
 0x571   : > { %2222 = vmatpush1.bf16.msra.mxu0 %v10185_v21  ;;  %2265 = vmatpush1.bf16.msra.mxu1 %v10188_v22 }
 0x572   : > { %2361 = vmatprep.subr.bf16.mxu0 %v10087_v29  ;;  %2404 = vmatprep.subr.bf16.mxu1 %v10090_v30 }
 0x627   : > { %v2087_v40 = vpop.f32.mrb[16].mxu0  ;;  %v2130_v42 = vpop.f32.mrb[24].mxu1 }
 0x628   : > { %v7511_v46 = vadd.f32 %v2087_v40, %v9954_v6  ;;  %v2089_v31 = vpop.f32.mrb[17].mxu0  ;;  %v2132_v57 = vpop.f32.mrb[25].mxu1  ;;  %v7551_v44 = vadd.f32 %v2130_v42, %v9968_v9 }
 0x629   : > { %v7512_v58 = vadd.f32 %v2089_v31, %v9957_v7  ;;  %v2091_v36 = vpop.f32.mrb[18].mxu0  ;;  %v2134_v34 = vpop.f32.mrb[26].mxu1  ;;  %v7552_v37 = vadd.f32 %v2132_v57, %v9971_v10 }
 0x62a   : > { %v7121_v47 = vmul.f32 -1.442695, %v7511_v46  ;;  %v7513_v38 = vadd.f32 %v2091_v36, %v9954_v6  ;;  %v2093_v62 = vpop.f32.mrb[19].mxu0  ;;  %v2136_v43 = vpop.f32.mrb[27].mxu1  ;;  %v7553_v31 = vadd.f32 %v2134_v34, %v9968_v9 }
 0x62b   : > { %v7123_v60 = vmul.f32 -1.442695, %v7512_v58  ;;  %v7514_v59 = vadd.f32 %v2093_v62, %v9957_v7  ;;  %v7125_v40 = vmul.f32 -1.442695, %v7552_v37  ;;  %v7554_v46 = vadd.f32 %v2136_v43, %v9971_v10 }
 0x62c   : > { %8392 = vpow2.f32 %v7121_v47  ;;  %v7122_v35 = vmul.f32 -1.442695, %v7513_v38 }
 0x62d   : > { %8394 = vpow2.f32 %v7123_v60  ;;  %v7124_v32 = vmul.f32 -1.442695, %v7514_v59  ;;  %v7126_v47 = vmul.f32 -1.442695, %v7554_v46 }
 0x62e   : > { %8396 = vpow2.f32 %v7122_v35 }
 0x62f   : > { %8398 = vpow2.f32 %v7124_v32 }
 0x630   : > { %8400 = vtanh.f32 %v7551_v44 }
 0x631   : > { %8402 = vpow2.f32 %v7125_v40 }
 0x632   : > { %8404 = vtanh.f32 %v7553_v31 }
 0x636   : > { %v8393_v36 = vpop.eup %8392 }
 0x637   : > { %v8395_v58 = vpop.eup %8394  ;;  %v2153_v45 = vadd.f32 1.0, %v8393_v36 }
 0x638   : > { %v2165_v38 = vadd.f32 1.0, %v8395_v58  ;;  %v8397_v62 = vpop.eup %8396 }
 0x639   : > { %8406 = vrcp.f32 %v2153_v45  ;;  %v2154_v57 = vadd.f32 1.0, %v8397_v62  ;;  %v8399_v60 = vpop.eup %8398 }
 0x63a   : > { %8408 = vrcp.f32 %v2165_v38  ;;  %v2166_v42 = vadd.f32 1.0, %v8399_v60  ;;  %v8401_v43 = vpop.eup %8400 }
 0x63b   : > { %8410 = vpow2.f32 %v7126_v47  ;;  %v8403_v59 = vpop.eup %8402 }
 0x63c   : > { %8412 = vrcp.f32 %v2154_v57  ;;  %v8405_v34 = vpop.eup %8404  ;;  %v2179_v31 = vadd.f32 1.0, %v8403_v59 }
 0x63d   : > { %8414 = vrcp.f32 %v2166_v42 }
 0x63e   : > { %8416 = vrcp.f32 %v2179_v31 }
 0x643   : > { %v8407_v35 = vpop.eup %8406 }
 0x644   : > { %v8409_v32 = vpop.eup %8408  ;;  %v2187_v37 = vmul.f32 %v8407_v35, %v8401_v43 }
 0x645   : > { %v8411_v44 = vpop.eup %8410  ;;  %v2185_v40 = vmul.f32 %v8409_v32, %v10202_v39 }
 0x646   : > { %v8413_v46 = vpop.eup %8412  ;;  %v2180_v38 = vadd.f32 1.0, %v8411_v44 }
 0x647   : > { %v10256_v36 = vadd.f32 %v2187_v37, %v2185_v40  ;;  %v2188_v45 = vmul.f32 %v8413_v46, %v8405_v34  ;;  %v8415_v58 = vpop.eup %8414 }
 0x648   : > { %v2186_v47 = vmul.f32 %v8415_v58, %v10206_v0  ;;  %v8417_v57 = vpop.eup %8416 }
 0x649   : > { %8418 = vtanh.f32 %v10256_v36 }
 0x64a   : > { %v10260_v62 = vadd.f32 %v2188_v45, %v2186_v47  ;;  %8420 = vrcp.f32 %v2180_v38 }
 0x64c   : > { %8422 = vtanh.f32 %v10260_v62 }
 0x653   : > { %v8419_v60 = vpop.eup %8418 }
 0x654   : > { %v8421_v39 = vpop.eup %8420  ;;  %v2193_v43 = vmul.f32 %v8419_v60, %v8417_v57 }
 0x656   : > { %v8423_v42 = vpop.eup %8422 }
 0x657   : > { %v2194_v59 = vmul.f32 %v8423_v42, %v8421_v39 }
 0x659   : > { %v10263_v35 = vpack.c.bf16 %v2194_v59, %v2193_v43 }
 0x65b   : > { %2240 = vmatmul.mubr.bf16.vlgmr.msra.gmra.mrb[20].mxu0 %v10263_v35  ;;  %2283 = vmatmul.mubr.bf16.vlgmr.msra.gmra.mrb[28].mxu1 %v10263_v35 }
 0x65c   : > { %2362 = vmatpush1.bf16.msra.mxu0 %v10041_v19  ;;  %2405 = vmatpush1.bf16.msra.mxu1 %v10114_v63 }
 0x65d   : > { %2363 = vmatprep.subr.bf16.mxu0 %v10045_v24  ;;  %2406 = vmatprep.subr.bf16.mxu1 %v10118_v48 }
 0x65e   : > { %2393 = vmatprep.mubr.bf16.mxu0 %v11829_v3  ;;  %2436 = vmatprep.mubr.bf16.mxu1 %v11829_v3 }
 0x660   : > { %2364 = vmatpush1.bf16.msra.mxu0 %v10051_v20  ;;  %2407 = vmatpush1.bf16.msra.mxu1 %v10124_v50 }
 0x661   : > { %2365 = vmatprep.subr.bf16.mxu0 %v10055_v28  ;;  %2408 = vmatprep.subr.bf16.mxu1 %v10128_v51 }
 0x664   : > { %2366 = vmatpush1.bf16.msra.mxu0 %v10059_v26  ;;  %2409 = vmatpush1.bf16.msra.mxu1 %v10132_v52 }
 0x665   : > { %2367 = vmatprep.subr.bf16.mxu0 %v10063_v27  ;;  %2410 = vmatprep.subr.bf16.mxu1 %v10136_v33 }
 0x668   : > { %2368 = vmatpush1.bf16.msra.mxu0 %v10067_v49  ;;  %2411 = vmatpush1.bf16.msra.mxu1 %v10140_v12 }
 0x669   : > { %2369 = vmatprep.subr.bf16.mxu0 %v10143_v4  ;;  %2412 = vmatprep.subr.bf16.mxu1 %v10146_v14 }
 0x66c   : > { %2370 = vmatpush1.bf16.msra.mxu0 %v10149_v13  ;;  %2413 = vmatpush1.bf16.msra.mxu1 %v10152_v16 }
 0x66d   : > { %2371 = vmatprep.subr.bf16.mxu0 %v10155_v17  ;;  %2414 = vmatprep.subr.bf16.mxu1 %v10158_v11 }
 0x670   : > { %2372 = vmatpush1.bf16.msra.mxu0 %v10161_v25  ;;  %2415 = vmatpush1.bf16.msra.mxu1 %v10164_v41 }
 0x671   : > { %2373 = vmatprep.subr.bf16.mxu0 %v10167_v2  ;;  %2416 = vmatprep.subr.bf16.mxu1 %v10170_v61 }
 0x674   : > { %2374 = vmatpush1.bf16.msra.mxu0 %v10173_v1  ;;  %2417 = vmatpush1.bf16.msra.mxu1 %v10176_v5 }
 0x675   : > { %2375 = vmatprep.subr.bf16.mxu0 %v10179_v15  ;;  %2418 = vmatprep.subr.bf16.mxu1 %v10182_v18 }
 0x678   : > { %2376 = vmatpush1.bf16.msra.mxu0 %v10185_v21  ;;  %2419 = vmatpush1.bf16.msra.mxu1 %v10188_v22 }
 0x679   : > { %2515 = vmatprep.subr.bf16.mxu0 %v10087_v29  ;;  %2558 = vmatprep.subr.bf16.mxu1 %v10090_v30 }
 0x72e   : > { %v2241_v0 = vpop.f32.mrb[20].mxu0  ;;  %v2284_v34 = vpop.f32.mrb[28].mxu1 }
 0x72f   : > { %v7515_v32 = vadd.f32 %v2241_v0, %v9954_v6  ;;  %v2243_v37 = vpop.f32.mrb[21].mxu0  ;;  %v2286_v44 = vpop.f32.mrb[29].mxu1  ;;  %v7555_v42 = vadd.f32 %v2284_v34, %v9968_v9 }
 0x730   : > { %v7516_v40 = vadd.f32 %v2243_v37, %v9957_v7  ;;  %v2245_v46 = vpop.f32.mrb[22].mxu0  ;;  %v2288_v31 = vpop.f32.mrb[30].mxu1  ;;  %v7556_v39 = vadd.f32 %v2286_v44, %v9971_v10 }
 0x731   : > { %v7127_v45 = vmul.f32 -1.442695, %v7515_v32  ;;  %v7517_v58 = vadd.f32 %v2245_v46, %v9954_v6  ;;  %v2247_v38 = vpop.f32.mrb[23].mxu0  ;;  %v2290_v47 = vpop.f32.mrb[31].mxu1  ;;  %v7557_v0 = vadd.f32 %v2288_v31, %v9968_v9 }
 0x732   : > { %v7129_v57 = vmul.f32 -1.442695, %v7516_v40  ;;  %v7518_v29 = vadd.f32 %v2247_v38, %v9957_v7  ;;  %v7131_v43 = vmul.f32 -1.442695, %v7556_v39  ;;  %v7558_v59 = vadd.f32 %v2290_v47, %v9971_v10 }
 0x733   : > { %8424 = vpow2.f32 %v7127_v45  ;;  %v7128_v30 = vmul.f32 -1.442695, %v7517_v58 }
 0x734   : > { %8426 = vpow2.f32 %v7129_v57  ;;  %v7130_v60 = vmul.f32 -1.442695, %v7518_v29  ;;  %v7132_v46 = vmul.f32 -1.442695, %v7558_v59 }
 0x735   : > { %8428 = vpow2.f32 %v7128_v30 }
 0x736   : > { %8430 = vpow2.f32 %v7130_v60 }
 0x737   : > { %8432 = vtanh.f32 %v7555_v42 }
 0x738   : > { %8434 = vpow2.f32 %v7131_v43 }
 0x739   : > { %8436 = vtanh.f32 %v7557_v0 }
 0x73d   : > { %v8425_v32 = vpop.eup %8424 }
 0x73e   : > { %v8427_v37 = vpop.eup %8426  ;;  %v2307_v40 = vadd.f32 1.0, %v8425_v32 }
 0x73f   : > { %v2319_v45 = vadd.f32 1.0, %v8427_v37  ;;  %v8429_v58 = vpop.eup %8428 }
 0x740   : > { %8438 = vrcp.f32 %v2307_v40  ;;  %v2308_v44 = vadd.f32 1.0, %v8429_v58  ;;  %v8431_v38 = vpop.eup %8430 }
 0x741   : > { %8440 = vrcp.f32 %v2319_v45  ;;  %v2320_v34 = vadd.f32 1.0, %v8431_v38  ;;  %v8433_v47 = vpop.eup %8432 }
 0x742   : > { %8442 = vpow2.f32 %v7132_v46  ;;  %v8435_v57 = vpop.eup %8434 }
 0x743   : > { %8444 = vrcp.f32 %v2308_v44  ;;  %v8437_v31 = vpop.eup %8436  ;;  %v2333_v59 = vadd.f32 1.0, %v8435_v57 }
 0x744   : > { %8446 = vrcp.f32 %v2320_v34 }
 0x745   : > { %8448 = vrcp.f32 %v2333_v59 }
 0x74a   : > { %v8439_v29 = vpop.eup %8438 }
 0x74b   : > { %v8441_v30 = vpop.eup %8440  ;;  %v2341_v60 = vmul.f32 %v8439_v29, %v8433_v47 }
 0x74c   : > { %v8443_v39 = vpop.eup %8442  ;;  %v2339_v42 = vmul.f32 %v8441_v30, %v10256_v36 }
 0x74d   : > { %v8445_v43 = vpop.eup %8444  ;;  %v2334_v40 = vadd.f32 1.0, %v8443_v39 }
 0x74e   : > { %v10310_v0 = vadd.f32 %v2341_v60, %v2339_v42  ;;  %v2342_v32 = vmul.f32 %v8445_v43, %v8437_v31  ;;  %v8447_v37 = vpop.eup %8446 }
 0x74f   : > { %v2340_v46 = vmul.f32 %v8447_v37, %v10260_v62  ;;  %v8449_v58 = vpop.eup %8448 }
 0x750   : > { %8450 = vtanh.f32 %v10310_v0 }
 0x751   : > { %v10314_v45 = vadd.f32 %v2342_v32, %v2340_v46  ;;  %8452 = vrcp.f32 %v2334_v40 }
 0x753   : > { %8454 = vtanh.f32 %v10314_v45 }
 0x75a   : > { %v8451_v44 = vpop.eup %8450 }
 0x75b   : > { %v8453_v36 = vpop.eup %8452  ;;  %v2347_v34 = vmul.f32 %v8451_v44, %v8449_v58 }
 0x75d   : > { %v8455_v38 = vpop.eup %8454 }
 0x75e   : > { %v2348_v47 = vmul.f32 %v8455_v38, %v8453_v36 }
 0x760   : > { %v10317_v57 = vpack.c.bf16 %v2348_v47, %v2347_v34 }
 0x762   : > { %2394 = vmatmul.mubr.bf16.vlgmr.msra.gmra.mrb[24].mxu0 %v10317_v57  ;;  %2437 = vmatmul.mubr.bf16.vlgmr.msra.gmra.mrb[32].mxu1 %v10317_v57 }
 0x763   : > { %2516 = vmatpush1.bf16.msra.mxu0 %v10041_v19  ;;  %2559 = vmatpush1.bf16.msra.mxu1 %v10114_v63  ;;  %v8050_v19 = vld [vmem:[#allocation10 + $0x4] ss:$16 sps:$4 sm:$0xff]  }
 0x764   : > { %2517 = vmatprep.subr.bf16.mxu0 %v10045_v24  ;;  %2560 = vmatprep.subr.bf16.mxu1 %v10118_v48  ;;  %v8053_v24 = vld [vmem:[#allocation10 + $0xc] ss:$16 sps:$4 sm:$0xff]  }
 0x765   : > { %2547 = vmatprep.mubr.bf16.mxu0 %v11829_v3  ;;  %2590 = vmatprep.mubr.bf16.mxu1 %v11829_v3 }
 0x767   : > { %2518 = vmatpush1.bf16.msra.mxu0 %v10051_v20  ;;  %2561 = vmatpush1.bf16.msra.mxu1 %v10124_v50  ;;  %v1043_v20 = vadd.f32 %v9930_v53, %v9954_v6 }
 0x768   : > { %2519 = vmatprep.subr.bf16.mxu0 %v10055_v28  ;;  %2562 = vmatprep.subr.bf16.mxu1 %v10128_v51  ;;  %v1045_v28 = vadd.f32 %v9932_v54, %v9957_v7  ;;  %v1049_v51 = vadd.f32 %v9936_v56, %v9957_v7 }
 0x76b   : > { %2520 = vmatpush1.bf16.msra.mxu0 %v10059_v26  ;;  %2563 = vmatpush1.bf16.msra.mxu1 %v10132_v52 }
 0x76c   : > { %2521 = vmatprep.subr.bf16.mxu0 %v10063_v27  ;;  %2564 = vmatprep.subr.bf16.mxu1 %v10136_v33 }
 0x76f   : > { %2522 = vmatpush1.bf16.msra.mxu0 %v10067_v49  ;;  %2565 = vmatpush1.bf16.msra.mxu1 %v10140_v12  ;;  %v1047_v49 = vadd.f32 %v9934_v55, %v9954_v6 }
 0x770   : > { %2523 = vmatprep.subr.bf16.mxu0 %v10143_v4  ;;  %2566 = vmatprep.subr.bf16.mxu1 %v10146_v14 }
 0x773   : > { %2524 = vmatpush1.bf16.msra.mxu0 %v10149_v13  ;;  %2567 = vmatpush1.bf16.msra.mxu1 %v10152_v16 }
 0x774   : > { %2525 = vmatprep.subr.bf16.mxu0 %v10155_v17  ;;  %2568 = vmatprep.subr.bf16.mxu1 %v10158_v11 }
 0x777   : > { %2526 = vmatpush1.bf16.msra.mxu0 %v10161_v25  ;;  %2569 = vmatpush1.bf16.msra.mxu1 %v10164_v41 }
 0x778   : > { %2527 = vmatprep.subr.bf16.mxu0 %v10167_v2  ;;  %2570 = vmatprep.subr.bf16.mxu1 %v10170_v61 }
 0x77b   : > { %2528 = vmatpush1.bf16.msra.mxu0 %v10173_v1  ;;  %2571 = vmatpush1.bf16.msra.mxu1 %v10176_v5 }
 0x77c   : > { %2529 = vmatprep.subr.bf16.mxu0 %v10179_v15  ;;  %2572 = vmatprep.subr.bf16.mxu1 %v10182_v18 }
 0x77f   : > { %2530 = vmatpush1.bf16.msra.mxu0 %v10185_v21  ;;  %2573 = vmatpush1.bf16.msra.mxu1 %v10188_v22 }
 0x780   : > { %2882 = vmatprep.subr.bf16.mxu0 %v8050_v19  ;;  %2995 = vmatprep.subr.bf16.mxu1 %v8053_v24 }
 0x835   : > { %v2395_v26 = vpop.f32.mrb[24].mxu0  ;;  %v2438_v27 = vpop.f32.mrb[32].mxu1 }
 0x836   : > { %v2447_v63 = vadd.f32 %v2395_v26, %v1043_v20  ;;  %v2397_v48 = vpop.f32.mrb[25].mxu0  ;;  %v2440_v50 = vpop.f32.mrb[33].mxu1  ;;  %v7559_v25 = vadd.f32 %v2438_v27, %v9968_v9  ;;  %v8048_v26 = vld [vmem:[#allocation10] ss:$16 sps:$4 sm:$0xff]   ;;  %v8051_v27 = vld [vmem:[#allocation10 + $0x8] ss:$16 sps:$4 sm:$0xff]  }
 0x837   : > { %v2448_v52 = vadd.f32 %v2397_v48, %v1045_v28  ;;  %v2399_v33 = vpop.f32.mrb[26].mxu0  ;;  %v2442_v12 = vpop.f32.mrb[34].mxu1  ;;  %v7560_v55 = vadd.f32 %v2440_v50, %v9971_v10  ;;  %v8054_v48 = vld [vmem:[#allocation10 + $0x20] ss:$16 sps:$4 sm:$0xff]   ;;  %v8057_v50 = vld [vmem:[#allocation10 + $0x28] ss:$16 sps:$4 sm:$0xff]  }
 0x838   : > { %v7133_v4 = vmul.f32 -1.442695, %v2447_v63  ;;  %v2451_v14 = vadd.f32 %v2399_v33, %v1047_v49  ;;  %v2401_v53 = vpop.f32.mrb[27].mxu0  ;;  %v2444_v13 = vpop.f32.mrb[35].mxu1  ;;  %v7561_v2 = vadd.f32 %v2442_v12, %v9968_v9  ;;  %v8056_v63 = vld [vmem:[#allocation10 + $0x24] ss:$16 sps:$4 sm:$0xff]  }
 0x839   : > { %v7135_v16 = vmul.f32 -1.442695, %v2448_v52  ;;  %v2452_v54 = vadd.f32 %v2401_v53, %v1049_v51  ;;  %v7137_v56 = vmul.f32 -1.442695, %v7560_v55  ;;  %v7562_v41 = vadd.f32 %v2444_v13, %v9971_v10  ;;  %v8062_v51 = vld [vmem:[#allocation10 + $0x44] ss:$16 sps:$4 sm:$0xff]  }
 0x83a   : > { %8456 = vpow2.f32 %v7133_v4  ;;  %v7134_v17 = vmul.f32 -1.442695, %v2451_v14  ;;  %v8065_v52 = vld [vmem:[#allocation10 + $0x4c] ss:$16 sps:$4 sm:$0xff]   ;;  %v8060_v33 = vld [vmem:[#allocation10 + $0x40] ss:$16 sps:$4 sm:$0xff]  }
 0x83b   : > { %8458 = vpow2.f32 %v7135_v16  ;;  %v7136_v11 = vmul.f32 -1.442695, %v2452_v54  ;;  %v7138_v15 = vmul.f32 -1.442695, %v7562_v41  ;;  %v8063_v12 = vld [vmem:[#allocation10 + $0x48] ss:$16 sps:$4 sm:$0xff]  }
 0x83c   : > { %8460 = vpow2.f32 %v7134_v17  ;;  %v8068_v4 = vld [vmem:[#allocation10 + $0x64] ss:$16 sps:$4 sm:$0xff]   ;;  %v8071_v14 = vld [vmem:[#allocation10 + $0x6c] ss:$16 sps:$4 sm:$0xff]   ;;  %v8066_v53 = vld [vmem:[#allocation10 + $0x60] ss:$16 sps:$4 sm:$0xff]  }
 0x83d   : > { %8462 = vpow2.f32 %v7136_v11  ;;  %v8069_v13 = vld [vmem:[#allocation10 + $0x68] ss:$16 sps:$4 sm:$0xff]   ;;  %v8074_v16 = vld [vmem:[#allocation10 + $0x84] ss:$16 sps:$4 sm:$0xff]   ;;  %v8077_v54 = vld [vmem:[#allocation10 + $0x8c] ss:$16 sps:$4 sm:$0xff]  }
 0x83e   : > { %8464 = vtanh.f32 %v7559_v25  ;;  %v8072_v17 = vld [vmem:[#allocation10 + $0x80] ss:$16 sps:$4 sm:$0xff]   ;;  %v8075_v11 = vld [vmem:[#allocation10 + $0x88] ss:$16 sps:$4 sm:$0xff]   ;;  %v8080_v55 = vld [vmem:[#allocation10 + $0xa4] ss:$16 sps:$4 sm:$0xff]  }
 0x83f   : > { %8466 = vpow2.f32 %v7137_v56  ;;  %v8083_v25 = vld [vmem:[#allocation10 + $0xac] ss:$16 sps:$4 sm:$0xff]   ;;  %v8078_v56 = vld [vmem:[#allocation10 + $0xa0] ss:$16 sps:$4 sm:$0xff]   ;;  %v8081_v41 = vld [vmem:[#allocation10 + $0xa8] ss:$16 sps:$4 sm:$0xff]  }
 0x840   : > { %8468 = vtanh.f32 %v7561_v2  ;;  %v8086_v2 = vld [vmem:[#allocation10 + $0xc4] ss:$16 sps:$4 sm:$0xff]  }
 0x844   : > { %v8457_v61 = vpop.eup %8456 }
 0x845   : > { %v8459_v1 = vpop.eup %8458  ;;  %v2461_v5 = vadd.f32 1.0, %v8457_v61  ;;  %v8089_v61 = vld [vmem:[#allocation10 + $0xcc] ss:$16 sps:$4 sm:$0xff]  }
 0x846   : > { %v2473_v18 = vadd.f32 1.0, %v8459_v1  ;;  %v8461_v21 = vpop.eup %8460  ;;  %v8084_v1 = vld [vmem:[#allocation10 + $0xc0] ss:$16 sps:$4 sm:$0xff]  }
 0x847   : > { %8470 = vrcp.f32 %v2461_v5  ;;  %v2462_v22 = vadd.f32 1.0, %v8461_v21  ;;  %v8463_v62 = vpop.eup %8462  ;;  %v8087_v5 = vld [vmem:[#allocation10 + $0xc8] ss:$16 sps:$4 sm:$0xff]   ;;  %v8090_v21 = vld [vmem:[#allocation10 + $0xe0] ss:$16 sps:$4 sm:$0xff]  }
 0x848   : > { %8472 = vrcp.f32 %v2473_v18  ;;  %v2474_v31 = vadd.f32 1.0, %v8463_v62  ;;  %v8465_v29 = vpop.eup %8464  ;;  %v8095_v18 = vld [vmem:[#allocation10 + $0xec] ss:$16 sps:$4 sm:$0xff]   ;;  %v10379_v62 = vld [vmem:[#allocation11 + $0x4] ss:$16 sps:$4 sm:$0xff]  }
 0x849   : > { %8474 = vpow2.f32 %v7138_v15  ;;  %v8467_v30 = vpop.eup %8466  ;;  %v8092_v15 = vld [vmem:[#allocation10 + $0xe4] ss:$16 sps:$4 sm:$0xff]  }
 0x84a   : > { %8476 = vrcp.f32 %v2462_v22  ;;  %v8469_v60 = vpop.eup %8468  ;;  %v2487_v40 = vadd.f32 1.0, %v8467_v30  ;;  %v8093_v22 = vld [vmem:[#allocation10 + $0xe8] ss:$16 sps:$4 sm:$0xff]   ;;  %v10421_v30 = vld [vmem:[#allocation11 + $0x2c] ss:$16 sps:$4 sm:$0xff]  }
 0x84b   : > { %8478 = vrcp.f32 %v2474_v31  ;;  %v10382_v31 = vld [vmem:[#allocation11] ss:$16 sps:$4 sm:$0xff]  }
 0x84c   : > { %8480 = vrcp.f32 %v2487_v40  ;;  %v10443_v40 = vld [vmem:[#allocation11 + $0x6c] ss:$16 sps:$4 sm:$0xff]  }
 0x851   : > { %v8471_v39 = vpop.eup %8470 }
 0x852   : > { %v8473_v42 = vpop.eup %8472  ;;  %v2495_v43 = vmul.f32 %v8471_v39, %v8465_v29  ;;  %v11832_v29 = vld [vmem:[#allocation35_spill] sm:$0xff] }
 0x853   : > { %v8475_v59 = vpop.eup %8474  ;;  %v2493_v32 = vmul.f32 %v8473_v42, %v10310_v0  ;;  %v10425_v39 = vld [vmem:[#allocation11 + $0x44] ss:$16 sps:$4 sm:$0xff]   ;;  %v10429_v42 = vld [vmem:[#allocation11 + $0x28] ss:$16 sps:$4 sm:$0xff]  }
 0x854   : > { %v8477_v37 = vpop.eup %8476  ;;  %v2488_v36 = vadd.f32 1.0, %v8475_v59  ;;  %v10434_v59 = vld [vmem:[#allocation11 + $0x4c] ss:$16 sps:$4 sm:$0xff]  }
 0x855   : > { %v10366_v46 = vadd.f32 %v2495_v43, %v2493_v32  ;;  %v2496_v58 = vmul.f32 %v8477_v37, %v8469_v60  ;;  %v8479_v44 = vpop.eup %8478  ;;  %v10423_v60 = vld [vmem:[#allocation11 + $0x20] ss:$16 sps:$4 sm:$0xff]   ;;  %v10437_v32 = vld [vmem:[#allocation11 + $0x64] ss:$16 sps:$4 sm:$0xff]   ;;  %v10440_v37 = vld [vmem:[#allocation11 + $0x48] ss:$16 sps:$4 sm:$0xff]  }
 0x856   : > { %v2494_v38 = vmul.f32 %v8479_v44, %v10314_v45  ;;  %v8481_v47 = vpop.eup %8480  ;;  %v8059_v45 = vld [vmem:[#allocation10 + $0x2c] ss:$16 sps:$4 sm:$0xff]   ;;  %v10432_v43 = vld [vmem:[#allocation11 + $0x40] ss:$16 sps:$4 sm:$0xff]   ;;  %v10449_v44 = vld [vmem:[#allocation11 + $0x84] ss:$16 sps:$4 sm:$0xff]  }
 0x857   : > { %8482 = vtanh.f32 %v10366_v46 }
 0x858   : > { %v10370_v34 = vadd.f32 %v2496_v58, %v2494_v38  ;;  %8484 = vrcp.f32 %v2488_v36  ;;  %v10446_v58 = vld [vmem:[#allocation11 + $0x60] ss:$16 sps:$4 sm:$0xff]   ;;  %v10452_v36 = vld [vmem:[#allocation11 + $0x68] ss:$16 sps:$4 sm:$0xff]   ;;  %v10455_v38 = vld [vmem:[#allocation11 + $0x8c] ss:$16 sps:$4 sm:$0xff]  }
 0x85a   : > { %8486 = vtanh.f32 %v10370_v34 }
 0x861   : > { %v8483_v19 = vpop.eup %8482 }
 0x862   : > { %v8485_v0 = vpop.eup %8484  ;;  %v2501_v20 = vmul.f32 %v8483_v19, %v8481_v47  ;;  %v10458_v47 = vld [vmem:[#allocation11 + $0x80] ss:$16 sps:$4 sm:$0xff]   ;;  %v10461_v19 = vld [vmem:[#allocation11 + $0xa4] ss:$16 sps:$4 sm:$0xff]  }
 0x864   : > { %v8487_v24 = vpop.eup %8486 }
 0x865   : > { %v2502_v28 = vmul.f32 %v8487_v24, %v8485_v0  ;;  %v10464_v0 = vld [vmem:[#allocation11 + $0x88] ss:$16 sps:$4 sm:$0xff]   ;;  %v10467_v24 = vld [vmem:[#allocation11 + $0xac] ss:$16 sps:$4 sm:$0xff]  }
 0x867   : > { %v10373_v49 = vpack.c.bf16 %v2502_v28, %v2501_v20  ;;  %v10470_v20 = vld [vmem:[#allocation11 + $0xa0] ss:$16 sps:$4 sm:$0xff]   ;;  %v10473_v28 = vld [vmem:[#allocation11 + $0xc4] ss:$16 sps:$4 sm:$0xff]  }
 0x869   : > { %2548 = vmatmul.mubr.bf16.vlgmr.msra.gmra.mrb[28].mxu0 %v10373_v49  ;;  %2591 = vmatmul.mubr.bf16.vlgmr.msra.gmra.mrb[36].mxu1 %v10373_v49 }
 0x86a   : > { %2883 = vmatpush1.bf16.msra.mxu0 %v8048_v26  ;;  %2996 = vmatpush1.bf16.msra.mxu1 %v8051_v27  ;;  %v10476_v26 = vld [vmem:[#allocation11 + $0xa8] ss:$16 sps:$4 sm:$0xff]   ;;  %v10480_v27 = vld [vmem:[#allocation11 + $0xc0] ss:$16 sps:$4 sm:$0xff]  }
 0x86b   : > { %2884 = vmatprep.subr.bf16.mxu0 %v8056_v63  ;;  %2997 = vmatprep.subr.bf16.mxu1 %v8059_v45  ;;  %v10486_v63 = vld [vmem:[#allocation11 + $0xcc] ss:$16 sps:$4 sm:$0xff]   ;;  %v10488_v45 = vld [vmem:[#allocation11 + $0xc8] ss:$16 sps:$4 sm:$0xff]  }
 0x86c   : > { %2914 = vmatprep.mubr.bf16.mxu0 %v11829_v3  ;;  %3027 = vmatprep.mubr.bf16.mxu1 %v11829_v3 }
 0x86e   : > { %2885 = vmatpush1.bf16.msra.mxu0 %v8054_v48  ;;  %2998 = vmatpush1.bf16.msra.mxu1 %v8057_v50  ;;  %v10490_v48 = vld [vmem:[#allocation11 + $0xec] ss:$16 sps:$4 sm:$0xff]   ;;  %v10494_v50 = vld [vmem:[#allocation11 + $0xe0] ss:$16 sps:$4 sm:$0xff]  }
 0x86f   : > { %2886 = vmatprep.subr.bf16.mxu0 %v8062_v51  ;;  %2999 = vmatprep.subr.bf16.mxu1 %v8065_v52  ;;  %v10498_v51 = vld [vmem:[#allocation11 + $0xe8] ss:$16 sps:$4 sm:$0xff]   ;;  %v11834_v52 = vld [vmem:[#allocation27_spill] sm:$0xff] }
 0x872   : > { %2887 = vmatpush1.bf16.msra.mxu0 %v8060_v33  ;;  %3000 = vmatpush1.bf16.msra.mxu1 %v8063_v12  ;;  %v1053_v33 = vadd.f32 %v11834_v52, %v9954_v6  ;;  %v11835_v12 = vld [vmem:[#allocation28_spill] sm:$0xff] }
 0x873   : > { %2888 = vmatprep.subr.bf16.mxu0 %v8068_v4  ;;  %3001 = vmatprep.subr.bf16.mxu1 %v8071_v14  ;;  %v1055_v4 = vadd.f32 %v11835_v12, %v9957_v7 }
 0x876   : > { %2889 = vmatpush1.bf16.msra.mxu0 %v8066_v53  ;;  %3002 = vmatpush1.bf16.msra.mxu1 %v8069_v13  ;;  %v11836_v13 = vld [vmem:[#allocation29_spill] sm:$0xff] }
 0x877   : > { %2890 = vmatprep.subr.bf16.mxu0 %v8074_v16  ;;  %3003 = vmatprep.subr.bf16.mxu1 %v8077_v54  ;;  %v1057_v16 = vadd.f32 %v11836_v13, %v9954_v6 }
 0x87a   : > { %2891 = vmatpush1.bf16.msra.mxu0 %v8072_v17  ;;  %3004 = vmatpush1.bf16.msra.mxu1 %v8075_v11 }
 0x87b   : > { %2892 = vmatprep.subr.bf16.mxu0 %v8080_v55  ;;  %3005 = vmatprep.subr.bf16.mxu1 %v8083_v25  ;;  %v11837_v55 = vld [vmem:[#allocation30_spill] sm:$0xff] }
 0x87c   : > { %v1059_v25 = vadd.f32 %v11837_v55, %v9957_v7 }
 0x87e   : > { %2893 = vmatpush1.bf16.msra.mxu0 %v8078_v56  ;;  %3006 = vmatpush1.bf16.msra.mxu1 %v8081_v41 }
 0x87f   : > { %2894 = vmatprep.subr.bf16.mxu0 %v8086_v2  ;;  %3007 = vmatprep.subr.bf16.mxu1 %v8089_v61 }
 0x882   : > { %2895 = vmatpush1.bf16.msra.mxu0 %v8084_v1  ;;  %3008 = vmatpush1.bf16.msra.mxu1 %v8087_v5 }
 0x883   : > { %2896 = vmatprep.subr.bf16.mxu0 %v8092_v15  ;;  %3009 = vmatprep.subr.bf16.mxu1 %v8095_v18 }
 0x886   : > { %2897 = vmatpush1.bf16.msra.mxu0 %v8090_v21  ;;  %3010 = vmatpush1.bf16.msra.mxu1 %v8093_v22 }
 0x887   : > { %3372 = vmatprep.subr.bf16.mxu0 %v10379_v62 }
 0x889   : > { %2915 = vmatmul.mubr.bf16.vlgmr.msra.gmra.mrb[32].mxu0 %v9983_v8  ;;  %3028 = vmatmul.mubr.bf16.vlgmr.msra.gmra.mrb[40].mxu1 %v9983_v8  ;;  %v11833_v8 = vld [vmem:[#allocation36_spill] sm:$0xff] }
 0x88a   : > { %2924 = vmatprep.mubr.bf16.mxu0 %v11829_v3  ;;  %3037 = vmatprep.mubr.bf16.mxu1 %v11829_v3 }
 0x88b   : > { %3373 = vmatpush1.bf16.msra.mxu0 %v10382_v31 }
 0x891   : > { %2925 = vmatmul.mubr.bf16.gmra.mrb[36].mxu0 %v10037_v23  ;;  %3038 = vmatmul.mubr.bf16.gmra.mrb[44].mxu1 %v10037_v23  ;;  %v10413_v23 = vld [vmem:[#allocation11 + $0xc] ss:$16 sps:$4 sm:$0xff]  }
 0x892   : > { %2934 = vmatprep.mubr.bf16.mxu0 %v11829_v3  ;;  %3047 = vmatprep.mubr.bf16.mxu1 %v11829_v3 }
 0x893   : > { %3415 = vmatprep.subr.bf16.mxu1 %v10413_v23 }
 0x899   : > { %2935 = vmatmul.mubr.bf16.gmra.mrb[40].mxu0 %v11832_v29  ;;  %3048 = vmatmul.mubr.bf16.gmra.mrb[48].mxu1 %v11832_v29 }
 0x89a   : > { %2944 = vmatprep.mubr.bf16.mxu0 %v11829_v3  ;;  %3057 = vmatprep.mubr.bf16.mxu1 %v11829_v3 }
 0x8a1   : > { %2945 = vmatmul.mubr.bf16.gmra.mrb[44].mxu0 %v11833_v8  ;;  %3058 = vmatmul.mubr.bf16.gmra.mrb[52].mxu1 %v11833_v8 }
 0x8a2   : > { %2954 = vmatprep.mubr.bf16.mxu0 %v11829_v3  ;;  %3067 = vmatprep.mubr.bf16.mxu1 %v11829_v3 }
 0x8a9   : > { %2955 = vmatmul.mubr.bf16.gmra.mrb[48].mxu0 %v10263_v35  ;;  %3068 = vmatmul.mubr.bf16.gmra.mrb[56].mxu1 %v10263_v35  ;;  %v10415_v35 = vld [vmem:[#allocation11 + $0x8] ss:$16 sps:$4 sm:$0xff]  }
 0x8aa   : > { %2964 = vmatprep.mubr.bf16.mxu0 %v11829_v3  ;;  %3077 = vmatprep.mubr.bf16.mxu1 %v11829_v3 }
 0x8ab   : > { %3416 = vmatpush1.bf16.msra.mxu1 %v10415_v35 }
 0x8ac   : > { %3417 = vmatprep.subr.bf16.mxu1 %v10421_v30 }
 0x8af   : > { %3418 = vmatpush1.bf16.msra.mxu1 %v10429_v42 }
 0x8b0   : > { %3419 = vmatprep.subr.bf16.mxu1 %v10434_v59 }
 0x8b1   : > { %2965 = vmatmul.mubr.bf16.gmra.mrb[52].mxu0 %v10317_v57  ;;  %3078 = vmatmul.mubr.bf16.gmra.mrb[60].mxu1 %v10317_v57  ;;  %v10419_v57 = vld [vmem:[#allocation11 + $0x24] ss:$16 sps:$4 sm:$0xff]  }
 0x8b2   : > { %2974 = vmatprep.mubr.bf16.mxu0 %v11829_v3  ;;  %3087 = vmatprep.mubr.bf16.mxu1 %v11829_v3 }
 0x8b3   : > { %3374 = vmatprep.subr.bf16.mxu0 %v10419_v57  ;;  %3420 = vmatpush1.bf16.msra.mxu1 %v10440_v37 }
 0x8b4   : > { %3375 = vmatpush1.bf16.msra.mxu0 %v10423_v60  ;;  %3421 = vmatprep.subr.bf16.mxu1 %v10443_v40 }
 0x8b5   : > { %3376 = vmatprep.subr.bf16.mxu0 %v10425_v39 }
 0x8b7   : > { %3422 = vmatpush1.bf16.msra.mxu1 %v10452_v36 }
 0x8b8   : > { %3377 = vmatpush1.bf16.msra.mxu0 %v10432_v43  ;;  %3423 = vmatprep.subr.bf16.mxu1 %v10455_v38 }
 0x8b9   : > { %2975 = vmatmul.mubr.bf16.gmra.mrb[56].mxu0 %v10373_v49  ;;  %3088 = vmatmul.mubr.bf16.gmra.mrb[64].mxu1 %v10373_v49  ;;  %v10484_v49 = vld [vmem:[#allocation11 + $0xe4] ss:$16 sps:$4 sm:$0xff]  }
 0x8ba   : > { %2984 = vmatprep.mubr.bf16.mxu0 %v11829_v3  ;;  %3097 = vmatprep.mubr.bf16.mxu1 %v11829_v3 }
 0x8bb   : > { %3378 = vmatprep.subr.bf16.mxu0 %v10437_v32  ;;  %3424 = vmatpush1.bf16.msra.mxu1 %v10464_v0 }
 0x8bc   : > { %3379 = vmatpush1.bf16.msra.mxu0 %v10446_v58  ;;  %3425 = vmatprep.subr.bf16.mxu1 %v10467_v24 }
 0x8bd   : > { %3380 = vmatprep.subr.bf16.mxu0 %v10449_v44 }
 0x8bf   : > { %3426 = vmatpush1.bf16.msra.mxu1 %v10476_v26 }
 0x8c0   : > { %3381 = vmatpush1.bf16.msra.mxu0 %v10458_v47  ;;  %3427 = vmatprep.subr.bf16.mxu1 %v10486_v63 }
 0x8c1   : > { %3382 = vmatprep.subr.bf16.mxu0 %v10461_v19 }
 0x8c3   : > { %3428 = vmatpush1.bf16.msra.mxu1 %v10488_v45 }
 0x8c4   : > { %3383 = vmatpush1.bf16.msra.mxu0 %v10470_v20  ;;  %3429 = vmatprep.subr.bf16.mxu1 %v10490_v48 }
 0x8c5   : > { %3384 = vmatprep.subr.bf16.mxu0 %v10473_v28 }
 0x8c7   : > { %3430 = vmatpush1.bf16.msra.mxu1 %v10498_v51 }
 0x8c8   : > { %3385 = vmatpush1.bf16.msra.mxu0 %v10480_v27  ;;  %3567 = vmatprep.subr.bf16.mxu1 %v10413_v23 }
 0x8c9   : > { %3386 = vmatprep.subr.bf16.mxu0 %v10484_v49 }
 0x8cc   : > { %3387 = vmatpush1.bf16.msra.mxu0 %v10494_v50 }
 0x8cd   : > { %3524 = vmatprep.subr.bf16.mxu0 %v10379_v62 }
 0x93c   : > { %v2549_v14 = vpop.f32.mrb[28].mxu0  ;;  %v2592_v53 = vpop.f32.mrb[36].mxu1 }
 0x93d   : > { %v2601_v54 = vadd.f32 %v2549_v14, %v1053_v33  ;;  %v2551_v17 = vpop.f32.mrb[29].mxu0  ;;  %v2594_v11 = vpop.f32.mrb[37].mxu1  ;;  %v7563_v8 = vadd.f32 %v2592_v53, %v9968_v9 }
 0x93e   : > { %v2602_v56 = vadd.f32 %v2551_v17, %v1055_v4  ;;  %v2553_v41 = vpop.f32.mrb[30].mxu0  ;;  %v2596_v2 = vpop.f32.mrb[38].mxu1  ;;  %v7564_v6 = vadd.f32 %v2594_v11, %v9971_v10 }
 0x93f   : > { %v7139_v61 = vmul.f32 -1.442695, %v2601_v54  ;;  %v2605_v1 = vadd.f32 %v2553_v41, %v1057_v16  ;;  %v2555_v5 = vpop.f32.mrb[31].mxu0  ;;  %v2598_v15 = vpop.f32.mrb[39].mxu1  ;;  %v7565_v33 = vadd.f32 %v2596_v2, %v9968_v9 }
 0x940   : > { %v7141_v18 = vmul.f32 -1.442695, %v2602_v56  ;;  %v2606_v21 = vadd.f32 %v2555_v5, %v1059_v25  ;;  %v7143_v7 = vmul.f32 -1.442695, %v7564_v6  ;;  %v7566_v52 = vadd.f32 %v2598_v15, %v9971_v10 }
 0x941   : > { %8488 = vpow2.f32 %v7139_v61  ;;  %v7140_v22 = vmul.f32 -1.442695, %v2605_v1 }
 0x942   : > { %8490 = vpow2.f32 %v7141_v18  ;;  %v7142_v29 = vmul.f32 -1.442695, %v2606_v21  ;;  %v7144_v13 = vmul.f32 -1.442695, %v7566_v52 }
 0x943   : > { %8492 = vpow2.f32 %v7140_v22 }
 0x944   : > { %8494 = vpow2.f32 %v7142_v29 }
 0x945   : > { %8496 = vtanh.f32 %v7563_v8 }
 0x946   : > { %8498 = vpow2.f32 %v7143_v7 }
 0x947   : > { %8500 = vtanh.f32 %v7565_v33 }
 0x94b   : > { %v8489_v12 = vpop.eup %8488 }
 0x94c   : > { %v8491_v4 = vpop.eup %8490  ;;  %v2615_v14 = vadd.f32 1.0, %v8489_v12 }
 0x94d   : > { %v2627_v16 = vadd.f32 1.0, %v8491_v4  ;;  %v8493_v54 = vpop.eup %8492 }
 0x94e   : > { %8502 = vrcp.f32 %v2615_v14  ;;  %v2616_v17 = vadd.f32 1.0, %v8493_v54  ;;  %v8495_v11 = vpop.eup %8494 }
 0x94f   : > { %8504 = vrcp.f32 %v2627_v16  ;;  %v2628_v53 = vadd.f32 1.0, %v8495_v11  ;;  %v8497_v10 = vpop.eup %8496  ;;  %v11839_v16 = vld [vmem:[#allocation32_spill] sm:$0xff] }
 0x950   : > { %8506 = vpow2.f32 %v7144_v13  ;;  %v8499_v55 = vpop.eup %8498 }
 0x951   : > { %8508 = vrcp.f32 %v2616_v17  ;;  %v8501_v9 = vpop.eup %8500  ;;  %v2641_v2 = vadd.f32 1.0, %v8499_v55 }
 0x952   : > { %8510 = vrcp.f32 %v2628_v53 }
 0x953   : > { %8512 = vrcp.f32 %v2641_v2 }
 0x958   : > { %v8503_v25 = vpop.eup %8502 }
 0x959   : > { %v8505_v56 = vpop.eup %8504  ;;  %v2649_v41 = vmul.f32 %v8503_v25, %v8497_v10 }
 0x95a   : > { %v8507_v61 = vpop.eup %8506  ;;  %v2647_v1 = vmul.f32 %v8505_v56, %v10366_v46  ;;  %v2700_v46 = vld [vmem:[%s11734_s6] sm:$0xf] }
 0x95b   : > { %v8509_v5 = vpop.eup %8508  ;;  %v2642_v22 = vadd.f32 1.0, %v8507_v61  ;;  %v10564_v54 = vrot.slane %v2700_v46, %v11839_v16 }
 0x95c   : > { %v2650_v15 = vmul.f32 %v8509_v5, %v8501_v9  ;;  %v2651_v18 = vadd.f32 %v2649_v41, %v2647_v1  ;;  %v8511_v21 = vpop.eup %8510 }
 0x95d   : > { %v2648_v29 = vmul.f32 %v8511_v21, %v10370_v34  ;;  %v8513_v8 = vpop.eup %8512  ;;  %v11838_v34 = vld [vmem:[#allocation31_spill] sm:$0xff] }
 0x95e   : > { %8514 = vtanh.f32 %v2651_v18  ;;  %v10561_v13 = vrot.slane %v2700_v46, %v11838_v34 }
 0x95f   : > { %v2652_v6 = vadd.f32 %v2650_v15, %v2648_v29  ;;  %8516 = vrcp.f32 %v2642_v22  ;;  %v11840_v15 = vld [vmem:[#allocation34_spill] sm:$0xff] }
 0x960   : > { %v10570_v18 = vrot.slane %v2700_v46, %v11840_v15 }
 0x961   : > { %8518 = vtanh.f32 %v2652_v6  ;;  %v11841_v6 = vld [vmem:[#allocation33_spill] sm:$0xff] }
 0x968   : > { %v8515_v7 = vpop.eup %8514 }
 0x969   : > { %v2655_v52 = vmul.f32 %v8515_v7, %v8513_v8  ;;  %v8517_v33 = vpop.eup %8516  ;;  %v10574_v8 = vrot.slane %v2700_v46, %v11841_v6 }
 0x96b   : > { %v8519_v12 = vpop.eup %8518 }
 0x96c   : > { %v2656_v4 = vmul.f32 %v8519_v12, %v8517_v33 }
 0x96e   : > { %v2657_v14 = vpack.c.bf16 %v2656_v4, %v2655_v52 }
 0x970   : > { %2985 = vmatmul.mubr.bf16.gmra.mrb[60].mxu0 %v2657_v14  ;;  %3098 = vmatmul.mubr.bf16.gmra.mrb[68].mxu1 %v2657_v14 }
 0x971   : > { %3404 = vmatprep.mubr.bf16.mxu0 %v11829_v3  ;;  %3447 = vmatprep.mubr.bf16.mxu1 %v11829_v3 }
 0x978   : > { %3405 = vmatmul.mubr.bf16.vlgmr.msra.gmra.mrb[32].mxu0 %v11829_v3  ;;  %3448 = vmatmul.mubr.bf16.vlgmr.msra.gmra.mrb[40].mxu1 %v11829_v3 }
 0x979   : > { %3525 = vmatpush1.bf16.msra.mxu0 %v10382_v31  ;;  %3568 = vmatpush1.bf16.msra.mxu1 %v10415_v35 }
 0x97a   : > { %3526 = vmatprep.subr.bf16.mxu0 %v10419_v57  ;;  %3569 = vmatprep.subr.bf16.mxu1 %v10421_v30 }
 0x97b   : > { %3556 = vmatprep.mubr.bf16.mxu0 %v11829_v3  ;;  %3599 = vmatprep.mubr.bf16.mxu1 %v11829_v3 }
 0x97d   : > { %3527 = vmatpush1.bf16.msra.mxu0 %v10423_v60  ;;  %3570 = vmatpush1.bf16.msra.mxu1 %v10429_v42 }
 0x97e   : > { %3528 = vmatprep.subr.bf16.mxu0 %v10425_v39  ;;  %3571 = vmatprep.subr.bf16.mxu1 %v10434_v59 }
 0x981   : > { %3529 = vmatpush1.bf16.msra.mxu0 %v10432_v43  ;;  %3572 = vmatpush1.bf16.msra.mxu1 %v10440_v37 }
 0x982   : > { %3530 = vmatprep.subr.bf16.mxu0 %v10437_v32  ;;  %3573 = vmatprep.subr.bf16.mxu1 %v10443_v40 }
 0x985   : > { %3531 = vmatpush1.bf16.msra.mxu0 %v10446_v58  ;;  %3574 = vmatpush1.bf16.msra.mxu1 %v10452_v36 }
 0x986   : > { %3532 = vmatprep.subr.bf16.mxu0 %v10449_v44  ;;  %3575 = vmatprep.subr.bf16.mxu1 %v10455_v38 }
 0x989   : > { %3533 = vmatpush1.bf16.msra.mxu0 %v10458_v47  ;;  %3576 = vmatpush1.bf16.msra.mxu1 %v10464_v0 }
 0x98a   : > { %3534 = vmatprep.subr.bf16.mxu0 %v10461_v19  ;;  %3577 = vmatprep.subr.bf16.mxu1 %v10467_v24 }
 0x98d   : > { %3535 = vmatpush1.bf16.msra.mxu0 %v10470_v20  ;;  %3578 = vmatpush1.bf16.msra.mxu1 %v10476_v26 }
 0x98e   : > { %3536 = vmatprep.subr.bf16.mxu0 %v10473_v28  ;;  %3579 = vmatprep.subr.bf16.mxu1 %v10486_v63 }
 0x991   : > { %3537 = vmatpush1.bf16.msra.mxu0 %v10480_v27  ;;  %3580 = vmatpush1.bf16.msra.mxu1 %v10488_v45 }
 0x992   : > { %3538 = vmatprep.subr.bf16.mxu0 %v10484_v49  ;;  %3581 = vmatprep.subr.bf16.mxu1 %v10490_v48 }
 0x995   : > { %3539 = vmatpush1.bf16.msra.mxu0 %v10494_v50  ;;  %3582 = vmatpush1.bf16.msra.mxu1 %v10498_v51 }
 0x996   : > { %3676 = vmatprep.subr.bf16.mxu0 %v10379_v62  ;;  %3719 = vmatprep.subr.bf16.mxu1 %v10413_v23 }
 0xa4b   : > { %v3406_v17 = vpop.f32.mrb[32].mxu0  ;;  %v3449_v11 = vpop.f32.mrb[40].mxu1 }
 0xa4c   : > { %v7567_v53 = vadd.f32 %v3406_v17, %v10561_v13  ;;  %v3408_v10 = vpop.f32.mrb[33].mxu0  ;;  %v3451_v55 = vpop.f32.mrb[41].mxu1  ;;  %v7599_v52 = vadd.f32 %v3449_v11, %v10574_v8 }
 0xa4d   : > { %v7568_v9 = vadd.f32 %v3408_v10, %v10564_v54  ;;  %v3410_v25 = vpop.f32.mrb[34].mxu0  ;;  %v3453_v56 = vpop.f32.mrb[42].mxu1  ;;  %v7600_v7 = vadd.f32 %v3451_v55, %v10570_v18 }
 0xa4e   : > { %v7209_v41 = vmul.f32 -1.442695, %v7567_v53  ;;  %v7569_v2 = vadd.f32 %v3410_v25, %v10561_v13  ;;  %v3412_v61 = vpop.f32.mrb[35].mxu0  ;;  %v3455_v1 = vpop.f32.mrb[43].mxu1  ;;  %v7601_v4 = vadd.f32 %v3453_v56, %v10574_v8 }
 0xa4f   : > { %v7211_v5 = vmul.f32 -1.442695, %v7568_v9  ;;  %v7570_v21 = vadd.f32 %v3412_v61, %v10564_v54  ;;  %v7213_v33 = vmul.f32 -1.442695, %v7600_v7  ;;  %v7602_v12 = vadd.f32 %v3455_v1, %v10570_v18 }
 0xa50   : > { %8520 = vpow2.f32 %v7209_v41  ;;  %v7210_v22 = vmul.f32 -1.442695, %v7569_v2 }
 0xa51   : > { %8522 = vpow2.f32 %v7211_v5  ;;  %v7212_v29 = vmul.f32 -1.442695, %v7570_v21  ;;  %v7214_v10 = vmul.f32 -1.442695, %v7602_v12 }
 0xa52   : > { %8524 = vpow2.f32 %v7210_v22 }
 0xa53   : > { %8526 = vpow2.f32 %v7212_v29 }
 0xa54   : > { %8528 = vtanh.f32 %v7599_v52 }
 0xa55   : > { %8530 = vpow2.f32 %v7213_v33 }
 0xa56   : > { %8532 = vtanh.f32 %v7601_v4 }
 0xa5a   : > { %v8521_v14 = vpop.eup %8520 }
 0xa5b   : > { %v8523_v17 = vpop.eup %8522  ;;  %v3472_v53 = vadd.f32 1.0, %v8521_v14 }
 0xa5c   : > { %v3484_v9 = vadd.f32 1.0, %v8523_v17  ;;  %v8525_v46 = vpop.eup %8524 }
 0xa5d   : > { %8534 = vrcp.f32 %v3472_v53  ;;  %v3473_v55 = vadd.f32 1.0, %v8525_v46  ;;  %v8527_v25 = vpop.eup %8526 }
 0xa5e   : > { %8536 = vrcp.f32 %v3484_v9  ;;  %v3485_v11 = vadd.f32 1.0, %v8527_v25  ;;  %v8529_v41 = vpop.eup %8528 }
 0xa5f   : > { %8538 = vpow2.f32 %v7214_v10  ;;  %v8531_v2 = vpop.eup %8530 }
 0xa60   : > { %8540 = vrcp.f32 %v3473_v55  ;;  %v8533_v56 = vpop.eup %8532  ;;  %v3498_v7 = vadd.f32 1.0, %v8531_v2 }
 0xa61   : > { %8542 = vrcp.f32 %v3485_v11 }
 0xa62   : > { %8544 = vrcp.f32 %v3498_v7 }
 0xa67   : > { %v8535_v61 = vpop.eup %8534 }
 0xa68   : > { %v8537_v1 = vpop.eup %8536  ;;  %v3506_v5 = vmul.f32 %v8535_v61, %v8529_v41 }
 0xa69   : > { %v8539_v21 = vpop.eup %8538  ;;  %v3504_v22 = vmul.f32 0.0, %v8537_v1 }
 0xa6a   : > { %v8541_v29 = vpop.eup %8540  ;;  %v3499_v4 = vadd.f32 1.0, %v8539_v21 }
 0xa6b   : > { %v10580_v52 = vadd.f32 %v3506_v5, %v3504_v22  ;;  %v3507_v33 = vmul.f32 %v8541_v29, %v8533_v56  ;;  %v8543_v12 = vpop.eup %8542 }
 0xa6c   : > { %v3505_v14 = vmul.f32 0.0, %v8543_v12  ;;  %v8545_v53 = vpop.eup %8544 }
 0xa6d   : > { %8546 = vtanh.f32 %v10580_v52 }
 0xa6e   : > { %v10583_v17 = vadd.f32 %v3507_v33, %v3505_v14  ;;  %8548 = vrcp.f32 %v3499_v4 }
 0xa70   : > { %8550 = vtanh.f32 %v10583_v17 }
 0xa77   : > { %v8547_v10 = vpop.eup %8546 }
 0xa78   : > { %v8549_v9 = vpop.eup %8548  ;;  %v3512_v55 = vmul.f32 %v8547_v10, %v8545_v53 }
 0xa7a   : > { %v8551_v46 = vpop.eup %8550 }
 0xa7b   : > { %v3513_v25 = vmul.f32 %v8551_v46, %v8549_v9 }
 0xa7d   : > { %v10586_v11 = vpack.c.bf16 %v3513_v25, %v3512_v55 }
 0xa7f   : > { %3557 = vmatmul.mubr.bf16.vlgmr.msra.gmra.mrb[36].mxu0 %v10586_v11  ;;  %3600 = vmatmul.mubr.bf16.vlgmr.msra.gmra.mrb[44].mxu1 %v10586_v11 }
 0xa80   : > { %3677 = vmatpush1.bf16.msra.mxu0 %v10382_v31  ;;  %3720 = vmatpush1.bf16.msra.mxu1 %v10415_v35 }
 0xa81   : > { %3678 = vmatprep.subr.bf16.mxu0 %v10419_v57  ;;  %3721 = vmatprep.subr.bf16.mxu1 %v10421_v30 }
 0xa82   : > { %3708 = vmatprep.mubr.bf16.mxu0 %v11829_v3  ;;  %3751 = vmatprep.mubr.bf16.mxu1 %v11829_v3 }
 0xa84   : > { %3679 = vmatpush1.bf16.msra.mxu0 %v10423_v60  ;;  %3722 = vmatpush1.bf16.msra.mxu1 %v10429_v42 }
 0xa85   : > { %3680 = vmatprep.subr.bf16.mxu0 %v10425_v39  ;;  %3723 = vmatprep.subr.bf16.mxu1 %v10434_v59 }
 0xa88   : > { %3681 = vmatpush1.bf16.msra.mxu0 %v10432_v43  ;;  %3724 = vmatpush1.bf16.msra.mxu1 %v10440_v37 }
 0xa89   : > { %3682 = vmatprep.subr.bf16.mxu0 %v10437_v32  ;;  %3725 = vmatprep.subr.bf16.mxu1 %v10443_v40 }
 0xa8c   : > { %3683 = vmatpush1.bf16.msra.mxu0 %v10446_v58  ;;  %3726 = vmatpush1.bf16.msra.mxu1 %v10452_v36 }
 0xa8d   : > { %3684 = vmatprep.subr.bf16.mxu0 %v10449_v44  ;;  %3727 = vmatprep.subr.bf16.mxu1 %v10455_v38 }
 0xa90   : > { %3685 = vmatpush1.bf16.msra.mxu0 %v10458_v47  ;;  %3728 = vmatpush1.bf16.msra.mxu1 %v10464_v0 }
 0xa91   : > { %3686 = vmatprep.subr.bf16.mxu0 %v10461_v19  ;;  %3729 = vmatprep.subr.bf16.mxu1 %v10467_v24 }
 0xa94   : > { %3687 = vmatpush1.bf16.msra.mxu0 %v10470_v20  ;;  %3730 = vmatpush1.bf16.msra.mxu1 %v10476_v26 }
 0xa95   : > { %3688 = vmatprep.subr.bf16.mxu0 %v10473_v28  ;;  %3731 = vmatprep.subr.bf16.mxu1 %v10486_v63 }
 0xa98   : > { %3689 = vmatpush1.bf16.msra.mxu0 %v10480_v27  ;;  %3732 = vmatpush1.bf16.msra.mxu1 %v10488_v45 }
 0xa99   : > { %3690 = vmatprep.subr.bf16.mxu0 %v10484_v49  ;;  %3733 = vmatprep.subr.bf16.mxu1 %v10490_v48 }
 0xa9c   : > { %3691 = vmatpush1.bf16.msra.mxu0 %v10494_v50  ;;  %3734 = vmatpush1.bf16.msra.mxu1 %v10498_v51 }
 0xa9d   : > { %3828 = vmatprep.subr.bf16.mxu0 %v10379_v62  ;;  %3871 = vmatprep.subr.bf16.mxu1 %v10413_v23 }
 0xb52   : > { %v3558_v41 = vpop.f32.mrb[36].mxu0  ;;  %v3601_v2 = vpop.f32.mrb[44].mxu1 }
 0xb53   : > { %v7571_v56 = vadd.f32 %v3558_v41, %v10561_v13  ;;  %v3560_v61 = vpop.f32.mrb[37].mxu0  ;;  %v3603_v1 = vpop.f32.mrb[45].mxu1  ;;  %v7603_v46 = vadd.f32 %v3601_v2, %v10574_v8 }
 0xb54   : > { %v7572_v5 = vadd.f32 %v3560_v61, %v10564_v54  ;;  %v3562_v21 = vpop.f32.mrb[38].mxu0  ;;  %v3605_v22 = vpop.f32.mrb[46].mxu1  ;;  %v7604_v9 = vadd.f32 %v3603_v1, %v10570_v18 }
 0xb55   : > { %v7215_v29 = vmul.f32 -1.442695, %v7571_v56  ;;  %v7573_v7 = vadd.f32 %v3562_v21, %v10561_v13  ;;  %v3564_v33 = vpop.f32.mrb[39].mxu0  ;;  %v3607_v12 = vpop.f32.mrb[47].mxu1  ;;  %v7605_v41 = vadd.f32 %v3605_v22, %v10574_v8 }
 0xb56   : > { %v7217_v4 = vmul.f32 -1.442695, %v7572_v5  ;;  %v7574_v14 = vadd.f32 %v3564_v33, %v10564_v54  ;;  %v7219_v55 = vmul.f32 -1.442695, %v7604_v9  ;;  %v7606_v25 = vadd.f32 %v3607_v12, %v10570_v18 }
 0xb57   : > { %8552 = vpow2.f32 %v7215_v29  ;;  %v7216_v53 = vmul.f32 -1.442695, %v7573_v7 }
 0xb58   : > { %8554 = vpow2.f32 %v7217_v4  ;;  %v7218_v10 = vmul.f32 -1.442695, %v7574_v14  ;;  %v7220_v21 = vmul.f32 -1.442695, %v7606_v25 }
 0xb59   : > { %8556 = vpow2.f32 %v7216_v53 }
 0xb5a   : > { %8558 = vpow2.f32 %v7218_v10 }
 0xb5b   : > { %8560 = vtanh.f32 %v7603_v46 }
 0xb5c   : > { %8562 = vpow2.f32 %v7219_v55 }
 0xb5d   : > { %8564 = vtanh.f32 %v7605_v41 }
 0xb61   : > { %v8553_v56 = vpop.eup %8552 }
 0xb62   : > { %v8555_v61 = vpop.eup %8554  ;;  %v3624_v5 = vadd.f32 1.0, %v8553_v56 }
 0xb63   : > { %v3636_v29 = vadd.f32 1.0, %v8555_v61  ;;  %v8557_v7 = vpop.eup %8556 }
 0xb64   : > { %8566 = vrcp.f32 %v3624_v5  ;;  %v3625_v1 = vadd.f32 1.0, %v8557_v7  ;;  %v8559_v33 = vpop.eup %8558 }
 0xb65   : > { %8568 = vrcp.f32 %v3636_v29  ;;  %v3637_v2 = vadd.f32 1.0, %v8559_v33  ;;  %v8561_v12 = vpop.eup %8560 }
 0xb66   : > { %8570 = vpow2.f32 %v7220_v21  ;;  %v8563_v4 = vpop.eup %8562 }
 0xb67   : > { %8572 = vrcp.f32 %v3625_v1  ;;  %v8565_v22 = vpop.eup %8564  ;;  %v3650_v25 = vadd.f32 1.0, %v8563_v4 }
 0xb68   : > { %8574 = vrcp.f32 %v3637_v2 }
 0xb69   : > { %8576 = vrcp.f32 %v3650_v25 }
 0xb6e   : > { %v8567_v14 = vpop.eup %8566 }
 0xb6f   : > { %v8569_v53 = vpop.eup %8568  ;;  %v3658_v10 = vmul.f32 %v8567_v14, %v8561_v12 }
 0xb70   : > { %v8571_v9 = vpop.eup %8570  ;;  %v3656_v46 = vmul.f32 %v8569_v53, %v10580_v52 }
 0xb71   : > { %v8573_v55 = vpop.eup %8572  ;;  %v3651_v5 = vadd.f32 1.0, %v8571_v9 }
 0xb72   : > { %v10633_v41 = vadd.f32 %v3658_v10, %v3656_v46  ;;  %v3659_v56 = vmul.f32 %v8573_v55, %v8565_v22  ;;  %v8575_v61 = vpop.eup %8574 }
 0xb73   : > { %v3657_v21 = vmul.f32 %v8575_v61, %v10583_v17  ;;  %v8577_v7 = vpop.eup %8576 }
 0xb74   : > { %8578 = vtanh.f32 %v10633_v41 }
 0xb75   : > { %v10637_v29 = vadd.f32 %v3659_v56, %v3657_v21  ;;  %8580 = vrcp.f32 %v3651_v5 }
 0xb77   : > { %8582 = vtanh.f32 %v10637_v29 }
 0xb7e   : > { %v8579_v1 = vpop.eup %8578 }
 0xb7f   : > { %v8581_v52 = vpop.eup %8580  ;;  %v3664_v2 = vmul.f32 %v8579_v1, %v8577_v7 }
 0xb81   : > { %v8583_v33 = vpop.eup %8582 }
 0xb82   : > { %v3665_v12 = vmul.f32 %v8583_v33, %v8581_v52 }
 0xb84   : > { %v10640_v4 = vpack.c.bf16 %v3665_v12, %v3664_v2 }
 0xb86   : > { %3709 = vmatmul.mubr.bf16.vlgmr.msra.gmra.mrb[40].mxu0 %v10640_v4  ;;  %3752 = vmatmul.mubr.bf16.vlgmr.msra.gmra.mrb[48].mxu1 %v10640_v4 }
 0xb87   : > { %3829 = vmatpush1.bf16.msra.mxu0 %v10382_v31  ;;  %3872 = vmatpush1.bf16.msra.mxu1 %v10415_v35 }
 0xb88   : > { %3830 = vmatprep.subr.bf16.mxu0 %v10419_v57  ;;  %3873 = vmatprep.subr.bf16.mxu1 %v10421_v30 }
 0xb89   : > { %3860 = vmatprep.mubr.bf16.mxu0 %v11829_v3  ;;  %3903 = vmatprep.mubr.bf16.mxu1 %v11829_v3 }
 0xb8b   : > { %3831 = vmatpush1.bf16.msra.mxu0 %v10423_v60  ;;  %3874 = vmatpush1.bf16.msra.mxu1 %v10429_v42 }
 0xb8c   : > { %3832 = vmatprep.subr.bf16.mxu0 %v10425_v39  ;;  %3875 = vmatprep.subr.bf16.mxu1 %v10434_v59 }
 0xb8f   : > { %3833 = vmatpush1.bf16.msra.mxu0 %v10432_v43  ;;  %3876 = vmatpush1.bf16.msra.mxu1 %v10440_v37 }
 0xb90   : > { %3834 = vmatprep.subr.bf16.mxu0 %v10437_v32  ;;  %3877 = vmatprep.subr.bf16.mxu1 %v10443_v40 }
 0xb93   : > { %3835 = vmatpush1.bf16.msra.mxu0 %v10446_v58  ;;  %3878 = vmatpush1.bf16.msra.mxu1 %v10452_v36 }
 0xb94   : > { %3836 = vmatprep.subr.bf16.mxu0 %v10449_v44  ;;  %3879 = vmatprep.subr.bf16.mxu1 %v10455_v38 }
 0xb97   : > { %3837 = vmatpush1.bf16.msra.mxu0 %v10458_v47  ;;  %3880 = vmatpush1.bf16.msra.mxu1 %v10464_v0 }
 0xb98   : > { %3838 = vmatprep.subr.bf16.mxu0 %v10461_v19  ;;  %3881 = vmatprep.subr.bf16.mxu1 %v10467_v24 }
 0xb9b   : > { %3839 = vmatpush1.bf16.msra.mxu0 %v10470_v20  ;;  %3882 = vmatpush1.bf16.msra.mxu1 %v10476_v26 }
 0xb9c   : > { %3840 = vmatprep.subr.bf16.mxu0 %v10473_v28  ;;  %3883 = vmatprep.subr.bf16.mxu1 %v10486_v63 }
 0xb9f   : > { %3841 = vmatpush1.bf16.msra.mxu0 %v10480_v27  ;;  %3884 = vmatpush1.bf16.msra.mxu1 %v10488_v45 }
 0xba0   : > { %3842 = vmatprep.subr.bf16.mxu0 %v10484_v49  ;;  %3885 = vmatprep.subr.bf16.mxu1 %v10490_v48 }
 0xba3   : > { %3843 = vmatpush1.bf16.msra.mxu0 %v10494_v50  ;;  %3886 = vmatpush1.bf16.msra.mxu1 %v10498_v51 }
 0xba4   : > { %3980 = vmatprep.subr.bf16.mxu0 %v10379_v62  ;;  %4023 = vmatprep.subr.bf16.mxu1 %v10413_v23 }
 0xc59   : > { %v3710_v17 = vpop.f32.mrb[40].mxu0  ;;  %v3753_v22 = vpop.f32.mrb[48].mxu1 }
 0xc5a   : > { %v7575_v14 = vadd.f32 %v3710_v17, %v10561_v13  ;;  %v3712_v53 = vpop.f32.mrb[41].mxu0  ;;  %v3755_v10 = vpop.f32.mrb[49].mxu1  ;;  %v7607_v33 = vadd.f32 %v3753_v22, %v10574_v8 }
 0xc5b   : > { %v7576_v9 = vadd.f32 %v3712_v53, %v10564_v54  ;;  %v3714_v46 = vpop.f32.mrb[42].mxu0  ;;  %v3757_v55 = vpop.f32.mrb[50].mxu1  ;;  %v7608_v52 = vadd.f32 %v3755_v10, %v10570_v18 }
 0xc5c   : > { %v7221_v25 = vmul.f32 -1.442695, %v7575_v14  ;;  %v7577_v56 = vadd.f32 %v3714_v46, %v10561_v13  ;;  %v3716_v61 = vpop.f32.mrb[43].mxu0  ;;  %v3759_v5 = vpop.f32.mrb[51].mxu1  ;;  %v7609_v17 = vadd.f32 %v3757_v55, %v10574_v8 }
 0xc5d   : > { %v7223_v21 = vmul.f32 -1.442695, %v7576_v9  ;;  %v7578_v62 = vadd.f32 %v3716_v61, %v10564_v54  ;;  %v7225_v2 = vmul.f32 -1.442695, %v7608_v52  ;;  %v7610_v12 = vadd.f32 %v3759_v5, %v10570_v18 }
 0xc5e   : > { %8584 = vpow2.f32 %v7221_v25  ;;  %v7222_v7 = vmul.f32 -1.442695, %v7577_v56 }
 0xc5f   : > { %8586 = vpow2.f32 %v7223_v21  ;;  %v7224_v1 = vmul.f32 -1.442695, %v7578_v62  ;;  %v7226_v46 = vmul.f32 -1.442695, %v7610_v12 }
 0xc60   : > { %8588 = vpow2.f32 %v7222_v7 }
 0xc61   : > { %8590 = vpow2.f32 %v7224_v1 }
 0xc62   : > { %8592 = vtanh.f32 %v7607_v33 }
 0xc63   : > { %8594 = vpow2.f32 %v7225_v2 }
 0xc64   : > { %8596 = vtanh.f32 %v7609_v17 }
 0xc68   : > { %v8585_v14 = vpop.eup %8584 }
 0xc69   : > { %v8587_v53 = vpop.eup %8586  ;;  %v3776_v9 = vadd.f32 1.0, %v8585_v14 }
 0xc6a   : > { %v3788_v25 = vadd.f32 1.0, %v8587_v53  ;;  %v8589_v56 = vpop.eup %8588 }
 0xc6b   : > { %8598 = vrcp.f32 %v3776_v9  ;;  %v3777_v10 = vadd.f32 1.0, %v8589_v56  ;;  %v8591_v61 = vpop.eup %8590 }
 0xc6c   : > { %8600 = vrcp.f32 %v3788_v25  ;;  %v3789_v22 = vadd.f32 1.0, %v8591_v61  ;;  %v8593_v5 = vpop.eup %8592 }
 0xc6d   : > { %8602 = vpow2.f32 %v7226_v46  ;;  %v8595_v21 = vpop.eup %8594 }
 0xc6e   : > { %8604 = vrcp.f32 %v3777_v10  ;;  %v8597_v55 = vpop.eup %8596  ;;  %v3802_v12 = vadd.f32 1.0, %v8595_v21 }
 0xc6f   : > { %8606 = vrcp.f32 %v3789_v22 }
 0xc70   : > { %8608 = vrcp.f32 %v3802_v12 }
 0xc75   : > { %v8599_v62 = vpop.eup %8598 }
 0xc76   : > { %v8601_v7 = vpop.eup %8600  ;;  %v3810_v1 = vmul.f32 %v8599_v62, %v8593_v5 }
 0xc77   : > { %v8603_v52 = vpop.eup %8602  ;;  %v3808_v33 = vmul.f32 %v8601_v7, %v10633_v41 }
 0xc78   : > { %v8605_v2 = vpop.eup %8604  ;;  %v3803_v9 = vadd.f32 1.0, %v8603_v52 }
 0xc79   : > { %v10687_v17 = vadd.f32 %v3810_v1, %v3808_v33  ;;  %v3811_v14 = vmul.f32 %v8605_v2, %v8597_v55  ;;  %v8607_v53 = vpop.eup %8606 }
 0xc7a   : > { %v3809_v46 = vmul.f32 %v8607_v53, %v10637_v29  ;;  %v8609_v56 = vpop.eup %8608 }
 0xc7b   : > { %8610 = vtanh.f32 %v10687_v17 }
 0xc7c   : > { %v10691_v25 = vadd.f32 %v3811_v14, %v3809_v46  ;;  %8612 = vrcp.f32 %v3803_v9 }
 0xc7e   : > { %8614 = vtanh.f32 %v10691_v25 }
 0xc85   : > { %v8611_v10 = vpop.eup %8610 }
 0xc86   : > { %v8613_v41 = vpop.eup %8612  ;;  %v3816_v22 = vmul.f32 %v8611_v10, %v8609_v56 }
 0xc88   : > { %v8615_v61 = vpop.eup %8614 }
 0xc89   : > { %v3817_v5 = vmul.f32 %v8615_v61, %v8613_v41 }
 0xc8b   : > { %v10694_v21 = vpack.c.bf16 %v3817_v5, %v3816_v22 }
 0xc8d   : > { %3861 = vmatmul.mubr.bf16.vlgmr.msra.gmra.mrb[44].mxu0 %v10694_v21  ;;  %3904 = vmatmul.mubr.bf16.vlgmr.msra.gmra.mrb[52].mxu1 %v10694_v21 }
 0xc8e   : > { %3981 = vmatpush1.bf16.msra.mxu0 %v10382_v31  ;;  %4024 = vmatpush1.bf16.msra.mxu1 %v10415_v35  ;;  %v10730_v31 = vld [vmem:[#allocation11 + $0x4] ss:$16 sps:$4 sm:$0xff]  }
 0xc8f   : > { %3982 = vmatprep.subr.bf16.mxu0 %v10419_v57  ;;  %4025 = vmatprep.subr.bf16.mxu1 %v10421_v30 }
 0xc90   : > { %4012 = vmatprep.mubr.bf16.mxu0 %v11829_v3  ;;  %4055 = vmatprep.mubr.bf16.mxu1 %v11829_v3 }
 0xc92   : > { %3983 = vmatpush1.bf16.msra.mxu0 %v10423_v60  ;;  %4026 = vmatpush1.bf16.msra.mxu1 %v10429_v42 }
 0xc93   : > { %3984 = vmatprep.subr.bf16.mxu0 %v10425_v39  ;;  %4027 = vmatprep.subr.bf16.mxu1 %v10434_v59 }
 0xc96   : > { %3985 = vmatpush1.bf16.msra.mxu0 %v10432_v43  ;;  %4028 = vmatpush1.bf16.msra.mxu1 %v10440_v37 }
 0xc97   : > { %3986 = vmatprep.subr.bf16.mxu0 %v10437_v32  ;;  %4029 = vmatprep.subr.bf16.mxu1 %v10443_v40 }
 0xc9a   : > { %3987 = vmatpush1.bf16.msra.mxu0 %v10446_v58  ;;  %4030 = vmatpush1.bf16.msra.mxu1 %v10452_v36 }
 0xc9b   : > { %3988 = vmatprep.subr.bf16.mxu0 %v10449_v44  ;;  %4031 = vmatprep.subr.bf16.mxu1 %v10455_v38 }
 0xc9e   : > { %3989 = vmatpush1.bf16.msra.mxu0 %v10458_v47  ;;  %4032 = vmatpush1.bf16.msra.mxu1 %v10464_v0 }
 0xc9f   : > { %3990 = vmatprep.subr.bf16.mxu0 %v10461_v19  ;;  %4033 = vmatprep.subr.bf16.mxu1 %v10467_v24 }
 0xca2   : > { %3991 = vmatpush1.bf16.msra.mxu0 %v10470_v20  ;;  %4034 = vmatpush1.bf16.msra.mxu1 %v10476_v26 }
 0xca3   : > { %3992 = vmatprep.subr.bf16.mxu0 %v10473_v28  ;;  %4035 = vmatprep.subr.bf16.mxu1 %v10486_v63 }
 0xca6   : > { %3993 = vmatpush1.bf16.msra.mxu0 %v10480_v27  ;;  %4036 = vmatpush1.bf16.msra.mxu1 %v10488_v45 }
 0xca7   : > { %3994 = vmatprep.subr.bf16.mxu0 %v10484_v49  ;;  %4037 = vmatprep.subr.bf16.mxu1 %v10490_v48 }
 0xcaa   : > { %3995 = vmatpush1.bf16.msra.mxu0 %v10494_v50  ;;  %4038 = vmatpush1.bf16.msra.mxu1 %v10498_v51 }
 0xcab   : > { %4132 = vmatprep.subr.bf16.mxu0 %v10730_v31  ;;  %4175 = vmatprep.subr.bf16.mxu1 %v10413_v23 }
 0xd60   : > { %v3862_v35 = vpop.f32.mrb[44].mxu0  ;;  %v3905_v57 = vpop.f32.mrb[52].mxu1 }
 0xd61   : > { %v7579_v30 = vadd.f32 %v3862_v35, %v10561_v13  ;;  %v3864_v60 = vpop.f32.mrb[45].mxu0  ;;  %v3907_v39 = vpop.f32.mrb[53].mxu1  ;;  %v7611_v19 = vadd.f32 %v3905_v57, %v10574_v8 }
 0xd62   : > { %v7580_v42 = vadd.f32 %v3864_v60, %v10564_v54  ;;  %v3866_v43 = vpop.f32.mrb[46].mxu0  ;;  %v3909_v59 = vpop.f32.mrb[54].mxu1  ;;  %v7612_v47 = vadd.f32 %v3907_v39, %v10570_v18  ;;  %v10757_v60 = vld [vmem:[#allocation11 + $0x8] ss:$16 sps:$4 sm:$0xff]   ;;  %v10760_v39 = vld [vmem:[#allocation11 + $0x24] ss:$16 sps:$4 sm:$0xff]  }
 0xd63   : > { %v7227_v32 = vmul.f32 -1.442695, %v7579_v30  ;;  %v7581_v37 = vadd.f32 %v3866_v43, %v10561_v13  ;;  %v3868_v40 = vpop.f32.mrb[47].mxu0  ;;  %v3911_v58 = vpop.f32.mrb[55].mxu1  ;;  %v7613_v20 = vadd.f32 %v3909_v59, %v10574_v8  ;;  %v10768_v43 = vld [vmem:[#allocation11 + $0x20] ss:$16 sps:$4 sm:$0xff]  }
 0xd64   : > { %v7229_v44 = vmul.f32 -1.442695, %v7580_v42  ;;  %v7582_v36 = vadd.f32 %v3868_v40, %v10564_v54  ;;  %v7231_v0 = vmul.f32 -1.442695, %v7612_v47  ;;  %v7614_v24 = vadd.f32 %v3911_v58, %v10570_v18  ;;  %v10763_v42 = vld [vmem:[#allocation11 + $0x2c] ss:$16 sps:$4 sm:$0xff]  }
 0xd65   : > { %8616 = vpow2.f32 %v7227_v32  ;;  %v7228_v23 = vmul.f32 -1.442695, %v7581_v37  ;;  %v10771_v59 = vld [vmem:[#allocation11 + $0x28] ss:$16 sps:$4 sm:$0xff]   ;;  %v10774_v32 = vld [vmem:[#allocation11 + $0x44] ss:$16 sps:$4 sm:$0xff]  }
 0xd66   : > { %8618 = vpow2.f32 %v7229_v44  ;;  %v7230_v38 = vmul.f32 -1.442695, %v7582_v36  ;;  %v7232_v49 = vmul.f32 -1.442695, %v7614_v24  ;;  %v10777_v37 = vld [vmem:[#allocation11 + $0x4c] ss:$16 sps:$4 sm:$0xff]  }
 0xd67   : > { %8620 = vpow2.f32 %v7228_v23  ;;  %v10780_v40 = vld [vmem:[#allocation11 + $0x40] ss:$16 sps:$4 sm:$0xff]   ;;  %v10783_v58 = vld [vmem:[#allocation11 + $0x48] ss:$16 sps:$4 sm:$0xff]   ;;  %v10786_v44 = vld [vmem:[#allocation11 + $0x64] ss:$16 sps:$4 sm:$0xff]  }
 0xd68   : > { %8622 = vpow2.f32 %v7230_v38  ;;  %v10789_v36 = vld [vmem:[#allocation11 + $0x6c] ss:$16 sps:$4 sm:$0xff]   ;;  %v10792_v23 = vld [vmem:[#allocation11 + $0x60] ss:$16 sps:$4 sm:$0xff]   ;;  %v10795_v38 = vld [vmem:[#allocation11 + $0x68] ss:$16 sps:$4 sm:$0xff]  }
 0xd69   : > { %8624 = vtanh.f32 %v7611_v19  ;;  %v10798_v47 = vld [vmem:[#allocation11 + $0x84] ss:$16 sps:$4 sm:$0xff]   ;;  %v10801_v19 = vld [vmem:[#allocation11 + $0x8c] ss:$16 sps:$4 sm:$0xff]   ;;  %v10807_v24 = vld [vmem:[#allocation11 + $0x88] ss:$16 sps:$4 sm:$0xff]  }
 0xd6a   : > { %8626 = vpow2.f32 %v7231_v0  ;;  %v10804_v0 = vld [vmem:[#allocation11 + $0x80] ss:$16 sps:$4 sm:$0xff]  }
 0xd6b   : > { %8628 = vtanh.f32 %v7613_v20  ;;  %v10810_v20 = vld [vmem:[#allocation11 + $0xa4] ss:$16 sps:$4 sm:$0xff]  }
 0xd6f   : > { %v8617_v28 = vpop.eup %8616 }
 0xd70   : > { %v8619_v26 = vpop.eup %8618  ;;  %v3928_v27 = vadd.f32 1.0, %v8617_v28  ;;  %v10813_v28 = vld [vmem:[#allocation11 + $0xac] ss:$16 sps:$4 sm:$0xff]  }
 0xd71   : > { %v3940_v63 = vadd.f32 1.0, %v8619_v26  ;;  %v8621_v45 = vpop.eup %8620  ;;  %v10816_v26 = vld [vmem:[#allocation11 + $0xa0] ss:$16 sps:$4 sm:$0xff]  }
 0xd72   : > { %8630 = vrcp.f32 %v3928_v27  ;;  %v3929_v48 = vadd.f32 1.0, %v8621_v45  ;;  %v8623_v50 = vpop.eup %8622  ;;  %v10819_v27 = vld [vmem:[#allocation11 + $0xa8] ss:$16 sps:$4 sm:$0xff]   ;;  %v10828_v45 = vld [vmem:[#allocation11 + $0xc0] ss:$16 sps:$4 sm:$0xff]  }
 0xd73   : > { %8632 = vrcp.f32 %v3940_v63  ;;  %v3941_v51 = vadd.f32 1.0, %v8623_v50  ;;  %v8625_v29 = vpop.eup %8624  ;;  %v10825_v63 = vld [vmem:[#allocation11 + $0xcc] ss:$16 sps:$4 sm:$0xff]   ;;  %v10834_v50 = vld [vmem:[#allocation11 + $0xe4] ss:$16 sps:$4 sm:$0xff]  }
 0xd74   : > { %8634 = vpow2.f32 %v7232_v49  ;;  %v8627_v55 = vpop.eup %8626  ;;  %v10822_v49 = vld [vmem:[#allocation11 + $0xc4] ss:$16 sps:$4 sm:$0xff]  }
 0xd75   : > { %8636 = vrcp.f32 %v3929_v48  ;;  %v8629_v62 = vpop.eup %8628  ;;  %v3954_v14 = vadd.f32 1.0, %v8627_v55  ;;  %v10831_v48 = vld [vmem:[#allocation11 + $0xc8] ss:$16 sps:$4 sm:$0xff]  }
 0xd76   : > { %8638 = vrcp.f32 %v3941_v51  ;;  %v10837_v51 = vld [vmem:[#allocation11 + $0xec] ss:$16 sps:$4 sm:$0xff]   ;;  %v10843_v55 = vld [vmem:[#allocation11 + $0xe8] ss:$16 sps:$4 sm:$0xff]  }
 0xd77   : > { %8640 = vrcp.f32 %v3954_v14 }
 0xd7c   : > { %v8631_v7 = vpop.eup %8630 }
 0xd7d   : > { %v8633_v1 = vpop.eup %8632  ;;  %v3962_v52 = vmul.f32 %v8631_v7, %v8625_v29  ;;  %v10840_v29 = vld [vmem:[#allocation11 + $0xe0] ss:$16 sps:$4 sm:$0xff]  }
 0xd7e   : > { %v8635_v33 = vpop.eup %8634  ;;  %v3960_v2 = vmul.f32 %v8633_v1, %v10687_v17 }
 0xd7f   : > { %v8637_v12 = vpop.eup %8636  ;;  %v3955_v56 = vadd.f32 1.0, %v8635_v33 }
 0xd80   : > { %v10743_v53 = vadd.f32 %v3962_v52, %v3960_v2  ;;  %v3963_v9 = vmul.f32 %v8637_v12, %v8629_v62  ;;  %v8639_v46 = vpop.eup %8638  ;;  %v10847_v62 = vld [vmem:[#allocation11 + $0xc] ss:$16 sps:$4 sm:$0xff]  }
 0xd81   : > { %v3961_v10 = vmul.f32 %v8639_v46, %v10691_v25  ;;  %v8641_v61 = vpop.eup %8640  ;;  %v10754_v25 = vld [vmem:[#allocation11] ss:$16 sps:$4 sm:$0xff]  }
 0xd82   : > { %8642 = vtanh.f32 %v10743_v53 }
 0xd83   : > { %v10747_v41 = vadd.f32 %v3963_v9, %v3961_v10  ;;  %8644 = vrcp.f32 %v3955_v56 }
 0xd85   : > { %8646 = vtanh.f32 %v10747_v41 }
 0xd8c   : > { %v8643_v22 = vpop.eup %8642 }
 0xd8d   : > { %v8645_v17 = vpop.eup %8644  ;;  %v3968_v35 = vmul.f32 %v8643_v22, %v8641_v61 }
 0xd8f   : > { %v8647_v5 = vpop.eup %8646 }
 0xd90   : > { %v3969_v57 = vmul.f32 %v8647_v5, %v8645_v17 }
 0xd92   : > { %v10750_v30 = vpack.c.bf16 %v3969_v57, %v3968_v35 }
 0xd94   : > { %4013 = vmatmul.mubr.bf16.vlgmr.msra.gmra.mrb[48].mxu0 %v10750_v30  ;;  %4056 = vmatmul.mubr.bf16.vlgmr.msra.gmra.mrb[56].mxu1 %v10750_v30 }
 0xd95   : > { %4133 = vmatpush1.bf16.msra.mxu0 %v10754_v25  ;;  %4176 = vmatpush1.bf16.msra.mxu1 %v10757_v60 }
 0xd96   : > { %4134 = vmatprep.subr.bf16.mxu0 %v10760_v39  ;;  %4177 = vmatprep.subr.bf16.mxu1 %v10763_v42 }
 0xd97   : > { %4164 = vmatprep.mubr.bf16.mxu0 %v11829_v3  ;;  %4207 = vmatprep.mubr.bf16.mxu1 %v11829_v3 }
 0xd99   : > { %4135 = vmatpush1.bf16.msra.mxu0 %v10768_v43  ;;  %4178 = vmatpush1.bf16.msra.mxu1 %v10771_v59 }
 0xd9a   : > { %4136 = vmatprep.subr.bf16.mxu0 %v10774_v32  ;;  %4179 = vmatprep.subr.bf16.mxu1 %v10777_v37 }
 0xd9d   : > { %4137 = vmatpush1.bf16.msra.mxu0 %v10780_v40  ;;  %4180 = vmatpush1.bf16.msra.mxu1 %v10783_v58 }
 0xd9e   : > { %4138 = vmatprep.subr.bf16.mxu0 %v10786_v44  ;;  %4181 = vmatprep.subr.bf16.mxu1 %v10789_v36 }
 0xda1   : > { %4139 = vmatpush1.bf16.msra.mxu0 %v10792_v23  ;;  %4182 = vmatpush1.bf16.msra.mxu1 %v10795_v38 }
 0xda2   : > { %4140 = vmatprep.subr.bf16.mxu0 %v10798_v47  ;;  %4183 = vmatprep.subr.bf16.mxu1 %v10801_v19 }
 0xda5   : > { %4141 = vmatpush1.bf16.msra.mxu0 %v10804_v0  ;;  %4184 = vmatpush1.bf16.msra.mxu1 %v10807_v24 }
 0xda6   : > { %4142 = vmatprep.subr.bf16.mxu0 %v10810_v20  ;;  %4185 = vmatprep.subr.bf16.mxu1 %v10813_v28 }
 0xda9   : > { %4143 = vmatpush1.bf16.msra.mxu0 %v10816_v26  ;;  %4186 = vmatpush1.bf16.msra.mxu1 %v10819_v27 }
 0xdaa   : > { %4144 = vmatprep.subr.bf16.mxu0 %v10822_v49  ;;  %4187 = vmatprep.subr.bf16.mxu1 %v10825_v63 }
 0xdad   : > { %4145 = vmatpush1.bf16.msra.mxu0 %v10828_v45  ;;  %4188 = vmatpush1.bf16.msra.mxu1 %v10831_v48 }
 0xdae   : > { %4146 = vmatprep.subr.bf16.mxu0 %v10834_v50  ;;  %4189 = vmatprep.subr.bf16.mxu1 %v10837_v51 }
 0xdb1   : > { %4147 = vmatpush1.bf16.msra.mxu0 %v10840_v29  ;;  %4190 = vmatpush1.bf16.msra.mxu1 %v10843_v55 }
 0xdb2   : > { %4284 = vmatprep.subr.bf16.mxu0 %v10730_v31  ;;  %4327 = vmatprep.subr.bf16.mxu1 %v10847_v62 }
 0xe67   : > { %v4014_v7 = vpop.f32.mrb[48].mxu0  ;;  %v4057_v1 = vpop.f32.mrb[56].mxu1 }
 0xe68   : > { %v7583_v52 = vadd.f32 %v4014_v7, %v10561_v13  ;;  %v4016_v33 = vpop.f32.mrb[49].mxu0  ;;  %v4059_v2 = vpop.f32.mrb[57].mxu1  ;;  %v7615_v7 = vadd.f32 %v4057_v1, %v10574_v8 }
 0xe69   : > { %v7584_v12 = vadd.f32 %v4016_v33, %v10564_v54  ;;  %v4018_v14 = vpop.f32.mrb[50].mxu0  ;;  %v4061_v9 = vpop.f32.mrb[58].mxu1  ;;  %v7616_v57 = vadd.f32 %v4059_v2, %v10570_v18 }
 0xe6a   : > { %v7233_v46 = vmul.f32 -1.442695, %v7583_v52  ;;  %v7585_v56 = vadd.f32 %v4018_v14, %v10561_v13  ;;  %v4020_v10 = vpop.f32.mrb[51].mxu0  ;;  %v4063_v61 = vpop.f32.mrb[59].mxu1  ;;  %v7617_v14 = vadd.f32 %v4061_v9, %v10574_v8 }
 0xe6b   : > { %v7235_v22 = vmul.f32 -1.442695, %v7584_v12  ;;  %v7586_v17 = vadd.f32 %v4020_v10, %v10564_v54  ;;  %v7237_v33 = vmul.f32 -1.442695, %v7616_v57  ;;  %v7618_v52 = vadd.f32 %v4063_v61, %v10570_v18 }
 0xe6c   : > { %8648 = vpow2.f32 %v7233_v46  ;;  %v7234_v5 = vmul.f32 -1.442695, %v7585_v56 }
 0xe6d   : > { %8650 = vpow2.f32 %v7235_v22  ;;  %v7236_v35 = vmul.f32 -1.442695, %v7586_v17  ;;  %v7238_v46 = vmul.f32 -1.442695, %v7618_v52 }
 0xe6e   : > { %8652 = vpow2.f32 %v7234_v5 }
 0xe6f   : > { %8654 = vpow2.f32 %v7236_v35 }
 0xe70   : > { %8656 = vtanh.f32 %v7615_v7 }
 0xe71   : > { %8658 = vpow2.f32 %v7237_v33 }
 0xe72   : > { %8660 = vtanh.f32 %v7617_v14 }
 0xe76   : > { %v8649_v6 = vpop.eup %8648 }
 0xe77   : > { %v8651_v12 = vpop.eup %8650  ;;  %v4080_v15 = vadd.f32 1.0, %v8649_v6 }
 0xe78   : > { %v4092_v56 = vadd.f32 1.0, %v8651_v12  ;;  %v8653_v10 = vpop.eup %8652 }
 0xe79   : > { %8662 = vrcp.f32 %v4080_v15  ;;  %v4081_v2 = vadd.f32 1.0, %v8653_v10  ;;  %v8655_v22 = vpop.eup %8654 }
 0xe7a   : > { %8664 = vrcp.f32 %v4092_v56  ;;  %v4093_v1 = vadd.f32 1.0, %v8655_v22  ;;  %v8657_v61 = vpop.eup %8656 }
 0xe7b   : > { %8666 = vpow2.f32 %v7238_v46  ;;  %v8659_v17 = vpop.eup %8658 }
 0xe7c   : > { %8668 = vrcp.f32 %v4081_v2  ;;  %v8661_v9 = vpop.eup %8660  ;;  %v4106_v52 = vadd.f32 1.0, %v8659_v17 }
 0xe7d   : > { %8670 = vrcp.f32 %v4093_v1 }
 0xe7e   : > { %8672 = vrcp.f32 %v4106_v52 }
 0xe83   : > { %v8663_v5 = vpop.eup %8662 }
 0xe84   : > { %v8665_v35 = vpop.eup %8664  ;;  %v4114_v57 = vmul.f32 %v8663_v5, %v8657_v61 }
 0xe85   : > { %v8667_v6 = vpop.eup %8666  ;;  %v4112_v7 = vmul.f32 %v8665_v35, %v10743_v53 }
 0xe86   : > { %v8669_v33 = vpop.eup %8668  ;;  %v4107_v56 = vadd.f32 1.0, %v8667_v6 }
 0xe87   : > { %v10859_v14 = vadd.f32 %v4114_v57, %v4112_v7  ;;  %v4115_v15 = vmul.f32 %v8669_v33, %v8661_v9  ;;  %v8671_v12 = vpop.eup %8670 }
 0xe88   : > { %v4113_v46 = vmul.f32 %v8671_v12, %v10747_v41  ;;  %v8673_v2 = vpop.eup %8672 }
 0xe89   : > { %8674 = vtanh.f32 %v10859_v14 }
 0xe8a   : > { %v10863_v10 = vadd.f32 %v4115_v15, %v4113_v46  ;;  %8676 = vrcp.f32 %v4107_v56 }
 0xe8c   : > { %8678 = vtanh.f32 %v10863_v10 }
 0xe93   : > { %v8675_v22 = vpop.eup %8674 }
 0xe94   : > { %v8677_v53 = vpop.eup %8676  ;;  %v4120_v61 = vmul.f32 %v8675_v22, %v8673_v2 }
 0xe96   : > { %v8679_v1 = vpop.eup %8678 }
 0xe97   : > { %v4121_v17 = vmul.f32 %v8679_v1, %v8677_v53 }
 0xe99   : > { %v10866_v5 = vpack.c.bf16 %v4121_v17, %v4120_v61 }
 0xe9b   : > { %4165 = vmatmul.mubr.bf16.vlgmr.msra.gmra.mrb[52].mxu0 %v10866_v5  ;;  %4208 = vmatmul.mubr.bf16.vlgmr.msra.gmra.mrb[60].mxu1 %v10866_v5 }
 0xe9c   : > { %4285 = vmatpush1.bf16.msra.mxu0 %v10754_v25  ;;  %4328 = vmatpush1.bf16.msra.mxu1 %v10757_v60 }
 0xe9d   : > { %4286 = vmatprep.subr.bf16.mxu0 %v10760_v39  ;;  %4329 = vmatprep.subr.bf16.mxu1 %v10763_v42 }
 0xe9e   : > { %4316 = vmatprep.mubr.bf16.mxu0 %v11829_v3  ;;  %4359 = vmatprep.mubr.bf16.mxu1 %v11829_v3 }
 0xea0   : > { %4287 = vmatpush1.bf16.msra.mxu0 %v10768_v43  ;;  %4330 = vmatpush1.bf16.msra.mxu1 %v10771_v59 }
 0xea1   : > { %4288 = vmatprep.subr.bf16.mxu0 %v10774_v32  ;;  %4331 = vmatprep.subr.bf16.mxu1 %v10777_v37 }
 0xea4   : > { %4289 = vmatpush1.bf16.msra.mxu0 %v10780_v40  ;;  %4332 = vmatpush1.bf16.msra.mxu1 %v10783_v58 }
 0xea5   : > { %4290 = vmatprep.subr.bf16.mxu0 %v10786_v44  ;;  %4333 = vmatprep.subr.bf16.mxu1 %v10789_v36 }
 0xea8   : > { %4291 = vmatpush1.bf16.msra.mxu0 %v10792_v23  ;;  %4334 = vmatpush1.bf16.msra.mxu1 %v10795_v38 }
 0xea9   : > { %4292 = vmatprep.subr.bf16.mxu0 %v10798_v47  ;;  %4335 = vmatprep.subr.bf16.mxu1 %v10801_v19 }
 0xeac   : > { %4293 = vmatpush1.bf16.msra.mxu0 %v10804_v0  ;;  %4336 = vmatpush1.bf16.msra.mxu1 %v10807_v24 }
 0xead   : > { %4294 = vmatprep.subr.bf16.mxu0 %v10810_v20  ;;  %4337 = vmatprep.subr.bf16.mxu1 %v10813_v28 }
 0xeb0   : > { %4295 = vmatpush1.bf16.msra.mxu0 %v10816_v26  ;;  %4338 = vmatpush1.bf16.msra.mxu1 %v10819_v27 }
 0xeb1   : > { %4296 = vmatprep.subr.bf16.mxu0 %v10822_v49  ;;  %4339 = vmatprep.subr.bf16.mxu1 %v10825_v63 }
 0xeb4   : > { %4297 = vmatpush1.bf16.msra.mxu0 %v10828_v45  ;;  %4340 = vmatpush1.bf16.msra.mxu1 %v10831_v48 }
 0xeb5   : > { %4298 = vmatprep.subr.bf16.mxu0 %v10834_v50  ;;  %4341 = vmatprep.subr.bf16.mxu1 %v10837_v51 }
 0xeb8   : > { %4299 = vmatpush1.bf16.msra.mxu0 %v10840_v29  ;;  %4342 = vmatpush1.bf16.msra.mxu1 %v10843_v55 }
 0xeb9   : > { %4436 = vmatprep.subr.bf16.mxu0 %v10730_v31  ;;  %4479 = vmatprep.subr.bf16.mxu1 %v10847_v62 }
 0xf6e   : > { %v4166_v41 = vpop.f32.mrb[52].mxu0  ;;  %v4209_v9 = vpop.f32.mrb[60].mxu1 }
 0xf6f   : > { %v7587_v35 = vadd.f32 %v4166_v41, %v10561_v13  ;;  %v4168_v57 = vpop.f32.mrb[53].mxu0  ;;  %v4211_v6 = vpop.f32.mrb[61].mxu1  ;;  %v7619_v1 = vadd.f32 %v4209_v9, %v10574_v8 }
 0xf70   : > { %v7588_v7 = vadd.f32 %v4168_v57, %v10564_v54  ;;  %v4170_v33 = vpop.f32.mrb[54].mxu0  ;;  %v4213_v52 = vpop.f32.mrb[62].mxu1  ;;  %v7620_v53 = vadd.f32 %v4211_v6, %v10570_v18 }
 0xf71   : > { %v7239_v15 = vmul.f32 -1.442695, %v7587_v35  ;;  %v7589_v12 = vadd.f32 %v4170_v33, %v10561_v13  ;;  %v4172_v56 = vpop.f32.mrb[55].mxu0  ;;  %v4215_v46 = vpop.f32.mrb[63].mxu1  ;;  %v7621_v41 = vadd.f32 %v4213_v52, %v10574_v8 }
 0xf72   : > { %v7241_v2 = vmul.f32 -1.442695, %v7588_v7  ;;  %v7590_v31 = vadd.f32 %v4172_v56, %v10564_v54  ;;  %v7243_v61 = vmul.f32 -1.442695, %v7620_v53  ;;  %v7622_v17 = vadd.f32 %v4215_v46, %v10570_v18 }
 0xf73   : > { %8680 = vpow2.f32 %v7239_v15  ;;  %v7240_v62 = vmul.f32 -1.442695, %v7589_v12 }
 0xf74   : > { %8682 = vpow2.f32 %v7241_v2  ;;  %v7242_v22 = vmul.f32 -1.442695, %v7590_v31  ;;  %v7244_v33 = vmul.f32 -1.442695, %v7622_v17 }
 0xf75   : > { %8684 = vpow2.f32 %v7240_v62 }
 0xf76   : > { %8686 = vpow2.f32 %v7242_v22 }
 0xf77   : > { %8688 = vtanh.f32 %v7619_v1 }
 0xf78   : > { %8690 = vpow2.f32 %v7243_v61 }
 0xf79   : > { %8692 = vtanh.f32 %v7621_v41 }
 0xf7d   : > { %v8681_v35 = vpop.eup %8680 }
 0xf7e   : > { %v8683_v57 = vpop.eup %8682  ;;  %v4232_v7 = vadd.f32 1.0, %v8681_v35 }
 0xf7f   : > { %v4244_v15 = vadd.f32 1.0, %v8683_v57  ;;  %v8685_v12 = vpop.eup %8684 }
 0xf80   : > { %8694 = vrcp.f32 %v4232_v7  ;;  %v4233_v6 = vadd.f32 1.0, %v8685_v12  ;;  %v8687_v56 = vpop.eup %8686 }
 0xf81   : > { %8696 = vrcp.f32 %v4244_v15  ;;  %v4245_v9 = vadd.f32 1.0, %v8687_v56  ;;  %v8689_v46 = vpop.eup %8688 }
 0xf82   : > { %8698 = vpow2.f32 %v7244_v33  ;;  %v8691_v2 = vpop.eup %8690 }
 0xf83   : > { %8700 = vrcp.f32 %v4233_v6  ;;  %v8693_v52 = vpop.eup %8692  ;;  %v4258_v17 = vadd.f32 1.0, %v8691_v2 }
 0xf84   : > { %8702 = vrcp.f32 %v4245_v9 }
 0xf85   : > { %8704 = vrcp.f32 %v4258_v17 }
 0xf8a   : > { %v8695_v31 = vpop.eup %8694 }
 0xf8b   : > { %v8697_v62 = vpop.eup %8696  ;;  %v4266_v22 = vmul.f32 %v8695_v31, %v8689_v46 }
 0xf8c   : > { %v8699_v53 = vpop.eup %8698  ;;  %v4264_v1 = vmul.f32 %v8697_v62, %v10859_v14 }
 0xf8d   : > { %v8701_v61 = vpop.eup %8700  ;;  %v4259_v7 = vadd.f32 1.0, %v8699_v53 }
 0xf8e   : > { %v10913_v41 = vadd.f32 %v4266_v22, %v4264_v1  ;;  %v4267_v35 = vmul.f32 %v8701_v61, %v8693_v52  ;;  %v8703_v57 = vpop.eup %8702 }
 0xf8f   : > { %v4265_v33 = vmul.f32 %v8703_v57, %v10863_v10  ;;  %v8705_v12 = vpop.eup %8704 }
 0xf90   : > { %8706 = vtanh.f32 %v10913_v41 }
 0xf91   : > { %v10917_v15 = vadd.f32 %v4267_v35, %v4265_v33  ;;  %8708 = vrcp.f32 %v4259_v7 }
 0xf93   : > { %8710 = vtanh.f32 %v10917_v15 }
 0xf9a   : > { %v8707_v6 = vpop.eup %8706 }
 0xf9b   : > { %v8709_v14 = vpop.eup %8708  ;;  %v4272_v9 = vmul.f32 %v8707_v6, %v8705_v12 }
 0xf9d   : > { %v8711_v56 = vpop.eup %8710 }
 0xf9e   : > { %v4273_v46 = vmul.f32 %v8711_v56, %v8709_v14 }
 0xfa0   : > { %v10920_v2 = vpack.c.bf16 %v4273_v46, %v4272_v9 }
 0xfa2   : > { %4317 = vmatmul.mubr.bf16.vlgmr.msra.gmra.mrb[56].mxu0 %v10920_v2  ;;  %4360 = vmatmul.mubr.bf16.vlgmr.msra.gmra.mrb[64].mxu1 %v10920_v2 }
 0xfa3   : > { %4437 = vmatpush1.bf16.msra.mxu0 %v10754_v25  ;;  %4480 = vmatpush1.bf16.msra.mxu1 %v10757_v60  ;;  %v8146_v25 = vld [vmem:[#allocation13 + $0x4] ss:$16 sps:$4 sm:$0xff]   ;;  %v8149_v60 = vld [vmem:[#allocation13 + $0xc] ss:$16 sps:$4 sm:$0xff]  }
 0xfa4   : > { %4438 = vmatprep.subr.bf16.mxu0 %v10760_v39  ;;  %4481 = vmatprep.subr.bf16.mxu1 %v10763_v42 }
 0xfa5   : > { %4468 = vmatprep.mubr.bf16.mxu0 %v11829_v3  ;;  %4511 = vmatprep.mubr.bf16.mxu1 %v11829_v3 }
 0xfa7   : > { %4439 = vmatpush1.bf16.msra.mxu0 %v10768_v43  ;;  %4482 = vmatpush1.bf16.msra.mxu1 %v10771_v59 }
 0xfa8   : > { %4440 = vmatprep.subr.bf16.mxu0 %v10774_v32  ;;  %4483 = vmatprep.subr.bf16.mxu1 %v10777_v37 }
 0xfab   : > { %4441 = vmatpush1.bf16.msra.mxu0 %v10780_v40  ;;  %4484 = vmatpush1.bf16.msra.mxu1 %v10783_v58 }
 0xfac   : > { %4442 = vmatprep.subr.bf16.mxu0 %v10786_v44  ;;  %4485 = vmatprep.subr.bf16.mxu1 %v10789_v36 }
 0xfaf   : > { %4443 = vmatpush1.bf16.msra.mxu0 %v10792_v23  ;;  %4486 = vmatpush1.bf16.msra.mxu1 %v10795_v38 }
 0xfb0   : > { %4444 = vmatprep.subr.bf16.mxu0 %v10798_v47  ;;  %4487 = vmatprep.subr.bf16.mxu1 %v10801_v19 }
 0xfb3   : > { %4445 = vmatpush1.bf16.msra.mxu0 %v10804_v0  ;;  %4488 = vmatpush1.bf16.msra.mxu1 %v10807_v24 }
 0xfb4   : > { %4446 = vmatprep.subr.bf16.mxu0 %v10810_v20  ;;  %4489 = vmatprep.subr.bf16.mxu1 %v10813_v28 }
 0xfb7   : > { %4447 = vmatpush1.bf16.msra.mxu0 %v10816_v26  ;;  %4490 = vmatpush1.bf16.msra.mxu1 %v10819_v27 }
 0xfb8   : > { %4448 = vmatprep.subr.bf16.mxu0 %v10822_v49  ;;  %4491 = vmatprep.subr.bf16.mxu1 %v10825_v63 }
 0xfbb   : > { %4449 = vmatpush1.bf16.msra.mxu0 %v10828_v45  ;;  %4492 = vmatpush1.bf16.msra.mxu1 %v10831_v48 }
 0xfbc   : > { %4450 = vmatprep.subr.bf16.mxu0 %v10834_v50  ;;  %4493 = vmatprep.subr.bf16.mxu1 %v10837_v51 }
 0xfbf   : > { %4451 = vmatpush1.bf16.msra.mxu0 %v10840_v29  ;;  %4494 = vmatpush1.bf16.msra.mxu1 %v10843_v55 }
 0xfc0   : > { %4802 = vmatprep.subr.bf16.mxu0 %v8146_v25  ;;  %4915 = vmatprep.subr.bf16.mxu1 %v8149_v60 }
0x1075   : > { %v4318_v39 = vpop.f32.mrb[56].mxu0  ;;  %v4361_v42 = vpop.f32.mrb[64].mxu1 }
0x1076   : > { %v7591_v43 = vadd.f32 %v4318_v39, %v10561_v13  ;;  %v4320_v59 = vpop.f32.mrb[57].mxu0  ;;  %v4363_v32 = vpop.f32.mrb[65].mxu1  ;;  %v7623_v28 = vadd.f32 %v4361_v42, %v10574_v8 }
0x1077   : > { %v7592_v37 = vadd.f32 %v4320_v59, %v10564_v54  ;;  %v4322_v40 = vpop.f32.mrb[58].mxu0  ;;  %v4365_v58 = vpop.f32.mrb[66].mxu1  ;;  %v7624_v20 = vadd.f32 %v4363_v32, %v10570_v18  ;;  %v8147_v59 = vld [vmem:[#allocation13 + $0x8] ss:$16 sps:$4 sm:$0xff]  }
0x1078   : > { %v7245_v44 = vmul.f32 -1.442695, %v7591_v43  ;;  %v7593_v36 = vadd.f32 %v4322_v40, %v10561_v13  ;;  %v4324_v23 = vpop.f32.mrb[59].mxu0  ;;  %v4367_v38 = vpop.f32.mrb[67].mxu1  ;;  %v7625_v49 = vadd.f32 %v4365_v58, %v10574_v8  ;;  %v8144_v43 = vld [vmem:[#allocation13] ss:$16 sps:$4 sm:$0xff]  }
0x1079   : > { %v7247_v47 = vmul.f32 -1.442695, %v7592_v37  ;;  %v7594_v19 = vadd.f32 %v4324_v23, %v10564_v54  ;;  %v7249_v26 = vmul.f32 -1.442695, %v7624_v20  ;;  %v7626_v27 = vadd.f32 %v4367_v38, %v10570_v18  ;;  %v8152_v37 = vld [vmem:[#allocation13 + $0x24] ss:$16 sps:$4 sm:$0xff]  }
0x107a   : > { %8712 = vpow2.f32 %v7245_v44  ;;  %v7246_v0 = vmul.f32 -1.442695, %v7593_v36  ;;  %v8150_v40 = vld [vmem:[#allocation13 + $0x20] ss:$16 sps:$4 sm:$0xff]   ;;  %v8153_v58 = vld [vmem:[#allocation13 + $0x28] ss:$16 sps:$4 sm:$0xff]  }
0x107b   : > { %8714 = vpow2.f32 %v7247_v47  ;;  %v7248_v24 = vmul.f32 -1.442695, %v7594_v19  ;;  %v7250_v50 = vmul.f32 -1.442695, %v7626_v27  ;;  %v8158_v44 = vld [vmem:[#allocation13 + $0x44] ss:$16 sps:$4 sm:$0xff]  }
0x107c   : > { %8716 = vpow2.f32 %v7246_v0  ;;  %v8161_v36 = vld [vmem:[#allocation13 + $0x4c] ss:$16 sps:$4 sm:$0xff]   ;;  %v8156_v23 = vld [vmem:[#allocation13 + $0x40] ss:$16 sps:$4 sm:$0xff]   ;;  %v8159_v38 = vld [vmem:[#allocation13 + $0x48] ss:$16 sps:$4 sm:$0xff]  }
0x107d   : > { %8718 = vpow2.f32 %v7248_v24  ;;  %v8164_v47 = vld [vmem:[#allocation13 + $0x64] ss:$16 sps:$4 sm:$0xff]   ;;  %v8167_v19 = vld [vmem:[#allocation13 + $0x6c] ss:$16 sps:$4 sm:$0xff]   ;;  %v8162_v0 = vld [vmem:[#allocation13 + $0x60] ss:$16 sps:$4 sm:$0xff]  }
0x107e   : > { %8720 = vtanh.f32 %v7623_v28  ;;  %v8165_v24 = vld [vmem:[#allocation13 + $0x68] ss:$16 sps:$4 sm:$0xff]   ;;  %v8170_v20 = vld [vmem:[#allocation13 + $0x84] ss:$16 sps:$4 sm:$0xff]   ;;  %v8173_v28 = vld [vmem:[#allocation13 + $0x8c] ss:$16 sps:$4 sm:$0xff]  }
0x107f   : > { %8722 = vpow2.f32 %v7249_v26  ;;  %v8168_v26 = vld [vmem:[#allocation13 + $0x80] ss:$16 sps:$4 sm:$0xff]   ;;  %v8171_v27 = vld [vmem:[#allocation13 + $0x88] ss:$16 sps:$4 sm:$0xff]  }
0x1080   : > { %8724 = vtanh.f32 %v7625_v49  ;;  %v8176_v49 = vld [vmem:[#allocation13 + $0xa4] ss:$16 sps:$4 sm:$0xff]  }
0x1084   : > { %v8713_v63 = vpop.eup %8712 }
0x1085   : > { %v8715_v45 = vpop.eup %8714  ;;  %v4384_v48 = vadd.f32 1.0, %v8713_v63  ;;  %v8179_v63 = vld [vmem:[#allocation13 + $0xac] ss:$16 sps:$4 sm:$0xff]  }
0x1086   : > { %v4396_v51 = vadd.f32 1.0, %v8715_v45  ;;  %v8717_v29 = vpop.eup %8716  ;;  %v8174_v45 = vld [vmem:[#allocation13 + $0xa0] ss:$16 sps:$4 sm:$0xff]  }
0x1087   : > { %8726 = vrcp.f32 %v4384_v48  ;;  %v4385_v55 = vadd.f32 1.0, %v8717_v29  ;;  %v8719_v10 = vpop.eup %8718  ;;  %v8177_v48 = vld [vmem:[#allocation13 + $0xa8] ss:$16 sps:$4 sm:$0xff]   ;;  %v8180_v29 = vld [vmem:[#allocation13 + $0xc0] ss:$16 sps:$4 sm:$0xff]  }
0x1088   : > { %8728 = vrcp.f32 %v4396_v51  ;;  %v4397_v52 = vadd.f32 1.0, %v8719_v10  ;;  %v8721_v31 = vpop.eup %8720  ;;  %v8185_v51 = vld [vmem:[#allocation13 + $0xcc] ss:$16 sps:$4 sm:$0xff]   ;;  %v8188_v10 = vld [vmem:[#allocation13 + $0xe4] ss:$16 sps:$4 sm:$0xff]  }
0x1089   : > { %8730 = vpow2.f32 %v7250_v50  ;;  %v8723_v62 = vpop.eup %8722  ;;  %v8182_v50 = vld [vmem:[#allocation13 + $0xc4] ss:$16 sps:$4 sm:$0xff]  }
0x108a   : > { %8732 = vrcp.f32 %v4385_v55  ;;  %v8725_v22 = vpop.eup %8724  ;;  %v4410_v7 = vadd.f32 1.0, %v8723_v62  ;;  %v8183_v55 = vld [vmem:[#allocation13 + $0xc8] ss:$16 sps:$4 sm:$0xff]  }
0x108b   : > { %8734 = vrcp.f32 %v4397_v52  ;;  %v8191_v52 = vld [vmem:[#allocation13 + $0xec] ss:$16 sps:$4 sm:$0xff]   ;;  %v8189_v62 = vld [vmem:[#allocation13 + $0xe8] ss:$16 sps:$4 sm:$0xff]  }
0x108c   : > { %8736 = vrcp.f32 %v4410_v7  ;;  %v11042_v7 = vld [vmem:[#allocation14 + $0x6c] ss:$16 sps:$4 sm:$0xff]  }
0x1091   : > { %v8727_v53 = vpop.eup %8726 }
0x1092   : > { %v8729_v1 = vpop.eup %8728  ;;  %v4418_v61 = vmul.f32 %v8727_v53, %v8721_v31  ;;  %v8186_v31 = vld [vmem:[#allocation13 + $0xe0] ss:$16 sps:$4 sm:$0xff]  }
0x1093   : > { %v8731_v17 = vpop.eup %8730  ;;  %v4416_v35 = vmul.f32 %v8729_v1, %v10913_v41  ;;  %v10981_v53 = vld [vmem:[#allocation14] ss:$16 sps:$4 sm:$0xff]   ;;  %v11028_v1 = vld [vmem:[#allocation14 + $0x28] ss:$16 sps:$4 sm:$0xff]  }
0x1094   : > { %v8733_v57 = vpop.eup %8732  ;;  %v4411_v14 = vadd.f32 1.0, %v8731_v17  ;;  %v11033_v17 = vld [vmem:[#allocation14 + $0x4c] ss:$16 sps:$4 sm:$0xff]  }
0x1095   : > { %v10965_v33 = vadd.f32 %v4418_v61, %v4416_v35  ;;  %v4419_v12 = vmul.f32 %v8733_v57, %v8725_v22  ;;  %v8735_v6 = vpop.eup %8734  ;;  %v10978_v22 = vld [vmem:[#allocation14 + $0x4] ss:$16 sps:$4 sm:$0xff]   ;;  %v11031_v61 = vld [vmem:[#allocation14 + $0x40] ss:$16 sps:$4 sm:$0xff]   ;;  %v11039_v57 = vld [vmem:[#allocation14 + $0x48] ss:$16 sps:$4 sm:$0xff]  }
0x1096   : > { %v4417_v56 = vmul.f32 %v8735_v6, %v10917_v15  ;;  %v8737_v46 = vpop.eup %8736  ;;  %v8155_v15 = vld [vmem:[#allocation13 + $0x2c] ss:$16 sps:$4 sm:$0xff]   ;;  %v11036_v35 = vld [vmem:[#allocation14 + $0x64] ss:$16 sps:$4 sm:$0xff]  }
0x1097   : > { %8738 = vtanh.f32 %v10965_v33  ;;  %v11048_v6 = vld [vmem:[#allocation14 + $0x84] ss:$16 sps:$4 sm:$0xff]  }
0x1098   : > { %v10969_v9 = vadd.f32 %v4419_v12, %v4417_v56  ;;  %8740 = vrcp.f32 %v4411_v14  ;;  %v11045_v12 = vld [vmem:[#allocation14 + $0x60] ss:$16 sps:$4 sm:$0xff]   ;;  %v11051_v14 = vld [vmem:[#allocation14 + $0x68] ss:$16 sps:$4 sm:$0xff]   ;;  %v11054_v56 = vld [vmem:[#allocation14 + $0x8c] ss:$16 sps:$4 sm:$0xff]  }
0x109a   : > { %8742 = vtanh.f32 %v10969_v9 }
0x10a1   : > { %v8739_v25 = vpop.eup %8738 }
0x10a2   : > { %v8741_v41 = vpop.eup %8740  ;;  %v4424_v39 = vmul.f32 %v8739_v25, %v8737_v46  ;;  %v11057_v46 = vld [vmem:[#allocation14 + $0x80] ss:$16 sps:$4 sm:$0xff]   ;;  %v11060_v25 = vld [vmem:[#allocation14 + $0xa4] ss:$16 sps:$4 sm:$0xff]  }
0x10a4   : > { %v8743_v60 = vpop.eup %8742 }
0x10a5   : > { %v4425_v42 = vmul.f32 %v8743_v60, %v8741_v41  ;;  %v11063_v41 = vld [vmem:[#allocation14 + $0x88] ss:$16 sps:$4 sm:$0xff]   ;;  %v11066_v60 = vld [vmem:[#allocation14 + $0xac] ss:$16 sps:$4 sm:$0xff]  }
0x10a7   : > { %v10972_v32 = vpack.c.bf16 %v4425_v42, %v4424_v39  ;;  %v11069_v39 = vld [vmem:[#allocation14 + $0xa0] ss:$16 sps:$4 sm:$0xff]   ;;  %v11072_v42 = vld [vmem:[#allocation14 + $0xc4] ss:$16 sps:$4 sm:$0xff]  }
0x10a9   : > { %4469 = vmatmul.mubr.bf16.vlgmr.msra.gmra.mrb[60].mxu0 %v10972_v32  ;;  %4512 = vmatmul.mubr.bf16.vlgmr.msra.gmra.mrb[68].mxu1 %v10972_v32 }
0x10aa   : > { %4803 = vmatpush1.bf16.msra.mxu0 %v8144_v43  ;;  %4916 = vmatpush1.bf16.msra.mxu1 %v8147_v59  ;;  %v11075_v43 = vld [vmem:[#allocation14 + $0xa8] ss:$16 sps:$4 sm:$0xff]   ;;  %v11079_v59 = vld [vmem:[#allocation14 + $0xc0] ss:$16 sps:$4 sm:$0xff]  }
0x10ab   : > { %4804 = vmatprep.subr.bf16.mxu0 %v8152_v37  ;;  %4917 = vmatprep.subr.bf16.mxu1 %v8155_v15  ;;  %v11085_v37 = vld [vmem:[#allocation14 + $0xcc] ss:$16 sps:$4 sm:$0xff]   ;;  %v11087_v15 = vld [vmem:[#allocation14 + $0xc8] ss:$16 sps:$4 sm:$0xff]  }
0x10ac   : > { %4834 = vmatprep.mubr.bf16.mxu0 %v11829_v3  ;;  %4947 = vmatprep.mubr.bf16.mxu1 %v11829_v3 }
0x10ae   : > { %4805 = vmatpush1.bf16.msra.mxu0 %v8150_v40  ;;  %4918 = vmatpush1.bf16.msra.mxu1 %v8153_v58  ;;  %v11089_v40 = vld [vmem:[#allocation14 + $0xec] ss:$16 sps:$4 sm:$0xff]   ;;  %v11093_v58 = vld [vmem:[#allocation14 + $0xe0] ss:$16 sps:$4 sm:$0xff]  }
0x10af   : > { %4806 = vmatprep.subr.bf16.mxu0 %v8158_v44  ;;  %4919 = vmatprep.subr.bf16.mxu1 %v8161_v36  ;;  %v11097_v44 = vld [vmem:[#allocation14 + $0xe8] ss:$16 sps:$4 sm:$0xff]  }
0x10b2   : > { %4807 = vmatpush1.bf16.msra.mxu0 %v8156_v23  ;;  %4920 = vmatpush1.bf16.msra.mxu1 %v8159_v38 }
0x10b3   : > { %4808 = vmatprep.subr.bf16.mxu0 %v8164_v47  ;;  %4921 = vmatprep.subr.bf16.mxu1 %v8167_v19 }
0x10b6   : > { %4809 = vmatpush1.bf16.msra.mxu0 %v8162_v0  ;;  %4922 = vmatpush1.bf16.msra.mxu1 %v8165_v24 }
0x10b7   : > { %4810 = vmatprep.subr.bf16.mxu0 %v8170_v20  ;;  %4923 = vmatprep.subr.bf16.mxu1 %v8173_v28 }
0x10ba   : > { %4811 = vmatpush1.bf16.msra.mxu0 %v8168_v26  ;;  %4924 = vmatpush1.bf16.msra.mxu1 %v8171_v27 }
0x10bb   : > { %4812 = vmatprep.subr.bf16.mxu0 %v8176_v49  ;;  %4925 = vmatprep.subr.bf16.mxu1 %v8179_v63 }
0x10be   : > { %4813 = vmatpush1.bf16.msra.mxu0 %v8174_v45  ;;  %4926 = vmatpush1.bf16.msra.mxu1 %v8177_v48 }
0x10bf   : > { %4814 = vmatprep.subr.bf16.mxu0 %v8182_v50  ;;  %4927 = vmatprep.subr.bf16.mxu1 %v8185_v51 }
0x10c2   : > { %4815 = vmatpush1.bf16.msra.mxu0 %v8180_v29  ;;  %4928 = vmatpush1.bf16.msra.mxu1 %v8183_v55 }
0x10c3   : > { %4816 = vmatprep.subr.bf16.mxu0 %v8188_v10  ;;  %4929 = vmatprep.subr.bf16.mxu1 %v8191_v52 }
0x10c6   : > { %4817 = vmatpush1.bf16.msra.mxu0 %v8186_v31  ;;  %4930 = vmatpush1.bf16.msra.mxu1 %v8189_v62 }
0x10c7   : > { %5292 = vmatprep.subr.bf16.mxu0 %v10978_v22 }
0x10c9   : > { %4835 = vmatmul.mubr.bf16.vlgmr.msra.gmra.mrb[64].mxu0 %v10586_v11  ;;  %4948 = vmatmul.mubr.bf16.vlgmr.msra.gmra.mrb[72].mxu1 %v10586_v11  ;;  %v11012_v11 = vld [vmem:[#allocation14 + $0xc] ss:$16 sps:$4 sm:$0xff]  }
0x10ca   : > { %4844 = vmatprep.mubr.bf16.mxu0 %v11829_v3  ;;  %4957 = vmatprep.mubr.bf16.mxu1 %v11829_v3 }
0x10cb   : > { %5293 = vmatpush1.bf16.msra.mxu0 %v10981_v53  ;;  %5335 = vmatprep.subr.bf16.mxu1 %v11012_v11 }
0x10d1   : > { %4845 = vmatmul.mubr.bf16.gmra.mrb[68].mxu0 %v10640_v4  ;;  %4958 = vmatmul.mubr.bf16.gmra.mrb[76].mxu1 %v10640_v4  ;;  %v11014_v4 = vld [vmem:[#allocation14 + $0x8] ss:$16 sps:$4 sm:$0xff]  }
0x10d2   : > { %4854 = vmatprep.mubr.bf16.mxu0 %v11829_v3  ;;  %4967 = vmatprep.mubr.bf16.mxu1 %v11829_v3 }
0x10d3   : > { %5336 = vmatpush1.bf16.msra.mxu1 %v11014_v4 }
0x10d9   : > { %4855 = vmatmul.mubr.bf16.gmra.mrb[72].mxu0 %v10694_v21  ;;  %4968 = vmatmul.mubr.bf16.gmra.mrb[80].mxu1 %v10694_v21  ;;  %v11018_v21 = vld [vmem:[#allocation14 + $0x24] ss:$16 sps:$4 sm:$0xff]  }
0x10da   : > { %4864 = vmatprep.mubr.bf16.mxu0 %v11829_v3  ;;  %4977 = vmatprep.mubr.bf16.mxu1 %v11829_v3 }
0x10db   : > { %5294 = vmatprep.subr.bf16.mxu0 %v11018_v21 }
0x10e1   : > { %4865 = vmatmul.mubr.bf16.gmra.mrb[76].mxu0 %v10750_v30  ;;  %4978 = vmatmul.mubr.bf16.gmra.mrb[84].mxu1 %v10750_v30  ;;  %v11020_v30 = vld [vmem:[#allocation14 + $0x2c] ss:$16 sps:$4 sm:$0xff]  }
0x10e2   : > { %4874 = vmatprep.mubr.bf16.mxu0 %v11829_v3  ;;  %4987 = vmatprep.mubr.bf16.mxu1 %v11829_v3 }
0x10e3   : > { %5337 = vmatprep.subr.bf16.mxu1 %v11020_v30 }
0x10e4   : > { %5338 = vmatpush1.bf16.msra.mxu1 %v11028_v1 }
0x10e5   : > { %5339 = vmatprep.subr.bf16.mxu1 %v11033_v17 }
0x10e8   : > { %5340 = vmatpush1.bf16.msra.mxu1 %v11039_v57 }
0x10e9   : > { %4875 = vmatmul.mubr.bf16.gmra.mrb[80].mxu0 %v10866_v5  ;;  %4988 = vmatmul.mubr.bf16.gmra.mrb[88].mxu1 %v10866_v5  ;;  %v11022_v5 = vld [vmem:[#allocation14 + $0x20] ss:$16 sps:$4 sm:$0xff]  }
0x10ea   : > { %4884 = vmatprep.mubr.bf16.mxu0 %v11829_v3  ;;  %4997 = vmatprep.mubr.bf16.mxu1 %v11829_v3 }
0x10eb   : > { %5295 = vmatpush1.bf16.msra.mxu0 %v11022_v5  ;;  %5341 = vmatprep.subr.bf16.mxu1 %v11042_v7 }
0x10ec   : > { %5342 = vmatpush1.bf16.msra.mxu1 %v11051_v14 }
0x10ed   : > { %5343 = vmatprep.subr.bf16.mxu1 %v11054_v56 }
0x10f0   : > { %5344 = vmatpush1.bf16.msra.mxu1 %v11063_v41 }
0x10f1   : > { %4885 = vmatmul.mubr.bf16.gmra.mrb[84].mxu0 %v10920_v2  ;;  %4998 = vmatmul.mubr.bf16.gmra.mrb[92].mxu1 %v10920_v2  ;;  %v11024_v2 = vld [vmem:[#allocation14 + $0x44] ss:$16 sps:$4 sm:$0xff]  }
0x10f2   : > { %4894 = vmatprep.mubr.bf16.mxu0 %v11829_v3  ;;  %5007 = vmatprep.mubr.bf16.mxu1 %v11829_v3 }
0x10f3   : > { %5296 = vmatprep.subr.bf16.mxu0 %v11024_v2  ;;  %5345 = vmatprep.subr.bf16.mxu1 %v11066_v60 }
0x10f4   : > { %5297 = vmatpush1.bf16.msra.mxu0 %v11031_v61  ;;  %5346 = vmatpush1.bf16.msra.mxu1 %v11075_v43 }
0x10f5   : > { %5298 = vmatprep.subr.bf16.mxu0 %v11036_v35  ;;  %5347 = vmatprep.subr.bf16.mxu1 %v11085_v37 }
0x10f8   : > { %5299 = vmatpush1.bf16.msra.mxu0 %v11045_v12  ;;  %5348 = vmatpush1.bf16.msra.mxu1 %v11087_v15 }
0x10f9   : > { %4895 = vmatmul.mubr.bf16.gmra.mrb[88].mxu0 %v10972_v32  ;;  %5008 = vmatmul.mubr.bf16.gmra.mrb[96].mxu1 %v10972_v32  ;;  %v11083_v32 = vld [vmem:[#allocation14 + $0xe4] ss:$16 sps:$4 sm:$0xff]  }
0x10fa   : > { %4904 = vmatprep.mubr.bf16.mxu0 %v11829_v3  ;;  %5017 = vmatprep.mubr.bf16.mxu1 %v11829_v3 }
0x10fb   : > { %5300 = vmatprep.subr.bf16.mxu0 %v11048_v6  ;;  %5349 = vmatprep.subr.bf16.mxu1 %v11089_v40 }
0x10fc   : > { %5301 = vmatpush1.bf16.msra.mxu0 %v11057_v46  ;;  %5350 = vmatpush1.bf16.msra.mxu1 %v11097_v44 }
0x10fd   : > { %5302 = vmatprep.subr.bf16.mxu0 %v11060_v25  ;;  %5486 = vmatprep.subr.bf16.mxu1 %v11012_v11 }
0x1100   : > { %5303 = vmatpush1.bf16.msra.mxu0 %v11069_v39 }
0x1101   : > { %5304 = vmatprep.subr.bf16.mxu0 %v11072_v42 }
0x1104   : > { %5305 = vmatpush1.bf16.msra.mxu0 %v11079_v59 }
0x1105   : > { %5306 = vmatprep.subr.bf16.mxu0 %v11083_v32 }
0x1108   : > { %5307 = vmatpush1.bf16.msra.mxu0 %v11093_v58 }
0x1109   : > { %5443 = vmatprep.subr.bf16.mxu0 %v10978_v22 }
0x117c   : > { %v4470_v36 = vpop.f32.mrb[60].mxu0  ;;  %v4513_v23 = vpop.f32.mrb[68].mxu1 }
0x117d   : > { %v7595_v38 = vadd.f32 %v4470_v36, %v10561_v13  ;;  %v4472_v47 = vpop.f32.mrb[61].mxu0  ;;  %v4515_v19 = vpop.f32.mrb[69].mxu1  ;;  %v7627_v29 = vadd.f32 %v4513_v23, %v10574_v8 }
0x117e   : > { %v7596_v0 = vadd.f32 %v4472_v47, %v10564_v54  ;;  %v4474_v24 = vpop.f32.mrb[62].mxu0  ;;  %v4517_v20 = vpop.f32.mrb[70].mxu1  ;;  %v7628_v51 = vadd.f32 %v4515_v19, %v10570_v18 }
0x117f   : > { %v7251_v28 = vmul.f32 -1.442695, %v7595_v38  ;;  %v7597_v26 = vadd.f32 %v4474_v24, %v10561_v13  ;;  %v4476_v27 = vpop.f32.mrb[63].mxu0  ;;  %v4519_v49 = vpop.f32.mrb[71].mxu1  ;;  %v7629_v13 = vadd.f32 %v4517_v20, %v10574_v8 }
0x1180   : > { %v7253_v63 = vmul.f32 -1.442695, %v7596_v0  ;;  %v7598_v45 = vadd.f32 %v4476_v27, %v10564_v54  ;;  %v7255_v55 = vmul.f32 -1.442695, %v7628_v51  ;;  %v7630_v10 = vadd.f32 %v4519_v49, %v10570_v18 }
0x1181   : > { %8744 = vpow2.f32 %v7251_v28  ;;  %v7252_v48 = vmul.f32 -1.442695, %v7597_v26 }
0x1182   : > { %8746 = vpow2.f32 %v7253_v63  ;;  %v7254_v50 = vmul.f32 -1.442695, %v7598_v45  ;;  %v7256_v54 = vmul.f32 -1.442695, %v7630_v10 }
0x1183   : > { %8748 = vpow2.f32 %v7252_v48 }
0x1184   : > { %8750 = vpow2.f32 %v7254_v50 }
0x1185   : > { %8752 = vtanh.f32 %v7627_v29 }
0x1186   : > { %8754 = vpow2.f32 %v7255_v55 }
0x1187   : > { %8756 = vtanh.f32 %v7629_v13 }
0x118b   : > { %v8745_v52 = vpop.eup %8744 }
0x118c   : > { %v8747_v31 = vpop.eup %8746  ;;  %v4536_v62 = vadd.f32 1.0, %v8745_v52 }
0x118d   : > { %v4548_v36 = vadd.f32 1.0, %v8747_v31  ;;  %v8749_v38 = vpop.eup %8748 }
0x118e   : > { %8758 = vrcp.f32 %v4536_v62  ;;  %v4537_v47 = vadd.f32 1.0, %v8749_v38  ;;  %v8751_v19 = vpop.eup %8750 }
0x118f   : > { %8760 = vrcp.f32 %v4548_v36  ;;  %v4549_v23 = vadd.f32 1.0, %v8751_v19  ;;  %v8753_v18 = vpop.eup %8752 }
0x1190   : > { %8762 = vpow2.f32 %v7256_v54  ;;  %v8755_v0 = vpop.eup %8754 }
0x1191   : > { %8764 = vrcp.f32 %v4537_v47  ;;  %v8757_v8 = vpop.eup %8756  ;;  %v4562_v26 = vadd.f32 1.0, %v8755_v0 }
0x1192   : > { %8766 = vrcp.f32 %v4549_v23 }
0x1193   : > { %8768 = vrcp.f32 %v4562_v26 }
0x1198   : > { %v8759_v24 = vpop.eup %8758 }
0x1199   : > { %v8761_v20 = vpop.eup %8760  ;;  %v4570_v28 = vmul.f32 %v8759_v24, %v8753_v18 }
0x119a   : > { %v8763_v27 = vpop.eup %8762  ;;  %v4568_v49 = vmul.f32 %v8761_v20, %v10965_v33  ;;  %v4620_v33 = vld [vmem:[%s11737_s9] sm:$0xf] }
0x119b   : > { %v8765_v63 = vpop.eup %8764  ;;  %v4563_v51 = vadd.f32 1.0, %v8763_v27  ;;  %v11159_v38 = vrot.slane %v4620_v33, %v11839_v16 }
0x119c   : > { %v4571_v45 = vmul.f32 %v8765_v63, %v8757_v8  ;;  %v4572_v48 = vadd.f32 %v4570_v28, %v4568_v49  ;;  %v8767_v50 = vpop.eup %8766 }
0x119d   : > { %v4569_v29 = vmul.f32 %v8767_v50, %v10969_v9  ;;  %v8769_v10 = vpop.eup %8768  ;;  %v11156_v9 = vrot.slane %v4620_v33, %v11838_v34 }
0x119e   : > { %8770 = vtanh.f32 %v4572_v48 }
0x119f   : > { %v4573_v55 = vadd.f32 %v4571_v45, %v4569_v29  ;;  %8772 = vrcp.f32 %v4563_v51  ;;  %v11842_v45 = vld [vmem:[#allocation34_spill] sm:$0xff]  ;;  %v11843_v29 = vld [vmem:[#allocation33_spill] sm:$0xff] }
0x11a0   : > { %v11165_v48 = vrot.slane %v4620_v33, %v11842_v45 }
0x11a1   : > { %8774 = vtanh.f32 %v4573_v55  ;;  %v11169_v55 = vrot.slane %v4620_v33, %v11843_v29 }
0x11a8   : > { %v8771_v13 = vpop.eup %8770 }
0x11a9   : > { %v4576_v52 = vmul.f32 %v8771_v13, %v8769_v10  ;;  %v8773_v31 = vpop.eup %8772 }
0x11ab   : > { %v8775_v62 = vpop.eup %8774 }
0x11ac   : > { %v4577_v54 = vmul.f32 %v8775_v62, %v8773_v31 }
0x11ae   : > { %v4578_v36 = vpack.c.bf16 %v4577_v54, %v4576_v52 }
0x11b0   : > { %4905 = vmatmul.mubr.bf16.gmra.mrb[92].mxu0 %v4578_v36  ;;  %5018 = vmatmul.mubr.bf16.gmra.mrb[100].mxu1 %v4578_v36 }
0x11b1   : > { %5324 = vmatprep.mubr.bf16.mxu0 %v11829_v3  ;;  %5367 = vmatprep.mubr.bf16.mxu1 %v11829_v3 }
0x11b8   : > { %5325 = vmatmul.mubr.bf16.vlgmr.msra.gmra.mrb[64].mxu0 %v11829_v3  ;;  %5368 = vmatmul.mubr.bf16.vlgmr.msra.gmra.mrb[72].mxu1 %v11829_v3 }
0x11b9   : > { %5444 = vmatpush1.bf16.msra.mxu0 %v10981_v53  ;;  %5487 = vmatpush1.bf16.msra.mxu1 %v11014_v4 }
0x11ba   : > { %5445 = vmatprep.subr.bf16.mxu0 %v11018_v21  ;;  %5488 = vmatprep.subr.bf16.mxu1 %v11020_v30 }
0x11bb   : > { %5475 = vmatprep.mubr.bf16.mxu0 %v11829_v3  ;;  %5518 = vmatprep.mubr.bf16.mxu1 %v11829_v3 }
0x11bd   : > { %5446 = vmatpush1.bf16.msra.mxu0 %v11022_v5  ;;  %5489 = vmatpush1.bf16.msra.mxu1 %v11028_v1 }
0x11be   : > { %5447 = vmatprep.subr.bf16.mxu0 %v11024_v2  ;;  %5490 = vmatprep.subr.bf16.mxu1 %v11033_v17 }
0x11c1   : > { %5448 = vmatpush1.bf16.msra.mxu0 %v11031_v61  ;;  %5491 = vmatpush1.bf16.msra.mxu1 %v11039_v57 }
0x11c2   : > { %5449 = vmatprep.subr.bf16.mxu0 %v11036_v35  ;;  %5492 = vmatprep.subr.bf16.mxu1 %v11042_v7 }
0x11c5   : > { %5450 = vmatpush1.bf16.msra.mxu0 %v11045_v12  ;;  %5493 = vmatpush1.bf16.msra.mxu1 %v11051_v14 }
0x11c6   : > { %5451 = vmatprep.subr.bf16.mxu0 %v11048_v6  ;;  %5494 = vmatprep.subr.bf16.mxu1 %v11054_v56 }
0x11c9   : > { %5452 = vmatpush1.bf16.msra.mxu0 %v11057_v46  ;;  %5495 = vmatpush1.bf16.msra.mxu1 %v11063_v41 }
0x11ca   : > { %5453 = vmatprep.subr.bf16.mxu0 %v11060_v25  ;;  %5496 = vmatprep.subr.bf16.mxu1 %v11066_v60 }
0x11cd   : > { %5454 = vmatpush1.bf16.msra.mxu0 %v11069_v39  ;;  %5497 = vmatpush1.bf16.msra.mxu1 %v11075_v43 }
0x11ce   : > { %5455 = vmatprep.subr.bf16.mxu0 %v11072_v42  ;;  %5498 = vmatprep.subr.bf16.mxu1 %v11085_v37 }
0x11d1   : > { %5456 = vmatpush1.bf16.msra.mxu0 %v11079_v59  ;;  %5499 = vmatpush1.bf16.msra.mxu1 %v11087_v15 }
0x11d2   : > { %5457 = vmatprep.subr.bf16.mxu0 %v11083_v32  ;;  %5500 = vmatprep.subr.bf16.mxu1 %v11089_v40 }
0x11d5   : > { %5458 = vmatpush1.bf16.msra.mxu0 %v11093_v58  ;;  %5501 = vmatpush1.bf16.msra.mxu1 %v11097_v44 }
0x11d6   : > { %5594 = vmatprep.subr.bf16.mxu0 %v10978_v22  ;;  %5637 = vmatprep.subr.bf16.mxu1 %v11012_v11 }
0x128b   : > { %v5326_v47 = vpop.f32.mrb[64].mxu0  ;;  %v5369_v19 = vpop.f32.mrb[72].mxu1 }
0x128c   : > { %v7631_v23 = vadd.f32 %v5326_v47, %v11156_v9  ;;  %v5328_v18 = vpop.f32.mrb[65].mxu0  ;;  %v5371_v0 = vpop.f32.mrb[73].mxu1  ;;  %v7663_v13 = vadd.f32 %v5369_v19, %v11169_v55 }
0x128d   : > { %v7632_v8 = vadd.f32 %v5328_v18, %v11159_v38  ;;  %v5330_v24 = vpop.f32.mrb[66].mxu0  ;;  %v5373_v20 = vpop.f32.mrb[74].mxu1  ;;  %v7664_v10 = vadd.f32 %v5371_v0, %v11165_v48 }
0x128e   : > { %v7321_v28 = vmul.f32 -1.442695, %v7631_v23  ;;  %v7633_v26 = vadd.f32 %v5330_v24, %v11156_v9  ;;  %v5332_v27 = vpop.f32.mrb[67].mxu0  ;;  %v5375_v49 = vpop.f32.mrb[75].mxu1  ;;  %v7665_v62 = vadd.f32 %v5373_v20, %v11169_v55 }
0x128f   : > { %v7323_v63 = vmul.f32 -1.442695, %v7632_v8  ;;  %v7634_v16 = vadd.f32 %v5332_v27, %v11159_v38  ;;  %v7325_v52 = vmul.f32 -1.442695, %v7664_v10  ;;  %v7666_v31 = vadd.f32 %v5375_v49, %v11165_v48 }
0x1290   : > { %8776 = vpow2.f32 %v7321_v28  ;;  %v7322_v50 = vmul.f32 -1.442695, %v7633_v26 }
0x1291   : > { %8778 = vpow2.f32 %v7323_v63  ;;  %v7324_v51 = vmul.f32 -1.442695, %v7634_v16  ;;  %v7326_v23 = vmul.f32 -1.442695, %v7666_v31 }
0x1292   : > { %8780 = vpow2.f32 %v7322_v50 }
0x1293   : > { %8782 = vpow2.f32 %v7324_v51 }
0x1294   : > { %8784 = vtanh.f32 %v7663_v13 }
0x1295   : > { %8786 = vpow2.f32 %v7325_v52 }
0x1296   : > { %8788 = vtanh.f32 %v7665_v62 }
0x129a   : > { %v8777_v54 = vpop.eup %8776 }
0x129b   : > { %v8779_v36 = vpop.eup %8778  ;;  %v5392_v47 = vadd.f32 1.0, %v8777_v54 }
0x129c   : > { %v5404_v18 = vadd.f32 1.0, %v8779_v36  ;;  %v8781_v33 = vpop.eup %8780 }
0x129d   : > { %8790 = vrcp.f32 %v5392_v47  ;;  %v5393_v0 = vadd.f32 1.0, %v8781_v33  ;;  %v8783_v8 = vpop.eup %8782 }
0x129e   : > { %8792 = vrcp.f32 %v5404_v18  ;;  %v5405_v19 = vadd.f32 1.0, %v8783_v8  ;;  %v8785_v24 = vpop.eup %8784 }
0x129f   : > { %8794 = vpow2.f32 %v7326_v23  ;;  %v8787_v28 = vpop.eup %8786 }
0x12a0   : > { %8796 = vrcp.f32 %v5393_v0  ;;  %v8789_v20 = vpop.eup %8788  ;;  %v5418_v50 = vadd.f32 1.0, %v8787_v28 }
0x12a1   : > { %8798 = vrcp.f32 %v5405_v19 }
0x12a2   : > { %8800 = vrcp.f32 %v5418_v50 }
0x12a7   : > { %v8791_v26 = vpop.eup %8790 }
0x12a8   : > { %v8793_v27 = vpop.eup %8792  ;;  %v5426_v49 = vmul.f32 %v8791_v26, %v8785_v24 }
0x12a9   : > { %v8795_v63 = vpop.eup %8794  ;;  %v5424_v45 = vmul.f32 0.0, %v8793_v27 }
0x12aa   : > { %v8797_v16 = vpop.eup %8796  ;;  %v5419_v13 = vadd.f32 1.0, %v8795_v63 }
0x12ab   : > { %v11175_v51 = vadd.f32 %v5426_v49, %v5424_v45  ;;  %v5427_v29 = vmul.f32 %v8797_v16, %v8789_v20  ;;  %v8799_v10 = vpop.eup %8798 }
0x12ac   : > { %v5425_v52 = vmul.f32 0.0, %v8799_v10  ;;  %v8801_v62 = vpop.eup %8800 }
0x12ad   : > { %8802 = vtanh.f32 %v11175_v51 }
0x12ae   : > { %v11178_v31 = vadd.f32 %v5427_v29, %v5425_v52  ;;  %8804 = vrcp.f32 %v5419_v13 }
0x12b0   : > { %8806 = vtanh.f32 %v11178_v31 }
0x12b7   : > { %v8803_v54 = vpop.eup %8802 }
0x12b8   : > { %v8805_v36 = vpop.eup %8804  ;;  %v5432_v23 = vmul.f32 %v8803_v54, %v8801_v62 }
0x12ba   : > { %v8807_v47 = vpop.eup %8806 }
0x12bb   : > { %v5433_v18 = vmul.f32 %v8807_v47, %v8805_v36 }
0x12bd   : > { %v5442_v33 = vpack.c.bf16 %v5433_v18, %v5432_v23 }
0x12bf   : > { %5476 = vmatmul.mubr.bf16.vlgmr.msra.gmra.mrb[68].mxu0 %v5442_v33  ;;  %5519 = vmatmul.mubr.bf16.vlgmr.msra.gmra.mrb[76].mxu1 %v5442_v33 }
0x12c0   : > { %5595 = vmatpush1.bf16.msra.mxu0 %v10981_v53  ;;  %5638 = vmatpush1.bf16.msra.mxu1 %v11014_v4 }
0x12c1   : > { %5596 = vmatprep.subr.bf16.mxu0 %v11018_v21  ;;  %5639 = vmatprep.subr.bf16.mxu1 %v11020_v30 }
0x12c2   : > { %5626 = vmatprep.mubr.bf16.mxu0 %v11829_v3  ;;  %5669 = vmatprep.mubr.bf16.mxu1 %v11829_v3 }
0x12c4   : > { %5597 = vmatpush1.bf16.msra.mxu0 %v11022_v5  ;;  %5640 = vmatpush1.bf16.msra.mxu1 %v11028_v1 }
0x12c5   : > { %5598 = vmatprep.subr.bf16.mxu0 %v11024_v2  ;;  %5641 = vmatprep.subr.bf16.mxu1 %v11033_v17 }
0x12c8   : > { %5599 = vmatpush1.bf16.msra.mxu0 %v11031_v61  ;;  %5642 = vmatpush1.bf16.msra.mxu1 %v11039_v57 }
0x12c9   : > { %5600 = vmatprep.subr.bf16.mxu0 %v11036_v35  ;;  %5643 = vmatprep.subr.bf16.mxu1 %v11042_v7 }
0x12cc   : > { %5601 = vmatpush1.bf16.msra.mxu0 %v11045_v12  ;;  %5644 = vmatpush1.bf16.msra.mxu1 %v11051_v14 }
0x12cd   : > { %5602 = vmatprep.subr.bf16.mxu0 %v11048_v6  ;;  %5645 = vmatprep.subr.bf16.mxu1 %v11054_v56 }
0x12d0   : > { %5603 = vmatpush1.bf16.msra.mxu0 %v11057_v46  ;;  %5646 = vmatpush1.bf16.msra.mxu1 %v11063_v41 }
0x12d1   : > { %5604 = vmatprep.subr.bf16.mxu0 %v11060_v25  ;;  %5647 = vmatprep.subr.bf16.mxu1 %v11066_v60 }
0x12d4   : > { %5605 = vmatpush1.bf16.msra.mxu0 %v11069_v39  ;;  %5648 = vmatpush1.bf16.msra.mxu1 %v11075_v43 }
0x12d5   : > { %5606 = vmatprep.subr.bf16.mxu0 %v11072_v42  ;;  %5649 = vmatprep.subr.bf16.mxu1 %v11085_v37 }
0x12d8   : > { %5607 = vmatpush1.bf16.msra.mxu0 %v11079_v59  ;;  %5650 = vmatpush1.bf16.msra.mxu1 %v11087_v15 }
0x12d9   : > { %5608 = vmatprep.subr.bf16.mxu0 %v11083_v32  ;;  %5651 = vmatprep.subr.bf16.mxu1 %v11089_v40 }
0x12dc   : > { %5609 = vmatpush1.bf16.msra.mxu0 %v11093_v58  ;;  %5652 = vmatpush1.bf16.msra.mxu1 %v11097_v44 }
0x12dd   : > { %5745 = vmatprep.subr.bf16.mxu0 %v10978_v22  ;;  %5788 = vmatprep.subr.bf16.mxu1 %v11012_v11 }
0x1392   : > { %v5477_v0 = vpop.f32.mrb[68].mxu0  ;;  %v5520_v8 = vpop.f32.mrb[76].mxu1 }
0x1393   : > { %v7635_v19 = vadd.f32 %v5477_v0, %v11156_v9  ;;  %v5479_v24 = vpop.f32.mrb[69].mxu0  ;;  %v5522_v28 = vpop.f32.mrb[77].mxu1  ;;  %v7667_v62 = vadd.f32 %v5520_v8, %v11169_v55 }
0x1394   : > { %v7636_v20 = vadd.f32 %v5479_v24, %v11159_v38  ;;  %v5481_v26 = vpop.f32.mrb[70].mxu0  ;;  %v5524_v27 = vpop.f32.mrb[78].mxu1  ;;  %v7668_v52 = vadd.f32 %v5522_v28, %v11165_v48 }
0x1395   : > { %v7327_v49 = vmul.f32 -1.442695, %v7635_v19  ;;  %v7637_v63 = vadd.f32 %v5481_v26, %v11156_v9  ;;  %v5483_v45 = vpop.f32.mrb[71].mxu0  ;;  %v5526_v16 = vpop.f32.mrb[79].mxu1  ;;  %v7669_v47 = vadd.f32 %v5524_v27, %v11169_v55 }
0x1396   : > { %v7329_v50 = vmul.f32 -1.442695, %v7636_v20  ;;  %v7638_v29 = vadd.f32 %v5483_v45, %v11159_v38  ;;  %v7331_v54 = vmul.f32 -1.442695, %v7668_v52  ;;  %v7670_v36 = vadd.f32 %v5526_v16, %v11165_v48 }
0x1397   : > { %8808 = vpow2.f32 %v7327_v49  ;;  %v7328_v10 = vmul.f32 -1.442695, %v7637_v63 }
0x1398   : > { %8810 = vpow2.f32 %v7329_v50  ;;  %v7330_v13 = vmul.f32 -1.442695, %v7638_v29  ;;  %v7332_v0 = vmul.f32 -1.442695, %v7670_v36 }
0x1399   : > { %8812 = vpow2.f32 %v7328_v10 }
0x139a   : > { %8814 = vpow2.f32 %v7330_v13 }
0x139b   : > { %8816 = vtanh.f32 %v7667_v62 }
0x139c   : > { %8818 = vpow2.f32 %v7331_v54 }
0x139d   : > { %8820 = vtanh.f32 %v7669_v47 }
0x13a1   : > { %v8809_v23 = vpop.eup %8808 }
0x13a2   : > { %v8811_v18 = vpop.eup %8810  ;;  %v5543_v33 = vadd.f32 1.0, %v8809_v23 }
0x13a3   : > { %v5555_v19 = vadd.f32 1.0, %v8811_v18  ;;  %v8813_v24 = vpop.eup %8812 }
0x13a4   : > { %8822 = vrcp.f32 %v5543_v33  ;;  %v5544_v28 = vadd.f32 1.0, %v8813_v24  ;;  %v8815_v20 = vpop.eup %8814 }
0x13a5   : > { %8824 = vrcp.f32 %v5555_v19  ;;  %v5556_v8 = vadd.f32 1.0, %v8815_v20  ;;  %v8817_v26 = vpop.eup %8816 }
0x13a6   : > { %8826 = vpow2.f32 %v7332_v0  ;;  %v8819_v49 = vpop.eup %8818 }
0x13a7   : > { %8828 = vrcp.f32 %v5544_v28  ;;  %v8821_v27 = vpop.eup %8820  ;;  %v5569_v13 = vadd.f32 1.0, %v8819_v49 }
0x13a8   : > { %8830 = vrcp.f32 %v5556_v8 }
0x13a9   : > { %8832 = vrcp.f32 %v5569_v13 }
0x13ae   : > { %v8823_v63 = vpop.eup %8822 }
0x13af   : > { %v8825_v45 = vpop.eup %8824  ;;  %v5577_v16 = vmul.f32 %v8823_v63, %v8817_v26 }
0x13b0   : > { %v8827_v50 = vpop.eup %8826  ;;  %v5575_v29 = vmul.f32 %v8825_v45, %v11175_v51 }
0x13b1   : > { %v8829_v10 = vpop.eup %8828  ;;  %v5570_v36 = vadd.f32 1.0, %v8827_v50 }
0x13b2   : > { %v11224_v52 = vadd.f32 %v5577_v16, %v5575_v29  ;;  %v5578_v62 = vmul.f32 %v8829_v10, %v8821_v27  ;;  %v8831_v54 = vpop.eup %8830 }
0x13b3   : > { %v5576_v47 = vmul.f32 %v8831_v54, %v11178_v31  ;;  %v8833_v18 = vpop.eup %8832 }
0x13b4   : > { %8834 = vtanh.f32 %v11224_v52 }
0x13b5   : > { %v11228_v23 = vadd.f32 %v5578_v62, %v5576_v47  ;;  %8836 = vrcp.f32 %v5570_v36 }
0x13b7   : > { %8838 = vtanh.f32 %v11228_v23 }
0x13be   : > { %v8835_v33 = vpop.eup %8834 }
0x13bf   : > { %v8837_v51 = vpop.eup %8836  ;;  %v5583_v19 = vmul.f32 %v8835_v33, %v8833_v18 }
0x13c1   : > { %v8839_v0 = vpop.eup %8838 }
0x13c2   : > { %v5584_v24 = vmul.f32 %v8839_v0, %v8837_v51 }
0x13c4   : > { %v5593_v28 = vpack.c.bf16 %v5584_v24, %v5583_v19 }
0x13c6   : > { %5627 = vmatmul.mubr.bf16.vlgmr.msra.gmra.mrb[72].mxu0 %v5593_v28  ;;  %5670 = vmatmul.mubr.bf16.vlgmr.msra.gmra.mrb[80].mxu1 %v5593_v28 }
0x13c7   : > { %5746 = vmatpush1.bf16.msra.mxu0 %v10981_v53  ;;  %5789 = vmatpush1.bf16.msra.mxu1 %v11014_v4 }
0x13c8   : > { %5747 = vmatprep.subr.bf16.mxu0 %v11018_v21  ;;  %5790 = vmatprep.subr.bf16.mxu1 %v11020_v30 }
0x13c9   : > { %5777 = vmatprep.mubr.bf16.mxu0 %v11829_v3  ;;  %5820 = vmatprep.mubr.bf16.mxu1 %v11829_v3 }
0x13cb   : > { %5748 = vmatpush1.bf16.msra.mxu0 %v11022_v5  ;;  %5791 = vmatpush1.bf16.msra.mxu1 %v11028_v1 }
0x13cc   : > { %5749 = vmatprep.subr.bf16.mxu0 %v11024_v2  ;;  %5792 = vmatprep.subr.bf16.mxu1 %v11033_v17 }
0x13cf   : > { %5750 = vmatpush1.bf16.msra.mxu0 %v11031_v61  ;;  %5793 = vmatpush1.bf16.msra.mxu1 %v11039_v57 }
0x13d0   : > { %5751 = vmatprep.subr.bf16.mxu0 %v11036_v35  ;;  %5794 = vmatprep.subr.bf16.mxu1 %v11042_v7 }
0x13d3   : > { %5752 = vmatpush1.bf16.msra.mxu0 %v11045_v12  ;;  %5795 = vmatpush1.bf16.msra.mxu1 %v11051_v14 }
0x13d4   : > { %5753 = vmatprep.subr.bf16.mxu0 %v11048_v6  ;;  %5796 = vmatprep.subr.bf16.mxu1 %v11054_v56 }
0x13d7   : > { %5754 = vmatpush1.bf16.msra.mxu0 %v11057_v46  ;;  %5797 = vmatpush1.bf16.msra.mxu1 %v11063_v41 }
0x13d8   : > { %5755 = vmatprep.subr.bf16.mxu0 %v11060_v25  ;;  %5798 = vmatprep.subr.bf16.mxu1 %v11066_v60 }
0x13db   : > { %5756 = vmatpush1.bf16.msra.mxu0 %v11069_v39  ;;  %5799 = vmatpush1.bf16.msra.mxu1 %v11075_v43 }
0x13dc   : > { %5757 = vmatprep.subr.bf16.mxu0 %v11072_v42  ;;  %5800 = vmatprep.subr.bf16.mxu1 %v11085_v37 }
0x13df   : > { %5758 = vmatpush1.bf16.msra.mxu0 %v11079_v59  ;;  %5801 = vmatpush1.bf16.msra.mxu1 %v11087_v15 }
0x13e0   : > { %5759 = vmatprep.subr.bf16.mxu0 %v11083_v32  ;;  %5802 = vmatprep.subr.bf16.mxu1 %v11089_v40 }
0x13e3   : > { %5760 = vmatpush1.bf16.msra.mxu0 %v11093_v58  ;;  %5803 = vmatpush1.bf16.msra.mxu1 %v11097_v44 }
0x13e4   : > { %5896 = vmatprep.subr.bf16.mxu0 %v10978_v22  ;;  %5939 = vmatprep.subr.bf16.mxu1 %v11012_v11 }
0x1499   : > { %v5628_v31 = vpop.f32.mrb[72].mxu0  ;;  %v5671_v20 = vpop.f32.mrb[80].mxu1 }
0x149a   : > { %v7639_v8 = vadd.f32 %v5628_v31, %v11156_v9  ;;  %v5630_v26 = vpop.f32.mrb[73].mxu0  ;;  %v5673_v49 = vpop.f32.mrb[81].mxu1  ;;  %v7671_v47 = vadd.f32 %v5671_v20, %v11169_v55 }
0x149b   : > { %v7640_v27 = vadd.f32 %v5630_v26, %v11159_v38  ;;  %v5632_v63 = vpop.f32.mrb[74].mxu0  ;;  %v5675_v45 = vpop.f32.mrb[82].mxu1  ;;  %v7672_v36 = vadd.f32 %v5673_v49, %v11165_v48 }
0x149c   : > { %v7333_v16 = vmul.f32 -1.442695, %v7639_v8  ;;  %v7641_v50 = vadd.f32 %v5632_v63, %v11156_v9  ;;  %v5634_v29 = vpop.f32.mrb[75].mxu0  ;;  %v5677_v10 = vpop.f32.mrb[83].mxu1  ;;  %v7673_v51 = vadd.f32 %v5675_v45, %v11169_v55 }
0x149d   : > { %v7335_v13 = vmul.f32 -1.442695, %v7640_v27  ;;  %v7642_v22 = vadd.f32 %v5634_v29, %v11159_v38  ;;  %v7337_v18 = vmul.f32 -1.442695, %v7672_v36  ;;  %v7674_v33 = vadd.f32 %v5677_v10, %v11165_v48 }
0x149e   : > { %8840 = vpow2.f32 %v7333_v16  ;;  %v7334_v62 = vmul.f32 -1.442695, %v7641_v50 }
0x149f   : > { %8842 = vpow2.f32 %v7335_v13  ;;  %v7336_v54 = vmul.f32 -1.442695, %v7642_v22  ;;  %v7338_v28 = vmul.f32 -1.442695, %v7674_v33 }
0x14a0   : > { %8844 = vpow2.f32 %v7334_v62 }
0x14a1   : > { %8846 = vpow2.f32 %v7336_v54 }
0x14a2   : > { %8848 = vtanh.f32 %v7671_v47 }
0x14a3   : > { %8850 = vpow2.f32 %v7337_v18 }
0x14a4   : > { %8852 = vtanh.f32 %v7673_v51 }
0x14a8   : > { %v8841_v0 = vpop.eup %8840 }
0x14a9   : > { %v8843_v19 = vpop.eup %8842  ;;  %v5694_v24 = vadd.f32 1.0, %v8841_v0 }
0x14aa   : > { %v5706_v31 = vadd.f32 1.0, %v8843_v19  ;;  %v8845_v8 = vpop.eup %8844 }
0x14ab   : > { %8854 = vrcp.f32 %v5694_v24  ;;  %v5695_v26 = vadd.f32 1.0, %v8845_v8  ;;  %v8847_v49 = vpop.eup %8846 }
0x14ac   : > { %8856 = vrcp.f32 %v5706_v31  ;;  %v5707_v20 = vadd.f32 1.0, %v8847_v49  ;;  %v8849_v27 = vpop.eup %8848 }
0x14ad   : > { %8858 = vpow2.f32 %v7338_v28  ;;  %v8851_v63 = vpop.eup %8850 }
0x14ae   : > { %8860 = vrcp.f32 %v5695_v26  ;;  %v8853_v45 = vpop.eup %8852  ;;  %v5720_v62 = vadd.f32 1.0, %v8851_v63 }
0x14af   : > { %8862 = vrcp.f32 %v5707_v20 }
0x14b0   : > { %8864 = vrcp.f32 %v5720_v62 }
0x14b5   : > { %v8855_v16 = vpop.eup %8854 }
0x14b6   : > { %v8857_v50 = vpop.eup %8856  ;;  %v5728_v29 = vmul.f32 %v8855_v16, %v8849_v27 }
0x14b7   : > { %v8859_v10 = vpop.eup %8858  ;;  %v5726_v13 = vmul.f32 %v8857_v50, %v11224_v52 }
0x14b8   : > { %v8861_v22 = vpop.eup %8860  ;;  %v5721_v18 = vadd.f32 1.0, %v8859_v10 }
0x14b9   : > { %v11274_v54 = vadd.f32 %v5728_v29, %v5726_v13  ;;  %v5729_v36 = vmul.f32 %v8861_v22, %v8853_v45  ;;  %v8863_v47 = vpop.eup %8862 }
0x14ba   : > { %v5727_v33 = vmul.f32 %v8863_v47, %v11228_v23  ;;  %v8865_v0 = vpop.eup %8864 }
0x14bb   : > { %8866 = vtanh.f32 %v11274_v54 }
0x14bc   : > { %v11278_v51 = vadd.f32 %v5729_v36, %v5727_v33  ;;  %8868 = vrcp.f32 %v5721_v18 }
0x14be   : > { %8870 = vtanh.f32 %v11278_v51 }
0x14c5   : > { %v8867_v19 = vpop.eup %8866 }
0x14c6   : > { %v8869_v52 = vpop.eup %8868  ;;  %v5734_v28 = vmul.f32 %v8867_v19, %v8865_v0 }
0x14c8   : > { %v8871_v24 = vpop.eup %8870 }
0x14c9   : > { %v5735_v31 = vmul.f32 %v8871_v24, %v8869_v52 }
0x14cb   : > { %v5744_v8 = vpack.c.bf16 %v5735_v31, %v5734_v28  ;;  %v11333_v28 = vld [vmem:[#allocation14] ss:$16 sps:$4 sm:$0xff]   ;;  %v11339_v31 = vld [vmem:[#allocation14 + $0x24] ss:$16 sps:$4 sm:$0xff]  }
0x14cd   : > { %5778 = vmatmul.mubr.bf16.vlgmr.msra.gmra.mrb[76].mxu0 %v5744_v8  ;;  %5821 = vmatmul.mubr.bf16.vlgmr.msra.gmra.mrb[84].mxu1 %v5744_v8  ;;  %v11342_v8 = vld [vmem:[#allocation14 + $0x2c] ss:$16 sps:$4 sm:$0xff]  }
0x14ce   : > { %5897 = vmatpush1.bf16.msra.mxu0 %v10981_v53  ;;  %5940 = vmatpush1.bf16.msra.mxu1 %v11014_v4  ;;  %v11313_v53 = vld [vmem:[#allocation14 + $0x4] ss:$16 sps:$4 sm:$0xff]  }
0x14cf   : > { %5898 = vmatprep.subr.bf16.mxu0 %v11018_v21  ;;  %5941 = vmatprep.subr.bf16.mxu1 %v11020_v30 }
0x14d0   : > { %5928 = vmatprep.mubr.bf16.mxu0 %v11829_v3  ;;  %5971 = vmatprep.mubr.bf16.mxu1 %v11829_v3 }
0x14d2   : > { %5899 = vmatpush1.bf16.msra.mxu0 %v11022_v5  ;;  %5942 = vmatpush1.bf16.msra.mxu1 %v11028_v1 }
0x14d3   : > { %5900 = vmatprep.subr.bf16.mxu0 %v11024_v2  ;;  %5943 = vmatprep.subr.bf16.mxu1 %v11033_v17 }
0x14d6   : > { %5901 = vmatpush1.bf16.msra.mxu0 %v11031_v61  ;;  %5944 = vmatpush1.bf16.msra.mxu1 %v11039_v57 }
0x14d7   : > { %5902 = vmatprep.subr.bf16.mxu0 %v11036_v35  ;;  %5945 = vmatprep.subr.bf16.mxu1 %v11042_v7 }
0x14da   : > { %5903 = vmatpush1.bf16.msra.mxu0 %v11045_v12  ;;  %5946 = vmatpush1.bf16.msra.mxu1 %v11051_v14 }
0x14db   : > { %5904 = vmatprep.subr.bf16.mxu0 %v11048_v6  ;;  %5947 = vmatprep.subr.bf16.mxu1 %v11054_v56 }
0x14de   : > { %5905 = vmatpush1.bf16.msra.mxu0 %v11057_v46  ;;  %5948 = vmatpush1.bf16.msra.mxu1 %v11063_v41 }
0x14df   : > { %5906 = vmatprep.subr.bf16.mxu0 %v11060_v25  ;;  %5949 = vmatprep.subr.bf16.mxu1 %v11066_v60 }
0x14e2   : > { %5907 = vmatpush1.bf16.msra.mxu0 %v11069_v39  ;;  %5950 = vmatpush1.bf16.msra.mxu1 %v11075_v43 }
0x14e3   : > { %5908 = vmatprep.subr.bf16.mxu0 %v11072_v42  ;;  %5951 = vmatprep.subr.bf16.mxu1 %v11085_v37 }
0x14e6   : > { %5909 = vmatpush1.bf16.msra.mxu0 %v11079_v59  ;;  %5952 = vmatpush1.bf16.msra.mxu1 %v11087_v15 }
0x14e7   : > { %5910 = vmatprep.subr.bf16.mxu0 %v11083_v32  ;;  %5953 = vmatprep.subr.bf16.mxu1 %v11089_v40 }
0x14ea   : > { %5911 = vmatpush1.bf16.msra.mxu0 %v11093_v58  ;;  %5954 = vmatpush1.bf16.msra.mxu1 %v11097_v44 }
0x14eb   : > { %6047 = vmatprep.subr.bf16.mxu0 %v11313_v53  ;;  %6090 = vmatprep.subr.bf16.mxu1 %v11012_v11 }
0x15a0   : > { %v5779_v4 = vpop.f32.mrb[76].mxu0  ;;  %v5822_v21 = vpop.f32.mrb[84].mxu1 }
0x15a1   : > { %v7643_v30 = vadd.f32 %v5779_v4, %v11156_v9  ;;  %v5781_v5 = vpop.f32.mrb[77].mxu0  ;;  %v5824_v2 = vpop.f32.mrb[85].mxu1  ;;  %v7675_v25 = vadd.f32 %v5822_v21, %v11169_v55  ;;  %v11347_v4 = vld [vmem:[#allocation14 + $0x20] ss:$16 sps:$4 sm:$0xff]   ;;  %v11350_v21 = vld [vmem:[#allocation14 + $0x28] ss:$16 sps:$4 sm:$0xff]  }
0x15a2   : > { %v7644_v1 = vadd.f32 %v5781_v5, %v11159_v38  ;;  %v5783_v61 = vpop.f32.mrb[78].mxu0  ;;  %v5826_v17 = vpop.f32.mrb[86].mxu1  ;;  %v7676_v46 = vadd.f32 %v5824_v2, %v11165_v48  ;;  %v11356_v5 = vld [vmem:[#allocation14 + $0x4c] ss:$16 sps:$4 sm:$0xff]   ;;  %v11359_v2 = vld [vmem:[#allocation14 + $0x40] ss:$16 sps:$4 sm:$0xff]  }
0x15a3   : > { %v7339_v35 = vmul.f32 -1.442695, %v7643_v30  ;;  %v7645_v57 = vadd.f32 %v5783_v61, %v11156_v9  ;;  %v5785_v7 = vpop.f32.mrb[79].mxu0  ;;  %v5828_v12 = vpop.f32.mrb[87].mxu1  ;;  %v7677_v39 = vadd.f32 %v5826_v17, %v11169_v55  ;;  %v11353_v30 = vld [vmem:[#allocation14 + $0x44] ss:$16 sps:$4 sm:$0xff]  }
0x15a4   : > { %v7341_v6 = vmul.f32 -1.442695, %v7644_v1  ;;  %v7646_v14 = vadd.f32 %v5785_v7, %v11159_v38  ;;  %v7343_v41 = vmul.f32 -1.442695, %v7676_v46  ;;  %v7678_v60 = vadd.f32 %v5828_v12, %v11165_v48  ;;  %v11362_v1 = vld [vmem:[#allocation14 + $0x48] ss:$16 sps:$4 sm:$0xff]  }
0x15a5   : > { %8872 = vpow2.f32 %v7339_v35  ;;  %v7340_v11 = vmul.f32 -1.442695, %v7645_v57  ;;  %v11365_v61 = vld [vmem:[#allocation14 + $0x64] ss:$16 sps:$4 sm:$0xff]   ;;  %v11368_v17 = vld [vmem:[#allocation14 + $0x6c] ss:$16 sps:$4 sm:$0xff]  }
0x15a6   : > { %8874 = vpow2.f32 %v7341_v6  ;;  %v7342_v56 = vmul.f32 -1.442695, %v7646_v14  ;;  %v7344_v32 = vmul.f32 -1.442695, %v7678_v60  ;;  %v11371_v35 = vld [vmem:[#allocation14 + $0x60] ss:$16 sps:$4 sm:$0xff]  }
0x15a7   : > { %8876 = vpow2.f32 %v7340_v11  ;;  %v11374_v57 = vld [vmem:[#allocation14 + $0x68] ss:$16 sps:$4 sm:$0xff]   ;;  %v11377_v7 = vld [vmem:[#allocation14 + $0x84] ss:$16 sps:$4 sm:$0xff]   ;;  %v11380_v12 = vld [vmem:[#allocation14 + $0x8c] ss:$16 sps:$4 sm:$0xff]  }
0x15a8   : > { %8878 = vpow2.f32 %v7342_v56  ;;  %v11383_v6 = vld [vmem:[#allocation14 + $0x80] ss:$16 sps:$4 sm:$0xff]   ;;  %v11386_v14 = vld [vmem:[#allocation14 + $0x88] ss:$16 sps:$4 sm:$0xff]   ;;  %v11389_v11 = vld [vmem:[#allocation14 + $0xa4] ss:$16 sps:$4 sm:$0xff]  }
0x15a9   : > { %8880 = vtanh.f32 %v7675_v25  ;;  %v11392_v56 = vld [vmem:[#allocation14 + $0xac] ss:$16 sps:$4 sm:$0xff]   ;;  %v11395_v46 = vld [vmem:[#allocation14 + $0xa0] ss:$16 sps:$4 sm:$0xff]   ;;  %v11398_v25 = vld [vmem:[#allocation14 + $0xa8] ss:$16 sps:$4 sm:$0xff]  }
0x15aa   : > { %8882 = vpow2.f32 %v7343_v41  ;;  %v11401_v41 = vld [vmem:[#allocation14 + $0xc4] ss:$16 sps:$4 sm:$0xff]   ;;  %v11404_v60 = vld [vmem:[#allocation14 + $0xcc] ss:$16 sps:$4 sm:$0xff]  }
0x15ab   : > { %8884 = vtanh.f32 %v7677_v39  ;;  %v11407_v39 = vld [vmem:[#allocation14 + $0xc0] ss:$16 sps:$4 sm:$0xff]  }
0x15af   : > { %v8873_v42 = vpop.eup %8872 }
0x15b0   : > { %v8875_v43 = vpop.eup %8874  ;;  %v5845_v59 = vadd.f32 1.0, %v8873_v42  ;;  %v11410_v42 = vld [vmem:[#allocation14 + $0xc8] ss:$16 sps:$4 sm:$0xff]  }
0x15b1   : > { %v5857_v37 = vadd.f32 1.0, %v8875_v43  ;;  %v8877_v15 = vpop.eup %8876  ;;  %v11413_v43 = vld [vmem:[#allocation14 + $0xe4] ss:$16 sps:$4 sm:$0xff]  }
0x15b2   : > { %8886 = vrcp.f32 %v5845_v59  ;;  %v5846_v40 = vadd.f32 1.0, %v8877_v15  ;;  %v8879_v58 = vpop.eup %8878  ;;  %v11416_v59 = vld [vmem:[#allocation14 + $0xec] ss:$16 sps:$4 sm:$0xff]  }
0x15b3   : > { %8888 = vrcp.f32 %v5857_v37  ;;  %v5858_v44 = vadd.f32 1.0, %v8879_v58  ;;  %v8881_v23 = vpop.eup %8880  ;;  %v11422_v37 = vld [vmem:[#allocation14 + $0xe8] ss:$16 sps:$4 sm:$0xff]   ;;  %v11426_v15 = vld [vmem:[#allocation14 + $0xc] ss:$16 sps:$4 sm:$0xff]  }
0x15b4   : > { %8890 = vpow2.f32 %v7344_v32  ;;  %v8883_v26 = vpop.eup %8882  ;;  %v11419_v32 = vld [vmem:[#allocation14 + $0xe0] ss:$16 sps:$4 sm:$0xff]  }
0x15b5   : > { %8892 = vrcp.f32 %v5846_v40  ;;  %v8885_v49 = vpop.eup %8884  ;;  %v5871_v29 = vadd.f32 1.0, %v8883_v26 }
0x15b6   : > { %8894 = vrcp.f32 %v5858_v44 }
0x15b7   : > { %8896 = vrcp.f32 %v5871_v29 }
0x15bc   : > { %v8887_v20 = vpop.eup %8886 }
0x15bd   : > { %v8889_v27 = vpop.eup %8888  ;;  %v5879_v63 = vmul.f32 %v8887_v20, %v8881_v23 }
0x15be   : > { %v8891_v45 = vpop.eup %8890  ;;  %v5877_v16 = vmul.f32 %v8889_v27, %v11274_v54 }
0x15bf   : > { %v8893_v50 = vpop.eup %8892  ;;  %v5872_v62 = vadd.f32 1.0, %v8891_v45 }
0x15c0   : > { %v11326_v10 = vadd.f32 %v5879_v63, %v5877_v16  ;;  %v5880_v13 = vmul.f32 %v8893_v50, %v8885_v49  ;;  %v8895_v22 = vpop.eup %8894 }
0x15c1   : > { %v5878_v36 = vmul.f32 %v8895_v22, %v11278_v51  ;;  %v8897_v18 = vpop.eup %8896  ;;  %v11336_v51 = vld [vmem:[#allocation14 + $0x8] ss:$16 sps:$4 sm:$0xff]  }
0x15c2   : > { %8898 = vtanh.f32 %v11326_v10 }
0x15c3   : > { %v11330_v47 = vadd.f32 %v5880_v13, %v5878_v36  ;;  %8900 = vrcp.f32 %v5872_v62 }
0x15c5   : > { %8902 = vtanh.f32 %v11330_v47 }
0x15cc   : > { %v8899_v33 = vpop.eup %8898 }
0x15cd   : > { %v8901_v54 = vpop.eup %8900  ;;  %v5885_v19 = vmul.f32 %v8899_v33, %v8897_v18 }
0x15cf   : > { %v8903_v0 = vpop.eup %8902 }
0x15d0   : > { %v5886_v52 = vmul.f32 %v8903_v0, %v8901_v54 }
0x15d2   : > { %v5895_v24 = vpack.c.bf16 %v5886_v52, %v5885_v19 }
0x15d4   : > { %5929 = vmatmul.mubr.bf16.vlgmr.msra.gmra.mrb[80].mxu0 %v5895_v24  ;;  %5972 = vmatmul.mubr.bf16.vlgmr.msra.gmra.mrb[88].mxu1 %v5895_v24 }
0x15d5   : > { %6048 = vmatpush1.bf16.msra.mxu0 %v11333_v28  ;;  %6091 = vmatpush1.bf16.msra.mxu1 %v11336_v51 }
0x15d6   : > { %6049 = vmatprep.subr.bf16.mxu0 %v11339_v31  ;;  %6092 = vmatprep.subr.bf16.mxu1 %v11342_v8 }
0x15d7   : > { %6079 = vmatprep.mubr.bf16.mxu0 %v11829_v3  ;;  %6122 = vmatprep.mubr.bf16.mxu1 %v11829_v3 }
0x15d9   : > { %6050 = vmatpush1.bf16.msra.mxu0 %v11347_v4  ;;  %6093 = vmatpush1.bf16.msra.mxu1 %v11350_v21 }
0x15da   : > { %6051 = vmatprep.subr.bf16.mxu0 %v11353_v30  ;;  %6094 = vmatprep.subr.bf16.mxu1 %v11356_v5 }
0x15dd   : > { %6052 = vmatpush1.bf16.msra.mxu0 %v11359_v2  ;;  %6095 = vmatpush1.bf16.msra.mxu1 %v11362_v1 }
0x15de   : > { %6053 = vmatprep.subr.bf16.mxu0 %v11365_v61  ;;  %6096 = vmatprep.subr.bf16.mxu1 %v11368_v17 }
0x15e1   : > { %6054 = vmatpush1.bf16.msra.mxu0 %v11371_v35  ;;  %6097 = vmatpush1.bf16.msra.mxu1 %v11374_v57 }
0x15e2   : > { %6055 = vmatprep.subr.bf16.mxu0 %v11377_v7  ;;  %6098 = vmatprep.subr.bf16.mxu1 %v11380_v12 }
0x15e5   : > { %6056 = vmatpush1.bf16.msra.mxu0 %v11383_v6  ;;  %6099 = vmatpush1.bf16.msra.mxu1 %v11386_v14 }
0x15e6   : > { %6057 = vmatprep.subr.bf16.mxu0 %v11389_v11  ;;  %6100 = vmatprep.subr.bf16.mxu1 %v11392_v56 }
0x15e9   : > { %6058 = vmatpush1.bf16.msra.mxu0 %v11395_v46  ;;  %6101 = vmatpush1.bf16.msra.mxu1 %v11398_v25 }
0x15ea   : > { %6059 = vmatprep.subr.bf16.mxu0 %v11401_v41  ;;  %6102 = vmatprep.subr.bf16.mxu1 %v11404_v60 }
0x15ed   : > { %6060 = vmatpush1.bf16.msra.mxu0 %v11407_v39  ;;  %6103 = vmatpush1.bf16.msra.mxu1 %v11410_v42 }
0x15ee   : > { %6061 = vmatprep.subr.bf16.mxu0 %v11413_v43  ;;  %6104 = vmatprep.subr.bf16.mxu1 %v11416_v59 }
0x15f1   : > { %6062 = vmatpush1.bf16.msra.mxu0 %v11419_v32  ;;  %6105 = vmatpush1.bf16.msra.mxu1 %v11422_v37 }
0x15f2   : > { %6198 = vmatprep.subr.bf16.mxu0 %v11313_v53  ;;  %6241 = vmatprep.subr.bf16.mxu1 %v11426_v15 }
0x16a7   : > { %v5930_v40 = vpop.f32.mrb[80].mxu0  ;;  %v5973_v58 = vpop.f32.mrb[88].mxu1 }
0x16a8   : > { %v7647_v44 = vadd.f32 %v5930_v40, %v11156_v9  ;;  %v5932_v23 = vpop.f32.mrb[81].mxu0  ;;  %v5975_v26 = vpop.f32.mrb[89].mxu1  ;;  %v7679_v18 = vadd.f32 %v5973_v58, %v11169_v55 }
0x16a9   : > { %v7648_v49 = vadd.f32 %v5932_v23, %v11159_v38  ;;  %v5934_v20 = vpop.f32.mrb[82].mxu0  ;;  %v5977_v27 = vpop.f32.mrb[90].mxu1  ;;  %v7680_v36 = vadd.f32 %v5975_v26, %v11165_v48 }
0x16aa   : > { %v7345_v63 = vmul.f32 -1.442695, %v7647_v44  ;;  %v7649_v45 = vadd.f32 %v5934_v20, %v11156_v9  ;;  %v5936_v16 = vpop.f32.mrb[83].mxu0  ;;  %v5979_v50 = vpop.f32.mrb[91].mxu1  ;;  %v7681_v0 = vadd.f32 %v5977_v27, %v11169_v55 }
0x16ab   : > { %v7347_v29 = vmul.f32 -1.442695, %v7648_v49  ;;  %v7650_v13 = vadd.f32 %v5936_v16, %v11159_v38  ;;  %v7349_v33 = vmul.f32 -1.442695, %v7680_v36  ;;  %v7682_v54 = vadd.f32 %v5979_v50, %v11165_v48 }
0x16ac   : > { %8904 = vpow2.f32 %v7345_v63  ;;  %v7346_v22 = vmul.f32 -1.442695, %v7649_v45 }
0x16ad   : > { %8906 = vpow2.f32 %v7347_v29  ;;  %v7348_v62 = vmul.f32 -1.442695, %v7650_v13  ;;  %v7350_v40 = vmul.f32 -1.442695, %v7682_v54 }
0x16ae   : > { %8908 = vpow2.f32 %v7346_v22 }
0x16af   : > { %8910 = vpow2.f32 %v7348_v62 }
0x16b0   : > { %8912 = vtanh.f32 %v7679_v18 }
0x16b1   : > { %8914 = vpow2.f32 %v7349_v33 }
0x16b2   : > { %8916 = vtanh.f32 %v7681_v0 }
0x16b6   : > { %v8905_v19 = vpop.eup %8904 }
0x16b7   : > { %v8907_v52 = vpop.eup %8906  ;;  %v5996_v24 = vadd.f32 1.0, %v8905_v19 }
0x16b8   : > { %v6008_v44 = vadd.f32 1.0, %v8907_v52  ;;  %v8909_v23 = vpop.eup %8908 }
0x16b9   : > { %8918 = vrcp.f32 %v5996_v24  ;;  %v5997_v26 = vadd.f32 1.0, %v8909_v23  ;;  %v8911_v49 = vpop.eup %8910 }
0x16ba   : > { %8920 = vrcp.f32 %v6008_v44  ;;  %v6009_v58 = vadd.f32 1.0, %v8911_v49  ;;  %v8913_v20 = vpop.eup %8912 }
0x16bb   : > { %8922 = vpow2.f32 %v7350_v40  ;;  %v8915_v63 = vpop.eup %8914 }
0x16bc   : > { %8924 = vrcp.f32 %v5997_v26  ;;  %v8917_v27 = vpop.eup %8916  ;;  %v6022_v62 = vadd.f32 1.0, %v8915_v63 }
0x16bd   : > { %8926 = vrcp.f32 %v6009_v58 }
0x16be   : > { %8928 = vrcp.f32 %v6022_v62 }
0x16c3   : > { %v8919_v45 = vpop.eup %8918 }
0x16c4   : > { %v8921_v16 = vpop.eup %8920  ;;  %v6030_v50 = vmul.f32 %v8919_v45, %v8913_v20 }
0x16c5   : > { %v8923_v29 = vpop.eup %8922  ;;  %v6028_v13 = vmul.f32 %v8921_v16, %v11326_v10 }
0x16c6   : > { %v8925_v22 = vpop.eup %8924  ;;  %v6023_v54 = vadd.f32 1.0, %v8923_v29 }
0x16c7   : > { %v11438_v36 = vadd.f32 %v6030_v50, %v6028_v13  ;;  %v6031_v18 = vmul.f32 %v8925_v22, %v8917_v27  ;;  %v8927_v33 = vpop.eup %8926 }
0x16c8   : > { %v6029_v0 = vmul.f32 %v8927_v33, %v11330_v47  ;;  %v8929_v52 = vpop.eup %8928 }
0x16c9   : > { %8930 = vtanh.f32 %v11438_v36 }
0x16ca   : > { %v11442_v19 = vadd.f32 %v6031_v18, %v6029_v0  ;;  %8932 = vrcp.f32 %v6023_v54 }
0x16cc   : > { %8934 = vtanh.f32 %v11442_v19 }
0x16d3   : > { %v8931_v24 = vpop.eup %8930 }
0x16d4   : > { %v8933_v10 = vpop.eup %8932  ;;  %v6036_v44 = vmul.f32 %v8931_v24, %v8929_v52 }
0x16d6   : > { %v8935_v40 = vpop.eup %8934 }
0x16d7   : > { %v6037_v23 = vmul.f32 %v8935_v40, %v8933_v10 }
0x16d9   : > { %v6046_v26 = vpack.c.bf16 %v6037_v23, %v6036_v44 }
0x16db   : > { %6080 = vmatmul.mubr.bf16.vlgmr.msra.gmra.mrb[84].mxu0 %v6046_v26  ;;  %6123 = vmatmul.mubr.bf16.vlgmr.msra.gmra.mrb[92].mxu1 %v6046_v26 }
0x16dc   : > { %6199 = vmatpush1.bf16.msra.mxu0 %v11333_v28  ;;  %6242 = vmatpush1.bf16.msra.mxu1 %v11336_v51 }
0x16dd   : > { %6200 = vmatprep.subr.bf16.mxu0 %v11339_v31  ;;  %6243 = vmatprep.subr.bf16.mxu1 %v11342_v8 }
0x16de   : > { %6230 = vmatprep.mubr.bf16.mxu0 %v11829_v3  ;;  %6273 = vmatprep.mubr.bf16.mxu1 %v11829_v3 }
0x16e0   : > { %6201 = vmatpush1.bf16.msra.mxu0 %v11347_v4  ;;  %6244 = vmatpush1.bf16.msra.mxu1 %v11350_v21 }
0x16e1   : > { %6202 = vmatprep.subr.bf16.mxu0 %v11353_v30  ;;  %6245 = vmatprep.subr.bf16.mxu1 %v11356_v5 }
0x16e4   : > { %6203 = vmatpush1.bf16.msra.mxu0 %v11359_v2  ;;  %6246 = vmatpush1.bf16.msra.mxu1 %v11362_v1 }
0x16e5   : > { %6204 = vmatprep.subr.bf16.mxu0 %v11365_v61  ;;  %6247 = vmatprep.subr.bf16.mxu1 %v11368_v17 }
0x16e8   : > { %6205 = vmatpush1.bf16.msra.mxu0 %v11371_v35  ;;  %6248 = vmatpush1.bf16.msra.mxu1 %v11374_v57 }
0x16e9   : > { %6206 = vmatprep.subr.bf16.mxu0 %v11377_v7  ;;  %6249 = vmatprep.subr.bf16.mxu1 %v11380_v12 }
0x16ec   : > { %6207 = vmatpush1.bf16.msra.mxu0 %v11383_v6  ;;  %6250 = vmatpush1.bf16.msra.mxu1 %v11386_v14 }
0x16ed   : > { %6208 = vmatprep.subr.bf16.mxu0 %v11389_v11  ;;  %6251 = vmatprep.subr.bf16.mxu1 %v11392_v56 }
0x16f0   : > { %6209 = vmatpush1.bf16.msra.mxu0 %v11395_v46  ;;  %6252 = vmatpush1.bf16.msra.mxu1 %v11398_v25 }
0x16f1   : > { %6210 = vmatprep.subr.bf16.mxu0 %v11401_v41  ;;  %6253 = vmatprep.subr.bf16.mxu1 %v11404_v60 }
0x16f4   : > { %6211 = vmatpush1.bf16.msra.mxu0 %v11407_v39  ;;  %6254 = vmatpush1.bf16.msra.mxu1 %v11410_v42 }
0x16f5   : > { %6212 = vmatprep.subr.bf16.mxu0 %v11413_v43  ;;  %6255 = vmatprep.subr.bf16.mxu1 %v11416_v59 }
0x16f8   : > { %6213 = vmatpush1.bf16.msra.mxu0 %v11419_v32  ;;  %6256 = vmatpush1.bf16.msra.mxu1 %v11422_v37 }
0x16f9   : > { %6349 = vmatprep.subr.bf16.mxu0 %v11313_v53  ;;  %6392 = vmatprep.subr.bf16.mxu1 %v11426_v15 }
0x17ae   : > { %v6081_v47 = vpop.f32.mrb[84].mxu0  ;;  %v6124_v49 = vpop.f32.mrb[92].mxu1 }
0x17af   : > { %v7651_v58 = vadd.f32 %v6081_v47, %v11156_v9  ;;  %v6083_v20 = vpop.f32.mrb[85].mxu0  ;;  %v6126_v63 = vpop.f32.mrb[93].mxu1  ;;  %v7683_v54 = vadd.f32 %v6124_v49, %v11169_v55 }
0x17b0   : > { %v7652_v27 = vadd.f32 %v6083_v20, %v11159_v38  ;;  %v6085_v45 = vpop.f32.mrb[86].mxu0  ;;  %v6128_v16 = vpop.f32.mrb[94].mxu1  ;;  %v7684_v33 = vadd.f32 %v6126_v63, %v11165_v48 }
0x17b1   : > { %v7351_v50 = vmul.f32 -1.442695, %v7651_v58  ;;  %v7653_v29 = vadd.f32 %v6085_v45, %v11156_v9  ;;  %v6087_v13 = vpop.f32.mrb[87].mxu0  ;;  %v6130_v22 = vpop.f32.mrb[95].mxu1  ;;  %v7685_v24 = vadd.f32 %v6128_v16, %v11169_v55 }
0x17b2   : > { %v7353_v62 = vmul.f32 -1.442695, %v7652_v27  ;;  %v7654_v53 = vadd.f32 %v6087_v13, %v11159_v38  ;;  %v7355_v0 = vmul.f32 -1.442695, %v7684_v33  ;;  %v7686_v52 = vadd.f32 %v6130_v22, %v11165_v48 }
0x17b3   : > { %8936 = vpow2.f32 %v7351_v50  ;;  %v7352_v15 = vmul.f32 -1.442695, %v7653_v29 }
0x17b4   : > { %8938 = vpow2.f32 %v7353_v62  ;;  %v7354_v18 = vmul.f32 -1.442695, %v7654_v53  ;;  %v7356_v23 = vmul.f32 -1.442695, %v7686_v52 }
0x17b5   : > { %8940 = vpow2.f32 %v7352_v15 }
0x17b6   : > { %8942 = vpow2.f32 %v7354_v18 }
0x17b7   : > { %8944 = vtanh.f32 %v7683_v54 }
0x17b8   : > { %8946 = vpow2.f32 %v7355_v0 }
0x17b9   : > { %8948 = vtanh.f32 %v7685_v24 }
0x17bd   : > { %v8937_v10 = vpop.eup %8936 }
0x17be   : > { %v8939_v40 = vpop.eup %8938  ;;  %v6147_v44 = vadd.f32 1.0, %v8937_v10 }
0x17bf   : > { %v6159_v26 = vadd.f32 1.0, %v8939_v40  ;;  %v8941_v47 = vpop.eup %8940 }
0x17c0   : > { %8950 = vrcp.f32 %v6147_v44  ;;  %v6148_v58 = vadd.f32 1.0, %v8941_v47  ;;  %v8943_v20 = vpop.eup %8942 }
0x17c1   : > { %8952 = vrcp.f32 %v6159_v26  ;;  %v6160_v49 = vadd.f32 1.0, %v8943_v20  ;;  %v8945_v63 = vpop.eup %8944 }
0x17c2   : > { %8954 = vpow2.f32 %v7356_v23  ;;  %v8947_v27 = vpop.eup %8946 }
0x17c3   : > { %8956 = vrcp.f32 %v6148_v58  ;;  %v8949_v45 = vpop.eup %8948  ;;  %v6173_v53 = vadd.f32 1.0, %v8947_v27 }
0x17c4   : > { %8958 = vrcp.f32 %v6160_v49 }
0x17c5   : > { %8960 = vrcp.f32 %v6173_v53 }
0x17ca   : > { %v8951_v16 = vpop.eup %8950 }
0x17cb   : > { %v8953_v50 = vpop.eup %8952  ;;  %v6181_v29 = vmul.f32 %v8951_v16, %v8945_v63 }
0x17cc   : > { %v8955_v13 = vpop.eup %8954  ;;  %v6179_v22 = vmul.f32 %v8953_v50, %v11438_v36 }
0x17cd   : > { %v8957_v62 = vpop.eup %8956  ;;  %v6174_v54 = vadd.f32 1.0, %v8955_v13 }
0x17ce   : > { %v11488_v15 = vadd.f32 %v6181_v29, %v6179_v22  ;;  %v6182_v18 = vmul.f32 %v8957_v62, %v8949_v45  ;;  %v8959_v33 = vpop.eup %8958 }
0x17cf   : > { %v6180_v0 = vmul.f32 %v8959_v33, %v11442_v19  ;;  %v8961_v24 = vpop.eup %8960 }
0x17d0   : > { %8962 = vtanh.f32 %v11488_v15 }
0x17d1   : > { %v11492_v52 = vadd.f32 %v6182_v18, %v6180_v0  ;;  %8964 = vrcp.f32 %v6174_v54 }
0x17d3   : > { %8966 = vtanh.f32 %v11492_v52 }
0x17da   : > { %v8963_v10 = vpop.eup %8962 }
0x17db   : > { %v8965_v36 = vpop.eup %8964  ;;  %v6187_v44 = vmul.f32 %v8963_v10, %v8961_v24 }
0x17dd   : > { %v8967_v40 = vpop.eup %8966 }
0x17de   : > { %v6188_v23 = vmul.f32 %v8967_v40, %v8965_v36  ;;  %v9387_v36 = vmov 0.0   ;;  %v8241_v40 = vld [vmem:[%s11742_s14 + $0x8] sm:$0xff]  }
0x17e0   : > { %v6197_v26 = vpack.c.bf16 %v6188_v23, %v6187_v44  ;;  %v8242_v44 = vld [vmem:[%s11742_s14 + $0x10] sm:$0xff]   ;;  %v8243_v23 = vld [vmem:[%s11742_s14 + $0x18] sm:$0xff]  }
0x17e2   : > { %6231 = vmatmul.mubr.bf16.vlgmr.msra.gmra.mrb[88].mxu0 %v6197_v26  ;;  %6274 = vmatmul.mubr.bf16.vlgmr.msra.gmra.mrb[96].mxu1 %v6197_v26  ;;  %v8244_v26 = vld [vmem:[%s11742_s14 + $0x20] sm:$0xff]  }
0x17e3   : > { %6350 = vmatpush1.bf16.msra.mxu0 %v11333_v28  ;;  %6393 = vmatpush1.bf16.msra.mxu1 %v11336_v51 }
0x17e4   : > { %6351 = vmatprep.subr.bf16.mxu0 %v11339_v31  ;;  %6394 = vmatprep.subr.bf16.mxu1 %v11342_v8 }
0x17e5   : > { %6381 = vmatprep.mubr.bf16.mxu0 %v11829_v3  ;;  %6424 = vmatprep.mubr.bf16.mxu1 %v11829_v3 }
0x17e7   : > { %6352 = vmatpush1.bf16.msra.mxu0 %v11347_v4  ;;  %6395 = vmatpush1.bf16.msra.mxu1 %v11350_v21 }
0x17e8   : > { %6353 = vmatprep.subr.bf16.mxu0 %v11353_v30  ;;  %6396 = vmatprep.subr.bf16.mxu1 %v11356_v5 }
0x17eb   : > { %6354 = vmatpush1.bf16.msra.mxu0 %v11359_v2  ;;  %6397 = vmatpush1.bf16.msra.mxu1 %v11362_v1 }
0x17ec   : > { %6355 = vmatprep.subr.bf16.mxu0 %v11365_v61  ;;  %6398 = vmatprep.subr.bf16.mxu1 %v11368_v17 }
0x17ef   : > { %6356 = vmatpush1.bf16.msra.mxu0 %v11371_v35  ;;  %6399 = vmatpush1.bf16.msra.mxu1 %v11374_v57 }
0x17f0   : > { %6357 = vmatprep.subr.bf16.mxu0 %v11377_v7  ;;  %6400 = vmatprep.subr.bf16.mxu1 %v11380_v12 }
0x17f3   : > { %6358 = vmatpush1.bf16.msra.mxu0 %v11383_v6  ;;  %6401 = vmatpush1.bf16.msra.mxu1 %v11386_v14 }
0x17f4   : > { %6359 = vmatprep.subr.bf16.mxu0 %v11389_v11  ;;  %6402 = vmatprep.subr.bf16.mxu1 %v11392_v56 }
0x17f7   : > { %6360 = vmatpush1.bf16.msra.mxu0 %v11395_v46  ;;  %6403 = vmatpush1.bf16.msra.mxu1 %v11398_v25 }
0x17f8   : > { %6361 = vmatprep.subr.bf16.mxu0 %v11401_v41  ;;  %6404 = vmatprep.subr.bf16.mxu1 %v11404_v60 }
0x17fb   : > { %6362 = vmatpush1.bf16.msra.mxu0 %v11407_v39  ;;  %6405 = vmatpush1.bf16.msra.mxu1 %v11410_v42 }
0x17fc   : > { %6363 = vmatprep.subr.bf16.mxu0 %v11413_v43  ;;  %6406 = vmatprep.subr.bf16.mxu1 %v11416_v59 }
0x17ff   : > { %6364 = vmatpush1.bf16.msra.mxu0 %v11419_v32  ;;  %6407 = vmatpush1.bf16.msra.mxu1 %v11422_v37 }
0x1800   : > { %7433 = vmatprep.subr.bf16.mxu0 %v9387_v36  ;;  %7453 = vmatprep.subr.bf16.mxu1 %v9387_v36 }
0x18b5   : > { %v6232_v3 = vpop.f32.mrb[88].mxu0  ;;  %v6275_v28 = vpop.f32.mrb[96].mxu1 }
0x18b6   : > { %v7655_v51 = vadd.f32 %v6232_v3, %v11156_v9  ;;  %v6234_v31 = vpop.f32.mrb[89].mxu0  ;;  %v6277_v8 = vpop.f32.mrb[97].mxu1  ;;  %v7687_v6 = vadd.f32 %v6275_v28, %v11169_v55  ;;  %v8245_v3 = vld [vmem:[%s11742_s14 + $0x28] sm:$0xff]   ;;  %v8246_v28 = vld [vmem:[%s11742_s14 + $0x30] sm:$0xff]  }
0x18b7   : > { %v7656_v4 = vadd.f32 %v6234_v31, %v11159_v38  ;;  %v6236_v21 = vpop.f32.mrb[90].mxu0  ;;  %v6279_v30 = vpop.f32.mrb[98].mxu1  ;;  %v7688_v12 = vadd.f32 %v6277_v8, %v11165_v48  ;;  %v8248_v31 = vld [vmem:[%s11744_s16] sm:$0xff]   ;;  %v8249_v8 = vld [vmem:[%s11744_s16 + $0x8] sm:$0xff]  }
0x18b8   : > { %v7357_v5 = vmul.f32 -1.442695, %v7655_v51  ;;  %v7657_v2 = vadd.f32 %v6236_v21, %v11156_v9  ;;  %v6238_v1 = vpop.f32.mrb[91].mxu0  ;;  %v6281_v61 = vpop.f32.mrb[99].mxu1  ;;  %v7689_v56 = vadd.f32 %v6279_v30, %v11169_v55  ;;  %v8247_v51 = vld [vmem:[%s11742_s14 + $0x38] sm:$0xff]   ;;  %v8252_v30 = vld [vmem:[%s11744_s16 + $0x20] sm:$0xff]  }
0x18b9   : > { %v7359_v17 = vmul.f32 -1.442695, %v7656_v4  ;;  %v7658_v35 = vadd.f32 %v6238_v1, %v11159_v38  ;;  %v7361_v14 = vmul.f32 -1.442695, %v7688_v12  ;;  %v7690_v11 = vadd.f32 %v6281_v61, %v11165_v48  ;;  %v8250_v4 = vld [vmem:[%s11744_s16 + $0x10] sm:$0xff]   ;;  %v8251_v21 = vld [vmem:[%s11744_s16 + $0x18] sm:$0xff]  }
0x18ba   : > { %8968 = vpow2.f32 %v7357_v5  ;;  %v7358_v57 = vmul.f32 -1.442695, %v7657_v2  ;;  %v8253_v5 = vld [vmem:[%s11744_s16 + $0x28] sm:$0xff]  }
0x18bb   : > { %8970 = vpow2.f32 %v7359_v17  ;;  %v7360_v7 = vmul.f32 -1.442695, %v7658_v35  ;;  %v7362_v60 = vmul.f32 -1.442695, %v7690_v11 }
0x18bc   : > { %8972 = vpow2.f32 %v7358_v57 }
0x18bd   : > { %8974 = vpow2.f32 %v7360_v7 }
0x18be   : > { %8976 = vtanh.f32 %v7687_v6 }
0x18bf   : > { %8978 = vpow2.f32 %v7361_v14 }
0x18c0   : > { %8980 = vtanh.f32 %v7689_v56 }
0x18c4   : > { %v8969_v46 = vpop.eup %8968 }
0x18c5   : > { %v8971_v25 = vpop.eup %8970  ;;  %v6298_v41 = vadd.f32 1.0, %v8969_v46 }
0x18c6   : > { %v6310_v39 = vadd.f32 1.0, %v8971_v25  ;;  %v8973_v42 = vpop.eup %8972 }
0x18c7   : > { %8982 = vrcp.f32 %v6298_v41  ;;  %v6299_v43 = vadd.f32 1.0, %v8973_v42  ;;  %v8975_v59 = vpop.eup %8974 }
0x18c8   : > { %8984 = vrcp.f32 %v6310_v39  ;;  %v6311_v32 = vadd.f32 1.0, %v8975_v59  ;;  %v8977_v37 = vpop.eup %8976 }
0x18c9   : > { %8986 = vpow2.f32 %v7362_v60  ;;  %v8979_v19 = vpop.eup %8978 }
0x18ca   : > { %8988 = vrcp.f32 %v6299_v43  ;;  %v8981_v47 = vpop.eup %8980  ;;  %v6324_v16 = vadd.f32 1.0, %v8979_v19 }
0x18cb   : > { %8990 = vrcp.f32 %v6311_v32 }
0x18cc   : > { %8992 = vrcp.f32 %v6324_v16 }
0x18d1   : > { %v8983_v58 = vpop.eup %8982 }
0x18d2   : > { %v8985_v20 = vpop.eup %8984  ;;  %v6332_v49 = vmul.f32 %v8983_v58, %v8977_v37 }
0x18d3   : > { %v8987_v63 = vpop.eup %8986  ;;  %v6330_v27 = vmul.f32 %v8985_v20, %v11488_v15 }
0x18d4   : > { %v8989_v45 = vpop.eup %8988  ;;  %v6325_v22 = vadd.f32 1.0, %v8987_v63 }
0x18d5   : > { %v11536_v50 = vadd.f32 %v6332_v49, %v6330_v27  ;;  %v6333_v29 = vmul.f32 %v8989_v45, %v8981_v47  ;;  %v8991_v13 = vpop.eup %8990 }
0x18d6   : > { %v6331_v62 = vmul.f32 %v8991_v13, %v11492_v52  ;;  %v8993_v18 = vpop.eup %8992  ;;  %v8240_v52 = vld [vmem:[%s11742_s14] sm:$0xff]  }
0x18d7   : > { %8994 = vtanh.f32 %v11536_v50 }
0x18d8   : > { %v11540_v53 = vadd.f32 %v6333_v29, %v6331_v62  ;;  %8996 = vrcp.f32 %v6325_v22 }
0x18da   : > { %8998 = vtanh.f32 %v11540_v53 }
0x18e1   : > { %v8995_v33 = vpop.eup %8994 }
0x18e2   : > { %v8997_v15 = vpop.eup %8996  ;;  %v6338_v0 = vmul.f32 %v8995_v33, %v8993_v18 }
0x18e4   : > { %v8999_v54 = vpop.eup %8998 }
0x18e5   : > { %v6339_v24 = vmul.f32 %v8999_v54, %v8997_v15 }
0x18e7   : > { %v6348_v10 = vpack.c.bf16 %v6339_v24, %v6338_v0 }
0x18e9   : > { %6382 = vmatmul.mubr.bf16.vlgmr.msra.gmra.mrb[92].mxu0 %v6348_v10  ;;  %6425 = vmatmul.mubr.bf16.vlgmr.msra.gmra.mrb[100].mxu1 %v6348_v10 }
0x18ea   : > { %7434 = vmatpush3.bf16.msra.mxu0 %v8240_v52  ;;  %7449 = vmatprep.mubr.msk.bf16.mxu0 %vm9388_vm1, %v9387_v36 }
0x18eb   : > { %7435 = vmatprep.subr.bf16.mxu0 %v9387_v36  ;;  %7469 = vmatprep.mubr.msk.bf16.mxu1 %vm9388_vm1, %v9387_v36 }
0x18ec   : > { %7454 = vmatpush3.bf16.msra.mxu1 %v8248_v31 }
0x18ed   : > { %7455 = vmatprep.subr.bf16.mxu1 %v9387_v36 }
0x18ee   : > { %7436 = vmatpush3.bf16.msra.mxu0 %v8241_v40 }
0x18ef   : > { %7437 = vmatprep.subr.bf16.mxu0 %v9387_v36 }
0x18f0   : > { %7456 = vmatpush3.bf16.msra.mxu1 %v8249_v8 }
0x18f1   : > { %7457 = vmatprep.subr.bf16.mxu1 %v9387_v36 }
0x18f2   : > { %7438 = vmatpush3.bf16.msra.mxu0 %v8242_v44 }
0x18f3   : > { %7439 = vmatprep.subr.bf16.mxu0 %v9387_v36 }
0x18f4   : > { %7458 = vmatpush3.bf16.msra.mxu1 %v8250_v4 }
0x18f5   : > { %7459 = vmatprep.subr.bf16.mxu1 %v9387_v36 }
0x18f6   : > { %7440 = vmatpush3.bf16.msra.mxu0 %v8243_v23 }
0x18f7   : > { %7441 = vmatprep.subr.bf16.mxu0 %v9387_v36 }
0x18f8   : > { %7460 = vmatpush3.bf16.msra.mxu1 %v8251_v21 }
0x18f9   : > { %7461 = vmatprep.subr.bf16.mxu1 %v9387_v36 }
0x18fa   : > { %7442 = vmatpush3.bf16.msra.mxu0 %v8244_v26 }
0x18fb   : > { %7443 = vmatprep.subr.bf16.mxu0 %v9387_v36 }
0x18fc   : > { %7462 = vmatpush3.bf16.msra.mxu1 %v8252_v30 }
0x18fd   : > { %7463 = vmatprep.subr.bf16.mxu1 %v9387_v36 }
0x18fe   : > { %7444 = vmatpush3.bf16.msra.mxu0 %v8245_v3 }
0x18ff   : > { %7445 = vmatprep.subr.bf16.mxu0 %v9387_v36 }
0x1900   : > { %7464 = vmatpush3.bf16.msra.mxu1 %v8253_v5 }
0x1901   : > { %7465 = vmatprep.subr.bf16.mxu1 %v9387_v36 }
0x1902   : > { %7446 = vmatpush3.bf16.msra.mxu0 %v8246_v28 }
0x1903   : > { %7447 = vmatprep.subr.bf16.mxu0 %v9387_v36 }
0x1906   : > { %7448 = vmatpush3.bf16.msra.mxu0 %v8247_v51 }
0x1907   : > { %7473 = vmatprep.subr.bf16.mxu0 %v9387_v36 }
0x19bc   : > { %v6383_v2 = vpop.f32.mrb[92].mxu0  ;;  %v6426_v1 = vpop.f32.mrb[100].mxu1 }
0x19bd   : > { %v7659_v61 = vadd.f32 %v6383_v2, %v11156_v9  ;;  %v6385_v17 = vpop.f32.mrb[93].mxu0  ;;  %v6428_v35 = vpop.f32.mrb[101].mxu1  ;;  %v7691_v42 = vadd.f32 %v6426_v1, %v11169_v55  ;;  %v7371_v1 = vld [vmem:[%s11847_s25] ss:$0 sm:$0xff]  ;;  %s7405_s25 = sshll.u32 %s9518_s2, 8 }
0x19be   : > { %v7660_v57 = vadd.f32 %v6385_v17, %v11159_v38  ;;  %v6387_v7 = vpop.f32.mrb[94].mxu0  ;;  %v6430_v12 = vpop.f32.mrb[102].mxu1  ;;  %v7692_v39 = vadd.f32 %v6428_v35, %v11165_v48  ;;  %s11684_s18 = scalar_lea.hbm %s11853_s11, %s7405_s25 }
0x19bf   : > { %v7363_v6 = vmul.f32 -1.442695, %v7659_v61  ;;  %v7661_v14 = vadd.f32 %v6387_v7, %v11156_v9  ;;  %v6389_v11 = vpop.f32.mrb[95].mxu0  ;;  %v6432_v56 = vpop.f32.mrb[103].mxu1  ;;  %v7693_v9 = vadd.f32 %v6430_v12, %v11169_v55  ;;  %v6500_v55 = vld [vmem:[%s11844_s27] sm:$0x1] }
0x19c0   : > { %v7365_v46 = vmul.f32 -1.442695, %v7660_v57  ;;  %v7662_v25 = vadd.f32 %v6389_v11, %v11159_v38  ;;  %v7367_v43 = vmul.f32 -1.442695, %v7692_v39  ;;  %v7694_v59 = vadd.f32 %v6432_v56, %v11165_v48  ;;  %v8254_v57 = vld [vmem:[%s11744_s16 + $0x30] sm:$0xff]   ;;  %v8255_v7 = vld [vmem:[%s11744_s16 + $0x38] sm:$0xff]  }
0x19c1   : > { %9000 = vpow2.f32 %v7363_v6  ;;  %v7364_v41 = vmul.f32 -1.442695, %v7661_v14  ;;  %v6501_v29 = vadd.f32 1e-05, %v6500_v55  ;;  %7466 = vmatpush3.bf16.msra.mxu1 %v8254_v57  ;;  %v8256_v12 = vld [vmem:[%s11848_s13] sm:$0xff]   ;;  %v8257_v6 = vld [vmem:[%s11848_s13 + $0x8] sm:$0xff]  }
0x19c2   : > { %9002 = vpow2.f32 %v7365_v46  ;;  %v7366_v60 = vmul.f32 -1.442695, %v7662_v25  ;;  %v7368_v38 = vmul.f32 -1.442695, %v7694_v59  ;;  %7467 = vmatprep.subr.bf16.mxu1 %v9387_v36  ;;  %v8258_v14 = vld [vmem:[%s11848_s13 + $0x10] sm:$0xff]   ;;  %v8259_v11 = vld [vmem:[%s11848_s13 + $0x18] sm:$0xff]  }
0x19c3   : > { %9004 = vpow2.f32 %v7364_v41  ;;  %v8260_v56 = vld [vmem:[%s11848_s13 + $0x20] sm:$0xff]   ;;  %v8261_v46 = vld [vmem:[%s11848_s13 + $0x28] sm:$0xff]   ;;  %s9304_s27 = scalar_lea.vmem %s9303_s0, 512 }
0x19c4   : > { %9006 = vpow2.f32 %v7366_v60  ;;  %v7372_v25 = vld [vmem:[%s11849_s29] ss:$0 sm:$0xff] }
0x19c5   : > { %9008 = vtanh.f32 %v7691_v42  ;;  %7468 = vmatpush3.bf16.msra.mxu1 %v8255_v7 }
0x19c6   : > { %9010 = vpow2.f32 %v7367_v43 }
0x19c7   : > { %9012 = vtanh.f32 %v7693_v9 }
0x19cb   : > { %v9001_v32 = vpop.eup %9000 }
0x19cc   : > { %v9003_v37 = vpop.eup %9002  ;;  %v6449_v19 = vadd.f32 1.0, %v9001_v32 }
0x19cd   : > { %v6461_v47 = vadd.f32 1.0, %v9003_v37  ;;  %v9005_v58 = vpop.eup %9004 }
0x19ce   : > { %9014 = vrcp.f32 %v6449_v19  ;;  %v6450_v20 = vadd.f32 1.0, %v9005_v58  ;;  %v9007_v49 = vpop.eup %9006  ;;  %v8262_v19 = vld [vmem:[%s11848_s13 + $0x30] sm:$0xff]  }
0x19cf   : > { %9016 = vrcp.f32 %v6461_v47  ;;  %v6462_v63 = vadd.f32 1.0, %v9007_v49  ;;  %v9009_v48 = vpop.eup %9008  ;;  %v7381_v47 = vld [vmem:[%s11850_s3] ss:$0 sm:$0xff] }
0x19d0   : > { %9018 = vpow2.f32 %v7368_v38  ;;  %v9011_v27 = vpop.eup %9010  ;;  %v8263_v38 = vld [vmem:[%s11848_s13 + $0x38] sm:$0xff]  }
0x19d1   : > { %9020 = vrcp.f32 %v6450_v20  ;;  %v9013_v45 = vpop.eup %9012  ;;  %v6475_v62 = vadd.f32 1.0, %v9011_v27 }
0x19d2   : > { %9022 = vrcp.f32 %v6462_v63 }
0x19d3   : > { %9024 = vrsqrt.f32 %v6501_v29 }
0x19d4   : > { %9026 = vrcp.f32 %v6475_v62 }
0x19d8   : > { %v9015_v16 = vpop.eup %9014 }
0x19d9   : > { %v9017_v13 = vpop.eup %9016  ;;  %v6483_v22 = vmul.f32 %v9015_v16, %v9009_v48 }
0x19da   : > { %v9019_v18 = vpop.eup %9018  ;;  %v6481_v33 = vmul.f32 %v9017_v13, %v11536_v50  ;;  %v7369_v50 = vld [vmem:[%s11845_s10] ss:$0 sm:$0xff] }
0x19db   : > { %v9021_v15 = vpop.eup %9020  ;;  %v6476_v10 = vadd.f32 1.0, %v9019_v18 }
0x19dc   : > { %v6485_v54 = vadd.f32 %v6483_v22, %v6481_v33  ;;  %v6484_v0 = vmul.f32 %v9021_v15, %v9013_v45  ;;  %v9023_v24 = vpop.eup %9022 }
0x19dd   : > { %v6482_v52 = vmul.f32 %v9023_v24, %v11540_v53  ;;  %v9025_v44 = vpop.eup %9024  ;;  %v7370_v53 = vld [vmem:[%s11846_s12] ss:$0 sm:$0xff]  ;;  %s817_s12 = scalar_lea.vmem [#allocation16], %s7036_s26 }
0x19de   : > { %9028 = vtanh.f32 %v6485_v54  ;;  %v9027_v23 = vpop.eup %9026  ;;  %v6507_v28 = vrot.slane %v9025_v44, %v11838_v34  ;;  %s6888_s30 = sshll.u32 %s817_s12, 4  ;;  %s11679_s30 = int_to_ptr.vmem [resolvable:$true] %s6888_s30 }
0x19df   : > { %v6486_v40 = vadd.f32 %v6484_v0, %v6482_v52  ;;  %9030 = vrcp.f32 %v6476_v10  ;;  %s9298_s2 = scalar_lea.vmem %s11679_s30, 256  ;;  %p9305_p0 = scmp.lt.s32.totalorder %s11679_s30, %s9303_s0 }
0x19e0   : > { %p9299_p3 = scmp.ne.s32.totalorder %s11679_s30, %s9298_s2  ;;  %p9306_p12 = scmp.lt.s32.totalorder %s9304_s27, %s9298_s2 }
0x19e1   : > { %9032 = vtanh.f32 %v6486_v40 }
0x19e2   : > { %p9300_p10 = pnand %p9299_p3, %p11854_p6  ;;  %p9307_p11 = por %p9306_p12, %p9305_p0 }
0x19e4   : > { %p9301_p2 = pneg %p9300_p10 }
0x19e6   : > { %p9308_p4 = pnand %p9307_p11, %p9301_p2 }
0x19e8   : > { %v9029_v26 = vpop.eup %9028 }
0x19e9   : > { %v6489_v3 = vmul.f32 %v9029_v26, %v9027_v23  ;;  %v9031_v51 = vpop.eup %9030 }
0x19eb   : > { %v6498_v31 = vsub.f32 %v6489_v3, %v7369_v50  ;;  %v9033_v8 = vpop.eup %9032 }
0x19ec   : > { %v6490_v4 = vmul.f32 %v9033_v8, %v9031_v51 }
0x19ed   : > { %v6509_v21 = vmul.f32 %v6507_v28, %v6498_v31 }
0x19ee   : > { %v6499_v30 = vsub.f32 %v6490_v4, %v7369_v50 }
0x19ef   : > { %v6518_v2 = vmul.f32 %v7370_v53, %v6509_v21 }
0x19f0   : > { %v6510_v5 = vmul.f32 %v6507_v28, %v6499_v30 }
0x19f1   : > { %v6527_v17 = vadd.f32 %v7371_v1, %v6518_v2 }
0x19f2   : > { %v6519_v61 = vmul.f32 %v7370_v53, %v6510_v5 }
0x19f4   : > { %v6528_v35 = vadd.f32 %v7371_v1, %v6519_v61 }
0x19f6   : > { %v6529_v34 = vpack.c.bf16 %v6528_v35, %v6527_v17 }
0x19f8   : > { %7450 = vmatmul.mubr.bf16.vlgmr.msra.gmra.mrb[96].mxu0 %v6529_v34 }
0x19f9   : > { %7489 = vmatprep.mubr.msk.bf16.mxu0 %vm9388_vm1, %v9387_v36  ;;  %7474 = vmatpush3.bf16.msra.mxu0 %v8256_v12 }
0x19fa   : > { %7475 = vmatprep.subr.bf16.mxu0 %v9387_v36 }
0x19fd   : > { %7476 = vmatpush3.bf16.msra.mxu0 %v8257_v6 }
0x19fe   : > { %7477 = vmatprep.subr.bf16.mxu0 %v9387_v36 }
0x1a01   : > { %7478 = vmatpush3.bf16.msra.mxu0 %v8258_v14 }
0x1a02   : > { %7479 = vmatprep.subr.bf16.mxu0 %v9387_v36 }
0x1a05   : > { %7480 = vmatpush3.bf16.msra.mxu0 %v8259_v11 }
0x1a06   : > { %7481 = vmatprep.subr.bf16.mxu0 %v9387_v36 }
0x1a09   : > { %7482 = vmatpush3.bf16.msra.mxu0 %v8260_v56 }
0x1a0a   : > { %7483 = vmatprep.subr.bf16.mxu0 %v9387_v36 }
0x1a0d   : > { %7484 = vmatpush3.bf16.msra.mxu0 %v8261_v46 }
0x1a0e   : > { %7485 = vmatprep.subr.bf16.mxu0 %v9387_v36 }
0x1a11   : > { %7486 = vmatpush3.bf16.msra.mxu0 %v8262_v19 }
0x1a12   : > { %7487 = vmatprep.subr.bf16.mxu0 %v9387_v36  ;;  %v7390_v36 = vld [vmem:[%s11851_s28] ss:$0 sm:$0xff] }
0x1a15   : > { %7488 = vmatpush3.bf16.msra.mxu0 %v8263_v38 }
0x1acb   : > { %v6635_v41 = vpop.f32.mrb[96].mxu0 }
0x1acc   : > { %v6636_v60 = vadd.f32 %v7372_v25, %v6635_v41  ;;  %v7451_v39 = vpop.f32.mrb[97].mxu0 }
0x1acd   : > { %v6638_v42 = vpop.f32.mrb[98].mxu0 }
0x1ace   : > { %v6639_v43 = vadd.f32 %v7372_v25, %v6638_v42  ;;  %v7452_v59 = vpop.f32.mrb[99].mxu0  ;;  %v6642_v9 = vmax.f32 %v6636_v60, 0.0 }
0x1ad0   : > { %v6643_v32 = vmax.f32 %v6639_v43, 0.0 }
0x1ad2   : > { %v6644_v37 = vpack.c.bf16 %v6643_v32, %v6642_v9 }
0x1ad4   : > { %7470 = vmatmul.mubr.bf16.vlgmr.msra.gmra.mrb[104].mxu1 %v6644_v37 }
0x1ba7   : > { %v6750_v58 = vpop.f32.mrb[104].mxu1 }
0x1ba8   : > { %v6751_v20 = vadd.f32 %v7381_v47, %v6750_v58  ;;  %v7471_v49 = vpop.f32.mrb[105].mxu1 }
0x1ba9   : > { %v6753_v63 = vpop.f32.mrb[106].mxu1 }
0x1baa   : > { %v6754_v48 = vadd.f32 %v7381_v47, %v6753_v63  ;;  %v7472_v55 = vpop.f32.mrb[107].mxu1  ;;  %v6757_v27 = vmax.f32 %v6751_v20, 0.0 }
0x1bac   : > { %v6758_v45 = vmax.f32 %v6754_v48, 0.0 }
0x1bae   : > { %v6759_v16 = vpack.c.bf16 %v6758_v45, %v6757_v27 }
0x1bb0   : > { %7490 = vmatmul.mubr.bf16.vlgmr.msra.gmra.mrb[100].mxu0 %v6759_v16 }
0x1c83   : > { %v6865_v29 = vpop.f32.mrb[100].mxu0 }
0x1c84   : > { %v6866_v13 = vadd.f32 %v7390_v36, %v6865_v29  ;;  %v7491_v22 = vpop.f32.mrb[101].mxu0 }
0x1c85   : > { %v6868_v62 = vpop.f32.mrb[102].mxu0 }
0x1c86   : > { %6872 = vst [vmem:[%s817_s12] sm:$0xff] %v6866_v13  ;;  %v6869_v18 = vadd.f32 %v7390_v36, %v6868_v62  ;;  %v7492_v33 = vpop.f32.mrb[103].mxu0 }
0x1c88   : > { %6873 = vst [vmem:[%s817_s12 + $0x8] sm:$0xff] %v6869_v18 }
0x1c89   : > { %9311 = shalt.err (!%p9308_p4)
}
0x1c8a   : > { %s9312_s3 = scalar_lea.hbm %s11684_s18, 256  ;;  %s9316_s1 = scalar_lea.hbm %s11853_s11, 512 }
0x1c8b   : > { %p9313_p7 = scmp.ne.s32.totalorder %s11684_s18, %s9312_s3  ;;  %p9317_p13 = scmp.lt.u32.totalorder %s11684_s18, %s11853_s11 }
0x1c8c   : > { %p9318_p1 = scmp.lt.u32.totalorder %s9316_s1, %s9312_s3  ;;  %p9320_p10 = scmp.lt.u32.totalorder %s9312_s3, %s11684_s18 }
0x1c8d   : > { %p9314_p8 = pnand %p9313_p7, %p11854_p6 }
0x1c8e   : > { %p9319_p3 = por %p9318_p1, %p9317_p13 }
0x1c8f   : > { %p9315_p9 = pneg %p9314_p8 }
0x1c90   : > { %p9321_p2 = por %p9320_p10, %p9319_p3 }
0x1c92   : > { %p9322_p0 = pnand %p9321_p2, %p9315_p9 }
0x1c94   : > { %9325 = shalt.err (!%p9322_p0)
}
0x1c95   : > { %s9390_s25 = smov 128   ;;  %s9391_s5 = smov 8  }
0x1c96   : > { %7903 = dma.vmem_to_hbm [thread:$0]  (%p11854_p6), %s11679_s30, 256, %s11684_s18, %s6875_s20, %s9390_s25, %s9390_s25, %s9391_s5  }
0x1c97 PF: > { %s11855_s29 = sld [smem:[#allocation22_spill]]  ;;  %s11856_s2 = sld [smem:[#allocation26_spill]] }
0x1c9d   : > { %s6903_s19 = sand.u32 1, %s11855_s29   ;;  %p11857_p12 = scmp.ne.s32.totalorder %s11856_s2, 0 }
0x1c9e   : > { %s6904_s0 = scalar_lea.sflag [#allocation7], %s6903_s19 }
0x1c9f   : > { %p7925_p11 = pnand %p7024_p5, %p11857_p12 }
0x1ca1   : > { %9359 = dma.done.wait (!%p7925_p11), %s6904_s0, 256  }
0x1ca2   : > { %9361 = vsyncadd (!%p7925_p11), %s6904_s0, 4294967040  ;;  %s11858_s24 = sld [smem:[#allocation23_spill]]  ;;  %s11859_s27 = sld [smem:[#allocation24_spill]] }
0x1ca3   : > { %s11860_s1 = smov %s9368_s22  ;;  %s11861_s22 = smov %s9372_s23 }
0x1ca8   : > { %p34_p4 = scmp.ge.s32.totalorder %s11858_s24, 4   ;;  %s11862_s23 = smov %s11859_s27 }
0x1caa   :  { %36 = sbr.rel (!%p34_p4) target bundleno = 23 (0x17), region = 220 }
0x1cb1   :  { %6909 = vsyncpa [#allocation6], 1 }
0x1cb2   :  { %6911 = vsyncpa [#allocation6 + $0x1], 1 }
0x1cb3   :  { %6912 = vsyncpa [#allocation9], 1 }
0x1cb4   :  { %6913 = vsyncpa [#allocation12], 1 }
0x1cb5   :  { %6914 = vsyncpa [#allocation15], 1 }
0x1cb6   :  { %6915 = vsyncpa [#allocation7], 1 }
0x1cb7   :  { %6917 = vsyncpa [#allocation7 + $0x1], 1 }

</bundles_post_ra>
